<compile_context>
chip_gen: v5e
topology: v5e:2x2
jax: 0.10.0
libtpu: 0.0.40
codegen_flags: <defaults>
</compile_context>

<pallas_src>
import jax
import jax.numpy as jnp
from jax import lax
from jax.experimental import pallas as pl
from jax.experimental.pallas import tpu as pltpu


# ---------------------------------------------------------------------------
# Fused kernel factory.  Static graph/shape info is closed over; the kernel body
# runs once (no grid) and keeps the stacked node state resident as values.
# Data layout: rows = node_block*C + channel, lanes = b*H*W + h*W + w.
# ---------------------------------------------------------------------------
def _make_graph_kernel(num_nodes, C, W, N, n_steps, eps=1e-5):
    inv_n = 1.0 / float(N)
    inv_nodes = 1.0 / float(num_nodes)

    # Off-centre taps: (weight-slab index, lane shift) such that
    #   pltpu.roll(r, shift, axis=1)[:, j] == r[:, (j + dh*W + dw) % N]
    # (pltpu.roll follows the jnp.roll convention: out[j] = in[j - shift]).
    taps = []
    for dh in (-1, 0, 1):
        for dw in (-1, 0, 1):
            if dh == 0 and dw == 0:
                continue
            idx = (dh + 1) * 3 + (dw + 1)            # PyTorch weight[c, 0, dh+1, dw+1]
            taps.append((idx, (-(dh * W + dw)) % N))

    def kernel(y0_ref, wmask_ref, mixk_ref, pwblk_ref, fbias_ref,
               gamma_ref, beta_ref, out_ref):

        def update(mixed):
            # `mixed` is the post-mix, pre-ReLU tensor (matches y.clone() in PyTorch)
            identity = mixed
            r = jnp.maximum(mixed, 0.0)

            # depthwise 3x3, stride 1, pad 1: 9 lane-rolled taps shared by all nodes;
            # boundary-mask x tap-weight is pre-folded into wmask (no selects/compares)
            acc = r * wmask_ref[4]                              # centre tap
            for idx, shift in taps:
                acc = acc + pltpu.roll(r, shift, axis=1) * wmask_ref[idx]

            # pointwise 1x1 conv for ALL nodes: one block-diagonal matmul + fused bias
            pw = jnp.dot(pwblk_ref[...], acc,
                         preferred_element_type=jnp.float32) + fbias_ref[...]

            # BatchNorm2d training-mode batch stats, one pass over all nodes at once
            mean = jnp.sum(pw, axis=1, keepdims=True) * inv_n            # (NC, 1)
            ex2 = jnp.sum(pw * pw, axis=1, keepdims=True) * inv_n        # (NC, 1)
            scale = lax.rsqrt(ex2 - mean * mean + eps) * gamma_ref[...]  # (NC, 1)
            return (pw - mean) * scale + beta_ref[...] + identity

        # step 0: every node sees the raw input (already tiled along sublanes)
        state = update(y0_ref[...])

        # steps 1..n_steps-1: softmax-weighted neighbour mixing as one (NC,NC) matmul
        for _ in range(1, n_steps):
            mixed = jnp.dot(mixk_ref[...], state, preferred_element_type=jnp.float32)
            state = update(mixed)

        # final: mean over node blocks (sublane-aligned static slices -> cheap VPU adds)
        acc = state[0:C, :]
        for ni in range(1, num_nodes):
            acc = acc + state[ni * C:(ni + 1) * C, :]
        out_ref[...] = acc * inv_nodes

    return kernel


# ---------------------------------------------------------------------------
# Wrapper: NCHW <-> (node*C, B*H*W) plumbing, parameter packing, one pallas_call.
# ---------------------------------------------------------------------------
def graph_layer_forward(x_nchw, params, nodes, nbrs, n_steps):
    B, C, H, W = x_nchw.shape
    N = B * H * W
    num_nodes = len(nodes)
    NC = num_nodes * C
    node_pos = {n: i for i, n in enumerate(nodes)}

    # NCHW -> channels-major lane-dense (C, B*H*W), then tile nodes along sublanes
    x_cn = jnp.transpose(x_nchw.astype(jnp.float32), (1, 0, 2, 3)).reshape(C, N)
    y0 = jnp.tile(x_cn, (num_nodes, 1))                                  # (NC, N)

    # per-tap boundary masks for the 3x3 / pad=1 stencil in the flattened lane axis
    lane = jnp.arange(N, dtype=jnp.int32)
    w_pos = lane % W
    h_pos = (lane // W) % H
    masks = []
    for dh in (-1, 0, 1):
        for dw in (-1, 0, 1):
            valid = jnp.ones((N,), dtype=bool)
            if dh == -1:
                valid &= h_pos >= 1
            elif dh == 1:
                valid &= h_pos <= H - 2
            if dw == -1:
                valid &= w_pos >= 1
            elif dw == 1:
                valid &= w_pos <= W - 2
            masks.append(valid)
    masks = jnp.stack(masks).astype(jnp.float32)                         # (9, N)

    # fold boundary mask x per-node/channel depthwise tap weight -> (9, NC, N) slab
    tapw = jnp.concatenate(
        [params[n]['dw_w'][:, 0, :, :].reshape(C, 9) for n in nodes], axis=0)  # (NC, 9)
    wmask = tapw.T[:, :, None] * masks[:, None, :]                       # (9, NC, N)

    # block-diagonal pointwise 1x1 weights: one (NC,NC)@(NC,N) matmul per step
    pwblk = jnp.zeros((NC, NC), jnp.float32)
    for i, n in enumerate(nodes):
        pwblk = pwblk.at[i * C:(i + 1) * C, i * C:(i + 1) * C].set(
            params[n]['pw_w'][:, :, 0, 0])

    # depthwise bias folded through the (linear) pointwise conv; pre-broadcast to lanes
    fb = jnp.concatenate([params[n]['pw_w'][:, :, 0, 0] @ params[n]['dw_b']
                          + params[n]['pw_b'] for n in nodes])           # (NC,)
    fbias = jnp.broadcast_to(fb[:, None], (NC, N))
    gamma = jnp.concatenate([params[n]['gamma'] for n in nodes])[:, None]  # (NC, 1)
    beta = jnp.broadcast_to(
        jnp.concatenate([params[n]['beta'] for n in nodes])[:, None], (NC, N))

    # softmax mixing [self, *sorted nbrs] as kron(M, I_C): one matmul per step > 0
    M = jnp.zeros((num_nodes, num_nodes), jnp.float32)
    for i, n in enumerate(nodes):
        wsm = jax.nn.softmax(params[n]['mix_logits'])
        M = M.at[i, i].set(wsm[0])
        for k, nbr in enumerate(nbrs[n]):
            M = M.at[i, node_pos[nbr]].add(wsm[k + 1])
    mixk = jnp.kron(M, jnp.eye(C, dtype=jnp.float32))                    # (NC, NC)

    kernel = _make_graph_kernel(num_nodes, C, W, N, n_steps)

    flops = int(n_steps * (2 * NC * NC * N + 26 * NC * N)        # pointwise + dw + BN
                + (n_steps - 1) * 2 * NC * NC * N                # mixing matmuls
                + num_nodes * C * N)                             # final mean
    bytes_accessed = int(4 * (y0.size + wmask.size + mixk.size + pwblk.size
                              + fbias.size + gamma.size + beta.size + C * N))

    vmem = pl.BlockSpec(memory_space=pltpu.MemorySpace.VMEM)
    out_cn = pl.pallas_call(
        kernel,
        out_shape=jax.ShapeDtypeStruct((C, N), jnp.float32),     # lane-dense output
        in_specs=[vmem] * 7,
        out_specs=vmem,
        cost_estimate=pl.CostEstimate(flops=flops,
                                      transcendentals=int(n_steps * NC),
                                      bytes_accessed=bytes_accessed),
    )(y0, wmask, mixk, pwblk, fbias, gamma, beta)

    return jnp.transpose(out_cn.reshape(C, B, H, W), (1, 0, 2, 3))       # -> NCHW


def init_graph_layer_params(key, nodes, nbrs, channels):
    """Deterministic synthetic init with the raw PyTorch parameter shapes."""
    C = channels
    params = {}
    for n in nodes:
        key, k1, k2, k3, k4, k5 = jax.random.split(key, 6)
        params[n] = {
            'dw_w': jax.random.normal(k1, (C, 1, 3, 3), jnp.float32) * 0.1,  # depthwise
            'dw_b': jax.random.normal(k2, (C,), jnp.float32) * 0.1,
            'pw_w': jax.random.normal(k3, (C, C, 1, 1), jnp.float32) * 0.1,  # pointwise
            'pw_b': jax.random.normal(k4, (C,), jnp.float32) * 0.1,
            'gamma': jnp.ones((C,), jnp.float32),                  # BN weight init
            'beta': jnp.zeros((C,), jnp.float32),                  # BN bias init
            # PyTorch zero-inits these; small random values here exercise the mixing
            'mix_logits': jax.random.normal(k5, (1 + len(nbrs[n]),), jnp.float32) * 0.5,
        }
    return params


# ---------------------------------------------------------------------------
# Pure-XLA reference of the PyTorch GraphLayer forward (training-mode BatchNorm),
# used only as a correctness check in __main__.
# ---------------------------------------------------------------------------
def reference_forward(x, params, nodes, nbrs, n_steps, eps=1e-5):
    def sep_conv(y, p):
        dw = lax.conv_general_dilated(
            y, p['dw_w'], window_strides=(1, 1), padding=((1, 1), (1, 1)),
            dimension_numbers=('NCHW', 'OIHW', 'NCHW'),
            feature_group_count=y.shape[1])
        dw = dw + p['dw_b'][None, :, None, None]
        pw = lax.conv_general_dilated(
            dw, p['pw_w'], window_strides=(1, 1), padding='VALID',
            dimension_numbers=('NCHW', 'OIHW', 'NCHW'))
        return pw + p['pw_b'][None, :, None, None]

    def node_fwd(y, p, step):
        if step > 0:
            wsm = jax.nn.softmax(p['mix_logits'])
            y = jnp.einsum('bchwk,k->bchw', y, wsm)
        identity = y
        y = jax.nn.relu(y)
        y = sep_conv(y, p)
        mean = jnp.mean(y, axis=(0, 2, 3), keepdims=True)
        var = jnp.var(y, axis=(0, 2, 3), keepdims=True)          # biased, like BN train
        y = ((y - mean) * lax.rsqrt(var + eps) * p['gamma'][None, :, None, None]
             + p['beta'][None, :, None, None])
        return y + identity

    outputs = {n: node_fwd(x, params[n], 0) for n in nodes}
    for step in range(1, n_steps):
        new_outputs = {}
        for n in nodes:
            stacked = jnp.stack([outputs[n]] + [outputs[i] for i in nbrs[n]], axis=-1)
            new_outputs[n] = node_fwd(stacked, params[n], step)
        outputs = new_outputs
    return jnp.mean(jnp.stack([outputs[n] for n in nodes], axis=-1), axis=-1)


if __name__ == "__main__":
    B, C, H, W = 2, 8, 16, 16
    n_steps = 3
    # small 4-node cycle graph (stand-in for nx.Graph); neighbor lists sorted
    nbrs = {0: [1, 3], 1: [0, 2], 2: [1, 3], 3: [0, 2]}
    nodes = sorted(nbrs.keys())

    key = jax.random.PRNGKey(0)
    key, kx = jax.random.split(key)
    x = jax.random.normal(kx, (B, C, H, W), jnp.float32)
    params = init_graph_layer_params(key, nodes, nbrs, C)

    out = jax.block_until_ready(graph_layer_forward(x, params, nodes, nbrs, n_steps))
    assert out.shape == (B, C, H, W) and out.dtype == jnp.float32

    ref = jax.block_until_ready(reference_forward(x, params, nodes, nbrs, n_steps))
    err = float(jnp.max(jnp.abs(out - ref)))
    tol = 1e-3 + 1e-2 * float(jnp.max(jnp.abs(ref)))
    assert err < tol, f"kernel/reference mismatch: max abs err {err} (tol {tol})"
    print("KERNEL_OK")
</pallas_src>

<mosaic_0001>
module attributes {stable_mosaic.version = 11 : i64} {
  func.func @kernel(%arg0: memref<32x512xf32, #tpu.memory_space<vmem>>, %arg1: memref<9x32x512xf32, #tpu.memory_space<vmem>>, %arg2: memref<32x32xf32, #tpu.memory_space<vmem>>, %arg3: memref<32x32xf32, #tpu.memory_space<vmem>>, %arg4: memref<32x512xf32, #tpu.memory_space<vmem>>, %arg5: memref<32x1xf32, #tpu.memory_space<vmem>>, %arg6: memref<32x512xf32, #tpu.memory_space<vmem>>, %arg7: memref<8x512xf32, #tpu.memory_space<vmem>>) attributes {dimension_semantics = [], scalar_prefetch = 0 : i64, scratch_operands = 0 : i64, tpu.core_type = #tpu.core_type<tc>} {
    %c0 = arith.constant 0 : index
    %c0_0 = arith.constant 0 : index
    %0 = vector.load %arg0[%c0, %c0_0] : memref<32x512xf32, #tpu.memory_space<vmem>>, vector<32x512xf32>
    %cst = arith.constant 0.000000e+00 : f32
    %1 = vector.broadcast %cst : f32 to vector<32x512xf32>
    %2 = arith.maximumf %0, %1 : vector<32x512xf32>
    %c4 = arith.constant 4 : index
    %c0_1 = arith.constant 0 : index
    %c0_2 = arith.constant 0 : index
    %3 = vector.load %arg1[%c4, %c0_1, %c0_2] : memref<9x32x512xf32, #tpu.memory_space<vmem>>, vector<1x32x512xf32>
    %4 = vector.shape_cast %3 : vector<1x32x512xf32> to vector<32x512xf32>
    %5 = arith.mulf %2, %4 : vector<32x512xf32>
    %c17_i32 = arith.constant 17 : i32
    %6 = tpu.dynamic_rotate %2 by %c17_i32 dim 1 : vector<32x512xf32>, i32 -> vector<32x512xf32>
    %c0_3 = arith.constant 0 : index
    %c0_4 = arith.constant 0 : index
    %c0_5 = arith.constant 0 : index
    %7 = vector.load %arg1[%c0_3, %c0_4, %c0_5] : memref<9x32x512xf32, #tpu.memory_space<vmem>>, vector<1x32x512xf32>
    %8 = vector.shape_cast %7 : vector<1x32x512xf32> to vector<32x512xf32>
    %9 = arith.mulf %6, %8 : vector<32x512xf32>
    %10 = arith.addf %5, %9 : vector<32x512xf32>
    %c16_i32 = arith.constant 16 : i32
    %11 = tpu.dynamic_rotate %2 by %c16_i32 dim 1 : vector<32x512xf32>, i32 -> vector<32x512xf32>
    %c1 = arith.constant 1 : index
    %c0_6 = arith.constant 0 : index
    %c0_7 = arith.constant 0 : index
    %12 = vector.load %arg1[%c1, %c0_6, %c0_7] : memref<9x32x512xf32, #tpu.memory_space<vmem>>, vector<1x32x512xf32>
    %13 = vector.shape_cast %12 : vector<1x32x512xf32> to vector<32x512xf32>
    %14 = arith.mulf %11, %13 : vector<32x512xf32>
    %15 = arith.addf %10, %14 : vector<32x512xf32>
    %c15_i32 = arith.constant 15 : i32
    %16 = tpu.dynamic_rotate %2 by %c15_i32 dim 1 : vector<32x512xf32>, i32 -> vector<32x512xf32>
    %c2 = arith.constant 2 : index
    %c0_8 = arith.constant 0 : index
    %c0_9 = arith.constant 0 : index
    %17 = vector.load %arg1[%c2, %c0_8, %c0_9] : memref<9x32x512xf32, #tpu.memory_space<vmem>>, vector<1x32x512xf32>
    %18 = vector.shape_cast %17 : vector<1x32x512xf32> to vector<32x512xf32>
    %19 = arith.mulf %16, %18 : vector<32x512xf32>
    %20 = arith.addf %15, %19 : vector<32x512xf32>
    %c1_i32 = arith.constant 1 : i32
    %21 = tpu.dynamic_rotate %2 by %c1_i32 dim 1 : vector<32x512xf32>, i32 -> vector<32x512xf32>
    %c3 = arith.constant 3 : index
    %c0_10 = arith.constant 0 : index
    %c0_11 = arith.constant 0 : index
    %22 = vector.load %arg1[%c3, %c0_10, %c0_11] : memref<9x32x512xf32, #tpu.memory_space<vmem>>, vector<1x32x512xf32>
    %23 = vector.shape_cast %22 : vector<1x32x512xf32> to vector<32x512xf32>
    %24 = arith.mulf %21, %23 : vector<32x512xf32>
    %25 = arith.addf %20, %24 : vector<32x512xf32>
    %c511_i32 = arith.constant 511 : i32
    %26 = tpu.dynamic_rotate %2 by %c511_i32 dim 1 : vector<32x512xf32>, i32 -> vector<32x512xf32>
    %c5 = arith.constant 5 : index
    %c0_12 = arith.constant 0 : index
    %c0_13 = arith.constant 0 : index
    %27 = vector.load %arg1[%c5, %c0_12, %c0_13] : memref<9x32x512xf32, #tpu.memory_space<vmem>>, vector<1x32x512xf32>
    %28 = vector.shape_cast %27 : vector<1x32x512xf32> to vector<32x512xf32>
    %29 = arith.mulf %26, %28 : vector<32x512xf32>
    %30 = arith.addf %25, %29 : vector<32x512xf32>
    %c497_i32 = arith.constant 497 : i32
    %31 = tpu.dynamic_rotate %2 by %c497_i32 dim 1 : vector<32x512xf32>, i32 -> vector<32x512xf32>
    %c6 = arith.constant 6 : index
    %c0_14 = arith.constant 0 : index
    %c0_15 = arith.constant 0 : index
    %32 = vector.load %arg1[%c6, %c0_14, %c0_15] : memref<9x32x512xf32, #tpu.memory_space<vmem>>, vector<1x32x512xf32>
    %33 = vector.shape_cast %32 : vector<1x32x512xf32> to vector<32x512xf32>
    %34 = arith.mulf %31, %33 : vector<32x512xf32>
    %35 = arith.addf %30, %34 : vector<32x512xf32>
    %c496_i32 = arith.constant 496 : i32
    %36 = tpu.dynamic_rotate %2 by %c496_i32 dim 1 : vector<32x512xf32>, i32 -> vector<32x512xf32>
    %c7 = arith.constant 7 : index
    %c0_16 = arith.constant 0 : index
    %c0_17 = arith.constant 0 : index
    %37 = vector.load %arg1[%c7, %c0_16, %c0_17] : memref<9x32x512xf32, #tpu.memory_space<vmem>>, vector<1x32x512xf32>
    %38 = vector.shape_cast %37 : vector<1x32x512xf32> to vector<32x512xf32>
    %39 = arith.mulf %36, %38 : vector<32x512xf32>
    %40 = arith.addf %35, %39 : vector<32x512xf32>
    %c495_i32 = arith.constant 495 : i32
    %41 = tpu.dynamic_rotate %2 by %c495_i32 dim 1 : vector<32x512xf32>, i32 -> vector<32x512xf32>
    %c8 = arith.constant 8 : index
    %c0_18 = arith.constant 0 : index
    %c0_19 = arith.constant 0 : index
    %42 = vector.load %arg1[%c8, %c0_18, %c0_19] : memref<9x32x512xf32, #tpu.memory_space<vmem>>, vector<1x32x512xf32>
    %43 = vector.shape_cast %42 : vector<1x32x512xf32> to vector<32x512xf32>
    %44 = arith.mulf %41, %43 : vector<32x512xf32>
    %45 = arith.addf %40, %44 : vector<32x512xf32>
    %c0_20 = arith.constant 0 : index
    %c0_21 = arith.constant 0 : index
    %46 = vector.load %arg3[%c0_20, %c0_21] : memref<32x32xf32, #tpu.memory_space<vmem>>, vector<32x32xf32>
    %cst_22 = arith.constant dense<0.000000e+00> : vector<32x512xf32>
    %47 = tpu.matmul %46, %45, %cst_22 {dimension_numbers = #tpu.dot_dimension_numbers<[1], [0], [0], [1], [0, 0, 1, 1], [], []>} : vector<32x32xf32>, vector<32x512xf32>, vector<32x512xf32> -> vector<32x512xf32>
    %c0_23 = arith.constant 0 : index
    %c0_24 = arith.constant 0 : index
    %48 = vector.load %arg4[%c0_23, %c0_24] : memref<32x512xf32, #tpu.memory_space<vmem>>, vector<32x512xf32>
    %49 = arith.addf %47, %48 : vector<32x512xf32>
    %cst_25 = arith.constant dense<0.000000e+00> : vector<32xf32>
    %50 = vector.multi_reduction <add>, %49, %cst_25 [1] : vector<32x512xf32> to vector<32xf32>
    %51 = vector.shape_cast %50 : vector<32xf32> to vector<32x1xf32>
    %cst_26 = arith.constant 0.001953125 : f32
    %52 = vector.broadcast %cst_26 : f32 to vector<32x1xf32>
    %53 = arith.mulf %51, %52 : vector<32x1xf32>
    %54 = arith.mulf %49, %49 : vector<32x512xf32>
    %cst_27 = arith.constant dense<0.000000e+00> : vector<32xf32>
    %55 = vector.multi_reduction <add>, %54, %cst_27 [1] : vector<32x512xf32> to vector<32xf32>
    %56 = vector.shape_cast %55 : vector<32xf32> to vector<32x1xf32>
    %cst_28 = arith.constant 0.001953125 : f32
    %57 = vector.broadcast %cst_28 : f32 to vector<32x1xf32>
    %58 = arith.mulf %56, %57 : vector<32x1xf32>
    %59 = arith.mulf %53, %53 : vector<32x1xf32>
    %60 = arith.subf %58, %59 : vector<32x1xf32>
    %cst_29 = arith.constant 9.99999974E-6 : f32
    %61 = vector.broadcast %cst_29 : f32 to vector<32x1xf32>
    %62 = arith.addf %60, %61 : vector<32x1xf32>
    %63 = math.rsqrt %62 : vector<32x1xf32>
    %c0_30 = arith.constant 0 : index
    %c0_31 = arith.constant 0 : index
    %64 = vector.load %arg5[%c0_30, %c0_31] : memref<32x1xf32, #tpu.memory_space<vmem>>, vector<32x1xf32>
    %65 = arith.mulf %63, %64 : vector<32x1xf32>
    %66 = vector.broadcast %53 : vector<32x1xf32> to vector<32x512xf32>
    %67 = arith.subf %49, %66 : vector<32x512xf32>
    %68 = vector.broadcast %65 : vector<32x1xf32> to vector<32x512xf32>
    %69 = arith.mulf %67, %68 : vector<32x512xf32>
    %c0_32 = arith.constant 0 : index
    %c0_33 = arith.constant 0 : index
    %70 = vector.load %arg6[%c0_32, %c0_33] : memref<32x512xf32, #tpu.memory_space<vmem>>, vector<32x512xf32>
    %71 = arith.addf %69, %70 : vector<32x512xf32>
    %72 = arith.addf %71, %0 : vector<32x512xf32>
    %c0_34 = arith.constant 0 : index
    %c0_35 = arith.constant 0 : index
    %73 = vector.load %arg2[%c0_34, %c0_35] : memref<32x32xf32, #tpu.memory_space<vmem>>, vector<32x32xf32>
    %cst_36 = arith.constant dense<0.000000e+00> : vector<32x512xf32>
    %74 = tpu.matmul %73, %72, %cst_36 {dimension_numbers = #tpu.dot_dimension_numbers<[1], [0], [0], [1], [0, 0, 1, 1], [], []>} : vector<32x32xf32>, vector<32x512xf32>, vector<32x512xf32> -> vector<32x512xf32>
    %cst_37 = arith.constant 0.000000e+00 : f32
    %75 = vector.broadcast %cst_37 : f32 to vector<32x512xf32>
    %76 = arith.maximumf %74, %75 : vector<32x512xf32>
    %c4_38 = arith.constant 4 : index
    %c0_39 = arith.constant 0 : index
    %c0_40 = arith.constant 0 : index
    %77 = vector.load %arg1[%c4_38, %c0_39, %c0_40] : memref<9x32x512xf32, #tpu.memory_space<vmem>>, vector<1x32x512xf32>
    %78 = vector.shape_cast %77 : vector<1x32x512xf32> to vector<32x512xf32>
    %79 = arith.mulf %76, %78 : vector<32x512xf32>
    %c17_i32_41 = arith.constant 17 : i32
    %80 = tpu.dynamic_rotate %76 by %c17_i32_41 dim 1 : vector<32x512xf32>, i32 -> vector<32x512xf32>
    %c0_42 = arith.constant 0 : index
    %c0_43 = arith.constant 0 : index
    %c0_44 = arith.constant 0 : index
    %81 = vector.load %arg1[%c0_42, %c0_43, %c0_44] : memref<9x32x512xf32, #tpu.memory_space<vmem>>, vector<1x32x512xf32>
    %82 = vector.shape_cast %81 : vector<1x32x512xf32> to vector<32x512xf32>
    %83 = arith.mulf %80, %82 : vector<32x512xf32>
    %84 = arith.addf %79, %83 : vector<32x512xf32>
    %c16_i32_45 = arith.constant 16 : i32
    %85 = tpu.dynamic_rotate %76 by %c16_i32_45 dim 1 : vector<32x512xf32>, i32 -> vector<32x512xf32>
    %c1_46 = arith.constant 1 : index
    %c0_47 = arith.constant 0 : index
    %c0_48 = arith.constant 0 : index
    %86 = vector.load %arg1[%c1_46, %c0_47, %c0_48] : memref<9x32x512xf32, #tpu.memory_space<vmem>>, vector<1x32x512xf32>
    %87 = vector.shape_cast %86 : vector<1x32x512xf32> to vector<32x512xf32>
    %88 = arith.mulf %85, %87 : vector<32x512xf32>
    %89 = arith.addf %84, %88 : vector<32x512xf32>
    %c15_i32_49 = arith.constant 15 : i32
    %90 = tpu.dynamic_rotate %76 by %c15_i32_49 dim 1 : vector<32x512xf32>, i32 -> vector<32x512xf32>
    %c2_50 = arith.constant 2 : index
    %c0_51 = arith.constant 0 : index
    %c0_52 = arith.constant 0 : index
    %91 = vector.load %arg1[%c2_50, %c0_51, %c0_52] : memref<9x32x512xf32, #tpu.memory_space<vmem>>, vector<1x32x512xf32>
    %92 = vector.shape_cast %91 : vector<1x32x512xf32> to vector<32x512xf32>
    %93 = arith.mulf %90, %92 : vector<32x512xf32>
    %94 = arith.addf %89, %93 : vector<32x512xf32>
    %c1_i32_53 = arith.constant 1 : i32
    %95 = tpu.dynamic_rotate %76 by %c1_i32_53 dim 1 : vector<32x512xf32>, i32 -> vector<32x512xf32>
    %c3_54 = arith.constant 3 : index
    %c0_55 = arith.constant 0 : index
    %c0_56 = arith.constant 0 : index
    %96 = vector.load %arg1[%c3_54, %c0_55, %c0_56] : memref<9x32x512xf32, #tpu.memory_space<vmem>>, vector<1x32x512xf32>
    %97 = vector.shape_cast %96 : vector<1x32x512xf32> to vector<32x512xf32>
    %98 = arith.mulf %95, %97 : vector<32x512xf32>
    %99 = arith.addf %94, %98 : vector<32x512xf32>
    %c511_i32_57 = arith.constant 511 : i32
    %100 = tpu.dynamic_rotate %76 by %c511_i32_57 dim 1 : vector<32x512xf32>, i32 -> vector<32x512xf32>
    %c5_58 = arith.constant 5 : index
    %c0_59 = arith.constant 0 : index
    %c0_60 = arith.constant 0 : index
    %101 = vector.load %arg1[%c5_58, %c0_59, %c0_60] : memref<9x32x512xf32, #tpu.memory_space<vmem>>, vector<1x32x512xf32>
    %102 = vector.shape_cast %101 : vector<1x32x512xf32> to vector<32x512xf32>
    %103 = arith.mulf %100, %102 : vector<32x512xf32>
    %104 = arith.addf %99, %103 : vector<32x512xf32>
    %c497_i32_61 = arith.constant 497 : i32
    %105 = tpu.dynamic_rotate %76 by %c497_i32_61 dim 1 : vector<32x512xf32>, i32 -> vector<32x512xf32>
    %c6_62 = arith.constant 6 : index
    %c0_63 = arith.constant 0 : index
    %c0_64 = arith.constant 0 : index
    %106 = vector.load %arg1[%c6_62, %c0_63, %c0_64] : memref<9x32x512xf32, #tpu.memory_space<vmem>>, vector<1x32x512xf32>
    %107 = vector.shape_cast %106 : vector<1x32x512xf32> to vector<32x512xf32>
    %108 = arith.mulf %105, %107 : vector<32x512xf32>
    %109 = arith.addf %104, %108 : vector<32x512xf32>
    %c496_i32_65 = arith.constant 496 : i32
    %110 = tpu.dynamic_rotate %76 by %c496_i32_65 dim 1 : vector<32x512xf32>, i32 -> vector<32x512xf32>
    %c7_66 = arith.constant 7 : index
    %c0_67 = arith.constant 0 : index
    %c0_68 = arith.constant 0 : index
    %111 = vector.load %arg1[%c7_66, %c0_67, %c0_68] : memref<9x32x512xf32, #tpu.memory_space<vmem>>, vector<1x32x512xf32>
    %112 = vector.shape_cast %111 : vector<1x32x512xf32> to vector<32x512xf32>
    %113 = arith.mulf %110, %112 : vector<32x512xf32>
    %114 = arith.addf %109, %113 : vector<32x512xf32>
    %c495_i32_69 = arith.constant 495 : i32
    %115 = tpu.dynamic_rotate %76 by %c495_i32_69 dim 1 : vector<32x512xf32>, i32 -> vector<32x512xf32>
    %c8_70 = arith.constant 8 : index
    %c0_71 = arith.constant 0 : index
    %c0_72 = arith.constant 0 : index
    %116 = vector.load %arg1[%c8_70, %c0_71, %c0_72] : memref<9x32x512xf32, #tpu.memory_space<vmem>>, vector<1x32x512xf32>
    %117 = vector.shape_cast %116 : vector<1x32x512xf32> to vector<32x512xf32>
    %118 = arith.mulf %115, %117 : vector<32x512xf32>
    %119 = arith.addf %114, %118 : vector<32x512xf32>
    %c0_73 = arith.constant 0 : index
    %c0_74 = arith.constant 0 : index
    %120 = vector.load %arg3[%c0_73, %c0_74] : memref<32x32xf32, #tpu.memory_space<vmem>>, vector<32x32xf32>
    %cst_75 = arith.constant dense<0.000000e+00> : vector<32x512xf32>
    %121 = tpu.matmul %120, %119, %cst_75 {dimension_numbers = #tpu.dot_dimension_numbers<[1], [0], [0], [1], [0, 0, 1, 1], [], []>} : vector<32x32xf32>, vector<32x512xf32>, vector<32x512xf32> -> vector<32x512xf32>
    %c0_76 = arith.constant 0 : index
    %c0_77 = arith.constant 0 : index
    %122 = vector.load %arg4[%c0_76, %c0_77] : memref<32x512xf32, #tpu.memory_space<vmem>>, vector<32x512xf32>
    %123 = arith.addf %121, %122 : vector<32x512xf32>
    %cst_78 = arith.constant dense<0.000000e+00> : vector<32xf32>
    %124 = vector.multi_reduction <add>, %123, %cst_78 [1] : vector<32x512xf32> to vector<32xf32>
    %125 = vector.shape_cast %124 : vector<32xf32> to vector<32x1xf32>
    %cst_79 = arith.constant 0.001953125 : f32
    %126 = vector.broadcast %cst_79 : f32 to vector<32x1xf32>
    %127 = arith.mulf %125, %126 : vector<32x1xf32>
    %128 = arith.mulf %123, %123 : vector<32x512xf32>
    %cst_80 = arith.constant dense<0.000000e+00> : vector<32xf32>
    %129 = vector.multi_reduction <add>, %128, %cst_80 [1] : vector<32x512xf32> to vector<32xf32>
    %130 = vector.shape_cast %129 : vector<32xf32> to vector<32x1xf32>
    %cst_81 = arith.constant 0.001953125 : f32
    %131 = vector.broadcast %cst_81 : f32 to vector<32x1xf32>
    %132 = arith.mulf %130, %131 : vector<32x1xf32>
    %133 = arith.mulf %127, %127 : vector<32x1xf32>
    %134 = arith.subf %132, %133 : vector<32x1xf32>
    %cst_82 = arith.constant 9.99999974E-6 : f32
    %135 = vector.broadcast %cst_82 : f32 to vector<32x1xf32>
    %136 = arith.addf %134, %135 : vector<32x1xf32>
    %137 = math.rsqrt %136 : vector<32x1xf32>
    %c0_83 = arith.constant 0 : index
    %c0_84 = arith.constant 0 : index
    %138 = vector.load %arg5[%c0_83, %c0_84] : memref<32x1xf32, #tpu.memory_space<vmem>>, vector<32x1xf32>
    %139 = arith.mulf %137, %138 : vector<32x1xf32>
    %140 = vector.broadcast %127 : vector<32x1xf32> to vector<32x512xf32>
    %141 = arith.subf %123, %140 : vector<32x512xf32>
    %142 = vector.broadcast %139 : vector<32x1xf32> to vector<32x512xf32>
    %143 = arith.mulf %141, %142 : vector<32x512xf32>
    %c0_85 = arith.constant 0 : index
    %c0_86 = arith.constant 0 : index
    %144 = vector.load %arg6[%c0_85, %c0_86] : memref<32x512xf32, #tpu.memory_space<vmem>>, vector<32x512xf32>
    %145 = arith.addf %143, %144 : vector<32x512xf32>
    %146 = arith.addf %145, %74 : vector<32x512xf32>
    %c0_87 = arith.constant 0 : index
    %c0_88 = arith.constant 0 : index
    %147 = vector.load %arg2[%c0_87, %c0_88] : memref<32x32xf32, #tpu.memory_space<vmem>>, vector<32x32xf32>
    %cst_89 = arith.constant dense<0.000000e+00> : vector<32x512xf32>
    %148 = tpu.matmul %147, %146, %cst_89 {dimension_numbers = #tpu.dot_dimension_numbers<[1], [0], [0], [1], [0, 0, 1, 1], [], []>} : vector<32x32xf32>, vector<32x512xf32>, vector<32x512xf32> -> vector<32x512xf32>
    %cst_90 = arith.constant 0.000000e+00 : f32
    %149 = vector.broadcast %cst_90 : f32 to vector<32x512xf32>
    %150 = arith.maximumf %148, %149 : vector<32x512xf32>
    %c4_91 = arith.constant 4 : index
    %c0_92 = arith.constant 0 : index
    %c0_93 = arith.constant 0 : index
    %151 = vector.load %arg1[%c4_91, %c0_92, %c0_93] : memref<9x32x512xf32, #tpu.memory_space<vmem>>, vector<1x32x512xf32>
    %152 = vector.shape_cast %151 : vector<1x32x512xf32> to vector<32x512xf32>
    %153 = arith.mulf %150, %152 : vector<32x512xf32>
    %c17_i32_94 = arith.constant 17 : i32
    %154 = tpu.dynamic_rotate %150 by %c17_i32_94 dim 1 : vector<32x512xf32>, i32 -> vector<32x512xf32>
    %c0_95 = arith.constant 0 : index
    %c0_96 = arith.constant 0 : index
    %c0_97 = arith.constant 0 : index
    %155 = vector.load %arg1[%c0_95, %c0_96, %c0_97] : memref<9x32x512xf32, #tpu.memory_space<vmem>>, vector<1x32x512xf32>
    %156 = vector.shape_cast %155 : vector<1x32x512xf32> to vector<32x512xf32>
    %157 = arith.mulf %154, %156 : vector<32x512xf32>
    %158 = arith.addf %153, %157 : vector<32x512xf32>
    %c16_i32_98 = arith.constant 16 : i32
    %159 = tpu.dynamic_rotate %150 by %c16_i32_98 dim 1 : vector<32x512xf32>, i32 -> vector<32x512xf32>
    %c1_99 = arith.constant 1 : index
    %c0_100 = arith.constant 0 : index
    %c0_101 = arith.constant 0 : index
    %160 = vector.load %arg1[%c1_99, %c0_100, %c0_101] : memref<9x32x512xf32, #tpu.memory_space<vmem>>, vector<1x32x512xf32>
    %161 = vector.shape_cast %160 : vector<1x32x512xf32> to vector<32x512xf32>
    %162 = arith.mulf %159, %161 : vector<32x512xf32>
    %163 = arith.addf %158, %162 : vector<32x512xf32>
    %c15_i32_102 = arith.constant 15 : i32
    %164 = tpu.dynamic_rotate %150 by %c15_i32_102 dim 1 : vector<32x512xf32>, i32 -> vector<32x512xf32>
    %c2_103 = arith.constant 2 : index
    %c0_104 = arith.constant 0 : index
    %c0_105 = arith.constant 0 : index
    %165 = vector.load %arg1[%c2_103, %c0_104, %c0_105] : memref<9x32x512xf32, #tpu.memory_space<vmem>>, vector<1x32x512xf32>
    %166 = vector.shape_cast %165 : vector<1x32x512xf32> to vector<32x512xf32>
    %167 = arith.mulf %164, %166 : vector<32x512xf32>
    %168 = arith.addf %163, %167 : vector<32x512xf32>
    %c1_i32_106 = arith.constant 1 : i32
    %169 = tpu.dynamic_rotate %150 by %c1_i32_106 dim 1 : vector<32x512xf32>, i32 -> vector<32x512xf32>
    %c3_107 = arith.constant 3 : index
    %c0_108 = arith.constant 0 : index
    %c0_109 = arith.constant 0 : index
    %170 = vector.load %arg1[%c3_107, %c0_108, %c0_109] : memref<9x32x512xf32, #tpu.memory_space<vmem>>, vector<1x32x512xf32>
    %171 = vector.shape_cast %170 : vector<1x32x512xf32> to vector<32x512xf32>
    %172 = arith.mulf %169, %171 : vector<32x512xf32>
    %173 = arith.addf %168, %172 : vector<32x512xf32>
    %c511_i32_110 = arith.constant 511 : i32
    %174 = tpu.dynamic_rotate %150 by %c511_i32_110 dim 1 : vector<32x512xf32>, i32 -> vector<32x512xf32>
    %c5_111 = arith.constant 5 : index
    %c0_112 = arith.constant 0 : index
    %c0_113 = arith.constant 0 : index
    %175 = vector.load %arg1[%c5_111, %c0_112, %c0_113] : memref<9x32x512xf32, #tpu.memory_space<vmem>>, vector<1x32x512xf32>
    %176 = vector.shape_cast %175 : vector<1x32x512xf32> to vector<32x512xf32>
    %177 = arith.mulf %174, %176 : vector<32x512xf32>
    %178 = arith.addf %173, %177 : vector<32x512xf32>
    %c497_i32_114 = arith.constant 497 : i32
    %179 = tpu.dynamic_rotate %150 by %c497_i32_114 dim 1 : vector<32x512xf32>, i32 -> vector<32x512xf32>
    %c6_115 = arith.constant 6 : index
    %c0_116 = arith.constant 0 : index
    %c0_117 = arith.constant 0 : index
    %180 = vector.load %arg1[%c6_115, %c0_116, %c0_117] : memref<9x32x512xf32, #tpu.memory_space<vmem>>, vector<1x32x512xf32>
    %181 = vector.shape_cast %180 : vector<1x32x512xf32> to vector<32x512xf32>
    %182 = arith.mulf %179, %181 : vector<32x512xf32>
    %183 = arith.addf %178, %182 : vector<32x512xf32>
    %c496_i32_118 = arith.constant 496 : i32
    %184 = tpu.dynamic_rotate %150 by %c496_i32_118 dim 1 : vector<32x512xf32>, i32 -> vector<32x512xf32>
    %c7_119 = arith.constant 7 : index
    %c0_120 = arith.constant 0 : index
    %c0_121 = arith.constant 0 : index
    %185 = vector.load %arg1[%c7_119, %c0_120, %c0_121] : memref<9x32x512xf32, #tpu.memory_space<vmem>>, vector<1x32x512xf32>
    %186 = vector.shape_cast %185 : vector<1x32x512xf32> to vector<32x512xf32>
    %187 = arith.mulf %184, %186 : vector<32x512xf32>
    %188 = arith.addf %183, %187 : vector<32x512xf32>
    %c495_i32_122 = arith.constant 495 : i32
    %189 = tpu.dynamic_rotate %150 by %c495_i32_122 dim 1 : vector<32x512xf32>, i32 -> vector<32x512xf32>
    %c8_123 = arith.constant 8 : index
    %c0_124 = arith.constant 0 : index
    %c0_125 = arith.constant 0 : index
    %190 = vector.load %arg1[%c8_123, %c0_124, %c0_125] : memref<9x32x512xf32, #tpu.memory_space<vmem>>, vector<1x32x512xf32>
    %191 = vector.shape_cast %190 : vector<1x32x512xf32> to vector<32x512xf32>
    %192 = arith.mulf %189, %191 : vector<32x512xf32>
    %193 = arith.addf %188, %192 : vector<32x512xf32>
    %c0_126 = arith.constant 0 : index
    %c0_127 = arith.constant 0 : index
    %194 = vector.load %arg3[%c0_126, %c0_127] : memref<32x32xf32, #tpu.memory_space<vmem>>, vector<32x32xf32>
    %cst_128 = arith.constant dense<0.000000e+00> : vector<32x512xf32>
    %195 = tpu.matmul %194, %193, %cst_128 {dimension_numbers = #tpu.dot_dimension_numbers<[1], [0], [0], [1], [0, 0, 1, 1], [], []>} : vector<32x32xf32>, vector<32x512xf32>, vector<32x512xf32> -> vector<32x512xf32>
    %c0_129 = arith.constant 0 : index
    %c0_130 = arith.constant 0 : index
    %196 = vector.load %arg4[%c0_129, %c0_130] : memref<32x512xf32, #tpu.memory_space<vmem>>, vector<32x512xf32>
    %197 = arith.addf %195, %196 : vector<32x512xf32>
    %cst_131 = arith.constant dense<0.000000e+00> : vector<32xf32>
    %198 = vector.multi_reduction <add>, %197, %cst_131 [1] : vector<32x512xf32> to vector<32xf32>
    %199 = vector.shape_cast %198 : vector<32xf32> to vector<32x1xf32>
    %cst_132 = arith.constant 0.001953125 : f32
    %200 = vector.broadcast %cst_132 : f32 to vector<32x1xf32>
    %201 = arith.mulf %199, %200 : vector<32x1xf32>
    %202 = arith.mulf %197, %197 : vector<32x512xf32>
    %cst_133 = arith.constant dense<0.000000e+00> : vector<32xf32>
    %203 = vector.multi_reduction <add>, %202, %cst_133 [1] : vector<32x512xf32> to vector<32xf32>
    %204 = vector.shape_cast %203 : vector<32xf32> to vector<32x1xf32>
    %cst_134 = arith.constant 0.001953125 : f32
    %205 = vector.broadcast %cst_134 : f32 to vector<32x1xf32>
    %206 = arith.mulf %204, %205 : vector<32x1xf32>
    %207 = arith.mulf %201, %201 : vector<32x1xf32>
    %208 = arith.subf %206, %207 : vector<32x1xf32>
    %cst_135 = arith.constant 9.99999974E-6 : f32
    %209 = vector.broadcast %cst_135 : f32 to vector<32x1xf32>
    %210 = arith.addf %208, %209 : vector<32x1xf32>
    %211 = math.rsqrt %210 : vector<32x1xf32>
    %c0_136 = arith.constant 0 : index
    %c0_137 = arith.constant 0 : index
    %212 = vector.load %arg5[%c0_136, %c0_137] : memref<32x1xf32, #tpu.memory_space<vmem>>, vector<32x1xf32>
    %213 = arith.mulf %211, %212 : vector<32x1xf32>
    %214 = vector.broadcast %201 : vector<32x1xf32> to vector<32x512xf32>
    %215 = arith.subf %197, %214 : vector<32x512xf32>
    %216 = vector.broadcast %213 : vector<32x1xf32> to vector<32x512xf32>
    %217 = arith.mulf %215, %216 : vector<32x512xf32>
    %c0_138 = arith.constant 0 : index
    %c0_139 = arith.constant 0 : index
    %218 = vector.load %arg6[%c0_138, %c0_139] : memref<32x512xf32, #tpu.memory_space<vmem>>, vector<32x512xf32>
    %219 = arith.addf %217, %218 : vector<32x512xf32>
    %220 = arith.addf %219, %148 : vector<32x512xf32>
    %221 = vector.extract_strided_slice %220 {offsets = [0, 0], sizes = [8, 512], strides = [1, 1]} : vector<32x512xf32> to vector<8x512xf32>
    %222 = vector.extract_strided_slice %220 {offsets = [8, 0], sizes = [8, 512], strides = [1, 1]} : vector<32x512xf32> to vector<8x512xf32>
    %223 = arith.addf %221, %222 : vector<8x512xf32>
    %224 = vector.extract_strided_slice %220 {offsets = [16, 0], sizes = [8, 512], strides = [1, 1]} : vector<32x512xf32> to vector<8x512xf32>
    %225 = arith.addf %223, %224 : vector<8x512xf32>
    %226 = vector.extract_strided_slice %220 {offsets = [24, 0], sizes = [8, 512], strides = [1, 1]} : vector<32x512xf32> to vector<8x512xf32>
    %227 = arith.addf %225, %226 : vector<8x512xf32>
    %cst_140 = arith.constant 2.500000e-01 : f32
    %228 = vector.broadcast %cst_140 : f32 to vector<8x512xf32>
    %229 = arith.mulf %227, %228 : vector<8x512xf32>
    %c0_141 = arith.constant 0 : index
    %c0_142 = arith.constant 0 : index
    %230 = vector.load %arg7[%c0_141, %c0_142] : memref<8x512xf32, #tpu.memory_space<vmem>>, vector<8x512xf32>
    tpu.vector_store %arg7[%c0_141, %c0_142], %229 {strides = array<i32>} : memref<8x512xf32, #tpu.memory_space<vmem>>, vector<8x512xf32>,
    return
  }
}

</mosaic_0001>

<bundles_post_ra>
// kernel: tpu_custom_call.1
= control target key start
LH: loop header
LB: loop body
LE: loop exit
PB: predicated region body
PF: predicated region fallthrough
CT: control target
= control target key end

     0   :  { %12 = vsyncpa [#allocation3], 0  ;;  %s8238_s0 = inlined_call_operand.hbm [shape: f32[32,512], index: 0, kind: input, shape index: {}]   ;;  %s8239_s1 = inlined_call_operand.hbm [shape: f32[9,32,512], index: 1, kind: input, shape index: {}]   ;;  %s8240_s2 = inlined_call_operand.vmem [shape: f32[32,32], index: 2, kind: input, shape index: {}]   ;;  %s8241_s3 = inlined_call_operand.hbm [shape: f32[32,32], index: 3, kind: input, shape index: {}]   ;;  %s8242_s4 = inlined_call_operand.hbm [shape: f32[32,512], index: 4, kind: input, shape index: {}]   ;;  %s8243_s5 = inlined_call_operand.vmem [shape: f32[32,1], index: 5, kind: input, shape index: {}]   ;;  %s8244_s6 = inlined_call_operand.hbm [shape: f32[32,512], index: 6, kind: input, shape index: {}]   ;;  %s8245_s7 = inlined_call_operand.hbm [shape: f32[8,512], index: 7, kind: output, shape index: {}]  }
   0x1   :  { %13 = vsyncpa [#allocation6], 0 }
   0x2   :  { %14 = vsyncpa [#allocation9], 0 }
   0x3   :  { %15 = vsyncpa [#allocation4], 0  ;;  %s33_s26 = sshll.u32 %s8239_s1, 4  ;;  %s4259_s27 = smov [#allocation5]   ;;  %s34_s26 = int_to_ptr.hbm [resolvable:$true] %s33_s26 }
   0x4   :  { %s35_s28 = sshll.u32 %s4259_s27, 4  ;;  %s61_s8 = sshll.u32 %s8242_s4, 4  ;;  %s36_s28 = int_to_ptr.vmem [resolvable:$true] %s35_s28  ;;  %s62_s8 = int_to_ptr.hbm [resolvable:$true] %s61_s8 }
   0x5   :  { %s4260_s9 = smov 512   ;;  %s4261_s10 = smov 32  }
   0x6   :  { %41 = dma.hbm_to_vmem [thread:$0]  %s34_s26, 18432, %s36_s28, [#allocation6], %s4260_s9, %s4260_s9, %s4261_s10  }
   0x7   :  { %s4262_s11 = smov [#allocation8]   ;;  %s20_s1 = sshll.u32 %s8238_s0, 4  ;;  %s21_s1 = int_to_ptr.hbm [resolvable:$true] %s20_s1 }
   0x8   :  { %s63_s12 = sshll.u32 %s4262_s11, 4  ;;  %s48_s16 = sshll.u32 %s8241_s3, 4  ;;  %s64_s12 = int_to_ptr.vmem [resolvable:$true] %s63_s12  ;;  %s49_s16 = int_to_ptr.hbm [resolvable:$true] %s48_s16 }
   0x9   :  { %69 = dma.hbm_to_vmem [thread:$0]  %s62_s8, 2048, %s64_s12, [#allocation9], %s4260_s9, %s4260_s9, %s4261_s10  }
   0xa   :  { %s4263_s17 = smov [#allocation2]   ;;  %s4264_s19 = smov [#allocation7]  }
   0xb   :  { %s22_s18 = sshll.u32 %s4263_s17, 4  ;;  %s50_s0 = sshll.u32 %s4264_s19, 4  ;;  %s23_s18 = int_to_ptr.vmem [resolvable:$true] %s22_s18  ;;  %s51_s0 = int_to_ptr.vmem [resolvable:$true] %s50_s0 }
   0xc   :  { %28 = dma.hbm_to_vmem [thread:$0]  %s21_s1, 2048, %s23_s18, [#allocation3], %s4260_s9, %s4260_s9, %s4261_s10  }
   0xd   :  { %s4265_s20 = smov 128   ;;  %s4266_s21 = smov 8  }
   0xe   :  { %56 = dma.hbm_to_vmem [thread:$0]  %s49_s16, 512, %s51_s0, [#allocation6], %s4265_s20, %s4265_s20, %s4266_s21  }
   0xf   :  { %s76_s24 = sshll.u32 %s8244_s6, 4  ;;  %s4267_s3 = smov [#allocation10]   ;;  %s77_s24 = int_to_ptr.hbm [resolvable:$true] %s76_s24 }
  0x10   :  { %s78_s25 = sshll.u32 %s4267_s3, 4  ;;  %s79_s25 = int_to_ptr.vmem [resolvable:$true] %s78_s25 }
  0x11   :  { %84 = dma.hbm_to_vmem [thread:$0]  %s77_s24, 2048, %s79_s25, [#allocation9], %s4260_s9, %s4260_s9, %s4261_s10  }
  0x12   :  { %4251 = dma.done.wait [#allocation3], 2048  }
  0x13   :  { %4252 = vsyncadd [#allocation3], 4294965248 }
  0x14   :  { %4253 = dma.done.wait [#allocation6], 18944  }
  0x15   :  { %4254 = vsyncadd [#allocation6], 4294948352 }
  0x16   :  { %4255 = dma.done.wait [#allocation9], 4096  }
  0x17   :  { %4256 = vsyncadd [#allocation9], 4294963200  ;;  %v120_v0 = vld [vmem:[#allocation2 + $0x78] sm:$0xff]  ;;  %v118_v1 = vld [vmem:[#allocation2 + $0x68] sm:$0xff]  ;;  %s4268_s6 = smov 17   ;;  %s4269_s26 = smov 16  }
  0x18   :  { %v114_v2 = vld [vmem:[#allocation2 + $0x48] sm:$0xff]  ;;  %v4345_v3 = vmax.f32 %v120_v0, 0.0  ;;  %v4347_v4 = vmax.f32 %v118_v1, 0.0  ;;  %v119_v6 = vld [vmem:[#allocation2 + $0x70] sm:$0xff]  ;;  %v117_v11 = vld [vmem:[#allocation2 + $0x60] sm:$0xff]  ;;  %s4270_s27 = smov 15  }
  0x19   :  { %v4349_v5 = vmax.f32 %v114_v2, 0.0  ;;  %v115_v7 = vld [vmem:[#allocation2 + $0x50] sm:$0xff]  ;;  %v4357_v8 = vmax.f32 %v119_v6, 0.0  ;;  %v110_v10 = vld [vmem:[#allocation2 + $0x28] sm:$0xff]  ;;  %v4369_v13 = vmax.f32 %v117_v11, 0.0  ;;  %v116_v15 = vld [vmem:[#allocation2 + $0x58] sm:$0xff] }
  0x1a   :  { %200 = vrot.lane.b32.xlu2 %v4345_v3, %s4268_s6  ;;  %184 = vrot.lane.b32.xlu0 %v4347_v4, %s4268_s6  ;;  %v4359_v9 = vmax.f32 %v115_v7, 0.0  ;;  %v4367_v12 = vmax.f32 %v110_v10, 0.0  ;;  %v111_v14 = vld [vmem:[#allocation2 + $0x30] sm:$0xff]  ;;  %v4379_v17 = vmax.f32 %v116_v15, 0.0  ;;  %v106_v18 = vld [vmem:[#allocation2 + $0x8] sm:$0xff]  ;;  %v113_v19 = vld [vmem:[#allocation2 + $0x40] sm:$0xff] }
  0x1b   :  { %182 = vrot.lane.b32.xlu1 %v4349_v5, %s4268_s6  ;;  %v4377_v16 = vmax.f32 %v111_v14, 0.0  ;;  %v4393_v20 = vmax.f32 %v106_v18, 0.0  ;;  %v4395_v21 = vmax.f32 %v113_v19, 0.0  ;;  %v107_v22 = vld [vmem:[#allocation2 + $0x10] sm:$0xff]  ;;  %v112_v23 = vld [vmem:[#allocation2 + $0x38] sm:$0xff]  ;;  %v109_v26 = vld [vmem:[#allocation2 + $0x20] sm:$0xff] }
  0x1c   :  { %v4403_v24 = vmax.f32 %v107_v22, 0.0  ;;  %v4405_v25 = vmax.f32 %v112_v23, 0.0  ;;  %v4425_v27 = vmax.f32 %v109_v26, 0.0  ;;  %s4271_s28 = smov 1   ;;  %v108_v28 = vld [vmem:[#allocation2 + $0x18] sm:$0xff]  ;;  %v105_v32 = vld [vmem:[#allocation2] sm:$0xff] }
  0x1d   :  { %8432 = vst [vmem:[#allocation16_spill] sm:$0xff] %v4393_v20  ;;  %v4433_v29 = vmax.f32 %v108_v28, 0.0  ;;  %v4465_v34 = vmax.f32 %v105_v32, 0.0  ;;  %s4272_s29 = smov 127   ;;  %s4273_s30 = smov 113   ;;  %vm975_vm8 = vcmask 261120  }
  0x1e   :  { %s4274_s8 = smov 112   ;;  %s4275_s9 = smov 111  }
  0x1f   :  { %8433 = vst [vmem:[#allocation17_spill] sm:$0xff] %v4433_v29  ;;  %s3587_s21 = sshll.u32 %s8245_s7, 4  ;;  %s3588_s21 = int_to_ptr.hbm [resolvable:$true] %s3587_s21 }
  0x20   :  { %8434 = vst [vmem:[#allocation18_spill] sm:$0xff] %v4465_v34 }
  0x22   :  { %283 = vrot.lane.b32.xlu2 %v4347_v4, %s4269_s26  ;;  %192 = vrot.lane.b32.xlu0 %v4357_v8, %s4268_s6 }
  0x23   :  { %190 = vrot.lane.b32.xlu1 %v4359_v9, %s4268_s6 }
  0x2a   :  { %291 = vrot.lane.b32.xlu0 %v4357_v8, %s4269_s26  ;;  %180 = vrot.lane.b32.xlu2 %v4367_v12, %s4268_s6 }
  0x2b   :  { %176 = vrot.lane.b32.xlu1 %v4369_v13, %s4268_s6 }
  0x32   :  { %188 = vrot.lane.b32.xlu0 %v4377_v16, %s4268_s6  ;;  %281 = vrot.lane.b32.xlu2 %v4349_v5, %s4269_s26 }
  0x33   :  { %198 = vrot.lane.b32.xlu1 %v4379_v17, %s4268_s6 }
  0x3a   :  { %289 = vrot.lane.b32.xlu0 %v4359_v9, %s4269_s26  ;;  %381 = vrot.lane.b32.xlu2 %v4347_v4, %s4270_s27 }
  0x3b   :  { %299 = vrot.lane.b32.xlu1 %v4345_v3, %s4269_s26 }
  0x42   :  { %389 = vrot.lane.b32.xlu0 %v4357_v8, %s4270_s27  ;;  %178 = vrot.lane.b32.xlu2 %v4393_v20, %s4268_s6 }
  0x43   :  { %174 = vrot.lane.b32.xlu1 %v4395_v21, %s4268_s6 }
  0x4a   :  { %186 = vrot.lane.b32.xlu0 %v4403_v24, %s4268_s6  ;;  %275 = vrot.lane.b32.xlu2 %v4369_v13, %s4269_s26 }
  0x4b   :  { %196 = vrot.lane.b32.xlu1 %v4405_v25, %s4268_s6 }
  0x52   :  { %279 = vrot.lane.b32.xlu0 %v4367_v12, %s4269_s26  ;;  %297 = vrot.lane.b32.xlu2 %v4379_v17, %s4269_s26 }
  0x53   :  { %287 = vrot.lane.b32.xlu1 %v4377_v16, %s4269_s26 }
  0x5a   :  { %379 = vrot.lane.b32.xlu0 %v4349_v5, %s4270_s27  ;;  %397 = vrot.lane.b32.xlu2 %v4345_v3, %s4270_s27 }
  0x5b   :  { %387 = vrot.lane.b32.xlu1 %v4359_v9, %s4270_s27 }
  0x62   :  { %479 = vrot.lane.b32.xlu0 %v4347_v4, %s4271_s28  ;;  %172 = vrot.lane.b32.xlu2 %v4425_v27, %s4268_s6 }
  0x63   :  { %487 = vrot.lane.b32.xlu1 %v4357_v8, %s4271_s28 }
  0x6a   :  { %194 = vrot.lane.b32.xlu0 %v4433_v29, %s4268_s6  ;;  %277 = vrot.lane.b32.xlu2 %v4393_v20, %s4269_s26 }
  0x6b   :  { %273 = vrot.lane.b32.xlu1 %v4395_v21, %s4269_s26 }
  0x72   :  { %285 = vrot.lane.b32.xlu0 %v4403_v24, %s4269_s26  ;;  %373 = vrot.lane.b32.xlu2 %v4369_v13, %s4270_s27 }
  0x73   :  { %295 = vrot.lane.b32.xlu1 %v4405_v25, %s4269_s26 }
  0x74   :  { %v4447_v30 = vpop.permute.xlu2 %200 }
  0x7a   :  { %377 = vrot.lane.b32.xlu0 %v4367_v12, %s4270_s27  ;;  %395 = vrot.lane.b32.xlu2 %v4379_v17, %s4270_s27 }
  0x7b   :  { %385 = vrot.lane.b32.xlu1 %v4377_v16, %s4270_s27 }
  0x7c   :  { %v4455_v31 = vpop.permute.xlu2 %283 }
  0x82   :  { %477 = vrot.lane.b32.xlu0 %v4349_v5, %s4271_s28  ;;  %495 = vrot.lane.b32.xlu2 %v4345_v3, %s4271_s28 }
  0x83   :  { %485 = vrot.lane.b32.xlu1 %v4359_v9, %s4271_s28 }
  0x84   :  { %v4463_v33 = vpop.permute.xlu2 %180 }
  0x8a   :  { %585 = vrot.lane.b32.xlu0 %v4357_v8, %s4272_s29  ;;  %170 = vrot.lane.b32.xlu2 %v4465_v34, %s4268_s6 }
  0x8b   :  { %593 = vrot.lane.b32.xlu1 %v4345_v3, %s4272_s29 }
  0x8c   :  { %v4473_v35 = vpop.permute.xlu0 %184  ;;  %v4475_v36 = vpop.permute.xlu2 %281 }
  0x8d   :  { %v4477_v37 = vpop.permute.xlu1 %182 }
  0x92   :  { %271 = vrot.lane.b32.xlu0 %v4425_v27, %s4269_s26  ;;  %371 = vrot.lane.b32.xlu2 %v4395_v21, %s4270_s27 }
  0x93   :  { %293 = vrot.lane.b32.xlu1 %v4433_v29, %s4269_s26 }
  0x94   :  { %v4485_v38 = vpop.permute.xlu0 %192  ;;  %v4487_v39 = vpop.permute.xlu2 %381 }
  0x95   :  { %8435 = vst [vmem:[#allocation19_spill] sm:$0xff] %v4487_v39  ;;  %v4489_v40 = vpop.permute.xlu1 %190 }
  0x9a   :  { %375 = vrot.lane.b32.xlu0 %v4393_v20, %s4270_s27  ;;  %393 = vrot.lane.b32.xlu2 %v4405_v25, %s4270_s27 }
  0x9b   :  { %383 = vrot.lane.b32.xlu1 %v4403_v24, %s4270_s27 }
  0x9c   :  { %v4497_v41 = vpop.permute.xlu0 %291  ;;  %v4499_v42 = vpop.permute.xlu2 %178 }
  0x9d   :  { %v4501_v43 = vpop.permute.xlu1 %176 }
  0xa2   :  { %471 = vrot.lane.b32.xlu0 %v4369_v13, %s4271_s28  ;;  %483 = vrot.lane.b32.xlu2 %v4377_v16, %s4271_s28 }
  0xa3   :  { %475 = vrot.lane.b32.xlu1 %v4367_v12, %s4271_s28 }
  0xa4   :  { %v4509_v44 = vpop.permute.xlu0 %188  ;;  %v4511_v45 = vpop.permute.xlu2 %275 }
  0xa5   :  { %v4513_v46 = vpop.permute.xlu1 %198 }
  0xaa   :  { %493 = vrot.lane.b32.xlu0 %v4379_v17, %s4271_s28  ;;  %583 = vrot.lane.b32.xlu2 %v4359_v9, %s4272_s29 }
  0xab   :  { %569 = vrot.lane.b32.xlu1 %v4369_v13, %s4272_s29 }
  0xac   :  { %v4521_v47 = vpop.permute.xlu0 %289  ;;  %v4523_v48 = vpop.permute.xlu2 %297 }
  0xad   :  { %v4525_v49 = vpop.permute.xlu1 %299 }
  0xb2   :  { %591 = vrot.lane.b32.xlu0 %v4379_v17, %s4272_s29  ;;  %691 = vrot.lane.b32.xlu2 %v4345_v3, %s4273_s30 }
  0xb3   :  { %683 = vrot.lane.b32.xlu1 %v4357_v8, %s4273_s30 }
  0xb4   :  { %v4533_v50 = vpop.permute.xlu0 %389  ;;  %v4535_v51 = vpop.permute.xlu2 %397 }
  0xb5   :  { %v4537_v52 = vpop.permute.xlu1 %174 }
  0xba   :  { %269 = vrot.lane.b32.xlu0 %v4465_v34, %s4269_s26  ;;  %391 = vrot.lane.b32.xlu2 %v4433_v29, %s4270_s27 }
  0xbb   :  { %369 = vrot.lane.b32.xlu1 %v4425_v27, %s4270_s27 }
  0xbc   :  { %v4545_v53 = vpop.permute.xlu0 %186  ;;  %v4547_v54 = vpop.permute.xlu2 %172 }
  0xbd   :  { %v4549_v55 = vpop.permute.xlu1 %196 }
  0xc2   :  { %469 = vrot.lane.b32.xlu0 %v4395_v21, %s4271_s28  ;;  %481 = vrot.lane.b32.xlu2 %v4403_v24, %s4271_s28 }
  0xc3   :  { %473 = vrot.lane.b32.xlu1 %v4393_v20, %s4271_s28 }
  0xc4   :  { %v4557_v56 = vpop.permute.xlu0 %279  ;;  %v4559_v57 = vpop.permute.xlu2 %277 }
  0xc5   :  { %8436 = vst [vmem:[#allocation20_spill] sm:$0xff] %v4559_v57  ;;  %v4561_v58 = vpop.permute.xlu1 %287 }
  0xca   :  { %491 = vrot.lane.b32.xlu0 %v4405_v25, %s4271_s28  ;;  %577 = vrot.lane.b32.xlu2 %v4347_v4, %s4272_s29 }
  0xcb   :  { %567 = vrot.lane.b32.xlu1 %v4395_v21, %s4272_s29 }
  0xcc   :  { %v4569_v59 = vpop.permute.xlu0 %379  ;;  %v4571_v60 = vpop.permute.xlu2 %373 }
  0xcd   :  { %8437 = vst [vmem:[#allocation21_spill] sm:$0xff] %v4569_v59  ;;  %v4573_v61 = vpop.permute.xlu1 %387 }
  0xce   :  { %8438 = vst [vmem:[#allocation22_spill] sm:$0xff] %v4571_v60  ;;  %v233_v60 = vld [vmem:[#allocation5 + $0x60] sm:$0xff] }
  0xcf   :  { %8439 = vst [vmem:[#allocation23_spill] sm:$0xff] %v4573_v61  ;;  %v147_v61 = vld [vmem:[#allocation5 + $0x248] sm:$0xff] }
  0xd2   :  { %581 = vrot.lane.b32.xlu0 %v4377_v16, %s4272_s29  ;;  %667 = vrot.lane.b32.xlu2 %v4369_v13, %s4273_s30 }
  0xd3   :  { %589 = vrot.lane.b32.xlu1 %v4405_v25, %s4272_s29 }
  0xd4   :  { %v4581_v62 = vpop.permute.xlu0 %479  ;;  %v4583_v63 = vpop.permute.xlu2 %395 }
  0xd5   :  { %8440 = vst [vmem:[#allocation24_spill] sm:$0xff] %v4581_v62  ;;  %v4585_v0 = vpop.permute.xlu1 %487 }
  0xd6   :  { %8441 = vst [vmem:[#allocation25_spill] sm:$0xff] %v4583_v63 }
  0xd7   :  { %8442 = vst [vmem:[#allocation26_spill] sm:$0xff] %v4585_v0 }
  0xda   :  { %681 = vrot.lane.b32.xlu0 %v4359_v9, %s4273_s30  ;;  %781 = vrot.lane.b32.xlu2 %v4357_v8, %s4274_s8 }
  0xdb   :  { %689 = vrot.lane.b32.xlu1 %v4379_v17, %s4273_s30 }
  0xdc   :  { %v4593_v1 = vpop.permute.xlu0 %194  ;;  %v4595_v2 = vpop.permute.xlu2 %495 }
  0xdd   :  { %8443 = vst [vmem:[#allocation27_spill] sm:$0xff] %v4593_v1  ;;  %v4597_v6 = vpop.permute.xlu1 %273 }
  0xde   :  { %8444 = vst [vmem:[#allocation28_spill] sm:$0xff] %v4595_v2  ;;  %v431_v2 = vld [vmem:[#allocation5 + $0x170] sm:$0xff] }
  0xdf   :  { %8445 = vst [vmem:[#allocation29_spill] sm:$0xff] %v4597_v6 }
  0xe2   :  { %789 = vrot.lane.b32.xlu0 %v4345_v3, %s4274_s8  ;;  %467 = vrot.lane.b32.xlu2 %v4425_v27, %s4271_s28 }
  0xe3   :  { %367 = vrot.lane.b32.xlu1 %v4465_v34, %s4270_s27 }
  0xe4   :  { %v4605_v7 = vpop.permute.xlu0 %285  ;;  %v4607_v10 = vpop.permute.xlu2 %170 }
  0xe5   :  { %8446 = vst [vmem:[#allocation30_spill] sm:$0xff] %v4605_v7  ;;  %v4609_v11 = vpop.permute.xlu1 %295 }
  0xe6   :  { %8447 = vst [vmem:[#allocation31_spill] sm:$0xff] %v4607_v10 }
  0xe7   :  { %8448 = vst [vmem:[#allocation32_spill] sm:$0xff] %v4609_v11 }
  0xea   :  { %489 = vrot.lane.b32.xlu0 %v4433_v29, %s4271_s28  ;;  %575 = vrot.lane.b32.xlu2 %v4349_v5, %s4272_s29 }
  0xeb   :  { %565 = vrot.lane.b32.xlu1 %v4425_v27, %s4272_s29 }
  0xec   :  { %v4617_v14 = vpop.permute.xlu0 %377  ;;  %v4619_v15 = vpop.permute.xlu2 %371 }
  0xed   :  { %8449 = vst [vmem:[#allocation33_spill] sm:$0xff] %v4617_v14  ;;  %v4621_v18 = vpop.permute.xlu1 %385 }
  0xee   :  { %8450 = vst [vmem:[#allocation34_spill] sm:$0xff] %v4619_v15 }
  0xef   :  { %8451 = vst [vmem:[#allocation35_spill] sm:$0xff] %v4621_v18 }
  0xf2   :  { %579 = vrot.lane.b32.xlu0 %v4403_v24, %s4272_s29  ;;  %665 = vrot.lane.b32.xlu2 %v4395_v21, %s4273_s30 }
  0xf3   :  { %587 = vrot.lane.b32.xlu1 %v4433_v29, %s4272_s29 }
  0xf4   :  { %v4629_v19 = vpop.permute.xlu0 %477  ;;  %v4631_v22 = vpop.permute.xlu2 %393 }
  0xf5   :  { %8452 = vst [vmem:[#allocation36_spill] sm:$0xff] %v4629_v19  ;;  %v4633_v23 = vpop.permute.xlu1 %485 }
  0xf6   :  { %8453 = vst [vmem:[#allocation37_spill] sm:$0xff] %v4631_v22 }
  0xf7   :  { %8454 = vst [vmem:[#allocation38_spill] sm:$0xff] %v4633_v23 }
  0xfa   :  { %675 = vrot.lane.b32.xlu0 %v4347_v4, %s4273_s30  ;;  %687 = vrot.lane.b32.xlu2 %v4405_v25, %s4273_s30 }
  0xfb   :  { %679 = vrot.lane.b32.xlu1 %v4377_v16, %s4273_s30 }
  0xfc   :  { %v4641_v26 = vpop.permute.xlu0 %585  ;;  %v4643_v28 = vpop.permute.xlu2 %483 }
  0xfd   :  { %8455 = vst [vmem:[#allocation39_spill] sm:$0xff] %v4641_v26  ;;  %v4645_v32 = vpop.permute.xlu1 %593 }
  0xfe   :  { %8456 = vst [vmem:[#allocation40_spill] sm:$0xff] %v4643_v28 }
  0xff   :  { %8457 = vst [vmem:[#allocation41_spill] sm:$0xff] %v4645_v32 }
 0x102   :  { %765 = vrot.lane.b32.xlu0 %v4369_v13, %s4274_s8  ;;  %787 = vrot.lane.b32.xlu2 %v4379_v17, %s4274_s8 }
 0x103   :  { %779 = vrot.lane.b32.xlu1 %v4359_v9, %s4274_s8 }
 0x104   :  { %v4653_v22 = vpop.permute.xlu0 %271  ;;  %v4655_v15 = vpop.permute.xlu2 %583 }
 0x105   :  { %8458 = vst [vmem:[#allocation42_spill] sm:$0xff] %v4653_v22  ;;  %v4657_v14 = vpop.permute.xlu1 %293 }
 0x106   :  { %8459 = vst [vmem:[#allocation43_spill] sm:$0xff] %v4655_v15 }
 0x107   :  { %8460 = vst [vmem:[#allocation44_spill] sm:$0xff] %v4657_v14 }
 0x10a   :  { %879 = vrot.lane.b32.xlu0 %v4357_v8, %s4275_s9  ;;  %465 = vrot.lane.b32.xlu2 %v4465_v34, %s4271_s28 }
 0x10b   :  { %887 = vrot.lane.b32.xlu1 %v4345_v3, %s4275_s9 }
 0x10c   :  { %v4665_v28 = vpop.permute.xlu0 %375  ;;  %v4667_v18 = vpop.permute.xlu2 %691 }
 0x10d   :  { %8461 = vst [vmem:[#allocation45_spill] sm:$0xff] %v4665_v28  ;;  %v4669_v11 = vpop.permute.xlu1 %383 }
 0x10e   :  { %8462 = vst [vmem:[#allocation46_spill] sm:$0xff] %v4667_v18 }
 0x10f   :  { %8463 = vst [vmem:[#allocation47_spill] sm:$0xff] %v4669_v11 }
 0x112   :  { %563 = vrot.lane.b32.xlu0 %v4465_v34, %s4272_s29  ;;  %663 = vrot.lane.b32.xlu2 %v4425_v27, %s4273_s30 }
 0x113   :  { %573 = vrot.lane.b32.xlu1 %v4367_v12, %s4272_s29 }
 0x114   :  { %v4677_v14 = vpop.permute.xlu0 %471  ;;  %v4679_v22 = vpop.permute.xlu2 %391 }
 0x115   :  { %8464 = vst [vmem:[#allocation48_spill] sm:$0xff] %v4677_v14  ;;  %v4681_v10 = vpop.permute.xlu1 %475 }
 0x116   :  { %8465 = vst [vmem:[#allocation49_spill] sm:$0xff] %v4679_v22 }
 0x117   :  { %8466 = vst [vmem:[#allocation50_spill] sm:$0xff] %v4681_v10 }
 0x11a   :  { %673 = vrot.lane.b32.xlu0 %v4349_v5, %s4273_s30  ;;  %685 = vrot.lane.b32.xlu2 %v4433_v29, %s4273_s30 }
 0x11b   :  { %677 = vrot.lane.b32.xlu1 %v4403_v24, %s4273_s30 }
 0x11c   :  { %v4689_v28 = vpop.permute.xlu0 %493  ;;  %v4691_v11 = vpop.permute.xlu2 %481 }
 0x11d   :  { %8467 = vst [vmem:[#allocation51_spill] sm:$0xff] %v4689_v28  ;;  %v4693_v15 = vpop.permute.xlu1 %569 }
 0x11e   :  { %8468 = vst [vmem:[#allocation52_spill] sm:$0xff] %v4691_v11 }
 0x11f   :  { %8469 = vst [vmem:[#allocation53_spill] sm:$0xff] %v4693_v15 }
 0x122   :  { %763 = vrot.lane.b32.xlu0 %v4395_v21, %s4274_s8  ;;  %777 = vrot.lane.b32.xlu2 %v4377_v16, %s4274_s8 }
 0x123   :  { %773 = vrot.lane.b32.xlu1 %v4347_v4, %s4274_s8 }
 0x124   :  { %v4701_v22 = vpop.permute.xlu0 %591  ;;  %v4703_v10 = vpop.permute.xlu2 %577 }
 0x125   :  { %8470 = vst [vmem:[#allocation54_spill] sm:$0xff] %v4701_v22  ;;  %v4705_v14 = vpop.permute.xlu1 %683 }
 0x126   :  { %8471 = vst [vmem:[#allocation55_spill] sm:$0xff] %v4703_v10 }
 0x127   :  { %8472 = vst [vmem:[#allocation56_spill] sm:$0xff] %v4705_v14 }
 0x12a   :  { %785 = vrot.lane.b32.xlu0 %v4405_v25, %s4274_s8  ;;  %877 = vrot.lane.b32.xlu2 %v4359_v9, %s4275_s9 }
 0x12b   :  { %863 = vrot.lane.b32.xlu1 %v4369_v13, %s4275_s9 }
 0x12c   :  { %v4713_v11 = vpop.permute.xlu0 %269  ;;  %v4715_v57 = vpop.permute.xlu2 %667 }
 0x12d   :  { %8473 = vst [vmem:[#allocation57_spill] sm:$0xff] %v4713_v11  ;;  %v4717_v7 = vpop.permute.xlu1 %369 }
 0x12e   :  { %8474 = vst [vmem:[#allocation58_spill] sm:$0xff] %v4715_v57  ;;  %v202_v57 = vlaneseq }
 0x12f   :  { %8475 = vst [vmem:[#allocation59_spill] sm:$0xff] %v4717_v7 }
 0x130   :  { %v4801_v15 = vand.u32 127, %v202_v57 }
 0x132   :  { %885 = vrot.lane.b32.xlu0 %v4379_v17, %s4275_s9  ;;  %661 = vrot.lane.b32.xlu2 %v4465_v34, %s4273_s30  ;;  %vm204_vm0 = vcmp.lt.s32.totalorder %v4801_v15, 17  ;;  %vm301_vm1 = vcmp.lt.s32.totalorder %v4801_v15, 16  ;;  %vm399_vm2 = vcmp.lt.s32.totalorder %v4801_v15, 15  ;;  %vm497_vm3 = vcmp.lt.s32.totalorder %v4801_v15, 1 }
 0x133   :  { %571 = vrot.lane.b32.xlu1 %v4393_v20, %s4272_s29  ;;  %v212_v57 = vsel %vm204_vm0, %v4473_v35, %v4485_v38  ;;  %vm595_vm4 = vcmp.lt.s32.totalorder %v4801_v15, 127  ;;  %vm693_vm5 = vcmp.lt.s32.totalorder %v4801_v15, 113  ;;  %vm791_vm6 = vcmp.lt.s32.totalorder %v4801_v15, 112 }
 0x134   :  { %v4725_v10 = vpop.permute.xlu0 %469  ;;  %v4727_v22 = vpop.permute.xlu2 %781  ;;  %vm889_vm7 = vcmp.lt.s32.totalorder %v4801_v15, 111 }
 0x135   :  { %8476 = vst [vmem:[#allocation60_spill] sm:$0xff] %v4725_v10  ;;  %v4729_v28 = vpop.permute.xlu1 %473 }
 0x136   :  { %8477 = vst [vmem:[#allocation61_spill] sm:$0xff] %v4727_v22 }
 0x137   :  { %8478 = vst [vmem:[#allocation62_spill] sm:$0xff] %v4729_v28 }
 0x13a   :  { %671 = vrot.lane.b32.xlu0 %v4367_v12, %s4273_s30  ;;  %771 = vrot.lane.b32.xlu2 %v4349_v5, %s4274_s8 }
 0x13b   :  { %761 = vrot.lane.b32.xlu1 %v4425_v27, %s4274_s8 }
 0x13c   :  { %v4737_v7 = vpop.permute.xlu0 %491  ;;  %v4739_v11 = vpop.permute.xlu2 %467 }
 0x13d   :  { %8479 = vst [vmem:[#allocation63_spill] sm:$0xff] %v4737_v7  ;;  %v4741_v19 = vpop.permute.xlu1 %567 }
 0x13e   :  { %8480 = vst [vmem:[#allocation64_spill] sm:$0xff] %v4739_v11 }
 0x13f   :  { %8481 = vst [vmem:[#allocation65_spill] sm:$0xff] %v4741_v19 }
 0x142   :  { %775 = vrot.lane.b32.xlu0 %v4403_v24, %s4274_s8  ;;  %861 = vrot.lane.b32.xlu2 %v4395_v21, %s4275_s9 }
 0x143   :  { %783 = vrot.lane.b32.xlu1 %v4433_v29, %s4274_s8 }
 0x144   :  { %v4749_v28 = vpop.permute.xlu0 %581  ;;  %v4751_v10 = vpop.permute.xlu2 %575 }
 0x145   :  { %8482 = vst [vmem:[#allocation66_spill] sm:$0xff] %v4749_v28  ;;  %v4753_v23 = vpop.permute.xlu1 %589 }
 0x146   :  { %8483 = vst [vmem:[#allocation67_spill] sm:$0xff] %v4751_v10 }
 0x147   :  { %8484 = vst [vmem:[#allocation68_spill] sm:$0xff] %v4753_v23 }
 0x14a   :  { %871 = vrot.lane.b32.xlu0 %v4347_v4, %s4275_s9  ;;  %883 = vrot.lane.b32.xlu2 %v4405_v25, %s4275_s9 }
 0x14b   :  { %875 = vrot.lane.b32.xlu1 %v4377_v16, %s4275_s9 }
 0x14c   :  { %v4761_v11 = vpop.permute.xlu0 %681  ;;  %v4763_v7 = vpop.permute.xlu2 %665 }
 0x14d   :  { %8485 = vst [vmem:[#allocation69_spill] sm:$0xff] %v4761_v11  ;;  %v4765_v19 = vpop.permute.xlu1 %689 }
 0x14e   :  { %8486 = vst [vmem:[#allocation70_spill] sm:$0xff] %v4763_v7 }
 0x14f   :  { %8487 = vst [vmem:[#allocation71_spill] sm:$0xff] %v4765_v19 }
 0x152   :  { %669 = vrot.lane.b32.xlu0 %v4393_v20, %s4273_s30  ;;  %769 = vrot.lane.b32.xlu2 %v4367_v12, %s4274_s8 }
 0x153   :  { %759 = vrot.lane.b32.xlu1 %v4465_v34, %s4274_s8 }
 0x154   :  { %v4773_v10 = vpop.permute.xlu0 %789  ;;  %v4775_v28 = vpop.permute.xlu2 %687 }
 0x155   :  { %8488 = vst [vmem:[#allocation72_spill] sm:$0xff] %v4773_v10  ;;  %v4777_v23 = vpop.permute.xlu1 %367 }
 0x156   :  { %8489 = vst [vmem:[#allocation73_spill] sm:$0xff] %v4775_v28 }
 0x157   :  { %8490 = vst [vmem:[#allocation74_spill] sm:$0xff] %v4777_v23 }
 0x15a   :  { %859 = vrot.lane.b32.xlu0 %v4425_v27, %s4275_s9  ;;  %873 = vrot.lane.b32.xlu2 %v4403_v24, %s4275_s9 }
 0x15b   :  { %869 = vrot.lane.b32.xlu1 %v4349_v5, %s4275_s9 }
 0x15c   :  { %v4785_v7 = vpop.permute.xlu0 %489  ;;  %v4787_v11 = vpop.permute.xlu2 %787 }
 0x15d   :  { %8491 = vst [vmem:[#allocation75_spill] sm:$0xff] %v4785_v7  ;;  %v4789_v19 = vpop.permute.xlu1 %565 }
 0x15e   :  { %8492 = vst [vmem:[#allocation76_spill] sm:$0xff] %v4787_v11  ;;  %v235_v11 = vld [vmem:[#allocation5 + $0x70] sm:$0xff] }
 0x15f   :  { %8493 = vst [vmem:[#allocation77_spill] sm:$0xff] %v4789_v19  ;;  %v152_v19 = vld [vmem:[#allocation5 + $0x270] sm:$0xff]  ;;  %v251_v6 = vmul.f32 %v235_v11, %v212_v57 }
 0x160   :  { %v168_v1 = vmul.f32 %v152_v19, %v4357_v8  ;;  %v627_v11 = vld [vmem:[#allocation5 + $0x2f0] sm:$0xff]  ;;  %v599_v19 = vsel %vm595_vm4, %v4641_v26, %v4645_v32  ;;  %v795_v26 = vsel %vm791_vm6, %v4727_v22, %v4773_v10  ;;  %v151_v10 = vld [vmem:[#allocation5 + $0x268] sm:$0xff] }
 0x161   :  { %v144_v32 = vld [vmem:[#allocation5 + $0x230] sm:$0xff] }
 0x162   :  { %881 = vrot.lane.b32.xlu0 %v4433_v29, %s4275_s9  ;;  %857 = vrot.lane.b32.xlu2 %v4465_v34, %s4275_s9  ;;  %v333_v34 = vld [vmem:[#allocation5 + $0xf0] sm:$0xff]  ;;  %v505_v29 = vsel %vm497_vm3, %v4581_v62, %v4585_v0  ;;  %v267_v63 = vadd.f32 %v251_v6, %v168_v1  ;;  %v153_v62 = vld [vmem:[#allocation5 + $0x278] sm:$0xff]  ;;  %v146_v0 = vld [vmem:[#allocation5 + $0x240] sm:$0xff] }
 0x163   :  { %767 = vrot.lane.b32.xlu1 %v4393_v20, %s4274_s8  ;;  %v725_v1 = vld [vmem:[#allocation5 + $0x370] sm:$0xff] }
 0x164   :  { %v4797_v23 = vpop.permute.xlu0 %579  ;;  %v4799_v28 = vpop.permute.xlu2 %465 }
 0x165   :  { %8494 = vst [vmem:[#allocation78_spill] sm:$0xff] %v4797_v23  ;;  %v4803_v7 = vpop.permute.xlu1 %587 }
 0x166   :  { %8495 = vst [vmem:[#allocation79_spill] sm:$0xff] %v4799_v28 }
 0x167   :  { %8496 = vst [vmem:[#allocation80_spill] sm:$0xff] %v4803_v7 }
 0x16a   :  { %867 = vrot.lane.b32.xlu0 %v4367_v12, %s4275_s9 }
 0x16b   :  { %865 = vrot.lane.b32.xlu1 %v4393_v20, %s4275_s9  ;;  %v309_v20 = vsel %vm301_vm1, %v4455_v31, %v4497_v41 }
 0x16c   :  { %v4815_v23 = vpop.permute.xlu0 %675  ;;  %v4817_v7 = vpop.permute.xlu2 %663 }
 0x16d   :  { %8497 = vst [vmem:[#allocation81_spill] sm:$0xff] %v4815_v23  ;;  %v4820_v28 = vpop.permute.xlu1 %679  ;;  %v349_v23 = vmul.f32 %v333_v34, %v309_v20 }
 0x16e   :  { %8498 = vst [vmem:[#allocation82_spill] sm:$0xff] %v4817_v7  ;;  %v407_v7 = vsel %vm399_vm2, %v4487_v39, %v4533_v50 }
 0x16f   :  { %8499 = vst [vmem:[#allocation83_spill] sm:$0xff] %v4820_v28  ;;  %v529_v28 = vld [vmem:[#allocation5 + $0x1f0] sm:$0xff]  ;;  %v447_v8 = vmul.f32 %v431_v2, %v407_v7  ;;  %v365_v34 = vadd.f32 %v349_v23, %v267_v63  ;;  %v697_v2 = vsel %vm693_vm5, %v4705_v14, %v4667_v18  ;;  %v643_v7 = vmul.f32 %v627_v11, %v599_v19  ;;  %v149_v18 = vld [vmem:[#allocation5 + $0x258] sm:$0xff] }
 0x170   :  { %v545_v39 = vmul.f32 %v529_v28, %v505_v29  ;;  %v741_v29 = vmul.f32 %v725_v1, %v697_v2  ;;  %v921_v14 = vld [vmem:[#allocation5 + $0x470] sm:$0xff]  ;;  %v208_v11 = vsel %vm204_vm0, %v4485_v38, %v4447_v30  ;;  %v150_v2 = vld [vmem:[#allocation5 + $0x260] sm:$0xff]  ;;  %v169_v38 = vmul.f32 %v153_v62, %v4345_v3  ;;  %v234_v62 = vld [vmem:[#allocation5 + $0x68] sm:$0xff] }
 0x171   :  { %v463_v6 = vadd.f32 %v447_v8, %v365_v34  ;;  %v236_v8 = vld [vmem:[#allocation5 + $0x78] sm:$0xff]  ;;  %v148_v19 = vld [vmem:[#allocation5 + $0x250] sm:$0xff]  ;;  %v167_v3 = vmul.f32 %v151_v10, %v4347_v4  ;;  %v143_v4 = vld [vmem:[#allocation5 + $0x228] sm:$0xff] }
 0x172   :  { %v231_v34 = vld [vmem:[#allocation5 + $0x50] sm:$0xff] }
 0x173   :  { %v561_v63 = vadd.f32 %v545_v39, %v463_v6  ;;  %v211_v39 = vsel %vm204_vm0, %v4477_v37, %v4489_v40 }
 0x174   :  { %v4842_v57 = vpop.permute.xlu0 %765  ;;  %v4844_v20 = vpop.permute.xlu2 %685  ;;  %v247_v22 = vmul.f32 %v231_v34, %v211_v39  ;;  %v4891_v39 = vmul.f32 %v147_v61, %v4349_v5  ;;  %v210_v5 = vsel %vm204_vm0, %v4463_v33, %v4509_v44  ;;  %v332_v61 = vld [vmem:[#allocation5 + $0xe8] sm:$0xff] }
 0x175   :  { %8500 = vst [vmem:[#allocation84_spill] sm:$0xff] %v4842_v57  ;;  %v4847_v59 = vpop.permute.xlu1 %779  ;;  %v659_v23 = vadd.f32 %v643_v7, %v561_v63  ;;  %v252_v63 = vmul.f32 %v236_v8, %v208_v11  ;;  %v165_v8 = vmul.f32 %v149_v18, %v4379_v17  ;;  %v160_v11 = vmul.f32 %v144_v32, %v4377_v16  ;;  %v227_v17 = vld [vmem:[#allocation5 + $0x30] sm:$0xff] }
 0x176   :  { %8501 = vst [vmem:[#allocation85_spill] sm:$0xff] %v4844_v20  ;;  %v823_v20 = vld [vmem:[#allocation5 + $0x3f0] sm:$0xff]  ;;  %v207_v16 = vsel %vm204_vm0, %v4489_v40, %v4513_v46  ;;  %v305_v40 = vsel %vm301_vm1, %v4497_v41, %v4525_v49  ;;  %v317_v32 = vsel %vm301_vm1, %v4525_v49, %v4511_v45  ;;  %v159_v41 = vmul.f32 %v143_v4, %v4367_v12  ;;  %v432_v49 = vld [vmem:[#allocation5 + $0x178] sm:$0xff] }
 0x177   :  { %8502 = vst [vmem:[#allocation86_spill] sm:$0xff] %v4847_v59  ;;  %v839_v28 = vmul.f32 %v823_v20, %v795_v26  ;;  %v757_v20 = vadd.f32 %v741_v29, %v659_v23  ;;  %v166_v23 = vmul.f32 %v150_v2, %v4369_v13  ;;  %v140_v13 = vld [vmem:[#allocation5 + $0x210] sm:$0xff]  ;;  %v330_v2 = vld [vmem:[#allocation5 + $0xd8] sm:$0xff]  ;;  %v215_v12 = vsel %vm204_vm0, %v4537_v52, %v4477_v37 }
 0x178   :  { %v4920_v18 = vmul.f32 %v140_v13, %v4403_v24  ;;  %v304_v24 = vsel %vm301_vm1, %v4521_v47, %v4523_v48 }
 0x179   :  { %v855_v6 = vadd.f32 %v839_v28, %v757_v20  ;;  %v145_v28 = vld [vmem:[#allocation5 + $0x238] sm:$0xff] }
 0x17c   :  { %v4858_v59 = vpop.permute.xlu0 %879  ;;  %v4860_v57 = vpop.permute.xlu2 %777 }
 0x17d   :  { %8503 = vst [vmem:[#allocation87_spill] sm:$0xff] %v4858_v59  ;;  %v4870_v26 = vpop.permute.xlu1 %887 }
 0x17e   :  { %8504 = vst [vmem:[#allocation88_spill] sm:$0xff] %v4860_v57  ;;  %v893_v1 = vsel %vm889_vm7, %v4858_v59, %v4870_v26  ;;  %v164_v57 = vmul.f32 %v148_v19, %v4359_v9  ;;  %v216_v9 = vsel %vm204_vm0, %v4501_v43, %v4473_v35  ;;  %v268_v19 = vadd.f32 %v252_v63, %v169_v38  ;;  %v229_v38 = vld [vmem:[#allocation5 + $0x40] sm:$0xff] }
 0x17f   :  { %v937_v7 = vmul.f32 %v921_v14, %v893_v1  ;;  %v220_v14 = vsel %vm204_vm0, %v4447_v30, %v4501_v43  ;;  %v4894_v30 = vmul.f32 %v146_v0, %v4395_v21  ;;  %v232_v1 = vld [vmem:[#allocation5 + $0x58] sm:$0xff]  ;;  %v4907_v35 = vmul.f32 %v145_v28, %v4405_v25  ;;  %v8546_v59 = vld [vmem:[#allocation76_spill] sm:$0xff] }
 0x180   :  { %v263_v34 = vadd.f32 %v247_v22, %v164_v57  ;;  %v249_v20 = vmul.f32 %v233_v60, %v220_v14  ;;  %v250_v43 = vmul.f32 %v234_v62, %v216_v9  ;;  %v313_v60 = vsel %vm301_vm1, %v4511_v45, %v4455_v31  ;;  %v334_v0 = vld [vmem:[#allocation5 + $0xf8] sm:$0xff]  ;;  %v331_v22 = vld [vmem:[#allocation5 + $0xe0] sm:$0xff]  ;;  %v329_v57 = vld [vmem:[#allocation5 + $0xd0] sm:$0xff] }
 0x181   :  { %v953_v29 = vadd.f32 %v937_v7, %v855_v6  ;;  %v308_v31 = vsel %vm301_vm1, %v4475_v36, %v4521_v47  ;;  %v248_v6 = vmul.f32 %v232_v1, %v207_v16  ;;  %v243_v7 = vmul.f32 %v227_v17, %v210_v5  ;;  %v230_v47 = vld [vmem:[#allocation5 + $0x48] sm:$0xff]  ;;  %v142_v62 = vld [vmem:[#allocation5 + $0x220] sm:$0xff]  ;;  %v223_v17 = vld [vmem:[#allocation5 + $0x10] sm:$0xff] }
 0x182   :  { %v219_v45 = vsel %vm204_vm0, %v4513_v46, %v4537_v52  ;;  %v403_v63 = vsel %vm399_vm2, %v4533_v50, %v4535_v51  ;;  %v348_v14 = vmul.f32 %v332_v61, %v313_v60  ;;  %v350_v28 = vmul.f32 %v334_v0, %v305_v40  ;;  %v228_v0 = vld [vmem:[#allocation5 + $0x38] sm:$0xff] }
 0x183   :  { %1058 = vmatpush.msra.mxu2 %v953_v29  ;;  %v265_v29 = vadd.f32 %v249_v20, %v166_v23  ;;  %v266_v9 = vadd.f32 %v250_v43, %v167_v3  ;;  %v347_v13 = vmul.f32 %v331_v22, %v317_v32  ;;  %v345_v4 = vmul.f32 %v329_v57, %v308_v31  ;;  %v226_v23 = vld [vmem:[#allocation5 + $0x28] sm:$0xff]  ;;  %v225_v22 = vld [vmem:[#allocation5 + $0x20] sm:$0xff]  ;;  %v141_v31 = vld [vmem:[#allocation5 + $0x218] sm:$0xff] }
 0x184   :  { %v4896_v10 = vpop.permute.xlu0 %563  ;;  %v4922_v25 = vpop.permute.xlu2 %877  ;;  %v346_v46 = vmul.f32 %v330_v2, %v304_v24  ;;  %v245_v1 = vmul.f32 %v229_v38, %v219_v45  ;;  %v448_v16 = vmul.f32 %v432_v49, %v403_v63  ;;  %v209_v50 = vsel %vm204_vm0, %v4499_v42, %v4545_v53  ;;  %v429_v38 = vld [vmem:[#allocation5 + $0x160] sm:$0xff]  ;;  %v8511_v63 = vld [vmem:[#allocation23_spill] sm:$0xff] }
 0x185   :  { %8505 = vst [vmem:[#allocation89_spill] sm:$0xff] %v4896_v10  ;;  %v4909_v21 = vpop.permute.xlu1 %573  ;;  %v214_v20 = vsel %vm204_vm0, %v4547_v54, %v4463_v33  ;;  %v264_v37 = vadd.f32 %v248_v6, %v165_v8  ;;  %v4957_v52 = vadd.f32 %v243_v7, %v160_v11  ;;  %v246_v3 = vmul.f32 %v230_v47, %v215_v12  ;;  %v325_v6 = vld [vmem:[#allocation5 + $0xb0] sm:$0xff]  ;;  %v8513_v47 = vld [vmem:[#allocation19_spill] sm:$0xff]  ;;  %v8541_v10 = vld [vmem:[#allocation32_spill] sm:$0xff] }
 0x186   :  { %8506 = vst [vmem:[#allocation90_spill] sm:$0xff] %v4909_v21  ;;  %v158_v5 = vmul.f32 %v142_v62, %v4425_v27  ;;  %v4962_v61 = vadd.f32 %v348_v14, %v266_v9  ;;  %v366_v60 = vadd.f32 %v350_v28, %v268_v19  ;;  %v206_v40 = vsel %vm204_vm0, %v4509_v44, %v4549_v55  ;;  %v430_v28 = vld [vmem:[#allocation5 + $0x168] sm:$0xff]  ;;  %v428_v12 = vld [vmem:[#allocation5 + $0x158] sm:$0xff] }
 0x187   :  { %v218_v33 = vsel %vm204_vm0, %v4549_v55, %v4547_v54  ;;  %v361_v27 = vadd.f32 %v345_v4, %v263_v34  ;;  %v362_v11 = vadd.f32 %v346_v46, %v264_v37  ;;  %v239_v32 = vmul.f32 %v223_v17, %v209_v50  ;;  %v8509_v34 = vld [vmem:[#allocation22_spill] sm:$0xff]  ;;  %v8514_v62 = vld [vmem:[#allocation25_spill] sm:$0xff]  ;;  %v8516_v17 = vld [vmem:[#allocation28_spill] sm:$0xff] }
 0x188   :  { %v242_v57 = vmul.f32 %v226_v23, %v214_v20  ;;  %v363_v19 = vadd.f32 %v347_v13, %v265_v29  ;;  %v261_v2 = vadd.f32 %v245_v1, %v4894_v30  ;;  %v464_v24 = vadd.f32 %v448_v16, %v366_v60  ;;  %v427_v30 = vld [vmem:[#allocation5 + $0x150] sm:$0xff]  ;;  %v8512_v29 = vld [vmem:[#allocation21_spill] sm:$0xff]  ;;  %v530_v16 = vld [vmem:[#allocation5 + $0x1f8] sm:$0xff] }
 0x189   :  { %v307_v44 = vsel %vm301_vm1, %v4557_v56, %v4561_v58  ;;  %v262_v7 = vadd.f32 %v246_v3, %v4891_v39  ;;  %v244_v54 = vmul.f32 %v228_v0, %v206_v40  ;;  %v241_v55 = vmul.f32 %v225_v22, %v218_v33  ;;  %v8515_v9 = vld [vmem:[#allocation17_spill] sm:$0xff]  ;;  %v8517_v50 = vld [vmem:[#allocation26_spill] sm:$0xff]  ;;  %v327_v3 = vld [vmem:[#allocation5 + $0xc0] sm:$0xff] }
 0x18a   :  { %v415_v45 = vsel %vm399_vm2, %v4535_v51, %v8509_v34  ;;  %v406_v14 = vsel %vm399_vm2, %v8512_v29, %v8511_v63  ;;  %v411_v39 = vsel %vm399_vm2, %v8509_v34, %v8513_v47  ;;  %v402_v51 = vsel %vm399_vm2, %v8511_v63, %v8514_v62  ;;  %v139_v20 = vld [vmem:[#allocation5 + $0x208] sm:$0xff]  ;;  %v8519_v22 = vld [vmem:[#allocation27_spill] sm:$0xff] }
 0x18b   :  { %v157_v13 = vmul.f32 %v141_v31, %v8515_v9  ;;  %v5000_v4 = vadd.f32 %v239_v32, %v4920_v18  ;;  %v5002_v46 = vadd.f32 %v242_v57, %v159_v41  ;;  %v341_v1 = vmul.f32 %v325_v6, %v307_v44  ;;  %v328_v60 = vld [vmem:[#allocation5 + $0xc8] sm:$0xff]  ;;  %v224_v41 = vld [vmem:[#allocation5 + $0x18] sm:$0xff]  ;;  %v138_v6 = vld [vmem:[#allocation5 + $0x200] sm:$0xff] }
 0x18c   :  { %v4960_v43 = vpop.permute.xlu0 %673  ;;  %v4984_v49 = vpop.permute.xlu2 %661  ;;  %v501_v23 = vsel %vm497_vm3, %v8517_v50, %v8516_v17  ;;  %v445_v37 = vmul.f32 %v429_v38, %v415_v45  ;;  %v8518_v0 = vld [vmem:[#allocation29_spill] sm:$0xff]  ;;  %v205_v33 = vsel %vm204_vm0, %v4545_v53, %v8519_v22  ;;  %v443_v32 = vmul.f32 %v427_v30, %v406_v14  ;;  %v628_v44 = vld [vmem:[#allocation5 + $0x2f8] sm:$0xff]  ;;  %v8523_v9 = vld [vmem:[#allocation16_spill] sm:$0xff] }
 0x18d   :  { %8507 = vst [vmem:[#allocation91_spill] sm:$0xff] %v4960_v43  ;;  %v4972_v8 = vpop.permute.xlu1 %677  ;;  %v312_v40 = vsel %vm301_vm1, %v8518_v0, %v4475_v36  ;;  %v316_v18 = vsel %vm301_vm1, %v4523_v48, %v8518_v0  ;;  %v446_v57 = vmul.f32 %v430_v28, %v411_v39  ;;  %v444_v31 = vmul.f32 %v428_v12, %v402_v51  ;;  %v8520_v38 = vld [vmem:[#allocation53_spill] sm:$0xff]  ;;  %v726_v12 = vld [vmem:[#allocation5 + $0x378] sm:$0xff]  ;;  %v8525_v51 = vld [vmem:[#allocation58_spill] sm:$0xff] }
 0x18e   :  { %8508 = vst [vmem:[#allocation92_spill] sm:$0xff] %v4972_v8  ;;  %v8521_v34 = vld [vmem:[#allocation41_spill] sm:$0xff]  ;;  %v5027_v48 = vadd.f32 %v244_v54, %v4907_v35  ;;  %v5029_v63 = vadd.f32 %v241_v55, %v158_v5  ;;  %v546_v47 = vmul.f32 %v530_v16, %v501_v23  ;;  %v5032_v53 = vmul.f32 %v139_v20, %v8523_v9  ;;  %v8526_v50 = vld [vmem:[#allocation46_spill] sm:$0xff]  ;;  %v922_v21 = vld [vmem:[#allocation5 + $0x478] sm:$0xff] }
 0x18f   :  { %8510 = vst [vmem:[#allocation22_spill] sm:$0xff] %v4984_v49  ;;  %v611_v36 = vsel %vm595_vm4, %v8521_v34, %v8520_v38  ;;  %v343_v14 = vmul.f32 %v327_v3, %v316_v18  ;;  %v344_v28 = vmul.f32 %v328_v60, %v312_v40  ;;  %v240_v39 = vmul.f32 %v224_v41, %v205_v33  ;;  %v8527_v54 = vld [vmem:[#allocation18_spill] sm:$0xff]  ;;  %v8528_v60 = vld [vmem:[#allocation84_spill] sm:$0xff]  ;;  %v824_v41 = vld [vmem:[#allocation5 + $0x3f8] sm:$0xff] }
 0x190   :  { %v709_v0 = vsel %vm693_vm5, %v8526_v50, %v8525_v51  ;;  %v5041_v35 = vadd.f32 %v341_v1, %v4957_v52  ;;  %v5043_v5 = vadd.f32 %v445_v37, %v363_v19  ;;  %v5046_v55 = vmul.f32 %v138_v6, %v8527_v54  ;;  %v8529_v40 = vld [vmem:[#allocation72_spill] sm:$0xff]  ;;  %v525_v52 = vld [vmem:[#allocation5 + $0x1d0] sm:$0xff]  ;;  %v526_v6 = vld [vmem:[#allocation5 + $0x1d8] sm:$0xff] }
 0x191   :  { %v644_v16 = vmul.f32 %v628_v44, %v611_v36  ;;  %v459_v23 = vadd.f32 %v443_v32, %v361_v27  ;;  %v5049_v20 = vadd.f32 %v446_v57, %v4962_v61  ;;  %v460_v3 = vadd.f32 %v444_v31, %v362_v11  ;;  %v8530_v1 = vld [vmem:[#allocation38_spill] sm:$0xff]  ;;  %v8531_v19 = vld [vmem:[#allocation36_spill] sm:$0xff]  ;;  %v8532_v44 = vld [vmem:[#allocation51_spill] sm:$0xff] }
 0x192   :  { %v807_v18 = vsel %vm791_vm6, %v8529_v40, %v8528_v60  ;;  %v562_v33 = vadd.f32 %v546_v47, %v464_v24  ;;  %v504_v37 = vsel %vm497_vm3, %v8531_v19, %v8530_v1  ;;  %v500_v61 = vsel %vm497_vm3, %v8530_v1, %v8532_v44  ;;  %v8533_v24 = vld [vmem:[#allocation30_spill] sm:$0xff]  ;;  %v8534_v31 = vld [vmem:[#allocation20_spill] sm:$0xff]  ;;  %v8537_v54 = vld [vmem:[#allocation43_spill] sm:$0xff] }
 0x193   :  { %v742_v27 = vmul.f32 %v726_v12, %v709_v0  ;;  %v5063_v11 = vadd.f32 %v343_v14, %v261_v2  ;;  %v5065_v32 = vadd.f32 %v344_v28, %v262_v7  ;;  %v5067_v57 = vadd.f32 %v240_v39, %v157_v13  ;;  %v321_v47 = vld [vmem:[#allocation5 + $0x90] sm:$0xff]  ;;  %v624_v2 = vld [vmem:[#allocation5 + $0x2d8] sm:$0xff]  ;;  %v8538_v14 = vld [vmem:[#allocation65_spill] sm:$0xff] }
 0x194   :  { %v5024_v45 = vpop.permute.xlu0 %763  ;;  %v306_v34 = vsel %vm301_vm1, %v8534_v31, %v8533_v24  ;;  %v5073_v36 = vpop.permute.xlu2 %771  ;;  %v623_v9 = vld [vmem:[#allocation5 + $0x2d0] sm:$0xff]  ;;  %v660_v13 = vadd.f32 %v644_v16, %v562_v33  ;;  %v840_v28 = vmul.f32 %v824_v41, %v807_v18  ;;  %v8539_v39 = vld [vmem:[#allocation31_spill] sm:$0xff]  ;;  %v541_v1 = vmul.f32 %v525_v52, %v504_v37  ;;  %v8543_v33 = vld [vmem:[#allocation69_spill] sm:$0xff] }
 0x195   :  { %8522 = vst [vmem:[#allocation23_spill] sm:$0xff] %v5024_v45  ;;  %v5034_v30 = vpop.permute.xlu1 %773  ;;  %v8536_v50 = vld [vmem:[#allocation54_spill] sm:$0xff]  ;;  %v213_v0 = vsel %vm204_vm0, %v8539_v39, %v4499_v42  ;;  %v217_v40 = vsel %vm204_vm0, %v8519_v22, %v8539_v39  ;;  %v542_v8 = vmul.f32 %v526_v6, %v500_v61  ;;  %v303_v16 = vsel %vm301_vm1, %v4561_v58, %v8541_v10  ;;  %v8542_v41 = vld [vmem:[#allocation71_spill] sm:$0xff]  ;;  %v426_v60 = vld [vmem:[#allocation5 + $0x148] sm:$0xff] }
 0x196   :  { %8524 = vst [vmem:[#allocation21_spill] sm:$0xff] %v5034_v30  ;;  %v598_v12 = vsel %vm595_vm4, %v8537_v54, %v8536_v50  ;;  %v610_v7 = vsel %vm595_vm4, %v8536_v50, %v8538_v14  ;;  %v721_v18 = vld [vmem:[#allocation5 + $0x350] sm:$0xff]  ;;  %v696_v42 = vsel %vm693_vm5, %v8543_v33, %v8542_v41  ;;  %v722_v50 = vld [vmem:[#allocation5 + $0x358] sm:$0xff]  ;;  %v758_v37 = vadd.f32 %v742_v27, %v660_v13 }
 0x197   :  { %8535 = vst [vmem:[#allocation19_spill] sm:$0xff] %v5073_v36  ;;  %v8544_v36 = vld [vmem:[#allocation70_spill] sm:$0xff]  ;;  %v337_v6 = vmul.f32 %v321_v47, %v306_v34  ;;  %v639_v61 = vmul.f32 %v623_v9, %v598_v12  ;;  %v640_v39 = vmul.f32 %v624_v2, %v610_v7  ;;  %v820_v54 = vld [vmem:[#allocation5 + $0x3d8] sm:$0xff]  ;;  %v806_v27 = vsel %vm791_vm6, %v8546_v59, %v5024_v45  ;;  %v221_v12 = vld [vmem:[#allocation5] sm:$0xff] }
 0x198   :  { %v708_v22 = vsel %vm693_vm5, %v8542_v41, %v8544_v36  ;;  %v819_v43 = vld [vmem:[#allocation5 + $0x3d0] sm:$0xff]  ;;  %v856_v34 = vadd.f32 %v840_v28, %v758_v37  ;;  %v326_v9 = vld [vmem:[#allocation5 + $0xb8] sm:$0xff]  ;;  %v222_v2 = vld [vmem:[#allocation5 + $0x8] sm:$0xff]  ;;  %v557_v7 = vadd.f32 %v541_v1, %v459_v23  ;;  %v558_v13 = vadd.f32 %v542_v8, %v460_v3 }
 0x199   :  { %v8547_v33 = vld [vmem:[#allocation86_spill] sm:$0xff]  ;;  %v738_v41 = vmul.f32 %v722_v50, %v708_v22  ;;  %v8548_v36 = vld [vmem:[#allocation35_spill] sm:$0xff]  ;;  %v5132_v50 = vadd.f32 %v337_v6, %v5000_v4  ;;  %v237_v22 = vmul.f32 %v221_v12, %v217_v40  ;;  %v238_v37 = vmul.f32 %v222_v2, %v213_v0  ;;  %v324_v2 = vld [vmem:[#allocation5 + $0xa8] sm:$0xff] }
 0x19a   :  { %v794_v14 = vsel %vm791_vm6, %v8547_v33, %v8546_v59  ;;  %v8550_v30 = vld [vmem:[#allocation34_spill] sm:$0xff]  ;;  %v655_v3 = vadd.f32 %v639_v61, %v557_v7  ;;  %v656_v28 = vadd.f32 %v640_v39, %v558_v13  ;;  %v8552_v39 = vld [vmem:[#allocation37_spill] sm:$0xff] }
 0x19b   :  { %v410_v59 = vsel %vm399_vm2, %v8550_v30, %v8512_v29  ;;  %v423_v23 = vld [vmem:[#allocation5 + $0x130] sm:$0xff]  ;;  %v835_v1 = vmul.f32 %v819_v43, %v794_v14  ;;  %v918_v29 = vld [vmem:[#allocation5 + $0x458] sm:$0xff]  ;;  %v401_v43 = vsel %vm399_vm2, %v8548_v36, %v8552_v39  ;;  %v5150_v6 = vadd.f32 %v237_v22, %v5046_v55 }
 0x19c   :  { %v5091_v49 = vpop.permute.xlu0 %785  ;;  %v442_v51 = vmul.f32 %v426_v60, %v410_v59  ;;  %v5134_v19 = vpop.permute.xlu2 %861  ;;  %v424_v60 = vld [vmem:[#allocation5 + $0x138] sm:$0xff]  ;;  %v8555_v59 = vld [vmem:[#allocation44_spill] sm:$0xff] }
 0x19d   :  { %8540 = vst [vmem:[#allocation25_spill] sm:$0xff] %v5091_v49  ;;  %v5105_v52 = vpop.permute.xlu1 %863  ;;  %v425_v49 = vld [vmem:[#allocation5 + $0x140] sm:$0xff] }
 0x19e   :  { %8545 = vst [vmem:[#allocation17_spill] sm:$0xff] %v5105_v52  ;;  %v905_v58 = vsel %vm889_vm7, %v4870_v26, %v5105_v52  ;;  %v737_v26 = vmul.f32 %v721_v18, %v696_v42  ;;  %v8549_v52 = vld [vmem:[#allocation33_spill] sm:$0xff]  ;;  %v836_v18 = vmul.f32 %v820_v54, %v806_v27  ;;  %v342_v42 = vmul.f32 %v326_v9, %v303_v16  ;;  %v323_v27 = vld [vmem:[#allocation5 + $0xa0] sm:$0xff] }
 0x19f   :  { %v938_v47 = vmul.f32 %v922_v21, %v905_v58  ;;  %v405_v33 = vsel %vm399_vm2, %v8549_v52, %v8548_v36  ;;  %v414_v21 = vsel %vm399_vm2, %v8514_v62, %v8550_v30  ;;  %v917_v58 = vld [vmem:[#allocation5 + $0x450] sm:$0xff]  ;;  %8551 = vst [vmem:[#allocation28_spill] sm:$0xff] %v5134_v19  ;;  %v5153_v36 = vadd.f32 %v238_v37, %v5032_v53  ;;  %v420_v37 = vld [vmem:[#allocation5 + $0x118] sm:$0xff] }
 0x1a0   :  { %v441_v45 = vmul.f32 %v425_v49, %v414_v21  ;;  %v753_v30 = vadd.f32 %v737_v26, %v655_v3  ;;  %v439_v61 = vmul.f32 %v423_v23, %v405_v33  ;;  %v358_v33 = vadd.f32 %v342_v42, %v5027_v48  ;;  %v528_v21 = vld [vmem:[#allocation5 + $0x1e8] sm:$0xff]  ;;  %v8557_v23 = vld [vmem:[#allocation48_spill] sm:$0xff]  ;;  %v8558_v3 = vld [vmem:[#allocation47_spill] sm:$0xff] }
 0x1a1   :  { %v954_v8 = vadd.f32 %v938_v47, %v856_v34  ;;  %v754_v34 = vadd.f32 %v738_v41, %v656_v28  ;;  %v8554_v47 = vld [vmem:[#allocation42_spill] sm:$0xff]  ;;  %v5168_v13 = vadd.f32 %v442_v51, %v5065_v32  ;;  %v440_v26 = vmul.f32 %v424_v60, %v401_v43  ;;  %v322_v41 = vld [vmem:[#allocation5 + $0x98] sm:$0xff]  ;;  %v8559_v28 = vld [vmem:[#allocation45_spill] sm:$0xff] }
 0x1a2   :  { %v851_v14 = vadd.f32 %v835_v1, %v753_v30  ;;  %v315_v9 = vsel %vm301_vm1, %v8541_v10, %v8554_v47  ;;  %v5160_v12 = vadd.f32 %v441_v45, %v5063_v11  ;;  %v311_v48 = vsel %vm301_vm1, %v8554_v47, %v4557_v56  ;;  %v527_v11 = vld [vmem:[#allocation5 + $0x1e0] sm:$0xff]  ;;  %v419_v32 = vld [vmem:[#allocation5 + $0x110] sm:$0xff]  ;;  %v626_v30 = vld [vmem:[#allocation5 + $0x2e8] sm:$0xff] }
 0x1a3   :  { %1087 = vmatpush.msra.mxu3 %v954_v8  ;;  %v852_v40 = vadd.f32 %v836_v18, %v754_v34  ;;  %v455_v53 = vadd.f32 %v439_v61, %v5041_v35  ;;  %v302_v10 = vsel %vm301_vm1, %v8533_v24, %v8555_v59  ;;  %v339_v45 = vmul.f32 %v323_v27, %v315_v9  ;;  %v8556_v8 = vld [vmem:[#allocation24_spill] sm:$0xff]  ;;  %v521_v1 = vld [vmem:[#allocation5 + $0x1b0] sm:$0xff]  ;;  %v8563_v34 = vld [vmem:[#allocation39_spill] sm:$0xff] }
 0x1a4   :  { %v886_v62 = vpop.permute.xlu0 %885  ;;  %v509_v56 = vsel %vm497_vm3, %v8557_v23, %v8556_v8  ;;  %v513_v51 = vsel %vm497_vm3, %v8516_v17, %v8557_v23  ;;  %v340_v35 = vmul.f32 %v324_v2, %v311_v48  ;;  %v404_v24 = vsel %vm399_vm2, %v8559_v28, %v8558_v3  ;;  %v8560_v18 = vld [vmem:[#allocation40_spill] sm:$0xff]  ;;  %v8561_v42 = vld [vmem:[#allocation50_spill] sm:$0xff]  ;;  %v8564_v61 = vld [vmem:[#allocation55_spill] sm:$0xff] }
 0x1a5   :  { %v5140_v4 = vpop.permute.xlu1 %571  ;;  %v892_v54 = vsel %vm889_vm7, %v4922_v25, %v886_v62  ;;  %v904_v49 = vsel %vm889_vm7, %v886_v62, %v5134_v19  ;;  %v503_v22 = vsel %vm497_vm3, %v8561_v42, %v8560_v18  ;;  %v625_v62 = vld [vmem:[#allocation5 + $0x2e0] sm:$0xff]  ;;  %v603_v43 = vsel %vm595_vm4, %v8564_v61, %v8563_v34  ;;  %v8565_v60 = vld [vmem:[#allocation57_spill] sm:$0xff] }
 0x1a6   :  { %8553 = vst [vmem:[#allocation26_spill] sm:$0xff] %v5140_v4  ;;  %v933_v0 = vmul.f32 %v917_v58, %v892_v54  ;;  %v934_v16 = vmul.f32 %v918_v29, %v904_v49  ;;  %v8562_v58 = vld [vmem:[#allocation49_spill] sm:$0xff]  ;;  %v338_v29 = vmul.f32 %v322_v41, %v302_v10  ;;  %v607_v54 = vsel %vm595_vm4, %v8520_v38, %v8564_v61  ;;  %v319_v49 = vld [vmem:[#allocation5 + $0x80] sm:$0xff]  ;;  %v8567_v41 = vld [vmem:[#allocation59_spill] sm:$0xff] }
 0x1a7   :  { %v400_v17 = vsel %vm399_vm2, %v8558_v3, %v8562_v58  ;;  %v544_v27 = vmul.f32 %v528_v21, %v509_v56  ;;  %v320_v47 = vld [vmem:[#allocation5 + $0x88] sm:$0xff]  ;;  %v310_v9 = vsel %vm301_vm1, %v8565_v60, %v8534_v31  ;;  %v435_v38 = vmul.f32 %v419_v32, %v404_v24  ;;  %v523_v3 = vld [vmem:[#allocation5 + $0x1c0] sm:$0xff] }
 0x1a8   :  { %v949_v55 = vadd.f32 %v933_v0, %v851_v14  ;;  %v950_v7 = vadd.f32 %v934_v16, %v852_v40  ;;  %v314_v14 = vsel %vm301_vm1, %v8555_v59, %v8565_v60  ;;  %v5208_v40 = vadd.f32 %v440_v26, %v358_v33  ;;  %v422_v10 = vld [vmem:[#allocation5 + $0x128] sm:$0xff]  ;;  %v8568_v24 = vld [vmem:[#allocation60_spill] sm:$0xff]  ;;  %v8575_v60 = vld [vmem:[#allocation62_spill] sm:$0xff] }
 0x1a9   :  { %v543_v16 = vmul.f32 %v527_v11, %v513_v51  ;;  %v537_v48 = vmul.f32 %v521_v1, %v503_v22  ;;  %v413_v33 = vsel %vm399_vm2, %v8552_v39, %v8567_v41  ;;  %v641_v26 = vmul.f32 %v625_v62, %v607_v54  ;;  %v8571_v62 = vld [vmem:[#allocation66_spill] sm:$0xff]  ;;  %v723_v34 = vld [vmem:[#allocation5 + $0x360] sm:$0xff]  ;;  %v8572_v61 = vld [vmem:[#allocation81_spill] sm:$0xff] }
 0x1aa   :  { %1059 = vmatpush.msra.mxu2 %v949_v55  ;;  %1088 = vmatpush.msra.mxu3 %v950_v7  ;;  %v436_v55 = vmul.f32 %v420_v37, %v400_v17  ;;  %v421_v7 = vld [vmem:[#allocation5 + $0x120] sm:$0xff]  ;;  %v642_v59 = vmul.f32 %v626_v30, %v603_v43  ;;  %v409_v11 = vsel %vm399_vm2, %v8567_v41, %v8549_v52  ;;  %v619_v17 = vld [vmem:[#allocation5 + $0x2b0] sm:$0xff] }
 0x1ab   :  { %v335_v31 = vmul.f32 %v319_v49, %v314_v14  ;;  %v354_v21 = vadd.f32 %v338_v29, %v5067_v57  ;;  %v355_v8 = vadd.f32 %v339_v45, %v5029_v63  ;;  %v356_v23 = vadd.f32 %v340_v35, %v5002_v46  ;;  %v524_v45 = vld [vmem:[#allocation5 + $0x1c8] sm:$0xff]  ;;  %v8569_v46 = vld [vmem:[#allocation36_spill] sm:$0xff]  ;;  %v8573_v43 = vld [vmem:[#allocation58_spill] sm:$0xff] }
 0x1ac   :  { %v5206_v0 = vpop.permute.xlu0 %671  ;;  %v336_v56 = vmul.f32 %v320_v47, %v310_v9  ;;  %v559_v51 = vadd.f32 %v543_v16, %v5043_v5  ;;  %v560_v39 = vadd.f32 %v544_v27, %v5049_v20  ;;  %v437_v32 = vmul.f32 %v421_v7, %v413_v33  ;;  %v8570_v29 = vld [vmem:[#allocation68_spill] sm:$0xff]  ;;  %v517_v49 = vld [vmem:[#allocation5 + $0x190] sm:$0xff]  ;;  %v724_v27 = vld [vmem:[#allocation5 + $0x368] sm:$0xff] }
 0x1ad   :  { %8566 = vst [vmem:[#allocation29_spill] sm:$0xff] %v5206_v0  ;;  %v5214_v2 = vpop.permute.xlu1 %761  ;;  %v512_v1 = vsel %vm497_vm3, %v8532_v44, %v8568_v24  ;;  %v5234_v52 = vadd.f32 %v435_v38, %v5132_v50  ;;  %v5236_v57 = vadd.f32 %v436_v55, %v354_v21  ;;  %v438_v63 = vmul.f32 %v422_v10, %v409_v11  ;;  %v8576_v47 = vld [vmem:[#allocation56_spill] sm:$0xff]  ;;  %v8577_v55 = vld [vmem:[#allocation63_spill] sm:$0xff]  ;;  %v717_v41 = vld [vmem:[#allocation5 + $0x330] sm:$0xff]  ;;  %v5284_v21 = vpop.permute.xlu2 %883 }
 0x1ae   :  { %v508_v5 = vsel %vm497_vm3, %v8568_v24, %v8569_v46  ;;  %v553_v20 = vadd.f32 %v537_v48, %v455_v53  ;;  %v5243_v35 = vadd.f32 %v335_v31, %v5150_v6  ;;  %v657_v22 = vadd.f32 %v641_v26, %v559_v51  ;;  %v8578_v33 = vld [vmem:[#allocation73_spill] sm:$0xff]  ;;  %v8579_v26 = vld [vmem:[#allocation83_spill] sm:$0xff]  ;;  %v8581_v11 = vld [vmem:[#allocation84_spill] sm:$0xff] }
 0x1af   :  { %v658_v37 = vadd.f32 %v642_v59, %v560_v39  ;;  %v5246_v44 = vadd.f32 %v336_v56, %v5153_v36  ;;  %v539_v50 = vmul.f32 %v523_v3, %v512_v1  ;;  %v597_v30 = vsel %vm595_vm4, %v8571_v62, %v8570_v29  ;;  %v8574_v36 = vld [vmem:[#allocation52_spill] sm:$0xff]  ;;  %v8580_v10 = vld [vmem:[#allocation21_spill] sm:$0xff] }
 0x1b0   :  { %v705_v53 = vsel %vm693_vm5, %v8573_v43, %v8572_v61  ;;  %v5258_v54 = vadd.f32 %v437_v32, %v355_v8  ;;  %v502_v14 = vsel %vm497_vm3, %v8575_v60, %v8574_v36  ;;  %v540_v16 = vmul.f32 %v524_v45, %v508_v5  ;;  %v821_v8 = vld [vmem:[#allocation5 + $0x3e0] sm:$0xff]  ;;  %v8583_v3 = vld [vmem:[#allocation61_spill] sm:$0xff]  ;;  %v815_v5 = vld [vmem:[#allocation5 + $0x3b0] sm:$0xff] }
 0x1b1   :  { %v701_v9 = vsel %vm693_vm5, %v8572_v61, %v8576_v47  ;;  %v5270_v48 = vadd.f32 %v438_v63, %v356_v23  ;;  %v499_v7 = vsel %vm497_vm3, %v8560_v18, %v8577_v55  ;;  %v695_v59 = vsel %vm693_vm5, %v8579_v26, %v8578_v33  ;;  %v522_v23 = vld [vmem:[#allocation5 + $0x1b8] sm:$0xff]  ;;  %v519_v56 = vld [vmem:[#allocation5 + $0x1a0] sm:$0xff]  ;;  %v822_v1 = vld [vmem:[#allocation5 + $0x3e8] sm:$0xff] }
 0x1b2   :  { %v803_v31 = vsel %vm791_vm6, %v8581_v11, %v8580_v10  ;;  %v8582_v51 = vld [vmem:[#allocation64_spill] sm:$0xff]  ;;  %v635_v39 = vmul.f32 %v619_v17, %v597_v30  ;;  %v739_v32 = vmul.f32 %v723_v34, %v705_v53  ;;  %v799_v24 = vsel %vm791_vm6, %v8580_v10, %v8583_v3  ;;  %v8584_v61 = vld [vmem:[#allocation25_spill] sm:$0xff] }
 0x1b3   :  { %v511_v18 = vsel %vm497_vm3, %v8577_v55, %v8582_v51  ;;  %v533_v63 = vmul.f32 %v517_v49, %v502_v14  ;;  %v555_v45 = vadd.f32 %v539_v50, %v5160_v12  ;;  %v740_v46 = vmul.f32 %v724_v27, %v701_v9  ;;  %v8585_v43 = vld [vmem:[#allocation88_spill] sm:$0xff]  ;;  %v8586_v14 = vld [vmem:[#allocation43_spill] sm:$0xff]  ;;  %v8588_v10 = vld [vmem:[#allocation65_spill] sm:$0xff] }
 0x1b4   :  { %v5256_v6 = vpop.permute.xlu0 %775  ;;  %v793_v47 = vsel %vm791_vm6, %v8585_v43, %v8584_v61  ;;  %v556_v55 = vadd.f32 %v540_v16, %v5168_v13  ;;  %v507_v17 = vsel %vm497_vm3, %v8582_v51, %v8561_v42  ;;  %v733_v30 = vmul.f32 %v717_v41, %v695_v59  ;;  %v8587_v12 = vld [vmem:[#allocation67_spill] sm:$0xff]  ;;  %v919_v3 = vld [vmem:[#allocation5 + $0x460] sm:$0xff]  ;;  %v920_v42 = vld [vmem:[#allocation5 + $0x468] sm:$0xff] }
 0x1b5   :  { %v5268_v38 = vpop.permute.xlu1 %783  ;;  %v837_v34 = vmul.f32 %v821_v8, %v803_v31  ;;  %v538_v53 = vmul.f32 %v522_v23, %v499_v7  ;;  %v535_v49 = vmul.f32 %v519_v56, %v511_v18  ;;  %v602_v50 = vsel %vm595_vm4, %v8587_v12, %v8586_v14  ;;  %v520_v41 = vld [vmem:[#allocation5 + $0x1a8] sm:$0xff]  ;;  %v621_v59 = vld [vmem:[#allocation5 + $0x2c0] sm:$0xff]  ;;  %v8589_v7 = vld [vmem:[#allocation74_spill] sm:$0xff]  ;;  %v5336_v0 = vpop.permute.xlu2 %769 }
 0x1b6   :  { %v838_v27 = vmul.f32 %v822_v1, %v799_v24  ;;  %v651_v9 = vadd.f32 %v635_v39, %v553_v20  ;;  %v606_v13 = vsel %vm595_vm4, %v8588_v10, %v8587_v12  ;;  %v831_v16 = vmul.f32 %v815_v5, %v793_v47  ;;  %v8590_v8 = vld [vmem:[#allocation77_spill] sm:$0xff]  ;;  %v913_v51 = vld [vmem:[#allocation5 + $0x430] sm:$0xff]  ;;  %v417_v39 = vld [vmem:[#allocation5 + $0x100] sm:$0xff] }
 0x1b7   :  { %v755_v11 = vadd.f32 %v739_v32, %v657_v22  ;;  %v408_v31 = vsel %vm399_vm2, %v8589_v7, %v8559_v28  ;;  %v412_v20 = vsel %vm399_vm2, %v8562_v58, %v8589_v7  ;;  %v609_v23 = vsel %vm595_vm4, %v8570_v29, %v8590_v8  ;;  %v622_v18 = vld [vmem:[#allocation5 + $0x2c8] sm:$0xff]  ;;  %v8593_v5 = vld [vmem:[#allocation87_spill] sm:$0xff] }
 0x1b8   :  { %v756_v56 = vadd.f32 %v740_v46, %v658_v37  ;;  %v8592_v1 = vld [vmem:[#allocation17_spill] sm:$0xff]  ;;  %v749_v47 = vadd.f32 %v733_v30, %v651_v9  ;;  %v620_v12 = vld [vmem:[#allocation5 + $0x2b8] sm:$0xff]  ;;  %v433_v26 = vmul.f32 %v417_v39, %v412_v20  ;;  %v549_v9 = vadd.f32 %v533_v63, %v5234_v52  ;;  %v8598_v20 = vld [vmem:[#allocation82_spill] sm:$0xff] }
 0x1b9   :  { %v853_v24 = vadd.f32 %v837_v34, %v755_v11  ;;  %v418_v14 = vld [vmem:[#allocation5 + $0x108] sm:$0xff]  ;;  %v536_v34 = vmul.f32 %v520_v41, %v507_v17  ;;  %v637_v11 = vmul.f32 %v621_v59, %v606_v13  ;;  %v636_v4 = vmul.f32 %v620_v12, %v609_v23  ;;  %v515_v13 = vld [vmem:[#allocation5 + $0x180] sm:$0xff]  ;;  %v8600_v23 = vld [vmem:[#allocation70_spill] sm:$0xff] }
 0x1ba   :  { %v854_v46 = vadd.f32 %v838_v27, %v756_v56  ;;  %v847_v7 = vadd.f32 %v831_v16, %v749_v47  ;;  %v8594_v27 = vld [vmem:[#allocation75_spill] sm:$0xff]  ;;  %v5349_v52 = vadd.f32 %v535_v49, %v5258_v54  ;;  %v449_v59 = vadd.f32 %v433_v26, %v5243_v35  ;;  %v719_v49 = vld [vmem:[#allocation5 + $0x340] sm:$0xff]  ;;  %v720_v39 = vld [vmem:[#allocation5 + $0x348] sm:$0xff] }
 0x1bb   :  { %v498_v17 = vsel %vm497_vm3, %v8574_v36, %v8594_v27  ;;  %v5352_v63 = vadd.f32 %v536_v34, %v5270_v48  ;;  %v707_v54 = vsel %vm693_vm5, %v8578_v33, %v8598_v20  ;;  %v8599_v48 = vld [vmem:[#allocation91_spill] sm:$0xff]  ;;  %v617_v34 = vld [vmem:[#allocation5 + $0x2a0] sm:$0xff] }
 0x1bc   :  { %v872_v22 = vpop.permute.xlu0 %871  ;;  %v8603_v47 = vld [vmem:[#allocation23_spill] sm:$0xff] }
 0x1bd   :  { %v5324_v32 = vpop.permute.xlu1 %875  ;;  %v901_v28 = vsel %vm889_vm7, %v8592_v1, %v872_v22  ;;  %v897_v58 = vsel %vm889_vm7, %v872_v22, %v8593_v5  ;;  %v638_v1 = vmul.f32 %v622_v18, %v602_v50  ;;  %v434_v5 = vmul.f32 %v418_v14, %v408_v31  ;;  %v8595_v50 = vld [vmem:[#allocation79_spill] sm:$0xff] }
 0x1be   :  { %8591 = vst [vmem:[#allocation27_spill] sm:$0xff] %v5324_v32  ;;  %v891_v37 = vsel %vm889_vm7, %v5324_v32, %v5284_v21  ;;  %v935_v29 = vmul.f32 %v919_v3, %v901_v28  ;;  %v936_v10 = vmul.f32 %v920_v42, %v897_v58  ;;  %v554_v32 = vadd.f32 %v538_v53, %v5208_v40  ;;  %v518_v3 = vld [vmem:[#allocation5 + $0x198] sm:$0xff]  ;;  %v8596_v53 = vld [vmem:[#allocation80_spill] sm:$0xff]  ;;  %v8597_v42 = vld [vmem:[#allocation78_spill] sm:$0xff] }
 0x1bf   :  { %v929_v43 = vmul.f32 %v913_v51, %v891_v37  ;;  %v510_v16 = vsel %vm497_vm3, %v8594_v27, %v8595_v50  ;;  %v653_v40 = vadd.f32 %v637_v11, %v555_v45  ;;  %v596_v36 = vsel %vm595_vm4, %v8597_v42, %v8596_v53  ;;  %v718_v31 = vld [vmem:[#allocation5 + $0x338] sm:$0xff]  ;;  %v817_v28 = vld [vmem:[#allocation5 + $0x3c0] sm:$0xff]  ;;  %v8605_v11 = vld [vmem:[#allocation90_spill] sm:$0xff] }
 0x1c0   :  { %v951_v22 = vadd.f32 %v935_v29, %v853_v24  ;;  %v952_v30 = vadd.f32 %v936_v10, %v854_v46  ;;  %v654_v41 = vadd.f32 %v638_v1, %v556_v55  ;;  %v704_v45 = vsel %vm693_vm5, %v8600_v23, %v8599_v48  ;;  %v8601_v24 = vld [vmem:[#allocation69_spill] sm:$0xff]  ;;  %v8602_v58 = vld [vmem:[#allocation19_spill] sm:$0xff] }
 0x1c1   :  { %v945_v19 = vadd.f32 %v929_v43, %v847_v7  ;;  %v615_v43 = vld [vmem:[#allocation5 + $0x290] sm:$0xff]  ;;  %v5370_v51 = vadd.f32 %v434_v5, %v5246_v44  ;;  %v534_v55 = vmul.f32 %v518_v3, %v498_v17  ;;  %v531_v35 = vmul.f32 %v515_v13, %v510_v16  ;;  %v816_v44 = vld [vmem:[#allocation5 + $0x3b8] sm:$0xff]  ;;  %v8604_v29 = vld [vmem:[#allocation89_spill] sm:$0xff]  ;;  %v5410_v17 = vpop.permute.xlu2 %873 }
 0x1c2   :  { %1000 = vmatpush.msra.mxu0 %v951_v22  ;;  %1029 = vmatpush.msra.mxu1 %v952_v30  ;;  %v631_v18 = vmul.f32 %v615_v43, %v596_v36  ;;  %v700_v33 = vsel %vm693_vm5, %v8599_v48, %v8601_v24  ;;  %v802_v14 = vsel %vm791_vm6, %v8603_v47, %v8602_v58  ;;  %v616_v1 = vld [vmem:[#allocation5 + $0x298] sm:$0xff]  ;;  %v8607_v22 = vld [vmem:[#allocation85_spill] sm:$0xff]  ;;  %v8608_v3 = vld [vmem:[#allocation86_spill] sm:$0xff] }
 0x1c3   :  { %1060 = vmatpush.msra.mxu2 %v945_v19  ;;  %v652_v19 = vadd.f32 %v636_v4, %v554_v32  ;;  %v805_v4 = vsel %vm791_vm6, %v8584_v61, %v5214_v2  ;;  %v516_v32 = vld [vmem:[#allocation5 + $0x188] sm:$0xff]  ;;  %v506_v12 = vsel %vm497_vm3, %v8595_v50, %v8575_v60  ;;  %v734_v37 = vmul.f32 %v718_v31, %v707_v54  ;;  %v8606_v60 = vld [vmem:[#allocation22_spill] sm:$0xff]  ;;  %v8610_v50 = vld [vmem:[#allocation92_spill] sm:$0xff] }
 0x1c4   :  { %v5367_v56 = vpop.permute.xlu0 %669  ;;  %v608_v46 = vsel %vm595_vm4, %v8596_v53, %v8604_v29  ;;  %v735_v10 = vmul.f32 %v719_v49, %v704_v45  ;;  %v601_v7 = vsel %vm595_vm4, %v8605_v11, %v8571_v62  ;;  %v605_v61 = vsel %vm595_vm4, %v8590_v8, %v8605_v11  ;;  %v818_v5 = vld [vmem:[#allocation5 + $0x3c8] sm:$0xff]  ;;  %8609 = vst [vmem:[#allocation53_spill] sm:$0xff] %v5410_v17  ;;  %v713_v13 = vld [vmem:[#allocation5 + $0x310] sm:$0xff]  ;;  %v714_v43 = vld [vmem:[#allocation5 + $0x318] sm:$0xff] }
 0x1c5   :  { %v5372_v26 = vpop.permute.xlu1 %759  ;;  %v706_v30 = vsel %vm693_vm5, %v8607_v22, %v8606_v60  ;;  %v798_v27 = vsel %vm791_vm6, %v8602_v58, %v8608_v3  ;;  %v618_v62 = vld [vmem:[#allocation5 + $0x2a8] sm:$0xff]  ;;  %v694_v8 = vsel %vm693_vm5, %v8610_v50, %v8607_v22  ;;  %v736_v16 = vmul.f32 %v720_v39, %v700_v33  ;;  %v914_v47 = vld [vmem:[#allocation5 + $0x438] sm:$0xff]  ;;  %v915_v39 = vld [vmem:[#allocation5 + $0x440] sm:$0xff] }
 0x1c6   :  { %v833_v53 = vmul.f32 %v817_v28, %v802_v14  ;;  %v832_v36 = vmul.f32 %v816_v44, %v805_v4  ;;  %v550_v31 = vadd.f32 %v534_v55, %v5236_v57  ;;  %v647_v54 = vadd.f32 %v631_v18, %v549_v9  ;;  %v916_v33 = vld [vmem:[#allocation5 + $0x448] sm:$0xff]  ;;  %v8611_v18 = vld [vmem:[#allocation28_spill] sm:$0xff]  ;;  %v812_v4 = vld [vmem:[#allocation5 + $0x398] sm:$0xff] }
 0x1c7   :  { %v532_v49 = vmul.f32 %v516_v32, %v506_v12  ;;  %v5417_v48 = vadd.f32 %v531_v35, %v449_v59  ;;  %v632_v23 = vmul.f32 %v616_v1, %v608_v46  ;;  %v834_v45 = vmul.f32 %v818_v5, %v798_v27  ;;  %v8612_v46 = vld [vmem:[#allocation26_spill] sm:$0xff]  ;;  %v613_v1 = vld [vmem:[#allocation5 + $0x280] sm:$0xff]  ;;  %v8614_v5 = vld [vmem:[#allocation83_spill] sm:$0xff] }
 0x1c8   :  { %v751_v24 = vadd.f32 %v735_v10, %v653_v40  ;;  %v750_v58 = vadd.f32 %v734_v37, %v652_v19  ;;  %v633_v11 = vmul.f32 %v617_v34, %v605_v61  ;;  %v634_v3 = vmul.f32 %v618_v62, %v601_v7  ;;  %v811_v40 = vld [vmem:[#allocation5 + $0x390] sm:$0xff]  ;;  %v715_v10 = vld [vmem:[#allocation5 + $0x320] sm:$0xff]  ;;  %v8613_v34 = vld [vmem:[#allocation29_spill] sm:$0xff] }
 0x1c9   :  { %v729_v60 = vmul.f32 %v713_v13, %v694_v8  ;;  %v730_v17 = vmul.f32 %v714_v43, %v706_v30  ;;  %v752_v59 = vadd.f32 %v736_v16, %v654_v41  ;;  %v792_v19 = vsel %vm791_vm6, %v5256_v6, %v5268_v38  ;;  %v716_v30 = vld [vmem:[#allocation5 + $0x328] sm:$0xff] }
 0x1ca   :  { %v849_v9 = vadd.f32 %v833_v53, %v751_v24  ;;  %v848_v55 = vadd.f32 %v832_v36, %v750_v58  ;;  %v648_v37 = vadd.f32 %v632_v23, %v550_v31  ;;  %v703_v7 = vsel %vm693_vm5, %v8598_v20, %v8613_v34  ;;  %v5454_v20 = vpop.permute.xlu2 %857  ;;  %v909_v31 = vld [vmem:[#allocation5 + $0x410] sm:$0xff]  ;;  %v614_v24 = vld [vmem:[#allocation5 + $0x288] sm:$0xff] }
 0x1cb   :  { %v850_v32 = vadd.f32 %v834_v45, %v752_v59  ;;  %v827_v27 = vmul.f32 %v811_v40, %v792_v19  ;;  %v548_v8 = vadd.f32 %v532_v49, %v5370_v51  ;;  %v650_v16 = vadd.f32 %v634_v3, %v5352_v63  ;;  %v910_v45 = vld [vmem:[#allocation5 + $0x418] sm:$0xff]  ;;  %v813_v63 = vld [vmem:[#allocation5 + $0x3a0] sm:$0xff] }
 0x1cc   :  { %v5419_v22 = vpop.permute.xlu0 %859  ;;  %v731_v53 = vmul.f32 %v715_v10, %v703_v7  ;;  %v745_v36 = vadd.f32 %v729_v60, %v647_v54  ;;  %v746_v23 = vadd.f32 %v730_v17, %v648_v37  ;;  %v600_v51 = vsel %vm595_vm4, %v8612_v46, %v8597_v42  ;;  %v8615_v54 = vld [vmem:[#allocation53_spill] sm:$0xff]  ;;  %v8617_v40 = vld [vmem:[#allocation88_spill] sm:$0xff] }
 0x1cd   :  { %v870_v28 = vpop.permute.xlu1 %869  ;;  %v903_v57 = vsel %vm889_vm7, %v5284_v21, %v5419_v22  ;;  %v804_v21 = vsel %vm791_vm6, %v5268_v38, %v5372_v26  ;;  %v699_v38 = vsel %vm693_vm5, %v8613_v34, %v8614_v5  ;;  %v801_v58 = vsel %vm791_vm6, %v5214_v2, %v5336_v0  ;;  %v8616_v2 = vld [vmem:[#allocation22_spill] sm:$0xff]  ;;  %v911_v34 = vld [vmem:[#allocation5 + $0x420] sm:$0xff]  ;;  %v912_v7 = vld [vmem:[#allocation5 + $0x428] sm:$0xff] }
 0x1ce   :  { %v896_v35 = vsel %vm889_vm7, %v870_v28, %v4922_v25  ;;  %v900_v14 = vsel %vm889_vm7, %v8611_v18, %v870_v28  ;;  %v930_v44 = vmul.f32 %v914_v47, %v903_v57  ;;  %v604_v25 = vsel %vm595_vm4, %v8604_v29, %v8612_v46 }
 0x1cf   :  { %v931_v41 = vmul.f32 %v915_v39, %v900_v14  ;;  %v932_v12 = vmul.f32 %v916_v33, %v896_v35  ;;  %v649_v29 = vadd.f32 %v633_v11, %v5349_v52  ;;  %v828_v43 = vmul.f32 %v812_v4, %v804_v21  ;;  %v711_v39 = vld [vmem:[#allocation5 + $0x300] sm:$0xff]  ;;  %v712_v33 = vld [vmem:[#allocation5 + $0x308] sm:$0xff] }
 0x1d0   :  { %v946_v61 = vadd.f32 %v930_v44, %v848_v55  ;;  %v629_v52 = vmul.f32 %v613_v1, %v604_v25  ;;  %v732_v49 = vmul.f32 %v716_v30, %v699_v38  ;;  %v698_v60 = vsel %vm693_vm5, %v5367_v56, %v8610_v50  ;;  %v814_v55 = vld [vmem:[#allocation5 + $0x3a8] sm:$0xff]  ;;  %v955_v4 = vld [vmem:[#allocation7] sm:$0xff] }
 0x1d1   :  { %v947_v62 = vadd.f32 %v931_v41, %v849_v9  ;;  %v948_v13 = vadd.f32 %v932_v12, %v850_v32  ;;  %v843_v3 = vadd.f32 %v827_v27, %v745_v36  ;;  %v702_v28 = vsel %vm693_vm5, %v8616_v2, %v5367_v56  ;;  %v809_v56 = vld [vmem:[#allocation5 + $0x380] sm:$0xff]  ;;  %v810_v12 = vld [vmem:[#allocation5 + $0x388] sm:$0xff] }
 0x1d2   :  { %1089 = vmatpush.msra.mxu3 %v946_v61  ;;  %v844_v9 = vadd.f32 %v828_v43, %v746_v23  ;;  %v630_v59 = vmul.f32 %v614_v24, %v600_v51  ;;  %v797_v19 = vsel %vm791_vm6, %v5336_v0, %v8617_v40  ;;  %v829_v35 = vmul.f32 %v813_v63, %v801_v58  ;;  %v907_v38 = vld [vmem:[#allocation5 + $0x400] sm:$0xff]  ;;  %v908_v27 = vld [vmem:[#allocation5 + $0x408] sm:$0xff]  ;;  %v958_v58 = vld [vmem:[#allocation7 + $0x18] sm:$0xff] }
 0x1d3   :  { %1001 = vmatpush.msra.mxu0 %v947_v62  ;;  %1030 = vmatpush.msra.mxu1 %v948_v13  ;;  %v747_v18 = vadd.f32 %v731_v53, %v649_v29  ;;  %v748_v21 = vadd.f32 %v732_v49, %v650_v16  ;;  %v727_v41 = vmul.f32 %v711_v39, %v702_v28  ;;  %v8618_v62 = vld [vmem:[#allocation27_spill] sm:$0xff]  ;;  %v956_v49 = vld [vmem:[#allocation7 + $0x8] sm:$0xff]  ;;  %v967_v28 = vld [vmem:[#allocation8 + $0x40] sm:$0xff] }
 0x1d4   :  { %v882_v47 = vpop.permute.xlu0 %881  ;;  %v728_v32 = vmul.f32 %v712_v33, %v698_v60  ;;  %v830_v0 = vmul.f32 %v814_v55, %v797_v19  ;;  %v645_v25 = vadd.f32 %v629_v52, %v5417_v48  ;;  %v646_v10 = vadd.f32 %v630_v59, %v548_v8  ;;  %v960_v59 = vld [vmem:[#allocation8 + $0x8] sm:$0xff]  ;;  %v970_v19 = vld [vmem:[#allocation8 + $0x58] sm:$0xff] }
 0x1d5   :  { %v768_v17 = vpop.permute.xlu1 %767  ;;  %v890_v11 = vsel %vm889_vm7, %v8615_v54, %v882_v47  ;;  %v902_v42 = vsel %vm889_vm7, %v882_v47, %v5454_v20 }
 0x1d6   :  { %v925_v57 = vmul.f32 %v909_v31, %v890_v11  ;;  %v926_v50 = vmul.f32 %v910_v45, %v902_v42  ;;  %v796_v37 = vsel %vm791_vm6, %v768_v17, %v5256_v6  ;;  %v800_v46 = vsel %vm791_vm6, %v5372_v26, %v768_v17 }
 0x1d7   :  { %v825_v61 = vmul.f32 %v809_v56, %v800_v46  ;;  %v826_v1 = vmul.f32 %v810_v12, %v796_v37  ;;  %v845_v6 = vadd.f32 %v829_v35, %v747_v18  ;;  %v846_v5 = vadd.f32 %v830_v0, %v748_v21  ;;  %v961_v21 = vld [vmem:[#allocation8 + $0x10] sm:$0xff]  ;;  %v963_v37 = vld [vmem:[#allocation8 + $0x20] sm:$0xff]  ;;  %v964_v46 = vld [vmem:[#allocation8 + $0x28] sm:$0xff] }
 0x1d8   :  { %v941_v14 = vadd.f32 %v925_v57, %v843_v3  ;;  %v942_v44 = vadd.f32 %v926_v50, %v844_v9  ;;  %v743_v8 = vadd.f32 %v727_v41, %v645_v25  ;;  %v744_v29 = vadd.f32 %v728_v32, %v646_v10  ;;  %v968_v57 = vld [vmem:[#allocation8 + $0x48] sm:$0xff]  ;;  %v969_v9 = vld [vmem:[#allocation8 + $0x50] sm:$0xff]  ;;  %v959_v50 = vld [vmem:[#allocation8] sm:$0xff] }
 0x1d9   :  { %v973_v56 = vld [vmem:[#allocation8 + $0x70] sm:$0xff] }
 0x1da   :  { %1061 = vmatpush.msra.mxu2 %v941_v14  ;;  %1090 = vmatpush.msra.mxu3 %v942_v44  ;;  %v841_v51 = vadd.f32 %v825_v61, %v743_v8  ;;  %v842_v52 = vadd.f32 %v826_v1, %v744_v29  ;;  %v974_v61 = vld [vmem:[#allocation8 + $0x78] sm:$0xff] }
 0x1db   :  { %3607 = vmatmul.msk.f32.vlgmr.msra.gmra.mxu2 %vm975_vm8, %v955_v4  ;;  %3611 = vmatmul.msk.f32.vlgmr.msra.gmra.mxu3 %vm975_vm8, %v955_v4 }
 0x1dc   :  { %v868_v30 = vpop.permute.xlu0 %867 }
 0x1dd   :  { %v866_v26 = vpop.permute.xlu1 %865  ;;  %v895_v13 = vsel %vm889_vm7, %v868_v30, %v8618_v62  ;;  %v899_v48 = vsel %vm889_vm7, %v5419_v22, %v868_v30  ;;  %v962_v30 = vld [vmem:[#allocation8 + $0x18] sm:$0xff] }
 0x1de   :  { %v894_v16 = vsel %vm889_vm7, %v866_v26, %v8615_v54  ;;  %v898_v43 = vsel %vm889_vm7, %v5454_v20, %v866_v26  ;;  %v927_v53 = vmul.f32 %v911_v34, %v899_v48  ;;  %v928_v36 = vmul.f32 %v912_v7, %v895_v13  ;;  %v957_v20 = vld [vmem:[#allocation7 + $0x10] sm:$0xff]  ;;  %v971_v34 = vld [vmem:[#allocation8 + $0x60] sm:$0xff]  ;;  %v972_v7 = vld [vmem:[#allocation8 + $0x68] sm:$0xff] }
 0x1df   :  { %v923_v31 = vmul.f32 %v907_v38, %v898_v43  ;;  %v924_v23 = vmul.f32 %v908_v27, %v894_v16  ;;  %v965_v13 = vld [vmem:[#allocation8 + $0x30] sm:$0xff] }
 0x1e0   :  { %v943_v45 = vadd.f32 %v927_v53, %v845_v6  ;;  %v944_v24 = vadd.f32 %v928_v36, %v846_v5 }
 0x1e1   :  { %v939_v22 = vadd.f32 %v923_v31, %v841_v51  ;;  %v940_v63 = vadd.f32 %v924_v23, %v842_v52  ;;  %v966_v52 = vld [vmem:[#allocation8 + $0x38] sm:$0xff] }
 0x1e2   :  { %1002 = vmatpush.msra.mxu0 %v943_v45  ;;  %1031 = vmatpush.msra.mxu1 %v944_v24 }
 0x1e3   :  { %3608 = vmatmul.msk.f32.gmra.mxu2 %vm975_vm8, %v956_v49  ;;  %3612 = vmatmul.msk.f32.gmra.mxu3 %vm975_vm8, %v956_v49 }
 0x1e4   :  { %1003 = vmatpush.msra.mxu0 %v939_v22  ;;  %1032 = vmatpush.msra.mxu1 %v940_v63 }
 0x1e5   :  { %3599 = vmatmul.msk.f32.vlgmr.msra.gmra.mxu0 %vm975_vm8, %v955_v4  ;;  %3603 = vmatmul.msk.f32.vlgmr.msra.gmra.mxu1 %vm975_vm8, %v955_v4 }
 0x1eb   :  { %3609 = vmatmul.msk.f32.gmra.mxu2 %vm975_vm8, %v957_v20  ;;  %3613 = vmatmul.msk.f32.gmra.mxu3 %vm975_vm8, %v957_v20 }
 0x1ed   :  { %3600 = vmatmul.msk.f32.gmra.mxu0 %vm975_vm8, %v956_v49  ;;  %3604 = vmatmul.msk.f32.gmra.mxu1 %vm975_vm8, %v956_v49 }
 0x1f3   :  { %3610 = vmatmul.msk.f32.gmra.mxu2 %vm975_vm8, %v958_v58  ;;  %3614 = vmatmul.msk.f32.gmra.mxu3 %vm975_vm8, %v958_v58 }
 0x1f5   :  { %3601 = vmatmul.msk.f32.gmra.mxu0 %vm975_vm8, %v957_v20  ;;  %3605 = vmatmul.msk.f32.gmra.mxu1 %vm975_vm8, %v957_v20 }
 0x1fd   :  { %3602 = vmatmul.msk.f32.gmra.mxu0 %vm975_vm8, %v958_v58  ;;  %3606 = vmatmul.msk.f32.gmra.mxu1 %vm975_vm8, %v958_v58 }
 0x25e   :  { %v1063_v47 = vpop.f32.mrf.mxu2  ;;  %v1092_v60 = vpop.f32.mrf.mxu3 }
 0x25f   :  { %v5534_v10 = vadd.f32 %v1063_v47, %v961_v21  ;;  %v5549_v16 = vadd.f32 %v1092_v60, %v962_v30 }
 0x262   :  { %v1005_v17 = vpop.f32.mrf.mxu0  ;;  %v1034_v54 = vpop.f32.mrf.mxu1 }
 0x263   :  { %v5523_v44 = vadd.f32 %v1005_v17, %v959_v50  ;;  %v5525_v4 = vadd.f32 %v1034_v54, %v960_v59 }
 0x265   :  { %v1104_v25 = vadd.f32 %v5525_v4, %v5523_v44 }
 0x266   :  { %v1066_v11 = vpop.f32.mrf.mxu2  ;;  %v1095_v42 = vpop.f32.mrf.mxu3 }
 0x267   :  { %v1105_v43 = vadd.f32 %v1104_v25, %v5534_v10  ;;  %v5562_v24 = vadd.f32 %v1066_v11, %v965_v13  ;;  %v5573_v17 = vadd.f32 %v1095_v42, %v966_v52  ;;  %v4276_v25 = vmov 0  }
 0x268   :  { %3700 = vset.pattern.permute.xlu0 %v4276_v25  ;;  %3699 = vset.pattern.permute.xlu2 %v4276_v25 }
 0x269   :  { %v1106_v47 = vadd.f32 %v1105_v43, %v5549_v16  ;;  %v1134_v54 = vmul.f32 %v5562_v24, %v5562_v24  ;;  %v1135_v42 = vmul.f32 %v5573_v17, %v5573_v17  ;;  %3698 = vset.pattern.permute.xlu1 %v4276_v25 }
 0x26a   :  { %v1008_v3 = vpop.f32.mrf.mxu0  ;;  %v1037_v39 = vpop.f32.mrf.mxu1 }
 0x26b   :  { %v5539_v38 = vadd.f32 %v1008_v3, %v963_v37  ;;  %v5541_v62 = vadd.f32 %v1037_v39, %v964_v46  ;;  %v1131_v37 = vmul.f32 %v5549_v16, %v5549_v16 }
 0x26d   :  { %v1132_v45 = vmul.f32 %v5539_v38, %v5539_v38  ;;  %v1133_v51 = vmul.f32 %v5541_v62, %v5541_v62  ;;  %v1109_v20 = vadd.f32 %v5541_v62, %v5539_v38 }
 0x26e   :  { %v1069_v33 = vpop.f32.mrf.mxu2  ;;  %v1098_v2 = vpop.f32.mrf.mxu3 }
 0x26f   :  { %v5521_v14 = vadd.f32 %v1069_v33, %v969_v9  ;;  %v5529_v32 = vadd.f32 %v1098_v2, %v970_v19  ;;  %v1149_v3 = vadd.f32 %v1133_v51, %v1132_v45  ;;  %v1110_v2 = vadd.f32 %v1109_v20, %v5562_v24 }
 0x271   :  { %v1111_v9 = vadd.f32 %v1110_v2, %v5573_v17  ;;  %v1139_v19 = vmul.f32 %v5529_v32, %v5529_v32 }
 0x272   :  { %v1011_v55 = vpop.f32.mrf.mxu0  ;;  %v1040_v40 = vpop.f32.mrf.mxu1 }
 0x273   :  { %v5517_v35 = vadd.f32 %v1011_v55, %v967_v28  ;;  %v5519_v18 = vadd.f32 %v1040_v40, %v968_v57  ;;  %v1150_v28 = vadd.f32 %v1149_v3, %v1134_v54  ;;  %v1138_v57 = vmul.f32 %v5521_v14, %v5521_v14 }
 0x274   :  { %v1128_v55 = vmul.f32 %v5523_v44, %v5523_v44  ;;  %v1129_v40 = vmul.f32 %v5525_v4, %v5525_v4 }
 0x275   :  { %v1114_v41 = vadd.f32 %v5519_v18, %v5517_v35  ;;  %v1136_v39 = vmul.f32 %v5517_v35, %v5517_v35  ;;  %v1137_v33 = vmul.f32 %v5519_v18, %v5519_v18  ;;  %v1151_v59 = vadd.f32 %v1150_v28, %v1135_v42 }
 0x276   :  { %v1072_v12 = vpop.f32.mrf.mxu2  ;;  %v1101_v1 = vpop.f32.mrf.mxu3 }
 0x277   :  { %v1115_v0 = vadd.f32 %v1114_v41, %v5521_v14  ;;  %v5537_v5 = vadd.f32 %v1072_v12, %v973_v56  ;;  %v5547_v29 = vadd.f32 %v1101_v1, %v974_v61  ;;  %v1154_v50 = vadd.f32 %v1137_v33, %v1136_v39 }
 0x278   :  { %v1130_v41 = vmul.f32 %v5534_v10, %v5534_v10  ;;  %v1144_v12 = vadd.f32 %v1129_v40, %v1128_v55 }
 0x279   :  { %v1116_v6 = vadd.f32 %v1115_v0, %v5529_v32  ;;  %v1142_v23 = vmul.f32 %v5537_v5, %v5537_v5  ;;  %v1143_v22 = vmul.f32 %v5547_v29, %v5547_v29  ;;  %v1155_v21 = vadd.f32 %v1154_v50, %v1138_v57  ;;  %v1223_v57 = vld [vmem:[%s8243_s5 + $0x18] sm:$0xff] }
 0x27a   :  { %v1014_v27 = vpop.f32.mrf.mxu0  ;;  %v1043_v26 = vpop.f32.mrf.mxu1  ;;  %v1145_v46 = vadd.f32 %v1144_v12, %v1130_v41 }
 0x27b   :  { %v5543_v48 = vadd.f32 %v1014_v27, %v971_v34  ;;  %v5545_v8 = vadd.f32 %v1043_v26, %v972_v7  ;;  %1117 = vadd.xlane.f32.xlu0 %v1116_v6  ;;  %v1156_v56 = vadd.f32 %v1155_v21, %v1139_v19 }
 0x27c   :  { %v1146_v0 = vadd.f32 %v1145_v46, %v1131_v37  ;;  %v1221_v46 = vld [vmem:[%s8243_s5 + $0x8] sm:$0xff] }
 0x27d   :  { %v1140_v53 = vmul.f32 %v5543_v48, %v5543_v48  ;;  %v1119_v36 = vadd.f32 %v5545_v8, %v5543_v48  ;;  %v1141_v31 = vmul.f32 %v5545_v8, %v5545_v8 }
 0x27f   :  { %v1120_v49 = vadd.f32 %v1119_v36, %v5537_v5  ;;  %v1159_v63 = vadd.f32 %v1141_v31, %v1140_v53 }
 0x281   :  { %v1121_v58 = vadd.f32 %v1120_v49, %v5547_v29  ;;  %v1160_v60 = vadd.f32 %v1159_v63, %v1142_v23 }
 0x283   :  { %1122 = vadd.xlane.f32.xlu2 %v1121_v58  ;;  %1107 = vadd.xlane.f32.xlu0 %v1106_v47  ;;  %v1161_v11 = vadd.f32 %v1160_v60, %v1143_v22 }
 0x285   :  { %1162 = vadd.xlane.f32.xlu1 %v1161_v11 }
 0x28b   :  { %1112 = vadd.xlane.f32.xlu2 %v1111_v9 }
 0x28d   :  { %1152 = vadd.xlane.f32.xlu1 %v1151_v59 }
 0x293   :  { %1157 = vadd.xlane.f32.xlu2 %v1156_v56 }
 0x29b   :  { %1147 = vadd.xlane.f32.xlu2 %v1146_v0 }
 0x2ee   :  { %v1118_v26 = vpop.xlane.xlu0 %1117 }
 0x2ef   :  { %v5605_v23 = vmul.f32 0.001953125, %v1118_v26 }
 0x2f1   :  { %v1170_v63 = vmul.f32 %v5605_v23, %v5605_v23 }
 0x2f6   :  { %v1123_v34 = vpop.xlane.xlu2 %1122  ;;  %v1108_v58 = vpop.xlane.xlu0 %1107 }
 0x2f7   :  { %v5597_v7 = vmul.f32 0.001953125, %v1123_v34  ;;  %v5609_v11 = vmul.f32 0.001953125, %v1108_v58  ;;  %v1292_v58 = vld [vmem:[#allocation10 + $0x60] sm:$0xff] }
 0x2f8   :  { %v1163_v61 = vpop.xlane.xlu1 %1162 }
 0x2f9   :  { %v1167_v1 = vmul.f32 0.001953125, %v1163_v61  ;;  %v1171_v30 = vmul.f32 %v5597_v7, %v5597_v7  ;;  %v1168_v50 = vmul.f32 %v5609_v11, %v5609_v11 }
 0x2fb   :  { %v1175_v6 = vsub.f32 %v1167_v1, %v1171_v30 }
 0x2fd   :  { %v1179_v27 = vadd.f32 1e-05, %v1175_v6 }
 0x2fe   :  { %v1113_v13 = vpop.xlane.xlu2 %1112 }
 0x2ff   :  { %3701 = vrsqrt.f32 %v1179_v27  ;;  %v5601_v43 = vmul.f32 0.001953125, %v1113_v13  ;;  %vm1216_vm10 = vweird.f32 %v1179_v27 }
 0x300   :  { %v1153_v53 = vpop.xlane.xlu1 %1152 }
 0x301   :  { %v1165_v36 = vmul.f32 0.001953125, %v1153_v53  ;;  %v1169_v31 = vmul.f32 %v5601_v43, %v5601_v43 }
 0x303   :  { %v1173_v45 = vsub.f32 %v1165_v36, %v1169_v31  ;;  %v1220_v36 = vld [vmem:[%s8243_s5] sm:$0xff] }
 0x305   :  { %v3702_v51 = vpop.eup %3701  ;;  %v1177_v52 = vadd.f32 1e-05, %v1173_v45 }
 0x306   :  { %v1211_v49 = vmul.f32 %v3702_v51, %v1179_v27  ;;  %v1158_v22 = vpop.xlane.xlu2 %1157  ;;  %vm1217_vm9 = vweird.f32 %v3702_v51 }
 0x307   :  { %3703 = vrsqrt.f32 %v1177_v52  ;;  %v1166_v20 = vmul.f32 0.001953125, %v1158_v22  ;;  %vm1218_vm11 = vmor %vm1216_vm10, %vm1217_vm9  ;;  %vm1196_vm13 = vweird.f32 %v1177_v52  ;;  %v1222_v22 = vld [vmem:[%s8243_s5 + $0x10] sm:$0xff] }
 0x308   :  { %v1212_v47 = vmul.f32 %v3702_v51, %v1211_v49 }
 0x309   :  { %v1174_v60 = vsub.f32 %v1166_v20, %v1170_v63  ;;  %v1240_v20 = vsub.f32 %v5543_v48, %v5597_v7 }
 0x30a   :  { %v1213_v54 = vmul.f32 0.5, %v1212_v47  ;;  %v1241_v47 = vsub.f32 %v5545_v8, %v5597_v7 }
 0x30b   :  { %v1178_v3 = vadd.f32 1e-05, %v1174_v60  ;;  %v1242_v60 = vsub.f32 %v5537_v5, %v5597_v7  ;;  %v3727_v5 = vld [vmem:[#allocation2 + $0x70] sm:$0xff] }
 0x30c   :  { %v1214_v39 = vsub.f32 1.5, %v1213_v54  ;;  %v1243_v54 = vsub.f32 %v5547_v29, %v5597_v7 }
 0x30d   :  { %v3704_v33 = vpop.eup %3703  ;;  %3705 = vrsqrt.f32 %v1178_v3 }
 0x30e   :  { %v1191_v2 = vmul.f32 %v3704_v33, %v1177_v52  ;;  %v1148_v42 = vpop.xlane.xlu2 %1147  ;;  %v1215_v28 = vmul.f32 %v3702_v51, %v1214_v39  ;;  %vm1197_vm12 = vweird.f32 %v3704_v33  ;;  %v1293_v39 = vld [vmem:[#allocation10 + $0x68] sm:$0xff] }
 0x30f   :  { %v1164_v9 = vmul.f32 0.001953125, %v1148_v42  ;;  %vm1198_vm14 = vmor %vm1196_vm13, %vm1197_vm12  ;;  %vm1206_vm12 = vweird.f32 %v1178_v3 }
 0x310   :  { %v1192_v59 = vmul.f32 %v3704_v33, %v1191_v2  ;;  %v1219_v55 = vsel %vm1218_vm11, %v3702_v51, %v1215_v28  ;;  %v1295_v2 = vld [vmem:[#allocation10 + $0x78] sm:$0xff] }
 0x311   :  { %v1172_v40 = vsub.f32 %v1164_v9, %v1168_v50  ;;  %v1227_v19 = vmul.f32 %v1223_v57, %v1219_v55 }
 0x312   :  { %v1193_v21 = vmul.f32 0.5, %v1192_v59 }
 0x313   :  { %v1176_v41 = vadd.f32 1e-05, %v1172_v40  ;;  %1261 = vperm.xlu0 %3700, %v1227_v19   ;;  %v3706_v12 = vpop.eup %3705  ;;  %v3725_v40 = vld [vmem:[#allocation2 + $0x60] sm:$0xff]  ;;  %v3726_v19 = vld [vmem:[#allocation2 + $0x68] sm:$0xff] }
 0x314   :  { %v1194_v56 = vsub.f32 1.5, %v1193_v21  ;;  %v1201_v0 = vmul.f32 %v3706_v12, %v1178_v3  ;;  %vm1207_vm11 = vweird.f32 %v3706_v12 }
 0x315   :  { %3707 = vrsqrt.f32 %v1176_v41  ;;  %vm1186_vm9 = vweird.f32 %v1176_v41  ;;  %vm1208_vm13 = vmor %vm1206_vm12, %vm1207_vm11 }
 0x316   :  { %v1195_v37 = vmul.f32 %v3704_v33, %v1194_v56  ;;  %v1202_v1 = vmul.f32 %v3706_v12, %v1201_v0  ;;  %v3728_v56 = vld [vmem:[#allocation2 + $0x78] sm:$0xff]  ;;  %v1236_v0 = vsub.f32 %v5517_v35, %v5605_v23  ;;  %v1238_v35 = vsub.f32 %v5521_v14, %v5605_v23 }
 0x318   :  { %v1199_v25 = vsel %vm1198_vm14, %v3704_v33, %v1195_v37  ;;  %v1203_v27 = vmul.f32 0.5, %v1202_v1  ;;  %v1294_v33 = vld [vmem:[#allocation10 + $0x70] sm:$0xff]  ;;  %v1232_v37 = vsub.f32 %v5539_v38, %v5601_v43  ;;  %v1234_v38 = vsub.f32 %v5562_v24, %v5601_v43  ;;  %v1289_v24 = vld [vmem:[#allocation10 + $0x48] sm:$0xff] }
 0x319   :  { %v1225_v34 = vmul.f32 %v1221_v46, %v1199_v25  ;;  %v1233_v46 = vsub.f32 %v5541_v62, %v5601_v43  ;;  %v1237_v25 = vsub.f32 %v5519_v18, %v5605_v23  ;;  %v1235_v62 = vsub.f32 %v5573_v17, %v5601_v43 }
 0x31a   :  { %v1204_v31 = vsub.f32 1.5, %v1203_v27  ;;  %v1288_v27 = vld [vmem:[#allocation10 + $0x40] sm:$0xff]  ;;  %v1239_v18 = vsub.f32 %v5529_v32, %v5605_v23  ;;  %v1287_v23 = vld [vmem:[#allocation10 + $0x38] sm:$0xff] }
 0x31b   :  { %v3708_v61 = vpop.eup %3707  ;;  %1251 = vperm.xlu2 %3699, %v1225_v34   ;;  %v1228_v34 = vsub.f32 %v5523_v44, %v5609_v11  ;;  %v1285_v44 = vld [vmem:[#allocation10 + $0x28] sm:$0xff] }
 0x31c   :  { %v1181_v30 = vmul.f32 %v3708_v61, %v1176_v41  ;;  %vm1187_vm15 = vweird.f32 %v3708_v61  ;;  %v1205_v52 = vmul.f32 %v3706_v12, %v1204_v31  ;;  %v1291_v31 = vld [vmem:[#allocation10 + $0x58] sm:$0xff] }
 0x31d   :  { %vm1188_vm10 = vmor %vm1186_vm9, %vm1187_vm15 }
 0x31e   :  { %v1182_v6 = vmul.f32 %v3708_v61, %v1181_v30  ;;  %v1209_v49 = vsel %vm1208_vm13, %v3706_v12, %v1205_v52  ;;  %v1284_v30 = vld [vmem:[#allocation10 + $0x20] sm:$0xff] }
 0x31f   :  { %v1226_v63 = vmul.f32 %v1222_v22, %v1209_v49  ;;  %v1280_v22 = vld [vmem:[#allocation10] sm:$0xff] }
 0x320   :  { %v1183_v26 = vmul.f32 0.5, %v1182_v6 }
 0x322   :  { %v1184_v13 = vsub.f32 1.5, %v1183_v26  ;;  %v1286_v26 = vld [vmem:[#allocation10 + $0x30] sm:$0xff] }
 0x324   :  { %v1185_v53 = vmul.f32 %v3708_v61, %v1184_v13  ;;  %v1231_v13 = vsub.f32 %v5549_v16, %v5609_v11 }
 0x326   :  { %v1189_v45 = vsel %vm1188_vm10, %v3708_v61, %v1185_v53  ;;  %v1229_v61 = vsub.f32 %v5525_v4, %v5609_v11  ;;  %v1230_v4 = vsub.f32 %v5534_v10, %v5609_v11 }
 0x327   :  { %v1224_v51 = vmul.f32 %v1220_v36, %v1189_v45  ;;  %v1290_v36 = vld [vmem:[#allocation10 + $0x50] sm:$0xff] }
 0x329   :  { %1246 = vperm.xlu1 %3698, %v1224_v51  }
 0x331   :  { %1256 = vperm.xlu1 %3698, %v1226_v63   ;;  %v1281_v63 = vld [vmem:[#allocation10 + $0x8] sm:$0xff] }
 0x375   :  { %v1252_v12 = vpop.permute.xlu2 %1251 }
 0x376   :  { %v1268_v1 = vmul.f32 %v1252_v12, %v1232_v37  ;;  %v1269_v6 = vmul.f32 %v1252_v12, %v1233_v46  ;;  %v1270_v17 = vmul.f32 %v1252_v12, %v1234_v38  ;;  %v1271_v43 = vmul.f32 %v1252_v12, %v1235_v62  ;;  %v3736_v37 = vld [vmem:[#allocation2 + $0x38] sm:$0xff]  ;;  %v1328_v62 = vld [vmem:[%s8240_s2] sm:$0xff] }
 0x378   :  { %v1301_v10 = vadd.f32 %v1285_v44, %v1269_v6  ;;  %v3740_v6 = vld [vmem:[#allocation2 + $0x18] sm:$0xff] }
 0x385   :  { %v1262_v3 = vpop.permute.xlu0 %1261 }
 0x386   :  { %v1276_v42 = vmul.f32 %v1262_v3, %v1240_v20  ;;  %v1277_v28 = vmul.f32 %v1262_v3, %v1241_v47  ;;  %v1278_v57 = vmul.f32 %v1262_v3, %v1242_v60  ;;  %v1279_v9 = vmul.f32 %v1262_v3, %v1243_v54  ;;  %v1282_v3 = vld [vmem:[#allocation10 + $0x10] sm:$0xff] }
 0x387   :  { %v1300_v20 = vadd.f32 %v1284_v30, %v1268_v1  ;;  %v3739_v1 = vld [vmem:[#allocation2 + $0x10] sm:$0xff] }
 0x388   :  { %v1308_v50 = vadd.f32 %v1292_v58, %v1276_v42  ;;  %v1309_v48 = vadd.f32 %v1293_v39, %v1277_v28  ;;  %v1310_v59 = vadd.f32 %v1294_v33, %v1278_v57  ;;  %v1311_v55 = vadd.f32 %v1295_v2, %v1279_v9  ;;  %v1283_v39 = vld [vmem:[#allocation10 + $0x18] sm:$0xff]  ;;  %v3729_v57 = vld [vmem:[#allocation2 + $0x40] sm:$0xff] }
 0x389   :  { %v1302_v33 = vadd.f32 %v1286_v26, %v1270_v17  ;;  %v1303_v2 = vadd.f32 %v1287_v23, %v1271_v43  ;;  %v1331_v17 = vld [vmem:[%s8240_s2 + $0x18] sm:$0xff] }
 0x38a   :  { %v1324_v8 = vadd.f32 %v3725_v40, %v1308_v50  ;;  %v1325_v21 = vadd.f32 %v3726_v19, %v1309_v48  ;;  %v1326_v41 = vadd.f32 %v3727_v5, %v1310_v59  ;;  %v1327_v29 = vadd.f32 %v3728_v56, %v1311_v55  ;;  %v3730_v50 = vld [vmem:[#allocation2 + $0x48] sm:$0xff]  ;;  %v3731_v59 = vld [vmem:[#allocation2 + $0x50] sm:$0xff]  ;;  %v3732_v40 = vld [vmem:[#allocation2 + $0x58] sm:$0xff] }
 0x38b   :  { %v3733_v5 = vld [vmem:[#allocation2 + $0x20] sm:$0xff]  ;;  %v3734_v56 = vld [vmem:[#allocation2 + $0x28] sm:$0xff]  ;;  %v1319_v46 = vadd.f32 %v3736_v37, %v1303_v2 }
 0x38c   :  { %1356 = vmatpush.msrb.mxu0 %v1324_v8  ;;  %1385 = vmatpush.msrb.mxu1 %v1325_v21 }
 0x38d   :  { %1414 = vmatpush.msrb.mxu2 %v1326_v41  ;;  %1443 = vmatpush.msrb.mxu3 %v1327_v29  ;;  %v1316_v41 = vadd.f32 %v3733_v5, %v1300_v20  ;;  %v1317_v29 = vadd.f32 %v3734_v56, %v1301_v10 }
 0x39b   :  { %v1247_v7 = vpop.permute.xlu1 %1246 }
 0x39c   :  { %v1264_v45 = vmul.f32 %v1247_v7, %v1228_v34  ;;  %v1265_v51 = vmul.f32 %v1247_v7, %v1229_v61  ;;  %v1266_v58 = vmul.f32 %v1247_v7, %v1230_v4  ;;  %v1267_v47 = vmul.f32 %v1247_v7, %v1231_v13  ;;  %v3735_v7 = vld [vmem:[#allocation2 + $0x30] sm:$0xff]  ;;  %v3738_v34 = vld [vmem:[#allocation2 + $0x8] sm:$0xff] }
 0x39d   :  { %v1318_v12 = vadd.f32 %v3735_v7, %v1302_v33 }
 0x39e   :  { %v1296_v42 = vadd.f32 %v1280_v22, %v1264_v45  ;;  %v1297_v28 = vadd.f32 %v1281_v63, %v1265_v51  ;;  %v1298_v19 = vadd.f32 %v1282_v3, %v1266_v58  ;;  %v1299_v21 = vadd.f32 %v1283_v39, %v1267_v47 }
 0x3a0   :  { %v1313_v61 = vadd.f32 %v3738_v34, %v1297_v28  ;;  %v1314_v30 = vadd.f32 %v3739_v1, %v1298_v19  ;;  %v1315_v38 = vadd.f32 %v3740_v6, %v1299_v21 }
 0x3a3   :  { %v1257_v53 = vpop.permute.xlu1 %1256 }
 0x3a4   :  { %v1272_v14 = vmul.f32 %v1257_v53, %v1236_v0  ;;  %v1273_v52 = vmul.f32 %v1257_v53, %v1237_v25  ;;  %v1274_v49 = vmul.f32 %v1257_v53, %v1238_v35  ;;  %v1275_v32 = vmul.f32 %v1257_v53, %v1239_v18  ;;  %v3737_v0 = vld [vmem:[#allocation2] sm:$0xff]  ;;  %v1330_v35 = vld [vmem:[%s8240_s2 + $0x10] sm:$0xff] }
 0x3a5   :  { %v1312_v25 = vadd.f32 %v3737_v0, %v1296_v42 }
 0x3a6   :  { %v1304_v16 = vadd.f32 %v1288_v27, %v1272_v14  ;;  %v1305_v11 = vadd.f32 %v1289_v24, %v1273_v52  ;;  %v1306_v60 = vadd.f32 %v1290_v36, %v1274_v49  ;;  %v1307_v54 = vadd.f32 %v1291_v31, %v1275_v32  ;;  %v1329_v27 = vld [vmem:[%s8240_s2 + $0x8] sm:$0xff] }
 0x3a8   :  { %v1320_v9 = vadd.f32 %v3729_v57, %v1304_v16  ;;  %v1321_v48 = vadd.f32 %v3730_v50, %v1305_v11  ;;  %v1322_v55 = vadd.f32 %v3731_v59, %v1306_v60  ;;  %v1323_v8 = vadd.f32 %v3732_v40, %v1307_v54 }
 0x3aa   :  { %1357 = vmatpush.msrb.mxu0 %v1320_v9  ;;  %1386 = vmatpush.msrb.mxu1 %v1321_v48 }
 0x3ab   :  { %1415 = vmatpush.msrb.mxu2 %v1322_v55  ;;  %1444 = vmatpush.msrb.mxu3 %v1323_v8 }
 0x3ac   :  { %1358 = vmatpush.msrb.mxu0 %v1316_v41  ;;  %1387 = vmatpush.msrb.mxu1 %v1317_v29 }
 0x3ad   :  { %1416 = vmatpush.msrb.mxu2 %v1318_v12  ;;  %1445 = vmatpush.msrb.mxu3 %v1319_v46 }
 0x3ae   :  { %1359 = vmatpush.msrb.mxu0 %v1312_v25  ;;  %1388 = vmatpush.msrb.mxu1 %v1313_v61 }
 0x3af   :  { %1417 = vmatpush.msrb.mxu2 %v1314_v30  ;;  %1446 = vmatpush.msrb.mxu3 %v1315_v38 }
 0x3b0   :  { %3615 = vmatmul.msk.f32.vlgmr.msrb.gmra.mxu0 %vm975_vm8, %v1328_v62  ;;  %3619 = vmatmul.msk.f32.vlgmr.msrb.gmra.mxu1 %vm975_vm8, %v1328_v62 }
 0x3b1   :  { %3627 = vmatmul.msk.f32.vlgmr.msrb.gmra.mxu3 %vm975_vm8, %v1328_v62  ;;  %3623 = vmatmul.msk.f32.vlgmr.msrb.gmra.mxu2 %vm975_vm8, %v1328_v62 }
 0x3b8   :  { %3620 = vmatmul.msk.f32.gmra.mxu1 %vm975_vm8, %v1329_v27  ;;  %3616 = vmatmul.msk.f32.gmra.mxu0 %vm975_vm8, %v1329_v27 }
 0x3b9   :  { %3624 = vmatmul.msk.f32.gmra.mxu2 %vm975_vm8, %v1329_v27  ;;  %3628 = vmatmul.msk.f32.gmra.mxu3 %vm975_vm8, %v1329_v27 }
 0x3c0   :  { %3621 = vmatmul.msk.f32.gmra.mxu1 %vm975_vm8, %v1330_v35  ;;  %3617 = vmatmul.msk.f32.gmra.mxu0 %vm975_vm8, %v1330_v35 }
 0x3c1   :  { %3625 = vmatmul.msk.f32.gmra.mxu2 %vm975_vm8, %v1330_v35  ;;  %3629 = vmatmul.msk.f32.gmra.mxu3 %vm975_vm8, %v1330_v35 }
 0x3c8   :  { %3618 = vmatmul.msk.f32.gmra.mxu0 %vm975_vm8, %v1331_v17  ;;  %3622 = vmatmul.msk.f32.gmra.mxu1 %vm975_vm8, %v1331_v17 }
 0x3c9   :  { %3630 = vmatmul.msk.f32.gmra.mxu3 %vm975_vm8, %v1331_v17  ;;  %3626 = vmatmul.msk.f32.gmra.mxu2 %vm975_vm8, %v1331_v17 }
 0x42d   :  { %v5678_v18 = vpop.f32.mrf.mxu0  ;;  %v5680_v44 = vpop.f32.mrf.mxu1 }
 0x42e   :  { %8619 = vst [vmem:[#allocation41_spill] sm:$0xff] %v5678_v18  ;;  %v5683_v26 = vmax.f32 %v5678_v18, 0.0  ;;  %v5686_v4 = vmax.f32 %v5680_v44, 0.0 }
 0x42f   :  { %8620 = vst [vmem:[#allocation16_spill] sm:$0xff] %v5680_v44 }
 0x430   :  { %1500 = vrot.lane.b32.xlu1 %v5686_v4, %s4268_s6  ;;  %1812 = vrot.lane.b32.xlu0 %v5683_v26, %s4272_s29 }
 0x431   :  { %1492 = vrot.lane.b32.xlu2 %v5683_v26, %s4268_s6 }
 0x434   :  { %v5700_v13 = vpop.f32.mrf.mxu3  ;;  %v5711_v24 = vpop.f32.mrf.mxu2 }
 0x435   :  { %8621 = vst [vmem:[#allocation46_spill] sm:$0xff] %v5700_v13  ;;  %v5703_v53 = vmax.f32 %v5700_v13, 0.0  ;;  %v5714_v36 = vmax.f32 %v5711_v24, 0.0  ;;  %v5740_v31 = vpop.f32.mrf.mxu1  ;;  %v5775_v14 = vpop.f32.mrf.mxu0 }
 0x436   :  { %8622 = vst [vmem:[#allocation18_spill] sm:$0xff] %v5711_v24  ;;  %v5750_v43 = vmax.f32 %v5740_v31, 0.0  ;;  %v5778_v52 = vmax.f32 %v5775_v14, 0.0 }
 0x437   :  { %8623 = vst [vmem:[#allocation72_spill] sm:$0xff] %v5740_v31 }
 0x438   :  { %1900 = vrot.lane.b32.xlu0 %v5686_v4, %s4273_s30  ;;  %1572 = vrot.lane.b32.xlu1 %v5683_v26, %s4269_s26  ;;  %8625 = vst [vmem:[#allocation51_spill] sm:$0xff] %v5775_v14 }
 0x439   :  { %1580 = vrot.lane.b32.xlu2 %v5686_v4, %s4269_s26 }
 0x43c   :  { %v5764_v45 = vpop.f32.mrf.mxu2  ;;  %v5786_v49 = vpop.f32.mrf.mxu3 }
 0x43d   :  { %8624 = vst [vmem:[#allocation38_spill] sm:$0xff] %v5764_v45  ;;  %v5767_v51 = vmax.f32 %v5764_v45, 0.0  ;;  %v5789_v32 = vmax.f32 %v5786_v49, 0.0  ;;  %v5833_v47 = vpop.f32.mrf.mxu1  ;;  %v5862_v2 = vpop.f32.mrf.mxu0 }
 0x43e   :  { %8626 = vst [vmem:[#allocation30_spill] sm:$0xff] %v5786_v49  ;;  %v5842_v54 = vmax.f32 %v5833_v47, 0.0  ;;  %v5871_v9 = vmax.f32 %v5862_v2, 0.0 }
 0x43f   :  { %8628 = vst [vmem:[#allocation54_spill] sm:$0xff] %v5833_v47 }
 0x440   :  { %1516 = vrot.lane.b32.xlu0 %v5703_v53, %s4268_s6  ;;  %1660 = vrot.lane.b32.xlu1 %v5686_v4, %s4270_s27  ;;  %8630 = vst [vmem:[#allocation32_spill] sm:$0xff] %v5862_v2 }
 0x441   :  { %1732 = vrot.lane.b32.xlu2 %v5683_v26, %s4271_s28 }
 0x444   :  { %v5915_v41 = vpop.f32.mrf.mxu2  ;;  %v5944_v25 = vpop.f32.mrf.mxu3 }
 0x445   :  { %8635 = vst [vmem:[#allocation34_spill] sm:$0xff] %v5915_v41  ;;  %v5924_v12 = vmax.f32 %v5915_v41, 0.0  ;;  %v5953_v30 = vmax.f32 %v5944_v25, 0.0  ;;  %v5985_v13 = vpop.f32.mrf.mxu0  ;;  %v6002_v45 = vpop.f32.mrf.mxu1 }
 0x446   :  { %8638 = vst [vmem:[#allocation44_spill] sm:$0xff] %v5944_v25  ;;  %v5994_v49 = vmax.f32 %v5985_v13, 0.0  ;;  %v6011_v41 = vmax.f32 %v6002_v45, 0.0 }
 0x447   :  { %8639 = vst [vmem:[#allocation24_spill] sm:$0xff] %v5953_v30 }
 0x448   :  { %1588 = vrot.lane.b32.xlu0 %v5714_v36, %s4269_s26  ;;  %1740 = vrot.lane.b32.xlu1 %v5686_v4, %s4271_s28  ;;  %8641 = vst [vmem:[#allocation47_spill] sm:$0xff] %v5985_v13 }
 0x449   :  { %1892 = vrot.lane.b32.xlu2 %v5683_v26, %s4273_s30  ;;  %8645 = vst [vmem:[#allocation49_spill] sm:$0xff] %v5994_v49 }
 0x44a   :  { %8646 = vst [vmem:[#allocation39_spill] sm:$0xff] %v6002_v45 }
 0x44b   :  { %8650 = vst [vmem:[#allocation60_spill] sm:$0xff] %v6011_v41 }
 0x450   :  { %1756 = vrot.lane.b32.xlu0 %v5703_v53, %s4271_s28  ;;  %1652 = vrot.lane.b32.xlu1 %v5683_v26, %s4270_s27 }
 0x451   :  { %1508 = vrot.lane.b32.xlu2 %v5714_v36, %s4268_s6 }
 0x458   :  { %1828 = vrot.lane.b32.xlu0 %v5714_v36, %s4272_s29  ;;  %1820 = vrot.lane.b32.xlu1 %v5686_v4, %s4272_s29 }
 0x459   :  { %1596 = vrot.lane.b32.xlu2 %v5703_v53, %s4269_s26 }
 0x460   :  { %1988 = vrot.lane.b32.xlu0 %v5714_v36, %s4274_s8  ;;  %1972 = vrot.lane.b32.xlu1 %v5683_v26, %s4274_s8 }
 0x461   :  { %1668 = vrot.lane.b32.xlu2 %v5714_v36, %s4270_s27 }
 0x468   :  { %1662 = vrot.lane.b32.xlu0 %v5750_v43, %s4270_s27  ;;  %1836 = vrot.lane.b32.xlu1 %v5703_v53, %s4272_s29 }
 0x469   :  { %1676 = vrot.lane.b32.xlu2 %v5703_v53, %s4270_s27 }
 0x470   :  { %1902 = vrot.lane.b32.xlu0 %v5750_v43, %s4273_s30  ;;  %1908 = vrot.lane.b32.xlu1 %v5714_v36, %s4273_s30 }
 0x471   :  { %1748 = vrot.lane.b32.xlu2 %v5714_v36, %s4271_s28 }
 0x478   :  { %1510 = vrot.lane.b32.xlu0 %v5767_v51, %s4268_s6  ;;  %1996 = vrot.lane.b32.xlu1 %v5703_v53, %s4274_s8 }
 0x479   :  { %1916 = vrot.lane.b32.xlu2 %v5703_v53, %s4273_s30 }
 0x480   :  { %1590 = vrot.lane.b32.xlu0 %v5767_v51, %s4269_s26  ;;  %1494 = vrot.lane.b32.xlu1 %v5778_v52, %s4268_s6 }
 0x481   :  { %1502 = vrot.lane.b32.xlu2 %v5750_v43, %s4268_s6 }
 0x488   :  { %1678 = vrot.lane.b32.xlu0 %v5789_v32, %s4270_s27  ;;  %1654 = vrot.lane.b32.xlu1 %v5778_v52, %s4270_s27 }
 0x489   :  { %1574 = vrot.lane.b32.xlu2 %v5778_v52, %s4269_s26 }
 0x48b   :  { %v5797_v23 = vpop.permute.xlu2 %1492 }
 0x490   :  { %1750 = vrot.lane.b32.xlu0 %v5767_v51, %s4271_s28  ;;  %1814 = vrot.lane.b32.xlu1 %v5778_v52, %s4272_s29 }
 0x491   :  { %1582 = vrot.lane.b32.xlu2 %v5750_v43, %s4269_s26 }
 0x493   :  { %v5805_v22 = vpop.permute.xlu2 %1580 }
 0x498   :  { %1758 = vrot.lane.b32.xlu0 %v5789_v32, %s4271_s28  ;;  %1822 = vrot.lane.b32.xlu1 %v5750_v43, %s4272_s29 }
 0x499   :  { %1742 = vrot.lane.b32.xlu2 %v5750_v43, %s4271_s28 }
 0x49b   :  { %v5813_v63 = vpop.permute.xlu2 %1732 }
 0x4a0   :  { %1830 = vrot.lane.b32.xlu0 %v5767_v51, %s4272_s29  ;;  %1974 = vrot.lane.b32.xlu1 %v5778_v52, %s4274_s8 }
 0x4a1   :  { %1734 = vrot.lane.b32.xlu2 %v5778_v52, %s4271_s28 }
 0x4a2   :  { %v5821_v20 = vpop.permute.xlu1 %1500  ;;  %v5823_v10 = vpop.permute.xlu0 %1812 }
 0x4a3   :  { %8627 = vst [vmem:[#allocation20_spill] sm:$0xff] %v5823_v10  ;;  %v5825_v58 = vpop.permute.xlu2 %1892 }
 0x4a8   :  { %1998 = vrot.lane.b32.xlu0 %v5789_v32, %s4274_s8  ;;  %1518 = vrot.lane.b32.xlu1 %v5789_v32, %s4268_s6 }
 0x4a9   :  { %1894 = vrot.lane.b32.xlu2 %v5778_v52, %s4273_s30 }
 0x4aa   :  { %v5835_v16 = vpop.permute.xlu0 %1900  ;;  %v5837_v11 = vpop.permute.xlu1 %1572 }
 0x4ab   :  { %8629 = vst [vmem:[#allocation31_spill] sm:$0xff] %v5835_v16  ;;  %v5839_v60 = vpop.permute.xlu2 %1508 }
 0x4b0   :  { %1504 = vrot.lane.b32.xlu0 %v5842_v54, %s4268_s6  ;;  %1598 = vrot.lane.b32.xlu1 %v5789_v32, %s4269_s26 }
 0x4b1   :  { %1918 = vrot.lane.b32.xlu2 %v5789_v32, %s4273_s30 }
 0x4b2   :  { %v5850_v3 = vpop.permute.xlu0 %1516  ;;  %v5852_v39 = vpop.permute.xlu1 %1660 }
 0x4b3   :  { %v5854_v33 = vpop.permute.xlu2 %1596 }
 0x4b8   :  { %1744 = vrot.lane.b32.xlu0 %v5842_v54, %s4271_s28  ;;  %1670 = vrot.lane.b32.xlu1 %v5767_v51, %s4270_s27 }
 0x4b9   :  { %1990 = vrot.lane.b32.xlu2 %v5767_v51, %s4274_s8 }
 0x4ba   :  { %v5864_v42 = vpop.permute.xlu0 %1588  ;;  %v5866_v28 = vpop.permute.xlu1 %1740 }
 0x4bb   :  { %v5868_v57 = vpop.permute.xlu2 %1668 }
 0x4c0   :  { %1838 = vrot.lane.b32.xlu1 %v5789_v32, %s4272_s29  ;;  %1656 = vrot.lane.b32.xlu0 %v5871_v9, %s4270_s27 }
 0x4c1   :  { %2078 = vrot.lane.b32.xlu2 %v5789_v32, %s4275_s9 }
 0x4c2   :  { %v5879_v50 = vpop.permute.xlu0 %1756  ;;  %v5881_v48 = vpop.permute.xlu1 %1652 }
 0x4c3   :  { %v5883_v59 = vpop.permute.xlu2 %1676 }
 0x4c8   :  { %1910 = vrot.lane.b32.xlu1 %v5767_v51, %s4273_s30  ;;  %1736 = vrot.lane.b32.xlu0 %v5871_v9, %s4271_s28 }
 0x4c9   :  { %1496 = vrot.lane.b32.xlu2 %v5871_v9, %s4268_s6 }
 0x4ca   :  { %v5891_v55 = vpop.permute.xlu0 %1828  ;;  %v5893_v40 = vpop.permute.xlu1 %1820 }
 0x4cb   :  { %8631 = vst [vmem:[#allocation71_spill] sm:$0xff] %v5891_v55  ;;  %v5895_v8 = vpop.permute.xlu2 %1748 }
 0x4cc   :  { %8632 = vst [vmem:[#allocation76_spill] sm:$0xff] %v5893_v40 }
 0x4d0   :  { %2070 = vrot.lane.b32.xlu1 %v5767_v51, %s4275_s9  ;;  %1904 = vrot.lane.b32.xlu0 %v5842_v54, %s4273_s30 }
 0x4d1   :  { %1584 = vrot.lane.b32.xlu2 %v5842_v54, %s4269_s26 }
 0x4d2   :  { %v5903_v19 = vpop.permute.xlu0 %1988  ;;  %v5905_v21 = vpop.permute.xlu1 %1972 }
 0x4d3   :  { %8633 = vst [vmem:[#allocation35_spill] sm:$0xff] %v5903_v19  ;;  %v5907_v5 = vpop.permute.xlu2 %1916 }
 0x4d4   :  { %8634 = vst [vmem:[#allocation33_spill] sm:$0xff] %v5905_v21 }
 0x4d8   :  { %1976 = vrot.lane.b32.xlu0 %v5871_v9, %s4274_s8  ;;  %1576 = vrot.lane.b32.xlu1 %v5871_v9, %s4269_s26 }
 0x4d9   :  { %1664 = vrot.lane.b32.xlu2 %v5842_v54, %s4270_s27 }
 0x4da   :  { %v5917_v56 = vpop.permute.xlu0 %1662  ;;  %v5919_v29 = vpop.permute.xlu1 %1836 }
 0x4db   :  { %v5921_v7 = vpop.permute.xlu2 %1502 }
 0x4e0   :  { %1592 = vrot.lane.b32.xlu0 %v5924_v12, %s4269_s26  ;;  %1816 = vrot.lane.b32.xlu1 %v5871_v9, %s4272_s29 }
 0x4e1   :  { %1824 = vrot.lane.b32.xlu2 %v5842_v54, %s4272_s29 }
 0x4e2   :  { %v5932_v37 = vpop.permute.xlu0 %1902  ;;  %v5934_v46 = vpop.permute.xlu1 %1908 }
 0x4e3   :  { %8636 = vst [vmem:[#allocation37_spill] sm:$0xff] %v5932_v37  ;;  %v5936_v0 = vpop.permute.xlu2 %1574 }
 0x4e4   :  { %8637 = vst [vmem:[#allocation42_spill] sm:$0xff] %v5934_v46 }
 0x4e8   :  { %1672 = vrot.lane.b32.xlu0 %v5924_v12, %s4270_s27  ;;  %1512 = vrot.lane.b32.xlu1 %v5924_v12, %s4268_s6 }
 0x4e9   :  { %1896 = vrot.lane.b32.xlu2 %v5871_v9, %s4273_s30 }
 0x4ea   :  { %v5946_v34 = vpop.permute.xlu0 %1510  ;;  %v5948_v61 = vpop.permute.xlu1 %1996 }
 0x4eb   :  { %v5950_v1 = vpop.permute.xlu2 %1582 }
 0x4f0   :  { %1832 = vrot.lane.b32.xlu0 %v5924_v12, %s4272_s29  ;;  %1600 = vrot.lane.b32.xlu1 %v5953_v30, %s4269_s26 }
 0x4f1   :  { %1984 = vrot.lane.b32.xlu2 %v5842_v54, %s4274_s8 }
 0x4f2   :  { %v5961_v6 = vpop.permute.xlu0 %1590  ;;  %v5963_v38 = vpop.permute.xlu1 %1494 }
 0x4f3   :  { %v5965_v62 = vpop.permute.xlu2 %1742 }
 0x4f8   :  { %1912 = vrot.lane.b32.xlu0 %v5924_v12, %s4273_s30  ;;  %1752 = vrot.lane.b32.xlu1 %v5924_v12, %s4271_s28 }
 0x4f9   :  { %2056 = vrot.lane.b32.xlu2 %v5871_v9, %s4275_s9 }
 0x4fa   :  { %v5973_v27 = vpop.permute.xlu0 %1678  ;;  %v5975_v35 = vpop.permute.xlu1 %1654 }
 0x4fb   :  { %8640 = vst [vmem:[#allocation48_spill] sm:$0xff] %v5973_v27  ;;  %v5977_v17 = vpop.permute.xlu2 %1734 }
 0x500   :  { %2080 = vrot.lane.b32.xlu0 %v5953_v30, %s4275_s9  ;;  %1760 = vrot.lane.b32.xlu1 %v5953_v30, %s4271_s28 }
 0x501   :  { %1520 = vrot.lane.b32.xlu2 %v5953_v30, %s4268_s6 }
 0x502   :  { %v5987_v24 = vpop.permute.xlu0 %1750  ;;  %v5989_v44 = vpop.permute.xlu1 %1814 }
 0x503   :  { %8642 = vst [vmem:[#allocation45_spill] sm:$0xff] %v5987_v24  ;;  %v5991_v18 = vpop.permute.xlu2 %1894  ;;  %v3744_v24 = vld [vmem:[#allocation5 + $0x8] sm:$0xff] }
 0x504   :  { %8643 = vst [vmem:[#allocation40_spill] sm:$0xff] %v5989_v44 }
 0x505   :  { %8644 = vst [vmem:[#allocation50_spill] sm:$0xff] %v5991_v18  ;;  %v6072_v18 = vpop.f32.mrf.mxu2 }
 0x506   :  { %8663 = vst [vmem:[#allocation64_spill] sm:$0xff] %v6072_v18 }
 0x508   :  { %1840 = vrot.lane.b32.xlu1 %v5953_v30, %s4272_s29  ;;  %1498 = vrot.lane.b32.xlu0 %v5994_v49, %s4268_s6 }
 0x509   :  { %1680 = vrot.lane.b32.xlu2 %v5953_v30, %s4270_s27 }
 0x50a   :  { %v6004_v31 = vpop.permute.xlu0 %1758  ;;  %v6006_v14 = vpop.permute.xlu1 %1822 }
 0x50b   :  { %8647 = vst [vmem:[#allocation55_spill] sm:$0xff] %v6004_v31  ;;  %v6008_v25 = vpop.permute.xlu2 %1918 }
 0x50c   :  { %8648 = vst [vmem:[#allocation57_spill] sm:$0xff] %v6006_v14 }
 0x50d   :  { %8649 = vst [vmem:[#allocation59_spill] sm:$0xff] %v6008_v25 }
 0x510   :  { %1920 = vrot.lane.b32.xlu1 %v5953_v30, %s4273_s30  ;;  %1586 = vrot.lane.b32.xlu0 %v6011_v41, %s4269_s26 }
 0x511   :  { %2000 = vrot.lane.b32.xlu2 %v5953_v30, %s4274_s8  ;;  %v1524_v30 = vsel %vm204_vm0, %v5839_v60, %v5850_v3 }
 0x512   :  { %v6019_v47 = vpop.permute.xlu0 %1830  ;;  %v6021_v2 = vpop.permute.xlu1 %1974 }
 0x513   :  { %8651 = vst [vmem:[#allocation36_spill] sm:$0xff] %v6019_v47  ;;  %v6023_v13 = vpop.permute.xlu2 %1990 }
 0x514   :  { %8652 = vst [vmem:[#allocation68_spill] sm:$0xff] %v6021_v2 }
 0x515   :  { %8653 = vst [vmem:[#allocation66_spill] sm:$0xff] %v6023_v13 }
 0x518   :  { %1992 = vrot.lane.b32.xlu1 %v5924_v12, %s4274_s8  ;;  %1906 = vrot.lane.b32.xlu0 %v6011_v41, %s4273_s30 }
 0x519   :  { %2072 = vrot.lane.b32.xlu2 %v5924_v12, %s4275_s9 }
 0x51a   :  { %v6031_v45 = vpop.permute.xlu0 %1998  ;;  %v6033_v40 = vpop.permute.xlu1 %1518 }
 0x51b   :  { %8654 = vst [vmem:[#allocation81_spill] sm:$0xff] %v6031_v45  ;;  %v6035_v14 = vpop.permute.xlu2 %2078 }
 0x51c   :  { %8655 = vst [vmem:[#allocation58_spill] sm:$0xff] %v6035_v14  ;;  %v6055_v14 = vpop.f32.mrf.mxu3 }
 0x51d   :  { %8658 = vst [vmem:[#allocation56_spill] sm:$0xff] %v6055_v14  ;;  %v6064_v25 = vmax.f32 %v6055_v14, 0.0  ;;  %v6081_v14 = vmax.f32 %v6072_v18, 0.0 }
 0x51f   :  { %8662 = vst [vmem:[#allocation84_spill] sm:$0xff] %v6064_v25 }
 0x520   :  { %1506 = vrot.lane.b32.xlu1 %v6011_v41, %s4268_s6  ;;  %1978 = vrot.lane.b32.xlu0 %v5994_v49, %s4274_s8  ;;  %8667 = vst [vmem:[#allocation67_spill] sm:$0xff] %v6081_v14 }
 0x521   :  { %1666 = vrot.lane.b32.xlu2 %v6011_v41, %s4270_s27 }
 0x522   :  { %v6043_v2 = vpop.permute.xlu0 %1504  ;;  %v6045_v13 = vpop.permute.xlu1 %1598 }
 0x523   :  { %8656 = vst [vmem:[#allocation52_spill] sm:$0xff] %v6043_v2  ;;  %v6047_v47 = vpop.permute.xlu2 %1496 }
 0x524   :  { %8657 = vst [vmem:[#allocation62_spill] sm:$0xff] %v6047_v47 }
 0x528   :  { %1578 = vrot.lane.b32.xlu1 %v5994_v49, %s4269_s26  ;;  %2066 = vrot.lane.b32.xlu0 %v6011_v41, %s4275_s9 }
 0x529   :  { %1746 = vrot.lane.b32.xlu2 %v6011_v41, %s4271_s28 }
 0x52a   :  { %v6057_v45 = vpop.permute.xlu0 %1744  ;;  %v6059_v44 = vpop.permute.xlu1 %1670 }
 0x52b   :  { %8659 = vst [vmem:[#allocation63_spill] sm:$0xff] %v6057_v45  ;;  %v6061_v37 = vpop.permute.xlu2 %1584 }
 0x52c   :  { %8660 = vst [vmem:[#allocation73_spill] sm:$0xff] %v6059_v44  ;;  %v3745_v44 = vld [vmem:[#allocation5 + $0x210] sm:$0xff] }
 0x52d   :  { %8661 = vst [vmem:[#allocation21_spill] sm:$0xff] %v6061_v37 }
 0x530   :  { %1738 = vrot.lane.b32.xlu1 %v5994_v49, %s4271_s28  ;;  %1522 = vrot.lane.b32.xlu0 %v6064_v25, %s4268_s6 }
 0x531   :  { %1658 = vrot.lane.b32.xlu2 %v5994_v49, %s4270_s27 }
 0x532   :  { %v6074_v31 = vpop.permute.xlu1 %1838  ;;  %v6076_v45 = vpop.permute.xlu0 %1656 }
 0x533   :  { %8664 = vst [vmem:[#allocation61_spill] sm:$0xff] %v6074_v31  ;;  %v6078_v47 = vpop.permute.xlu2 %1664 }
 0x534   :  { %8665 = vst [vmem:[#allocation25_spill] sm:$0xff] %v6076_v45 }
 0x535   :  { %8666 = vst [vmem:[#allocation43_spill] sm:$0xff] %v6078_v47 }
 0x538   :  { %1986 = vrot.lane.b32.xlu1 %v6011_v41, %s4274_s8  ;;  %1674 = vrot.lane.b32.xlu0 %v6081_v14, %s4270_s27 }
 0x539   :  { %1818 = vrot.lane.b32.xlu2 %v5994_v49, %s4272_s29 }
 0x53a   :  { %v6089_v37 = vpop.permute.xlu1 %1910  ;;  %v6091_v2 = vpop.permute.xlu0 %1736 }
 0x53b   :  { %8668 = vst [vmem:[#allocation65_spill] sm:$0xff] %v6089_v37  ;;  %v6093_v31 = vpop.permute.xlu2 %1824 }
 0x53c   :  { %8669 = vst [vmem:[#allocation74_spill] sm:$0xff] %v6091_v2 }
 0x53d   :  { %8670 = vst [vmem:[#allocation77_spill] sm:$0xff] %v6093_v31 }
 0x540   :  { %2058 = vrot.lane.b32.xlu1 %v5994_v49, %s4275_s9  ;;  %1754 = vrot.lane.b32.xlu0 %v6081_v14, %s4271_s28 }
 0x541   :  { %1826 = vrot.lane.b32.xlu2 %v6011_v41, %s4272_s29 }
 0x542   :  { %v6101_v18 = vpop.permute.xlu1 %2070  ;;  %v6103_v45 = vpop.permute.xlu0 %1904 }
 0x543   :  { %8671 = vst [vmem:[#allocation17_spill] sm:$0xff] %v6101_v18  ;;  %v6105_v47 = vpop.permute.xlu2 %1896 }
 0x544   :  { %8672 = vst [vmem:[#allocation87_spill] sm:$0xff] %v6103_v45 }
 0x545   :  { %8673 = vst [vmem:[#allocation75_spill] sm:$0xff] %v6105_v47 }
 0x548   :  { %1594 = vrot.lane.b32.xlu1 %v6081_v14, %s4269_s26  ;;  %1834 = vrot.lane.b32.xlu0 %v6081_v14, %s4272_s29 }
 0x549   :  { %1898 = vrot.lane.b32.xlu2 %v5994_v49, %s4273_s30  ;;  %v3743_v49 = vld [vmem:[#allocation5] sm:$0xff] }
 0x54a   :  { %v6113_v31 = vpop.permute.xlu0 %1976  ;;  %v6115_v2 = vpop.permute.xlu1 %1576 }
 0x54b   :  { %8674 = vst [vmem:[#allocation79_spill] sm:$0xff] %v6113_v31  ;;  %v6117_v37 = vpop.permute.xlu2 %1984 }
 0x54c   :  { %8675 = vst [vmem:[#allocation80_spill] sm:$0xff] %v6115_v2 }
 0x54d   :  { %8676 = vst [vmem:[#allocation78_spill] sm:$0xff] %v6117_v37 }
 0x550   :  { %1602 = vrot.lane.b32.xlu1 %v6064_v25, %s4269_s26  ;;  %1922 = vrot.lane.b32.xlu0 %v6064_v25, %s4273_s30 }
 0x551   :  { %1514 = vrot.lane.b32.xlu2 %v6081_v14, %s4268_s6 }
 0x552   :  { %v6125_v47 = vpop.permute.xlu0 %1592  ;;  %v6127_v45 = vpop.permute.xlu1 %1816 }
 0x553   :  { %8677 = vst [vmem:[#allocation82_spill] sm:$0xff] %v6125_v47  ;;  %v6129_v18 = vpop.permute.xlu2 %2056 }
 0x554   :  { %8678 = vst [vmem:[#allocation91_spill] sm:$0xff] %v6127_v45 }
 0x555   :  { %8679 = vst [vmem:[#allocation70_spill] sm:$0xff] %v6129_v18 }
 0x558   :  { %1682 = vrot.lane.b32.xlu1 %v6064_v25, %s4270_s27  ;;  %2002 = vrot.lane.b32.xlu0 %v6064_v25, %s4274_s8 }
 0x559   :  { %1762 = vrot.lane.b32.xlu2 %v6064_v25, %s4271_s28 }
 0x55a   :  { %v6137_v31 = vpop.permute.xlu0 %1672  ;;  %v6139_v37 = vpop.permute.xlu1 %1512 }
 0x55b   :  { %8680 = vst [vmem:[#allocation69_spill] sm:$0xff] %v6137_v31  ;;  %v6141_v2 = vpop.permute.xlu2 %1520 }
 0x55c   :  { %8681 = vst [vmem:[#allocation19_spill] sm:$0xff] %v6139_v37 }
 0x55d   :  { %8682 = vst [vmem:[#allocation23_spill] sm:$0xff] %v6141_v2 }
 0x560   :  { %1842 = vrot.lane.b32.xlu1 %v6064_v25, %s4272_s29  ;;  %2074 = vrot.lane.b32.xlu0 %v6081_v14, %s4275_s9 }
 0x561   :  { %1914 = vrot.lane.b32.xlu2 %v6081_v14, %s4273_s30 }
 0x562   :  { %v6149_v18 = vpop.permute.xlu0 %1832  ;;  %v6151_v45 = vpop.permute.xlu1 %1600 }
 0x563   :  { %8683 = vst [vmem:[#allocation89_spill] sm:$0xff] %v6149_v18  ;;  %v6153_v47 = vpop.permute.xlu2 %1680 }
 0x564   :  { %8684 = vst [vmem:[#allocation90_spill] sm:$0xff] %v6151_v45 }
 0x565   :  { %8685 = vst [vmem:[#allocation85_spill] sm:$0xff] %v6153_v47 }
 0x568   :  { %2082 = vrot.lane.b32.xlu1 %v6064_v25, %s4275_s9  ;;  %2054 = vrot.lane.b32.xlu0 %v5778_v52, %s4275_s9 }
 0x569   :  { %1994 = vrot.lane.b32.xlu2 %v6081_v14, %s4274_s8 }
 0x56a   :  { %v6161_v31 = vpop.permute.xlu0 %1912  ;;  %v6163_v2 = vpop.permute.xlu1 %1752 }
 0x56b   :  { %8686 = vst [vmem:[#allocation86_spill] sm:$0xff] %v6161_v31  ;;  %v6165_v37 = vpop.permute.xlu2 %2000 }
 0x56c   :  { %8687 = vst [vmem:[#allocation92_spill] sm:$0xff] %v6163_v2 }
 0x56d   :  { %8688 = vst [vmem:[#allocation28_spill] sm:$0xff] %v6165_v37 }
 0x570   :  { %2064 = vrot.lane.b32.xlu1 %v5842_v54, %s4275_s9  ;;  %2076 = vrot.lane.b32.xlu0 %v5703_v53, %s4275_s9 }
 0x571   :  { %1982 = vrot.lane.b32.xlu2 %v5750_v43, %s4274_s8 }
 0x572   :  { %v6173_v18 = vpop.permute.xlu0 %2080  ;;  %v6175_v47 = vpop.permute.xlu1 %1760 }
 0x573   :  { %8689 = vst [vmem:[#allocation26_spill] sm:$0xff] %v6173_v18  ;;  %v6177_v45 = vpop.permute.xlu2 %2072 }
 0x574   :  { %8690 = vst [vmem:[#allocation29_spill] sm:$0xff] %v6175_v47 }
 0x575   :  { %8691 = vst [vmem:[#allocation83_spill] sm:$0xff] %v6177_v45 }
 0x578   :  { %1980 = vrot.lane.b32.xlu1 %v5686_v4, %s4274_s8  ;;  %2062 = vrot.lane.b32.xlu0 %v5750_v43, %s4275_s9 }
 0x579   :  { %2068 = vrot.lane.b32.xlu2 %v5714_v36, %s4275_s9 }
 0x57a   :  { %v6185_v37 = vpop.permute.xlu1 %1840  ;;  %v6187_v31 = vpop.permute.xlu0 %1498 }
 0x57b   :  { %8692 = vst [vmem:[#allocation53_spill] sm:$0xff] %v6185_v37  ;;  %v6189_v2 = vpop.permute.xlu2 %1666 }
 0x57c   :  { %8693 = vst [vmem:[#allocation22_spill] sm:$0xff] %v6187_v31  ;;  %v3742_v31 = vld [vmem:[#allocation5 + $0x200] sm:$0xff] }
 0x57d   :  { %8694 = vst [vmem:[#allocation88_spill] sm:$0xff] %v6189_v2  ;;  %v1536_v2 = vsel %vm204_vm0, %v5850_v3, %v5797_v23 }
 0x57e   :  { %v1540_v41 = vmul.f32 %v3743_v49, %v1536_v2  ;;  %v3748_v49 = vld [vmem:[#allocation5 + $0x230] sm:$0xff] }
 0x57f   :  { %v6236_v2 = vmul.f32 %v3748_v49, %v5767_v51  ;;  %v3752_v51 = vld [vmem:[#allocation5 + $0x90] sm:$0xff]  ;;  %v3754_v49 = vld [vmem:[#allocation5 + $0x238] sm:$0xff] }
 0x580   :  { %2060 = vrot.lane.b32.xlu1 %v5686_v4, %s4275_s9 }
 0x581   :  { %2052 = vrot.lane.b32.xlu2 %v5683_v26, %s4275_s9 }
 0x582   :  { %v6195_v45 = vpop.permute.xlu1 %1920  ;;  %v6197_v18 = vpop.permute.xlu0 %1586 }
 0x583   :  { %8695 = vst [vmem:[#allocation27_spill] sm:$0xff] %v6195_v45  ;;  %v6199_v47 = vpop.permute.xlu2 %1746  ;;  %v1532_v45 = vsel %vm204_vm0, %v5797_v23, %v5821_v20  ;;  %v1608_v23 = vsel %vm301_vm1, %v5805_v22, %v5864_v42 }
 0x584   :  { %8696 = vst [vmem:[#allocation93_spill] sm:$0xff] %v6197_v18  ;;  %v1612_v18 = vsel %vm301_vm1, %v5837_v11, %v5805_v22  ;;  %v3749_v22 = vld [vmem:[#allocation5 + $0x228] sm:$0xff]  ;;  %v1622_v3 = vmul.f32 %v3752_v51, %v1608_v23  ;;  %v3759_v51 = vld [vmem:[#allocation5 + $0x118] sm:$0xff] }
 0x585   :  { %8697 = vst [vmem:[#allocation94_spill] sm:$0xff] %v6199_v47  ;;  %v1528_v47 = vsel %vm204_vm0, %v5821_v20, %v5839_v60  ;;  %v1541_v20 = vmul.f32 %v3744_v24, %v1532_v45  ;;  %v6239_v24 = vmul.f32 %v3749_v22, %v5750_v43  ;;  %v3750_v45 = vld [vmem:[#allocation5 + $0x220] sm:$0xff]  ;;  %v1616_v60 = vsel %vm301_vm1, %v5854_v33, %v5837_v11  ;;  %v3753_v43 = vld [vmem:[#allocation5 + $0x18] sm:$0xff] }
 0x58a   :  { %v6201_v14 = vpop.permute.xlu1 %1992  ;;  %v6203_v25 = vpop.permute.xlu0 %1906 }
 0x58b   :  { %8698 = vst [vmem:[#allocation95_spill] sm:$0xff] %v6201_v14  ;;  %v6209_v37 = vpop.permute.xlu2 %1658  ;;  %v3741_v14 = vld [vmem:[#allocation5 + $0x208] sm:$0xff] }
 0x58c   :  { %8699 = vst [vmem:[#allocation96_spill] sm:$0xff] %v6203_v25  ;;  %v1477_v25 = vmul.f32 %v3741_v14, %v5686_v4  ;;  %v1478_v4 = vmul.f32 %v3745_v44, %v5714_v36  ;;  %v3746_v14 = vld [vmem:[#allocation5 + $0x10] sm:$0xff]  ;;  %v6242_v44 = vmul.f32 %v3750_v45, %v5778_v52  ;;  %v3751_v36 = vld [vmem:[#allocation5 + $0x88] sm:$0xff]  ;;  %v6253_v52 = vmul.f32 %v3754_v49, %v5789_v32 }
 0x58d   :  { %8700 = vst [vmem:[#allocation97_spill] sm:$0xff] %v6209_v37  ;;  %v1476_v37 = vmul.f32 %v3742_v31, %v5683_v26  ;;  %v1542_v27 = vmul.f32 %v3746_v14, %v1528_v47  ;;  %v3747_v26 = vld [vmem:[#allocation5 + $0x218] sm:$0xff]  ;;  %v1621_v47 = vmul.f32 %v3751_v36, %v1612_v18  ;;  %v1543_v14 = vmul.f32 %v3753_v43, %v1524_v30  ;;  %v3755_v18 = vld [vmem:[#allocation5 + $0x248] sm:$0xff] }
 0x58e   :  { %v1479_v31 = vmul.f32 %v3747_v26, %v5703_v53  ;;  %8701 = vst [vmem:[#allocation98_spill] sm:$0xff] %v6242_v44  ;;  %v1604_v53 = vsel %vm301_vm1, %v5864_v42, %v5854_v33  ;;  %v6256_v22 = vmul.f32 %v3755_v18, %v5842_v54  ;;  %v1557_v36 = vadd.f32 %v1541_v20, %v1477_v25  ;;  %v3756_v42 = vld [vmem:[#allocation5 + $0x240] sm:$0xff]  ;;  %v3758_v30 = vld [vmem:[#allocation5 + $0x98] sm:$0xff]  ;;  %v3760_v18 = vld [vmem:[#allocation5 + $0x110] sm:$0xff] }
 0x58f   :  { %v1556_v26 = vadd.f32 %v1540_v41, %v1476_v37  ;;  %v1558_v44 = vadd.f32 %v1542_v27, %v1478_v4  ;;  %v1684_v33 = vsel %vm399_vm2, %v5868_v57, %v5883_v59  ;;  %v6267_v41 = vmul.f32 %v3756_v42, %v5871_v9  ;;  %v3757_v37 = vld [vmem:[#allocation5 + $0x80] sm:$0xff] }
 0x590   :  { %v1620_v54 = vmul.f32 %v3757_v37, %v1616_v60  ;;  %v1623_v23 = vmul.f32 %v3758_v30, %v1604_v53  ;;  %v1688_v25 = vsel %vm399_vm2, %v5852_v39, %v5868_v57  ;;  %v1768_v27 = vsel %vm497_vm3, %v5866_v28, %v5895_v8  ;;  %v3761_v37 = vld [vmem:[#allocation5 + $0x190] sm:$0xff] }
 0x591   :  { %v6283_v9 = vsel %vm693_vm5, %v5825_v58, %v5835_v16  ;;  %v6285_v20 = vadd.f32 %v1621_v47, %v1557_v36  ;;  %v1638_v4 = vadd.f32 %v1622_v3, %v1558_v44  ;;  %v1764_v60 = vsel %vm497_vm3, %v5895_v8, %v5879_v50  ;;  %v3793_v16 = vld [vmem:[#allocation5 + $0xa0] sm:$0xff] }
 0x592   :  { %v6258_v45 = vpop.permute.xlu1 %1506  ;;  %v6260_v11 = vpop.permute.xlu0 %1978  ;;  %8702 = vst [vmem:[#allocation99_spill] sm:$0xff] %v6283_v9  ;;  %v1559_v57 = vadd.f32 %v1543_v14, %v1479_v31  ;;  %v1636_v53 = vadd.f32 %v1620_v54, %v1556_v26  ;;  %v1703_v43 = vmul.f32 %v3759_v51, %v1684_v33  ;;  %v1533_v49 = vsel %vm204_vm0, %v5963_v38, %v5921_v7  ;;  %v3762_v26 = vld [vmem:[#allocation5 + $0x198] sm:$0xff] }
 0x593   :  { %v6269_v32 = vpop.permute.xlu2 %1818  ;;  %8703 = vst [vmem:[#allocation100_spill] sm:$0xff] %v6285_v20  ;;  %v1702_v42 = vmul.f32 %v3760_v18, %v1688_v25  ;;  %v1782_v47 = vmul.f32 %v3761_v37, %v1768_v27  ;;  %v1844_v44 = vsel %vm595_vm4, %v5891_v55, %v5919_v29  ;;  %v1856_v8 = vsel %vm595_vm4, %v5919_v29, %v5823_v10  ;;  %v3764_v25 = vld [vmem:[#allocation5 + $0x290] sm:$0xff]  ;;  %v3795_v10 = vld [vmem:[#allocation5 + $0x278] sm:$0xff]  ;;  %v8737_v55 = vld [vmem:[#allocation84_spill] sm:$0xff] }
 0x594   :  { %v1639_v31 = vadd.f32 %v1623_v23, %v1559_v57  ;;  %v1692_v3 = vsel %vm399_vm2, %v5881_v48, %v5852_v39  ;;  %v1696_v14 = vsel %vm399_vm2, %v5883_v59, %v5881_v48  ;;  %v1783_v36 = vmul.f32 %v3762_v26, %v1764_v60  ;;  %v3763_v39 = vld [vmem:[#allocation5 + $0x28] sm:$0xff]  ;;  %v3765_v59 = vld [vmem:[#allocation5 + $0x298] sm:$0xff] }
 0x595   :  { %v6315_v33 = vsel %vm497_vm3, %v5813_v63, %v5866_v28  ;;  %v1718_v29 = vadd.f32 %v1702_v42, %v1638_v4  ;;  %v6321_v54 = vsel %vm497_vm3, %v5879_v50, %v5813_v63  ;;  %v1545_v30 = vmul.f32 %v3763_v39, %v1533_v49  ;;  %v3766_v57 = vld [vmem:[#allocation5 + $0x108] sm:$0xff]  ;;  %v3767_v63 = vld [vmem:[#allocation5 + $0x100] sm:$0xff]  ;;  %v8736_v20 = vld [vmem:[#allocation98_spill] sm:$0xff] }
 0x596   :  { %8704 = vst [vmem:[#allocation101_spill] sm:$0xff] %v6315_v33  ;;  %v1719_v23 = vadd.f32 %v1703_v43, %v1639_v31  ;;  %v1862_v48 = vmul.f32 %v3764_v25, %v1844_v44  ;;  %v1863_v27 = vmul.f32 %v3765_v59, %v1856_v8  ;;  %v1924_v28 = vsel %vm693_vm5, %v5934_v46, %v5907_v5  ;;  %v3768_v8 = vld [vmem:[#allocation5 + $0x310] sm:$0xff] }
 0x597   :  { %8705 = vst [vmem:[#allocation102_spill] sm:$0xff] %v6321_v54  ;;  %v6331_v51 = vmul.f32 %v3766_v57, %v1692_v3  ;;  %v1700_v50 = vmul.f32 %v3767_v63, %v1696_v14  ;;  %v1798_v49 = vadd.f32 %v1782_v47, %v1718_v29  ;;  %v1529_v43 = vsel %vm204_vm0, %v5921_v7, %v5946_v34  ;;  %v3769_v29 = vld [vmem:[#allocation5 + $0x30] sm:$0xff]  ;;  %v8739_v54 = vld [vmem:[#allocation25_spill] sm:$0xff] }
 0x598   :  { %v1799_v42 = vadd.f32 %v1783_v36, %v1719_v23  ;;  %v2004_v37 = vsel %vm791_vm6, %v5903_v19, %v5948_v61  ;;  %v1613_v44 = vsel %vm301_vm1, %v5936_v0, %v5950_v1  ;;  %v1693_v47 = vsel %vm399_vm2, %v5975_v35, %v5917_v56  ;;  %v3770_v25 = vld [vmem:[#allocation5 + $0x390] sm:$0xff] }
 0x599   :  { %8706 = vst [vmem:[#allocation103_spill] sm:$0xff] %v6331_v51  ;;  %v1936_v7 = vsel %vm693_vm5, %v5907_v5, %v5825_v58  ;;  %v1942_v31 = vmul.f32 %v3768_v8, %v1924_v28  ;;  %v2016_v3 = vsel %vm791_vm6, %v5948_v61, %v5905_v21  ;;  %v1561_v14 = vadd.f32 %v1545_v30, %v6239_v24  ;;  %v3771_v5 = vld [vmem:[#allocation5 + $0xa8] sm:$0xff]  ;;  %v3773_v30 = vld [vmem:[#allocation5 + $0x318] sm:$0xff]  ;;  %v8708_v8 = vld [vmem:[#allocation24_spill] sm:$0xff] }
 0x59a   :  { %v6327_v60 = vpop.permute.xlu1 %1578  ;;  %v6329_v4 = vpop.permute.xlu0 %2066  ;;  %v1878_v26 = vadd.f32 %v1862_v48, %v1798_v49  ;;  %v1879_v36 = vadd.f32 %v1863_v27, %v1799_v42  ;;  %v1546_v39 = vmul.f32 %v3769_v29, %v1529_v43  ;;  %v1609_v23 = vsel %vm301_vm1, %v5950_v1, %v5961_v6  ;;  %v3772_v28 = vld [vmem:[#allocation5 + $0x128] sm:$0xff]  ;;  %v3774_v27 = vld [vmem:[#allocation5 + $0x398] sm:$0xff]  ;;  %v3775_v49 = vld [vmem:[#allocation5 + $0x250] sm:$0xff] }
 0x59b   :  { %v6337_v18 = vpop.permute.xlu2 %1826  ;;  %v2022_v58 = vmul.f32 %v3770_v25, %v2004_v37  ;;  %v1625_v59 = vmul.f32 %v3771_v5, %v1613_v44  ;;  %v1705_v57 = vmul.f32 %v3772_v28, %v1693_v47  ;;  %v1525_v61 = vsel %vm204_vm0, %v5946_v34, %v6033_v40  ;;  %v3776_v42 = vld [vmem:[#allocation5 + $0xb0] sm:$0xff]  ;;  %v3791_v21 = vld [vmem:[#allocation5 + $0x338] sm:$0xff] }
 0x59c   :  { %v6368_v24 = vadd.f32 %v1700_v50, %v1636_v53  ;;  %v1943_v48 = vmul.f32 %v3773_v30, %v1936_v7  ;;  %v2023_v63 = vmul.f32 %v3774_v27, %v2016_v3  ;;  %v6371_v1 = vmul.f32 %v3775_v49, %v5924_v12  ;;  %v3777_v53 = vld [vmem:[#allocation5 + $0x38] sm:$0xff]  ;;  %v3781_v49 = vld [vmem:[#allocation5 + $0x268] sm:$0xff] }
 0x59d   :  { %v1958_v43 = vadd.f32 %v1942_v31, %v1878_v26  ;;  %v1626_v37 = vmul.f32 %v3776_v42, %v1609_v23  ;;  %v1641_v44 = vadd.f32 %v1625_v59, %v1561_v14  ;;  %v1605_v47 = vsel %vm301_vm1, %v5961_v6, %v6045_v13  ;;  %v3778_v7 = vld [vmem:[#allocation5 + $0x258] sm:$0xff]  ;;  %v8709_v6 = vld [vmem:[#allocation48_spill] sm:$0xff]  ;;  %v8710_v23 = vld [vmem:[#allocation73_spill] sm:$0xff] }
 0x59e   :  { %8707 = vst [vmem:[#allocation104_spill] sm:$0xff] %v6368_v24  ;;  %v1773_v34 = vsel %vm497_vm3, %v5977_v17, %v5965_v62  ;;  %v1547_v50 = vmul.f32 %v3777_v53, %v1525_v61  ;;  %v6382_v12 = vmul.f32 %v3778_v7, %v8708_v8  ;;  %v1959_v14 = vadd.f32 %v1943_v48, %v1879_v36  ;;  %v8712_v61 = vld [vmem:[#allocation45_spill] sm:$0xff]  ;;  %v3779_v36 = vld [vmem:[#allocation5 + $0xb8] sm:$0xff]  ;;  %v3782_v42 = vld [vmem:[#allocation5 + $0x260] sm:$0xff] }
 0x59f   :  { %v1562_v26 = vadd.f32 %v1546_v39, %v6236_v2  ;;  %v1721_v29 = vadd.f32 %v1705_v57, %v1641_v44  ;;  %v1685_v25 = vsel %vm399_vm2, %v8710_v23, %v8709_v6  ;;  %v6395_v59 = vadd.f32 %v2022_v58, %v1958_v43  ;;  %v3780_v48 = vld [vmem:[#allocation5 + $0x1a8] sm:$0xff]  ;;  %v8714_v58 = vld [vmem:[#allocation60_spill] sm:$0xff]  ;;  %v3785_v8 = vld [vmem:[#allocation5 + $0x1b0] sm:$0xff] }
 0x5a0   :  { %v1697_v28 = vsel %vm399_vm2, %v8709_v6, %v5975_v35  ;;  %v1769_v2 = vsel %vm497_vm3, %v5965_v62, %v8712_v61  ;;  %v1627_v39 = vmul.f32 %v3779_v36, %v1605_v47  ;;  %v6405_v57 = vadd.f32 %v2023_v63, %v1959_v14  ;;  %v8715_v44 = vld [vmem:[#allocation49_spill] sm:$0xff]  ;;  %v8717_v6 = vld [vmem:[#allocation52_spill] sm:$0xff]  ;;  %v8718_v36 = vld [vmem:[#allocation62_spill] sm:$0xff] }
 0x5a1   :  { %8711 = vst [vmem:[#allocation24_spill] sm:$0xff] %v6395_v59  ;;  %v1642_v30 = vadd.f32 %v1626_v37, %v1562_v26  ;;  %v1785_v27 = vmul.f32 %v3780_v48, %v1773_v34  ;;  %v6408_v43 = vmul.f32 %v3781_v49, %v8714_v58  ;;  %v6411_v53 = vmul.f32 %v3782_v42, %v8715_v44  ;;  %v3783_v37 = vld [vmem:[#allocation5 + $0x138] sm:$0xff]  ;;  %v3784_v34 = vld [vmem:[#allocation5 + $0x120] sm:$0xff]  ;;  %v8724_v58 = vld [vmem:[#allocation21_spill] sm:$0xff] }
 0x5a2   :  { %v6384_v31 = vpop.permute.xlu1 %1738  ;;  %v6386_v3 = vpop.permute.xlu0 %1522  ;;  %8713 = vst [vmem:[#allocation48_spill] sm:$0xff] %v6405_v57  ;;  %v1537_v62 = vsel %vm204_vm0, %v6033_v40, %v5963_v38  ;;  %v1563_v35 = vadd.f32 %v1547_v50, %v6253_v52  ;;  %v1689_v63 = vsel %vm399_vm2, %v5917_v56, %v8710_v23  ;;  %v1707_v47 = vmul.f32 %v3783_v37, %v1685_v25  ;;  %v8719_v38 = vld [vmem:[#allocation55_spill] sm:$0xff]  ;;  %v8720_v50 = vld [vmem:[#allocation50_spill] sm:$0xff]  ;;  %v3786_v48 = vld [vmem:[#allocation5 + $0x20] sm:$0xff] }
 0x5a3   :  { %v6393_v5 = vpop.permute.xlu2 %1898  ;;  %v6422_v7 = vmul.f32 %v3784_v34, %v1697_v28  ;;  %v1786_v14 = vmul.f32 %v3785_v8, %v1769_v2  ;;  %v6424_v26 = vadd.f32 %v1785_v27, %v1721_v29  ;;  %v1534_v40 = vsel %vm204_vm0, %v8718_v36, %v8717_v6  ;;  %v8721_v23 = vld [vmem:[#allocation59_spill] sm:$0xff]  ;;  %v8722_v28 = vld [vmem:[#allocation37_spill] sm:$0xff]  ;;  %v8725_v42 = vld [vmem:[#allocation80_spill] sm:$0xff] }
 0x5a4   :  { %v1765_v52 = vsel %vm497_vm3, %v8712_v61, %v8719_v38  ;;  %v1777_v56 = vsel %vm497_vm3, %v8719_v38, %v5977_v17  ;;  %v1937_v29 = vsel %vm693_vm5, %v8721_v23, %v8720_v50  ;;  %v1643_v25 = vadd.f32 %v1627_v39, %v1563_v35  ;;  %v3787_v61 = vld [vmem:[#allocation5 + $0x130] sm:$0xff]  ;;  %v3788_v44 = vld [vmem:[#allocation5 + $0x48] sm:$0xff]  ;;  %v8726_v34 = vld [vmem:[#allocation40_spill] sm:$0xff] }
 0x5a5   :  { %8716 = vst [vmem:[#allocation73_spill] sm:$0xff] %v6424_v26  ;;  %v6446_v2 = vsel %vm693_vm5, %v8720_v50, %v8722_v28  ;;  %v1544_v27 = vmul.f32 %v3786_v48, %v1537_v62  ;;  %v1706_v49 = vmul.f32 %v3787_v61, %v1689_v63  ;;  %v1614_v17 = vsel %vm301_vm1, %v8725_v42, %v8724_v58  ;;  %v8727_v8 = vld [vmem:[#allocation61_spill] sm:$0xff]  ;;  %v3789_v50 = vld [vmem:[#allocation5 + $0x1a0] sm:$0xff]  ;;  %v3790_v61 = vld [vmem:[#allocation5 + $0x1b8] sm:$0xff] }
 0x5a6   :  { %8723 = vst [vmem:[#allocation45_spill] sm:$0xff] %v6446_v2  ;;  %v1617_v39 = vsel %vm301_vm1, %v6045_v13, %v5936_v0  ;;  %v1549_v35 = vmul.f32 %v3788_v44, %v1534_v40  ;;  %v1723_v37 = vadd.f32 %v1707_v47, %v1643_v25  ;;  %v1857_v62 = vsel %vm595_vm4, %v8727_v8, %v8726_v34  ;;  %v8729_v13 = vld [vmem:[#allocation57_spill] sm:$0xff]  ;;  %v8731_v40 = vld [vmem:[#allocation36_spill] sm:$0xff]  ;;  %v8734_v44 = vld [vmem:[#allocation66_spill] sm:$0xff] }
 0x5a7   :  { %v6464_v48 = vmul.f32 %v3789_v50, %v1777_v56  ;;  %v1787_v9 = vmul.f32 %v3790_v61, %v1765_v52  ;;  %v1947_v19 = vmul.f32 %v3791_v21, %v1937_v29  ;;  %v6470_v0 = vsel %vm595_vm4, %v8726_v34, %v8729_v13  ;;  %v8733_v56 = vld [vmem:[#allocation81_spill] sm:$0xff]  ;;  %v8735_v50 = vld [vmem:[#allocation68_spill] sm:$0xff]  ;;  %v3794_v24 = vld [vmem:[#allocation5 + $0x2b8] sm:$0xff] }
 0x5a8   :  { %8730 = vst [vmem:[#allocation49_spill] sm:$0xff] %v6470_v0  ;;  %v6478_v25 = vsel %vm595_vm4, %v8729_v13, %v8731_v40  ;;  %v2005_v52 = vsel %vm791_vm6, %v8734_v44, %v8733_v56  ;;  %v1845_v21 = vsel %vm595_vm4, %v8731_v40, %v8727_v8  ;;  %v3792_v29 = vld [vmem:[#allocation5 + $0xc8] sm:$0xff]  ;;  %v2017_v61 = vsel %vm791_vm6, %v8733_v56, %v8735_v50  ;;  %v3802_v59 = vld [vmem:[#allocation5 + $0x50] sm:$0xff]  ;;  %v3806_v28 = vld [vmem:[#allocation5 + $0xc0] sm:$0xff] }
 0x5a9   :  { %8728 = vst [vmem:[#allocation60_spill] sm:$0xff] %v6464_v48  ;;  %v1629_v34 = vmul.f32 %v3792_v29, %v1614_v17  ;;  %v1624_v13 = vmul.f32 %v3793_v16, %v1617_v39  ;;  %v1722_v46 = vadd.f32 %v1706_v49, %v1642_v30  ;;  %v1867_v51 = vmul.f32 %v3794_v24, %v1857_v62  ;;  %v3796_v17 = vld [vmem:[#allocation5 + $0x2b0] sm:$0xff]  ;;  %v8738_v29 = vld [vmem:[#allocation43_spill] sm:$0xff]  ;;  %v8740_v16 = vld [vmem:[#allocation65_spill] sm:$0xff] }
 0x5aa   :  { %v6460_v38 = vpop.permute.xlu1 %1986  ;;  %v6462_v63 = vpop.permute.xlu0 %1674  ;;  %8732 = vst [vmem:[#allocation52_spill] sm:$0xff] %v6478_v25  ;;  %v1560_v33 = vadd.f32 %v1544_v27, %v8736_v20  ;;  %v1565_v26 = vadd.f32 %v1549_v35, %v6256_v22  ;;  %v1803_v2 = vadd.f32 %v1787_v9, %v1723_v37  ;;  %v6495_v8 = vmul.f32 %v3795_v10, %v8737_v55  ;;  %v8741_v20 = vld [vmem:[#allocation19_spill] sm:$0xff]  ;;  %v3797_v9 = vld [vmem:[#allocation5 + $0x3b0] sm:$0xff] }
 0x5ab   :  { %v6472_v47 = vpop.permute.xlu2 %1514  ;;  %v1866_v40 = vmul.f32 %v3796_v17, %v1845_v21  ;;  %v1694_v56 = vsel %vm399_vm2, %v8739_v54, %v8738_v29  ;;  %v1925_v24 = vsel %vm693_vm5, %v8740_v16, %v8721_v23  ;;  %v1530_v22 = vsel %vm204_vm0, %v8717_v6, %v8741_v20  ;;  %v3798_v55 = vld [vmem:[#allocation5 + $0x3b8] sm:$0xff]  ;;  %v3799_v49 = vld [vmem:[#allocation5 + $0x270] sm:$0xff]  ;;  %v3800_v6 = vld [vmem:[#allocation5 + $0x148] sm:$0xff] }
 0x5ac   :  { %v6509_v10 = vmul.f32 %v3797_v9, %v2005_v52  ;;  %v6511_v30 = vmul.f32 %v3798_v55, %v2017_v61  ;;  %v1645_v27 = vadd.f32 %v1629_v34, %v1565_v26  ;;  %v8744_v39 = vld [vmem:[#allocation67_spill] sm:$0xff]  ;;  %v1640_v37 = vadd.f32 %v1624_v13, %v1560_v33  ;;  %v3801_v52 = vld [vmem:[#allocation5 + $0x330] sm:$0xff]  ;;  %v8749_v13 = vld [vmem:[#allocation17_spill] sm:$0xff] }
 0x5ad   :  { %v6514_v35 = vmul.f32 %v3799_v49, %v8744_v39  ;;  %v1802_v62 = vadd.f32 %v1786_v14, %v1722_v46  ;;  %v1883_v21 = vadd.f32 %v1867_v51, %v1803_v2  ;;  %v8745_v23 = vld [vmem:[#allocation23_spill] sm:$0xff]  ;;  %v1709_v57 = vmul.f32 %v3800_v6, %v1694_v56  ;;  %v8747_v14 = vld [vmem:[#allocation74_spill] sm:$0xff]  ;;  %v3803_v39 = vld [vmem:[#allocation5 + $0x40] sm:$0xff] }
 0x5ae   :  { %8742 = vst [vmem:[#allocation62_spill] sm:$0xff] %v6509_v10  ;;  %v1538_v17 = vsel %vm204_vm0, %v8745_v23, %v8718_v36  ;;  %v1946_v9 = vmul.f32 %v3801_v52, %v1925_v24  ;;  %v1550_v61 = vmul.f32 %v3802_v59, %v1530_v22  ;;  %v1526_v26 = vsel %vm204_vm0, %v8741_v20, %v8745_v23  ;;  %v8746_v51 = vld [vmem:[#allocation63_spill] sm:$0xff]  ;;  %v8748_v2 = vld [vmem:[#allocation58_spill] sm:$0xff] }
 0x5af   :  { %8743 = vst [vmem:[#allocation55_spill] sm:$0xff] %v6511_v30  ;;  %v1882_v33 = vadd.f32 %v1866_v40, %v1802_v62  ;;  %v1774_v36 = vsel %vm497_vm3, %v8747_v14, %v8746_v51  ;;  %v2085_v59 = vsel %vm889_vm7, %v8749_v13, %v8748_v2  ;;  %v8750_v56 = vld [vmem:[#allocation90_spill] sm:$0xff]  ;;  %v8751_v22 = vld [vmem:[#allocation87_spill] sm:$0xff]  ;;  %v1725_v49 = vadd.f32 %v1709_v57, %v1645_v27  ;;  %v3805_v27 = vld [vmem:[#allocation5 + $0x1c8] sm:$0xff] }
 0x5b0   :  { %v1618_v24 = vsel %vm301_vm1, %v8750_v56, %v8725_v42  ;;  %v8752_v55 = vld [vmem:[#allocation75_spill] sm:$0xff]  ;;  %v1548_v62 = vmul.f32 %v3803_v39, %v1538_v17  ;;  %v8753_v23 = vld [vmem:[#allocation82_spill] sm:$0xff]  ;;  %v6551_v52 = vadd.f32 %v6422_v7, %v1640_v37  ;;  %v6557_v44 = vadd.f32 %v1947_v19, %v1883_v21  ;;  %v3808_v37 = vld [vmem:[#allocation5 + $0x340] sm:$0xff] }
 0x5b1   :  { %v1934_v40 = vsel %vm693_vm5, %v8752_v55, %v8751_v22  ;;  %v1606_v6 = vsel %vm301_vm1, %v8753_v23, %v8750_v56  ;;  %v1610_v42 = vsel %vm301_vm1, %v8724_v58, %v8753_v23  ;;  %v3804_v13 = vld [vmem:[#allocation5 + $0x58] sm:$0xff]  ;;  %v6559_v57 = vadd.f32 %v1946_v9, %v1882_v33  ;;  %v3807_v16 = vld [vmem:[#allocation5 + $0x430] sm:$0xff] }
 0x5b2   :  { %v6524_v34 = vpop.permute.xlu1 %2058  ;;  %v6526_v46 = vpop.permute.xlu0 %1754  ;;  %8754 = vst [vmem:[#allocation50_spill] sm:$0xff] %v6551_v52  ;;  %v1551_v50 = vmul.f32 %v3804_v13, %v1526_v26  ;;  %v1789_v17 = vmul.f32 %v3805_v27, %v1774_v36  ;;  %v1566_v39 = vadd.f32 %v1550_v61, %v6371_v1  ;;  %v1628_v56 = vmul.f32 %v3806_v28, %v1618_v24  ;;  %v8759_v52 = vld [vmem:[#allocation78_spill] sm:$0xff]  ;;  %v8760_v58 = vld [vmem:[#allocation79_spill] sm:$0xff]  ;;  %v8762_v36 = vld [vmem:[#allocation69_spill] sm:$0xff] }
 0x5b3   :  { %v6540_v20 = vpop.permute.xlu2 %1762  ;;  %8755 = vst [vmem:[#allocation59_spill] sm:$0xff] %v6557_v44  ;;  %v6562_v7 = vmul.f32 %v3807_v16, %v2085_v59  ;;  %v6564_v48 = vmul.f32 %v3808_v37, %v1934_v40  ;;  %v6570_v19 = vsel %vm791_vm6, %v8760_v58, %v8759_v52  ;;  %v3809_v21 = vld [vmem:[#allocation5 + $0xd8] sm:$0xff]  ;;  %v3810_v26 = vld [vmem:[#allocation5 + $0xd0] sm:$0xff]  ;;  %v1690_v1 = vsel %vm399_vm2, %v8738_v29, %v8762_v36  ;;  %v8763_v61 = vld [vmem:[#allocation77_spill] sm:$0xff] }
 0x5b4   :  { %8756 = vst [vmem:[#allocation21_spill] sm:$0xff] %v6559_v57  ;;  %v1631_v9 = vmul.f32 %v3809_v21, %v1606_v6  ;;  %v1630_v33 = vmul.f32 %v3810_v26, %v1610_v42  ;;  %v1564_v28 = vadd.f32 %v1548_v62, %v6267_v41  ;;  %v6577_v16 = vadd.f32 %v1789_v17, %v1725_v49  ;;  %v8764_v13 = vld [vmem:[#allocation91_spill] sm:$0xff]  ;;  %v8765_v40 = vld [vmem:[#allocation85_spill] sm:$0xff]  ;;  %v8766_v6 = vld [vmem:[#allocation92_spill] sm:$0xff] }
 0x5b5   :  { %8757 = vst [vmem:[#allocation80_spill] sm:$0xff] %v6562_v7  ;;  %v1854_v59 = vsel %vm595_vm4, %v8764_v13, %v8763_v61  ;;  %v1567_v24 = vadd.f32 %v1551_v50, %v6382_v12  ;;  %v1698_v23 = vsel %vm399_vm2, %v8765_v40, %v8739_v54  ;;  %v1770_v29 = vsel %vm497_vm3, %v8746_v51, %v8766_v6  ;;  %v8767_v42 = vld [vmem:[#allocation22_spill] sm:$0xff]  ;;  %v8768_v37 = vld [vmem:[#allocation89_spill] sm:$0xff]  ;;  %v3818_v44 = vld [vmem:[#allocation5 + $0x1c0] sm:$0xff] }
 0x5b6   :  { %8758 = vst [vmem:[#allocation40_spill] sm:$0xff] %v6564_v48  ;;  %v1646_v41 = vadd.f32 %v1630_v33, %v1566_v39  ;;  %v1644_v49 = vadd.f32 %v1628_v56, %v1564_v28  ;;  %v1686_v62 = vsel %vm399_vm2, %v8762_v36, %v8765_v40  ;;  %v1535_v12 = vsel %vm204_vm0, %v8767_v42, %v6258_v45  ;;  %v3811_v27 = vld [vmem:[#allocation5 + $0x150] sm:$0xff]  ;;  %v8769_v56 = vld [vmem:[#allocation29_spill] sm:$0xff]  ;;  %v3812_v33 = vld [vmem:[#allocation5 + $0x140] sm:$0xff] }
 0x5b7   :  { %8761 = vst [vmem:[#allocation61_spill] sm:$0xff] %v6570_v19  ;;  %v1710_v17 = vmul.f32 %v3811_v27, %v1690_v1  ;;  %v1850_v51 = vsel %vm595_vm4, %v8763_v61, %v8768_v37  ;;  %v1647_v39 = vadd.f32 %v1631_v9, %v1567_v24  ;;  %v1778_v21 = vsel %vm497_vm3, %v8769_v56, %v8747_v14  ;;  %v3813_v28 = vld [vmem:[#allocation5 + $0x1d0] sm:$0xff]  ;;  %v8770_v27 = vld [vmem:[#allocation93_spill] sm:$0xff]  ;;  %v3814_v61 = vld [vmem:[#allocation5 + $0x2c0] sm:$0xff] }
 0x5b8   :  { %v1708_v36 = vmul.f32 %v3812_v33, %v1698_v23  ;;  %v1790_v40 = vmul.f32 %v3813_v28, %v1770_v29  ;;  %v1766_v1 = vsel %vm497_vm3, %v8766_v6, %v8769_v56  ;;  %v1615_v9 = vsel %vm301_vm1, %v6327_v60, %v8770_v27  ;;  %v3815_v14 = vld [vmem:[#allocation5 + $0x158] sm:$0xff]  ;;  %v8771_v25 = vld [vmem:[#allocation86_spill] sm:$0xff]  ;;  %v3816_v29 = vld [vmem:[#allocation5 + $0x68] sm:$0xff] }
 0x5b9   :  { %v6622_v24 = vmul.f32 %v3814_v61, %v1854_v59  ;;  %v1711_v7 = vmul.f32 %v3815_v14, %v1686_v62  ;;  %v1930_v23 = vsel %vm693_vm5, %v8751_v22, %v8771_v25  ;;  %v1553_v33 = vmul.f32 %v3816_v29, %v1535_v12  ;;  %v3817_v28 = vld [vmem:[#allocation5 + $0x2c8] sm:$0xff]  ;;  %v3819_v19 = vld [vmem:[#allocation5 + $0x1d8] sm:$0xff]  ;;  %v3823_v29 = vld [vmem:[#allocation5 + $0x70] sm:$0xff] }
 0x5ba   :  { %v6600_v50 = vpop.permute.xlu1 %1594  ;;  %v6602_v54 = vpop.permute.xlu0 %1834  ;;  %v6628_v30 = vmul.f32 %v3817_v28, %v1850_v51  ;;  %v1724_v6 = vadd.f32 %v1708_v36, %v1644_v49  ;;  %v1726_v56 = vadd.f32 %v1710_v17, %v1646_v41  ;;  %v1788_v10 = vmul.f32 %v3818_v44, %v1778_v21  ;;  %v8772_v61 = vld [vmem:[#allocation53_spill] sm:$0xff]  ;;  %v8773_v49 = vld [vmem:[#allocation28_spill] sm:$0xff] }
 0x5bb   :  { %v6612_v26 = vpop.permute.xlu2 %1914  ;;  %v1727_v57 = vadd.f32 %v1711_v7, %v1647_v39  ;;  %v1791_v59 = vmul.f32 %v3819_v19, %v1766_v1  ;;  %v1858_v62 = vsel %vm595_vm4, %v8772_v61, %v8764_v13  ;;  %v3820_v14 = vld [vmem:[#allocation5 + $0xe8] sm:$0xff]  ;;  %v6642_v44 = vsel %vm791_vm6, %v8773_v49, %v8760_v58  ;;  %v8774_v13 = vld [vmem:[#allocation88_spill] sm:$0xff]  ;;  %v8776_v39 = vld [vmem:[#allocation94_spill] sm:$0xff] }
 0x5bc   :  { %v1633_v0 = vmul.f32 %v3820_v14, %v1615_v9  ;;  %v3821_v22 = vld [vmem:[#allocation5 + $0x348] sm:$0xff]  ;;  %v6636_v12 = vadd.f32 %v1790_v40, %v1726_v56  ;;  %v1531_v7 = vsel %vm204_vm0, %v6258_v45, %v6472_v47  ;;  %v1846_v19 = vsel %vm595_vm4, %v8768_v37, %v8772_v61  ;;  %v3822_v45 = vld [vmem:[#allocation5 + $0x2d8] sm:$0xff] }
 0x5bd   :  { %v6634_v48 = vmul.f32 %v3821_v22, %v1930_v23  ;;  %v8775_v41 = vld [vmem:[#allocation97_spill] sm:$0xff]  ;;  %v1569_v51 = vadd.f32 %v1553_v33, %v6408_v43  ;;  %v1775_v58 = vsel %vm497_vm3, %v6384_v31, %v8776_v39  ;;  %v6661_v21 = vadd.f32 %v1788_v10, %v1724_v6  ;;  %v8777_v56 = vld [vmem:[#allocation27_spill] sm:$0xff]  ;;  %v3828_v22 = vld [vmem:[#allocation5 + $0xf0] sm:$0xff] }
 0x5be   :  { %v1695_v17 = vsel %vm399_vm2, %v8775_v41, %v8774_v13  ;;  %v1871_v36 = vmul.f32 %v3822_v45, %v1858_v62  ;;  %v1539_v37 = vsel %vm204_vm0, %v6386_v3, %v8767_v42  ;;  %v1611_v40 = vsel %vm301_vm1, %v8770_v27, %v6600_v50  ;;  %v3824_v42 = vld [vmem:[#allocation5 + $0x2d0] sm:$0xff]  ;;  %v3825_v61 = vld [vmem:[#allocation5 + $0x168] sm:$0xff]  ;;  %v3827_v62 = vld [vmem:[#allocation5 + $0x60] sm:$0xff] }
 0x5bf   :  { %v1807_v9 = vadd.f32 %v1791_v59, %v1727_v57  ;;  %v1649_v23 = vadd.f32 %v1633_v0, %v1569_v51  ;;  %v1527_v10 = vsel %vm204_vm0, %v6472_v47, %v6386_v3  ;;  %v1554_v33 = vmul.f32 %v3823_v29, %v1531_v7  ;;  %v3826_v0 = vld [vmem:[#allocation5 + $0x1e8] sm:$0xff]  ;;  %v3830_v45 = vld [vmem:[#allocation5 + $0x350] sm:$0xff] }
 0x5c0   :  { %v6679_v6 = vmul.f32 %v3824_v42, %v1846_v19  ;;  %v1926_v27 = vsel %vm693_vm5, %v8771_v25, %v8777_v56  ;;  %v1713_v57 = vmul.f32 %v3825_v61, %v1695_v17  ;;  %v1793_v59 = vmul.f32 %v3826_v0, %v1775_v58  ;;  %v3829_v17 = vld [vmem:[#allocation5 + $0x78] sm:$0xff]  ;;  %v3834_v61 = vld [vmem:[#allocation5 + $0x170] sm:$0xff] }
 0x5c1   :  { %v1552_v14 = vmul.f32 %v3827_v62, %v1539_v37  ;;  %v1634_v3 = vmul.f32 %v3828_v22, %v1611_v40  ;;  %v1851_v47 = vsel %vm595_vm4, %v6337_v18, %v6602_v54  ;;  %v6692_v19 = vadd.f32 %v1871_v36, %v1807_v9  ;;  %v8778_v36 = vld [vmem:[#allocation96_spill] sm:$0xff] }
 0x5c2   :  { %v1603_v43 = vpop.permute.xlu1 %1602  ;;  %v6671_v1 = vpop.permute.xlu0 %1922  ;;  %v1938_v25 = vsel %vm693_vm5, %v8777_v56, %v8752_v55  ;;  %v1555_v51 = vmul.f32 %v3829_v17, %v1527_v10  ;;  %v6701_v37 = vmul.f32 %v3830_v45, %v1926_v27  ;;  %v1729_v40 = vadd.f32 %v1713_v57, %v1649_v23  ;;  %v3832_v23 = vld [vmem:[#allocation5 + $0xe0] sm:$0xff]  ;;  %v3833_v56 = vld [vmem:[#allocation5 + $0xf8] sm:$0xff] }
 0x5c3   :  { %v6677_v28 = vpop.permute.xlu2 %1994  ;;  %v1619_v7 = vsel %vm301_vm1, %v1603_v43, %v6327_v60  ;;  %v1607_v58 = vsel %vm301_vm1, %v6600_v50, %v1603_v43  ;;  %v1570_v29 = vadd.f32 %v1554_v33, %v6514_v35  ;;  %v1691_v60 = vsel %vm399_vm2, %v8774_v13, %v6462_v63  ;;  %v3831_v43 = vld [vmem:[#allocation5 + $0x2e8] sm:$0xff] }
 0x5c4   :  { %v1855_v55 = vsel %vm595_vm4, %v6269_v32, %v6337_v18  ;;  %v1935_v50 = vsel %vm693_vm5, %v6393_v5, %v8778_v36  ;;  %v1873_v9 = vmul.f32 %v3831_v43, %v1851_v47  ;;  %v1632_v10 = vmul.f32 %v3832_v23, %v1619_v7  ;;  %v3836_v7 = vld [vmem:[#allocation5 + $0x178] sm:$0xff]  ;;  %v3839_v43 = vld [vmem:[#allocation5 + $0x3e8] sm:$0xff] }
 0x5c5   :  { %v1809_v35 = vadd.f32 %v1793_v59, %v1729_v40  ;;  %v1568_v33 = vadd.f32 %v1552_v14, %v6411_v53  ;;  %v1650_v42 = vadd.f32 %v1634_v3, %v1570_v29  ;;  %v1635_v13 = vmul.f32 %v3833_v56, %v1607_v58  ;;  %v3835_v3 = vld [vmem:[#allocation5 + $0x160] sm:$0xff]  ;;  %v3841_v56 = vld [vmem:[#allocation5 + $0x1f0] sm:$0xff] }
 0x5c6   :  { %v1571_v27 = vadd.f32 %v1555_v51, %v6495_v8  ;;  %v1714_v57 = vmul.f32 %v3834_v61, %v1691_v60  ;;  %v1779_v18 = vsel %vm497_vm3, %v6540_v20, %v6384_v31  ;;  %v1771_v0 = vsel %vm497_vm3, %v8776_v39, %v6526_v46  ;;  %v3838_v60 = vld [vmem:[#allocation5 + $0x368] sm:$0xff] }
 0x5c7   :  { %v1931_v53 = vsel %vm693_vm5, %v8778_v36, %v6612_v26  ;;  %v2011_v8 = vsel %vm791_vm6, %v6460_v38, %v6677_v28  ;;  %v1889_v14 = vadd.f32 %v1873_v9, %v1809_v35  ;;  %v1648_v22 = vadd.f32 %v1632_v10, %v1568_v33  ;;  %v3840_v10 = vld [vmem:[#allocation5 + $0x358] sm:$0xff] }
 0x5c8   :  { %v2015_v51 = vsel %vm791_vm6, %v6260_v11, %v6460_v38  ;;  %v1730_v58 = vadd.f32 %v1714_v57, %v1650_v42  ;;  %v1651_v45 = vadd.f32 %v1635_v13, %v1571_v27  ;;  %v1953_v36 = vmul.f32 %v3838_v60, %v1931_v53  ;;  %v8779_v38 = vld [vmem:[#allocation95_spill] sm:$0xff]  ;;  %v3842_v42 = vld [vmem:[#allocation5 + $0x2e0] sm:$0xff] }
 0x5c9   :  { %v2033_v9 = vmul.f32 %v3839_v43, %v2011_v8  ;;  %v1951_v35 = vmul.f32 %v3840_v10, %v1938_v25  ;;  %v2006_v33 = vsel %vm791_vm6, %v8779_v38, %v8773_v49  ;;  %v1872_v13 = vmul.f32 %v3842_v42, %v1855_v55  ;;  %v3843_v27 = vld [vmem:[#allocation5 + $0x360] sm:$0xff]  ;;  %v3845_v8 = vld [vmem:[#allocation5 + $0x1f8] sm:$0xff] }
 0x5ca   :  { %v1683_v59 = vpop.permute.xlu1 %1682  ;;  %v6726_v62 = vpop.permute.xlu0 %2002  ;;  %v1952_v61 = vmul.f32 %v3843_v27, %v1935_v50  ;;  %v1969_v57 = vadd.f32 %v1953_v36, %v1889_v14  ;;  %v2095_v25 = vsel %vm889_vm7, %v6524_v34, %v6329_v4  ;;  %v1927_v55 = vsel %vm693_vm5, %v6612_v26, %v6671_v1  ;;  %v3851_v43 = vld [vmem:[#allocation5 + $0x378] sm:$0xff] }
 0x5cb   :  { %v1687_v31 = vsel %vm399_vm2, %v6462_v63, %v1683_v59  ;;  %v1699_v39 = vsel %vm399_vm2, %v1683_v59, %v8775_v41  ;;  %v1767_v63 = vsel %vm497_vm3, %v6526_v46, %v6540_v20  ;;  %v6750_v40 = vpop.permute.xlu2 %1982  ;;  %v3837_v41 = vld [vmem:[#allocation5 + $0x1e0] sm:$0xff]  ;;  %v1794_v46 = vmul.f32 %v3841_v56, %v1771_v0 }
 0x5cc   :  { %v1712_v47 = vmul.f32 %v3835_v3, %v1699_v39  ;;  %v1715_v17 = vmul.f32 %v3836_v7, %v1687_v31  ;;  %v1792_v29 = vmul.f32 %v3837_v41, %v1779_v18  ;;  %v3844_v59 = vld [vmem:[#allocation5 + $0x3e0] sm:$0xff]  ;;  %v1795_v31 = vmul.f32 %v3845_v8, %v1767_v63  ;;  %v3847_v63 = vld [vmem:[#allocation5 + $0x2f8] sm:$0xff] }
 0x5cd   :  { %v2032_v53 = vmul.f32 %v3844_v59, %v2015_v51  ;;  %v1810_v39 = vadd.f32 %v1794_v46, %v1730_v58  ;;  %v2049_v49 = vadd.f32 %v2033_v9, %v1969_v57  ;;  %v1939_v50 = vsel %vm693_vm5, %v6671_v1, %v6393_v5  ;;  %v3848_v1 = vld [vmem:[#allocation5 + $0x468] sm:$0xff]  ;;  %v3852_v46 = vld [vmem:[#allocation5 + $0x3d0] sm:$0xff]  ;;  %v8782_v59 = vld [vmem:[#allocation83_spill] sm:$0xff] }
 0x5ce   :  { %v1728_v23 = vadd.f32 %v1712_v47, %v1648_v22  ;;  %v1731_v20 = vadd.f32 %v1715_v17, %v1651_v45  ;;  %v3846_v17 = vld [vmem:[#allocation5 + $0x2f0] sm:$0xff]  ;;  %v1967_v41 = vadd.f32 %v1951_v35, %v6692_v19  ;;  %v1955_v9 = vmul.f32 %v3851_v43, %v1939_v50  ;;  %v3855_v8 = vld [vmem:[#allocation5 + $0x3f8] sm:$0xff]  ;;  %v8785_v43 = vld [vmem:[#allocation61_spill] sm:$0xff] }
 0x5cf   :  { %v2007_v19 = vsel %vm791_vm6, %v6677_v28, %v6726_v62  ;;  %v2019_v35 = vsel %vm791_vm6, %v6726_v62, %v6260_v11  ;;  %v1884_v28 = vadd.f32 %v6622_v24, %v6661_v21 }
 0x5d0   :  { %v1808_v18 = vadd.f32 %v1792_v29, %v1728_v23  ;;  %v1811_v3 = vadd.f32 %v1795_v31, %v1731_v20  ;;  %v3849_v29 = vld [vmem:[#allocation5 + $0x460] sm:$0xff]  ;;  %v2030_v20 = vmul.f32 %v3852_v46, %v2006_v33  ;;  %v8781_v33 = vld [vmem:[#allocation26_spill] sm:$0xff]  ;;  %v2035_v31 = vmul.f32 %v3855_v8, %v2019_v35 }
 0x5d1   :  { %v2112_v60 = vmul.f32 %v3849_v29, %v2095_v25  ;;  %v2086_v11 = vsel %vm889_vm7, %v8782_v59, %v8781_v33  ;;  %v3862_v29 = vld [vmem:[#allocation5 + $0x2a0] sm:$0xff] }
 0x5d2   :  { %v1888_v0 = vadd.f32 %v1872_v13, %v1808_v18  ;;  %v1843_v14 = vpop.permute.xlu1 %1842  ;;  %v2075_v22 = vpop.permute.xlu0 %2074  ;;  %v3853_v13 = vld [vmem:[#allocation5 + $0x3d8] sm:$0xff]  ;;  %v8790_v35 = vld [vmem:[#allocation52_spill] sm:$0xff] }
 0x5d3   :  { %v1847_v47 = vsel %vm595_vm4, %v6602_v54, %v1843_v14  ;;  %v1859_v7 = vsel %vm595_vm4, %v1843_v14, %v6269_v32  ;;  %v2091_v26 = vsel %vm889_vm7, %v6329_v4, %v2075_v22  ;;  %v3850_v54 = vld [vmem:[#allocation5 + $0x370] sm:$0xff]  ;;  %v1886_v4 = vadd.f32 %v6679_v6, %v6636_v12  ;;  %v6788_v42 = vpop.permute.xlu2 %2068 }
 0x5d4   :  { %v1874_v51 = vmul.f32 %v3846_v17, %v1847_v47  ;;  %v1875_v5 = vmul.f32 %v3847_v63, %v1859_v7  ;;  %v2113_v58 = vmul.f32 %v3848_v1, %v2091_v26  ;;  %v1968_v45 = vadd.f32 %v1952_v61, %v1888_v0  ;;  %v8780_v6 = vld [vmem:[#allocation70_spill] sm:$0xff] }
 0x5d5   :  { %v1954_v36 = vmul.f32 %v3850_v54, %v1927_v55  ;;  %v2031_v27 = vmul.f32 %v3853_v13, %v6642_v44  ;;  %v2098_v18 = vsel %vm889_vm7, %v8781_v33, %v8780_v6  ;;  %v1966_v62 = vadd.f32 %v6701_v37, %v1886_v4  ;;  %v3856_v0 = vld [vmem:[#allocation5 + $0x470] sm:$0xff]  ;;  %v8794_v33 = vld [vmem:[#allocation37_spill] sm:$0xff] }
 0x5d6   :  { %v1890_v32 = vadd.f32 %v1874_v51, %v1810_v39  ;;  %v1891_v23 = vadd.f32 %v1875_v5, %v1811_v3  ;;  %v2129_v10 = vadd.f32 %v2113_v58, %v2049_v49  ;;  %v2048_v56 = vadd.f32 %v2032_v53, %v1968_v45  ;;  %v3854_v53 = vld [vmem:[#allocation5 + $0x3f0] sm:$0xff]  ;;  %v3857_v3 = vld [vmem:[#allocation5 + $0x478] sm:$0xff]  ;;  %v3860_v5 = vld [vmem:[#allocation5 + $0x3c8] sm:$0xff] }
 0x5d7   :  { %v2010_v44 = vsel %vm791_vm6, %v8759_v52, %v8779_v38  ;;  %v2034_v25 = vmul.f32 %v3854_v53, %v2007_v19  ;;  %v2047_v24 = vadd.f32 %v2031_v27, %v1967_v41  ;;  %v2046_v38 = vadd.f32 %v2030_v20, %v1966_v62  ;;  %v3859_v17 = vld [vmem:[#allocation5 + $0x450] sm:$0xff]  ;;  %v3861_v45 = vld [vmem:[#allocation5 + $0x438] sm:$0xff]  ;;  %v3864_v19 = vld [vmem:[#allocation5 + $0x2a8] sm:$0xff] }
 0x5d8   :  { %v1970_v61 = vadd.f32 %v1954_v36, %v1890_v32  ;;  %v1971_v57 = vadd.f32 %v1955_v9, %v1891_v23  ;;  %2173 = vmatpush.msra.mxu1 %v2129_v10  ;;  %v2128_v12 = vadd.f32 %v2112_v60, %v2048_v56  ;;  %v1885_v7 = vadd.f32 %v6628_v30, %v6577_v16  ;;  %v8784_v60 = vld [vmem:[#allocation49_spill] sm:$0xff]  ;;  %v3863_v36 = vld [vmem:[#allocation5 + $0x3c0] sm:$0xff]  ;;  %v8787_v30 = vld [vmem:[#allocation62_spill] sm:$0xff] }
 0x5d9   :  { %v2110_v51 = vmul.f32 %v3859_v17, %v2086_v11  ;;  %v2029_v1 = vmul.f32 %v3860_v5, %v2010_v44  ;;  %v1864_v54 = vmul.f32 %v3862_v29, %v8784_v60  ;;  %v2028_v9 = vmul.f32 %v3863_v36, %v8785_v43  ;;  %v8786_v32 = vld [vmem:[#allocation21_spill] sm:$0xff]  ;;  %v8788_v23 = vld [vmem:[#allocation59_spill] sm:$0xff]  ;;  %v8791_v27 = vld [vmem:[#allocation50_spill] sm:$0xff] }
 0x5da   :  { %v2083_v39 = vpop.permute.xlu1 %2082  ;;  %v6806_v49 = vpop.permute.xlu0 %2054  ;;  %2144 = vmatpush.msra.mxu0 %v2128_v12  ;;  %v2050_v55 = vadd.f32 %v2034_v25, %v1970_v61  ;;  %v2051_v50 = vadd.f32 %v2035_v31, %v1971_v57  ;;  %v2042_v16 = vadd.f32 %v8787_v30, %v8786_v32  ;;  %v8789_v10 = vld [vmem:[#allocation55_spill] sm:$0xff]  ;;  %v1965_v4 = vadd.f32 %v6634_v48, %v1885_v7  ;;  %v8792_v61 = vld [vmem:[#allocation60_spill] sm:$0xff]  ;;  %v8793_v12 = vld [vmem:[#allocation65_spill] sm:$0xff] }
 0x5db   :  { %v2087_v21 = vsel %vm889_vm7, %v2075_v22, %v2083_v39  ;;  %v2099_v37 = vsel %vm889_vm7, %v2083_v39, %v6524_v34  ;;  %v2097_v52 = vsel %vm889_vm7, %v8748_v2, %v6806_v49  ;;  %v3858_v22 = vld [vmem:[#allocation5 + $0x458] sm:$0xff]  ;;  %v8783_v34 = vld [vmem:[#allocation40_spill] sm:$0xff]  ;;  %v2043_v56 = vadd.f32 %v8789_v10, %v8788_v23  ;;  %v8805_v30 = vld [vmem:[#allocation73_spill] sm:$0xff] }
 0x5dc   :  { %v2114_v14 = vmul.f32 %v3856_v0, %v2087_v21  ;;  %v2115_v47 = vmul.f32 %v3857_v3, %v2099_v37  ;;  %v2111_v26 = vmul.f32 %v3858_v22, %v2098_v18  ;;  %v1964_v63 = vadd.f32 %v8783_v34, %v1884_v28  ;;  %v6834_v28 = vpop.permute.xlu2 %2052  ;;  %v8795_v11 = vld [vmem:[#allocation80_spill] sm:$0xff]  ;;  %v3869_v3 = vld [vmem:[#allocation5 + $0x328] sm:$0xff]  ;;  %v8801_v29 = vld [vmem:[#allocation71_spill] sm:$0xff] }
 0x5dd   :  { %v2107_v41 = vmul.f32 %v3861_v45, %v2097_v52  ;;  %v2126_v46 = vadd.f32 %v2110_v51, %v2046_v38  ;;  %v1865_v13 = vmul.f32 %v3864_v19, %v8790_v35  ;;  %v1800_v57 = vadd.f32 %v8792_v61, %v8791_v27  ;;  %v3865_v37 = vld [vmem:[#allocation5 + $0x440] sm:$0xff]  ;;  %v3866_v38 = vld [vmem:[#allocation5 + $0x448] sm:$0xff]  ;;  %v8800_v45 = vld [vmem:[#allocation102_spill] sm:$0xff] }
 0x5de   :  { %v2130_v58 = vadd.f32 %v2114_v14, %v2050_v55  ;;  %v2131_v2 = vadd.f32 %v2115_v47, %v2051_v50  ;;  %v2127_v20 = vadd.f32 %v2111_v26, %v2047_v24  ;;  %v1929_v18 = vsel %vm693_vm5, %v8794_v33, %v8793_v12  ;;  %v3867_v50 = vld [vmem:[#allocation5 + $0x410] sm:$0xff]  ;;  %v3868_v14 = vld [vmem:[#allocation5 + $0x418] sm:$0xff]  ;;  %v8797_v22 = vld [vmem:[#allocation68_spill] sm:$0xff] }
 0x5df   :  { %v2122_v62 = vadd.f32 %v8795_v11, %v2042_v16  ;;  %v2123_v53 = vadd.f32 %v2107_v41, %v2043_v56  ;;  %v2044_v25 = vadd.f32 %v2028_v9, %v1964_v63  ;;  %v2045_v8 = vadd.f32 %v2029_v1, %v1965_v4  ;;  %v8798_v63 = vld [vmem:[#allocation24_spill] sm:$0xff]  ;;  %v8804_v9 = vld [vmem:[#allocation45_spill] sm:$0xff]  ;;  %v8808_v27 = vld [vmem:[#allocation103_spill] sm:$0xff] }
 0x5e0   :  { %2202 = vmatpush.msra.mxu2 %v2130_v58  ;;  %2231 = vmatpush.msra.mxu3 %v2131_v2  ;;  %v1945_v47 = vmul.f32 %v3869_v3, %v1929_v18  ;;  %v2013_v26 = vsel %vm791_vm6, %v8797_v22, %v6750_v40  ;;  %v1880_v17 = vadd.f32 %v1864_v54, %v1800_v57  ;;  %v8799_v1 = vld [vmem:[#allocation48_spill] sm:$0xff]  ;;  %v3873_v56 = vld [vmem:[#allocation5 + $0x3a8] sm:$0xff]  ;;  %v8813_v3 = vld [vmem:[#allocation35_spill] sm:$0xff] }
 0x5e1   :  { %v6859_v2 = vld [vmem:[#allocation5 + $0x180] sm:$0xff]  ;;  %v1881_v16 = vadd.f32 %v1865_v13, %v8805_v30 }
 0x5e2   :  { %v2065_v48 = vpop.permute.xlu1 %2064  ;;  %2203 = vmatpush.msra.mxu2 %v2126_v46  ;;  %2232 = vmatpush.msra.mxu3 %v2127_v20  ;;  %v2077_v44 = vpop.permute.xlu0 %2076  ;;  %v1780_v41 = vmul.f32 %v6859_v2, %v8800_v45  ;;  %v8802_v60 = vld [vmem:[#allocation76_spill] sm:$0xff]  ;;  %v6873_v46 = vld [vmem:[#allocation5 + $0x188] sm:$0xff] }
 0x5e3   :  { %v2090_v31 = vsel %vm889_vm7, %v2065_v48, %v8782_v59  ;;  %v2094_v39 = vsel %vm889_vm7, %v8780_v6, %v2065_v48  ;;  %v2084_v24 = vsel %vm889_vm7, %v6788_v42, %v2077_v44  ;;  %v2096_v21 = vsel %vm889_vm7, %v2077_v44, %v6834_v28  ;;  %v8796_v6 = vld [vmem:[#allocation66_spill] sm:$0xff]  ;;  %v3871_v43 = vld [vmem:[#allocation5 + $0x320] sm:$0xff]  ;;  %v8806_v20 = vld [vmem:[#allocation101_spill] sm:$0xff] }
 0x5e4   :  { %v2108_v52 = vmul.f32 %v3865_v37, %v2094_v39  ;;  %v2109_v55 = vmul.f32 %v3866_v38, %v2090_v31  ;;  %v2102_v0 = vmul.f32 %v3867_v50, %v2084_v24  ;;  %v2103_v59 = vmul.f32 %v3868_v14, %v2096_v21  ;;  %2204 = vmatpush.msra.mxu2 %v2122_v62  ;;  %v3872_v23 = vld [vmem:[#allocation5 + $0x3a0] sm:$0xff]  ;;  %v8811_v31 = vld [vmem:[#allocation31_spill] sm:$0xff]  ;;  %v8812_v24 = vld [vmem:[#allocation17_spill] sm:$0xff] }
 0x5e5   :  { %v2009_v7 = vsel %vm791_vm6, %v6750_v40, %v8796_v6  ;;  %2233 = vmatpush.msra.mxu3 %v2123_v53  ;;  %v1848_v36 = vsel %vm595_vm4, %v8802_v60, %v8801_v29  ;;  %v8803_v40 = vld [vmem:[#allocation20_spill] sm:$0xff]  ;;  %v1944_v32 = vmul.f32 %v3871_v43, %v8804_v9  ;;  %v2024_v10 = vmul.f32 %v3872_v23, %v2013_v26  ;;  %v6885_v53 = vld [vmem:[#allocation5 + $0x288] sm:$0xff] }
 0x5e6   :  { %v2124_v51 = vadd.f32 %v2108_v52, %v2044_v25  ;;  %v2125_v34 = vadd.f32 %v2109_v55, %v2045_v8  ;;  %v2118_v5 = vadd.f32 %v2102_v0, %v8798_v63  ;;  %v2119_v58 = vadd.f32 %v2103_v59, %v8799_v1  ;;  %v8807_v35 = vld [vmem:[#allocation100_spill] sm:$0xff]  ;;  %v8810_v8 = vld [vmem:[#allocation42_spill] sm:$0xff]  ;;  %v3879_v55 = vld [vmem:[#allocation5 + $0x428] sm:$0xff] }
 0x5e7   :  { %v1852_v54 = vsel %vm595_vm4, %v8803_v40, %v8802_v60  ;;  %v2025_v4 = vmul.f32 %v3873_v56, %v2009_v7  ;;  %v1781_v19 = vmul.f32 %v6873_v46, %v8806_v20  ;;  %v1717_v61 = vadd.f32 %v8808_v27, %v8807_v35  ;;  %v8809_v57 = vld [vmem:[#allocation104_spill] sm:$0xff]  ;;  %v8814_v6 = vld [vmem:[#allocation33_spill] sm:$0xff]  ;;  %v8815_v63 = vld [vmem:[#allocation99_spill] sm:$0xff] }
 0x5e8   :  { %2145 = vmatpush.msra.mxu0 %v2124_v51  ;;  %2174 = vmatpush.msra.mxu1 %v2125_v34  ;;  %v1796_v12 = vadd.f32 %v1780_v41, %v8809_v57  ;;  %v6880_v33 = vld [vmem:[#allocation5 + $0x280] sm:$0xff]  ;;  %v1961_v18 = vadd.f32 %v1945_v47, %v1881_v16  ;;  %v1960_v48 = vadd.f32 %v1944_v32, %v1880_v17  ;;  %v6904_v26 = vld [vmem:[#allocation5 + $0x308] sm:$0xff]  ;;  %v3889_v27 = vld [vmem:[#allocation8 + $0x10] sm:$0xff] }
 0x5e9   :  { %2205 = vmatpush.msra.mxu2 %v2118_v5  ;;  %2234 = vmatpush.msra.mxu3 %v2119_v58  ;;  %v1860_v13 = vmul.f32 %v6880_v33, %v1852_v54  ;;  %v3876_v44 = vld [vmem:[#allocation7] sm:$0xff]  ;;  %v1861_v25 = vmul.f32 %v6885_v53, %v1848_v36  ;;  %v1928_v39 = vsel %vm693_vm5, %v8811_v31, %v8810_v8  ;;  %v3883_v41 = vld [vmem:[#allocation5 + $0x388] sm:$0xff] }
 0x5ea   :  { %v1981_v11 = vpop.permute.xlu1 %1980  ;;  %v2063_v62 = vpop.permute.xlu0 %2062  ;;  %3639 = vmatmul.msk.f32.vlgmr.msra.gmra.mxu2 %vm975_vm8, %v3876_v44  ;;  %3643 = vmatmul.msk.f32.vlgmr.msra.gmra.mxu3 %vm975_vm8, %v3876_v44  ;;  %v3878_v52 = vld [vmem:[#allocation5 + $0x420] sm:$0xff]  ;;  %v2040_v0 = vadd.f32 %v2024_v10, %v1960_v48  ;;  %v2041_v14 = vadd.f32 %v2025_v4, %v1961_v18  ;;  %v1797_v59 = vadd.f32 %v1781_v19, %v1717_v61  ;;  %v3884_v54 = vld [vmem:[#allocation7 + $0x8] sm:$0xff]  ;;  %v3887_v19 = vld [vmem:[#allocation7 + $0x10] sm:$0xff] }
 0x5eb   :  { %v2089_v21 = vsel %vm889_vm7, %v2063_v62, %v8812_v24  ;;  %v2093_v37 = vsel %vm889_vm7, %v6806_v49, %v2063_v62  ;;  %v2008_v47 = vsel %vm791_vm6, %v1981_v11, %v8813_v3  ;;  %v2012_v7 = vsel %vm791_vm6, %v8814_v6, %v1981_v11  ;;  %v6907_v34 = vld [vmem:[#allocation5 + $0x300] sm:$0xff]  ;;  %v3886_v16 = vld [vmem:[#allocation5 + $0x408] sm:$0xff] }
 0x5ec   :  { %v2104_v38 = vmul.f32 %v3878_v52, %v2093_v37  ;;  %v2105_v50 = vmul.f32 %v3879_v55, %v2089_v21  ;;  %v1876_v22 = vadd.f32 %v1860_v13, %v1796_v12  ;;  %v1941_v49 = vmul.f32 %v6904_v26, %v1928_v39  ;;  %v3882_v58 = vld [vmem:[#allocation5 + $0x380] sm:$0xff]  ;;  %v3891_v62 = vld [vmem:[#allocation8 + $0x8] sm:$0xff] }
 0x5ed   :  { %v1940_v5 = vmul.f32 %v6907_v34, %v8815_v63  ;;  %v1877_v1 = vadd.f32 %v1861_v25, %v1797_v59  ;;  %v2020_v45 = vmul.f32 %v3882_v58, %v2012_v7  ;;  %v2021_v29 = vmul.f32 %v3883_v41, %v2008_v47  ;;  %v3885_v32 = vld [vmem:[#allocation5 + $0x400] sm:$0xff]  ;;  %v3894_v47 = vld [vmem:[#allocation8 + $0x28] sm:$0xff]  ;;  %v3895_v7 = vld [vmem:[#allocation8 + $0x30] sm:$0xff] }
 0x5ee   :  { %v2120_v17 = vadd.f32 %v2104_v38, %v2040_v0  ;;  %v2121_v51 = vadd.f32 %v2105_v50, %v2041_v14  ;;  %v3890_v18 = vld [vmem:[#allocation8] sm:$0xff] }
 0x5ef   :  { %v1957_v60 = vadd.f32 %v1941_v49, %v1877_v1  ;;  %v1956_v40 = vadd.f32 %v1940_v5, %v1876_v22  ;;  %v3893_v59 = vld [vmem:[#allocation8 + $0x20] sm:$0xff]  ;;  %v3896_v1 = vld [vmem:[#allocation8 + $0x38] sm:$0xff] }
 0x5f0   :  { %2146 = vmatpush.msra.mxu0 %v2120_v17  ;;  %2175 = vmatpush.msra.mxu1 %v2121_v51 }
 0x5f1   :  { %v2036_v10 = vadd.f32 %v2020_v45, %v1956_v40  ;;  %v2037_v56 = vadd.f32 %v2021_v29, %v1957_v60 }
 0x5f2   :  { %v2061_v36 = vpop.permute.xlu1 %2060  ;;  %3640 = vmatmul.msk.f32.gmra.mxu2 %vm975_vm8, %v3884_v54  ;;  %3644 = vmatmul.msk.f32.gmra.mxu3 %vm975_vm8, %v3884_v54 }
 0x5f3   :  { %v2088_v43 = vsel %vm889_vm7, %v2061_v36, %v6788_v42  ;;  %v2092_v9 = vsel %vm889_vm7, %v6834_v28, %v2061_v36  ;;  %v3888_v42 = vld [vmem:[#allocation7 + $0x18] sm:$0xff] }
 0x5f4   :  { %v2100_v30 = vmul.f32 %v3885_v32, %v2092_v9  ;;  %v2101_v23 = vmul.f32 %v3886_v16, %v2088_v43  ;;  %v3897_v43 = vld [vmem:[#allocation8 + $0x40] sm:$0xff]  ;;  %v3898_v32 = vld [vmem:[#allocation8 + $0x48] sm:$0xff]  ;;  %v3899_v16 = vld [vmem:[#allocation8 + $0x50] sm:$0xff] }
 0x5f6   :  { %v2116_v4 = vadd.f32 %v2100_v30, %v2036_v10  ;;  %v2117_v20 = vadd.f32 %v2101_v23, %v2037_v56  ;;  %v3900_v56 = vld [vmem:[#allocation8 + $0x58] sm:$0xff] }
 0x5f8   :  { %2147 = vmatpush.msra.mxu0 %v2116_v4  ;;  %2176 = vmatpush.msra.mxu1 %v2117_v20 }
 0x5f9   :  { %3631 = vmatmul.msk.f32.vlgmr.msra.gmra.mxu0 %vm975_vm8, %v3876_v44  ;;  %3635 = vmatmul.msk.f32.vlgmr.msra.gmra.mxu1 %vm975_vm8, %v3876_v44  ;;  %v3892_v44 = vld [vmem:[#allocation8 + $0x18] sm:$0xff] }
 0x5fa   :  { %3641 = vmatmul.msk.f32.gmra.mxu2 %vm975_vm8, %v3887_v19  ;;  %3645 = vmatmul.msk.f32.gmra.mxu3 %vm975_vm8, %v3887_v19 }
 0x601   :  { %3632 = vmatmul.msk.f32.gmra.mxu0 %vm975_vm8, %v3884_v54  ;;  %3636 = vmatmul.msk.f32.gmra.mxu1 %vm975_vm8, %v3884_v54 }
 0x602   :  { %3642 = vmatmul.msk.f32.gmra.mxu2 %vm975_vm8, %v3888_v42  ;;  %3646 = vmatmul.msk.f32.gmra.mxu3 %vm975_vm8, %v3888_v42 }
 0x609   :  { %3633 = vmatmul.msk.f32.gmra.mxu0 %vm975_vm8, %v3887_v19  ;;  %3637 = vmatmul.msk.f32.gmra.mxu1 %vm975_vm8, %v3887_v19 }
 0x611   :  { %3634 = vmatmul.msk.f32.gmra.mxu0 %vm975_vm8, %v3888_v42  ;;  %3638 = vmatmul.msk.f32.gmra.mxu1 %vm975_vm8, %v3888_v42 }
 0x66d   :  { %v2207_v28 = vpop.f32.mrf.mxu2  ;;  %v2236_v35 = vpop.f32.mrf.mxu3 }
 0x66e   :  { %v6931_v61 = vadd.f32 %v3889_v27, %v2207_v28  ;;  %v6937_v25 = vadd.f32 %v3892_v44, %v2236_v35 }
 0x670   :  { %v2274_v21 = vmul.f32 %v6931_v61, %v6931_v61  ;;  %v2275_v38 = vmul.f32 %v6937_v25, %v6937_v25 }
 0x675   :  { %v2210_v57 = vpop.f32.mrf.mxu2  ;;  %v2239_v8 = vpop.f32.mrf.mxu3 }
 0x676   :  { %v2149_v12 = vpop.f32.mrf.mxu0  ;;  %v2178_v13 = vpop.f32.mrf.mxu1  ;;  %v6955_v22 = vadd.f32 %v3895_v7, %v2210_v57  ;;  %v6963_v58 = vadd.f32 %v3896_v1, %v2239_v8  ;;  %v3901_v57 = vld [vmem:[#allocation8 + $0x70] sm:$0xff] }
 0x677   :  { %v6933_v11 = vadd.f32 %v3890_v18, %v2149_v12  ;;  %v6935_v48 = vadd.f32 %v3891_v62, %v2178_v13 }
 0x678   :  { %v2278_v60 = vmul.f32 %v6955_v22, %v6955_v22  ;;  %v2279_v10 = vmul.f32 %v6963_v58, %v6963_v58 }
 0x679   :  { %v2272_v31 = vmul.f32 %v6933_v11, %v6933_v11  ;;  %v2248_v39 = vadd.f32 %v6935_v48, %v6933_v11  ;;  %v2273_v24 = vmul.f32 %v6935_v48, %v6935_v48 }
 0x67b   :  { %v2288_v37 = vadd.f32 %v2273_v24, %v2272_v31  ;;  %v2249_v52 = vadd.f32 %v2248_v39, %v6931_v61  ;;  %v3902_v24 = vld [vmem:[#allocation8 + $0x60] sm:$0xff] }
 0x67d   :  { %v2250_v55 = vadd.f32 %v2249_v52, %v6937_v25  ;;  %v2289_v50 = vadd.f32 %v2288_v37, %v2274_v21  ;;  %v2213_v17 = vpop.f32.mrf.mxu2  ;;  %v2242_v45 = vpop.f32.mrf.mxu3  ;;  %v3903_v37 = vld [vmem:[#allocation8 + $0x68] sm:$0xff] }
 0x67e   :  { %v2152_v0 = vpop.f32.mrf.mxu0  ;;  %v2181_v14 = vpop.f32.mrf.mxu1  ;;  %v6973_v23 = vadd.f32 %v3899_v16, %v2213_v17  ;;  %v6977_v4 = vadd.f32 %v3900_v56, %v2242_v45 }
 0x67f   :  { %v6951_v3 = vadd.f32 %v3893_v59, %v2152_v0  ;;  %v6953_v6 = vadd.f32 %v3894_v47, %v2181_v14  ;;  %2251 = vadd.xlane.f32.xlu1 %v2250_v55  ;;  %v2290_v49 = vadd.f32 %v2289_v50, %v2275_v38  ;;  %v3904_v38 = vld [vmem:[#allocation8 + $0x78] sm:$0xff] }
 0x680   :  { %v2282_v62 = vmul.f32 %v6973_v23, %v6973_v23  ;;  %v2283_v50 = vmul.f32 %v6977_v4, %v6977_v4 }
 0x681   :  { %v2276_v51 = vmul.f32 %v6951_v3, %v6951_v3  ;;  %v2253_v63 = vadd.f32 %v6953_v6, %v6951_v3  ;;  %v2277_v5 = vmul.f32 %v6953_v6, %v6953_v6  ;;  %2291 = vadd.xlane.f32.xlu0 %v2290_v49 }
 0x683   :  { %v2254_v41 = vadd.f32 %v2253_v63, %v6955_v22  ;;  %v2293_v29 = vadd.f32 %v2277_v5, %v2276_v51 }
 0x685   :  { %v2255_v36 = vadd.f32 %v2254_v41, %v6963_v58  ;;  %v2294_v28 = vadd.f32 %v2293_v29, %v2278_v60  ;;  %v2216_v35 = vpop.f32.mrf.mxu2  ;;  %v2245_v13 = vpop.f32.mrf.mxu3 }
 0x686   :  { %v2155_v40 = vpop.f32.mrf.mxu0  ;;  %v2184_v54 = vpop.f32.mrf.mxu1  ;;  %v6986_v12 = vadd.f32 %v3901_v57, %v2216_v35  ;;  %v6995_v55 = vadd.f32 %v3904_v38, %v2245_v13 }
 0x687   :  { %v6969_v9 = vadd.f32 %v3897_v43, %v2155_v40  ;;  %v6971_v30 = vadd.f32 %v3898_v32, %v2184_v54  ;;  %2256 = vadd.xlane.f32.xlu2 %v2255_v36  ;;  %v2295_v44 = vadd.f32 %v2294_v28, %v2279_v10 }
 0x688   :  { %v2286_v0 = vmul.f32 %v6986_v12, %v6986_v12  ;;  %v2287_v51 = vmul.f32 %v6995_v55, %v6995_v55 }
 0x689   :  { %v2280_v20 = vmul.f32 %v6969_v9, %v6969_v9  ;;  %v2258_v19 = vadd.f32 %v6971_v30, %v6969_v9  ;;  %v2281_v42 = vmul.f32 %v6971_v30, %v6971_v30 }
 0x68b   :  { %v2259_v27 = vadd.f32 %v2258_v19, %v6973_v23  ;;  %v2298_v18 = vadd.f32 %v2281_v42, %v2280_v20 }
 0x68d   :  { %v2260_v8 = vadd.f32 %v2259_v27, %v6977_v4  ;;  %v2299_v7 = vadd.f32 %v2298_v18, %v2282_v62 }
 0x68e   :  { %v2158_v31 = vpop.f32.mrf.mxu0  ;;  %v2187_v39 = vpop.f32.mrf.mxu1 }
 0x68f   :  { %v6991_v21 = vadd.f32 %v3902_v24, %v2158_v31  ;;  %v6993_v52 = vadd.f32 %v3903_v37, %v2187_v39  ;;  %2296 = vadd.xlane.f32.xlu2 %v2295_v44  ;;  %2261 = vadd.xlane.f32.xlu0 %v2260_v8  ;;  %v2300_v5 = vadd.f32 %v2299_v7, %v2283_v50 }
 0x691   :  { %v2284_v14 = vmul.f32 %v6991_v21, %v6991_v21  ;;  %v2263_v59 = vadd.f32 %v6993_v52, %v6991_v21  ;;  %v2285_v47 = vmul.f32 %v6993_v52, %v6993_v52 }
 0x693   :  { %v2303_v49 = vadd.f32 %v2285_v47, %v2284_v14  ;;  %v2264_v17 = vadd.f32 %v2263_v59, %v6986_v12  ;;  %v3905_v47 = vld [vmem:[%s8243_s5] sm:$0xff] }
 0x695   :  { %v2265_v63 = vadd.f32 %v2264_v17, %v6995_v55  ;;  %v2304_v1 = vadd.f32 %v2303_v49, %v2286_v0 }
 0x697   :  { %2266 = vadd.xlane.f32.xlu2 %v2265_v63  ;;  %2301 = vadd.xlane.f32.xlu0 %v2300_v5  ;;  %v2305_v45 = vadd.f32 %v2304_v1, %v2287_v51 }
 0x699   :  { %2306 = vadd.xlane.f32.xlu1 %v2305_v45 }
 0x6f2   :  { %v2252_v41 = vpop.xlane.xlu1 %2251 }
 0x6f3   :  { %v7011_v29 = vmul.f32 0.001953125, %v2252_v41 }
 0x6f4   :  { %v2292_v60 = vpop.xlane.xlu0 %2291 }
 0x6f5   :  { %v2308_v36 = vmul.f32 0.001953125, %v2292_v60  ;;  %v2312_v40 = vmul.f32 %v7011_v29, %v7011_v29 }
 0x6f7   :  { %v2316_v54 = vsub.f32 %v2308_v36, %v2312_v40 }
 0x6f9   :  { %v2320_v43 = vadd.f32 1e-05, %v2316_v54 }
 0x6fa   :  { %v2257_v32 = vpop.xlane.xlu2 %2256 }
 0x6fb   :  { %3709 = vrsqrt.f32 %v2320_v43  ;;  %v7015_v16 = vmul.f32 0.001953125, %v2257_v32  ;;  %vm2330_vm15 = vweird.f32 %v2320_v43 }
 0x6fd   :  { %v2313_v42 = vmul.f32 %v7015_v16, %v7015_v16 }
 0x701   :  { %v3710_v10 = vpop.eup %3709 }
 0x702   :  { %v2325_v56 = vmul.f32 %v3710_v10, %v2320_v43  ;;  %v2297_v20 = vpop.xlane.xlu2 %2296  ;;  %v2262_v19 = vpop.xlane.xlu0 %2261  ;;  %vm2331_vm14 = vweird.f32 %v3710_v10 }
 0x703   :  { %v2309_v28 = vmul.f32 0.001953125, %v2297_v20  ;;  %v7019_v18 = vmul.f32 0.001953125, %v2262_v19  ;;  %vm2332_vm9 = vmor %vm2330_vm15, %vm2331_vm14 }
 0x704   :  { %v2326_v35 = vmul.f32 %v3710_v10, %v2325_v56  ;;  %v3906_v56 = vld [vmem:[%s8243_s5 + $0x8] sm:$0xff] }
 0x705   :  { %v2317_v27 = vsub.f32 %v2309_v28, %v2313_v42  ;;  %v2314_v24 = vmul.f32 %v7019_v18, %v7019_v18 }
 0x706   :  { %v2327_v57 = vmul.f32 0.5, %v2326_v35 }
 0x707   :  { %v2321_v13 = vadd.f32 1e-05, %v2317_v27 }
 0x708   :  { %v2328_v62 = vsub.f32 1.5, %v2327_v57 }
 0x709   :  { %3711 = vrsqrt.f32 %v2321_v13  ;;  %vm2340_vm11 = vweird.f32 %v2321_v13 }
 0x70a   :  { %v2267_v44 = vpop.xlane.xlu2 %2266  ;;  %v2302_v8 = vpop.xlane.xlu0 %2301  ;;  %v2329_v31 = vmul.f32 %v3710_v10, %v2328_v62 }
 0x70b   :  { %v7021_v39 = vmul.f32 0.001953125, %v2267_v44  ;;  %v2310_v37 = vmul.f32 0.001953125, %v2302_v8  ;;  %v3907_v44 = vld [vmem:[%s8243_s5 + $0x10] sm:$0xff] }
 0x70c   :  { %v2307_v38 = vpop.xlane.xlu1 %2306  ;;  %v2333_v50 = vsel %vm2332_vm9, %v3710_v10, %v2329_v31 }
 0x70d   :  { %v2318_v0 = vsub.f32 %v2310_v37, %v2314_v24  ;;  %v2315_v14 = vmul.f32 %v7021_v39, %v7021_v39  ;;  %v2311_v59 = vmul.f32 0.001953125, %v2307_v38  ;;  %v2364_v7 = vmul.f32 %v3905_v47, %v2333_v50  ;;  %v3908_v24 = vld [vmem:[%s8243_s5 + $0x18] sm:$0xff] }
 0x70e   :  { %v2368_v50 = vsub.f32 %v6933_v11, %v7011_v29  ;;  %v2371_v47 = vsub.f32 %v6937_v25, %v7011_v29  ;;  %v2377_v11 = vsub.f32 %v6971_v30, %v7019_v18  ;;  %v2378_v25 = vsub.f32 %v6973_v23, %v7019_v18 }
 0x70f   :  { %v3712_v49 = vpop.eup %3711  ;;  %v2322_v17 = vadd.f32 1e-05, %v2318_v0  ;;  %v2319_v51 = vsub.f32 %v2311_v59, %v2315_v14  ;;  %2386 = vperm.xlu1 %3698, %v2364_v7   ;;  %v2369_v0 = vsub.f32 %v6935_v48, %v7011_v29  ;;  %v2370_v59 = vsub.f32 %v6931_v61, %v7011_v29 }
 0x710   :  { %v2335_v63 = vmul.f32 %v3712_v49, %v2321_v13  ;;  %vm2341_vm10 = vweird.f32 %v3712_v49  ;;  %v2372_v7 = vsub.f32 %v6951_v3, %v7015_v16  ;;  %v2374_v48 = vsub.f32 %v6955_v22, %v7015_v16 }
 0x711   :  { %3713 = vrsqrt.f32 %v2322_v17  ;;  %v2323_v5 = vadd.f32 1e-05, %v2319_v51  ;;  %vm2342_vm12 = vmor %vm2340_vm11, %vm2341_vm10  ;;  %vm2350_vm14 = vweird.f32 %v2322_v17  ;;  %v2375_v61 = vsub.f32 %v6963_v58, %v7015_v16 }
 0x712   :  { %v2336_v1 = vmul.f32 %v3712_v49, %v2335_v63  ;;  %v2379_v3 = vsub.f32 %v6977_v4, %v7019_v18  ;;  %v2382_v22 = vsub.f32 %v6986_v12, %v7021_v39  ;;  %v2383_v58 = vsub.f32 %v6995_v55, %v7021_v39  ;;  %v3911_v55 = vld [vmem:[#allocation10 + $0x60] sm:$0xff] }
 0x713   :  { %3715 = vrsqrt.f32 %v2323_v5  ;;  %vm2360_vm10 = vweird.f32 %v2323_v5 }
 0x714   :  { %v2337_v45 = vmul.f32 0.5, %v2336_v1 }
 0x716   :  { %v2338_v41 = vsub.f32 1.5, %v2337_v45 }
 0x717   :  { %v3714_v60 = vpop.eup %3713 }
 0x718   :  { %v2345_v36 = vmul.f32 %v3714_v60, %v2322_v17  ;;  %v2339_v40 = vmul.f32 %v3712_v49, %v2338_v41  ;;  %vm2351_vm13 = vweird.f32 %v3714_v60  ;;  %v2376_v17 = vsub.f32 %v6969_v9, %v7019_v18 }
 0x719   :  { %v3716_v54 = vpop.eup %3715  ;;  %vm2352_vm9 = vmor %vm2350_vm14, %vm2351_vm13  ;;  %v2381_v9 = vsub.f32 %v6993_v52, %v7021_v39 }
 0x71a   :  { %v2346_v43 = vmul.f32 %v3714_v60, %v2345_v36  ;;  %v2355_v32 = vmul.f32 %v3716_v54, %v2323_v5  ;;  %v2343_v10 = vsel %vm2342_vm12, %v3712_v49, %v2339_v40  ;;  %vm2361_vm15 = vweird.f32 %v3716_v54 }
 0x71b   :  { %v2365_v20 = vmul.f32 %v3906_v56, %v2343_v10  ;;  %vm2362_vm11 = vmor %vm2360_vm10, %vm2361_vm15  ;;  %v2373_v49 = vsub.f32 %v6953_v6, %v7015_v16  ;;  %v2380_v6 = vsub.f32 %v6991_v21, %v7021_v39  ;;  %v3912_v56 = vld [vmem:[#allocation10 + $0x68] sm:$0xff] }
 0x71c   :  { %v2347_v19 = vmul.f32 0.5, %v2346_v43  ;;  %v2356_v42 = vmul.f32 %v3716_v54, %v2355_v32  ;;  %v3909_v43 = vld [vmem:[#allocation10 + $0x40] sm:$0xff]  ;;  %v3910_v32 = vld [vmem:[#allocation10 + $0x48] sm:$0xff] }
 0x71d   :  { %2391 = vperm.xlu0 %3700, %v2365_v20  }
 0x71e   :  { %v2348_v28 = vsub.f32 1.5, %v2347_v19  ;;  %v2357_v35 = vmul.f32 0.5, %v2356_v42  ;;  %v3913_v19 = vld [vmem:[#allocation10 + $0x70] sm:$0xff] }
 0x720   :  { %v2349_v27 = vmul.f32 %v3714_v60, %v2348_v28  ;;  %v2358_v57 = vsub.f32 1.5, %v2357_v35  ;;  %v3914_v28 = vld [vmem:[#allocation10 + $0x78] sm:$0xff] }
 0x722   :  { %v2359_v13 = vmul.f32 %v3716_v54, %v2358_v57  ;;  %v2353_v62 = vsel %vm2352_vm9, %v3714_v60, %v2349_v27  ;;  %v3915_v27 = vld [vmem:[#allocation10 + $0x50] sm:$0xff] }
 0x723   :  { %v2366_v8 = vmul.f32 %v3907_v44, %v2353_v62  ;;  %v3917_v44 = vld [vmem:[#allocation10 + $0x20] sm:$0xff] }
 0x724   :  { %v2363_v31 = vsel %vm2362_vm11, %v3716_v54, %v2359_v13  ;;  %v3916_v13 = vld [vmem:[#allocation10 + $0x58] sm:$0xff] }
 0x725   :  { %2396 = vperm.xlu2 %3699, %v2366_v8   ;;  %v2367_v37 = vmul.f32 %v3908_v24, %v2363_v31  ;;  %v3918_v31 = vld [vmem:[#allocation10 + $0x28] sm:$0xff] }
 0x727   :  { %2401 = vperm.xlu1 %3698, %v2367_v37   ;;  %v8816_v37 = vld [vmem:[#allocation47_spill] sm:$0xff] }
 0x77f   :  { %v2397_v14 = vpop.permute.xlu2 %2396 }
 0x780   :  { %v2412_v30 = vmul.f32 %v2397_v14, %v2376_v17  ;;  %v2413_v51 = vmul.f32 %v2397_v14, %v2377_v11  ;;  %v2414_v16 = vmul.f32 %v2397_v14, %v2378_v25  ;;  %v2415_v23 = vmul.f32 %v2397_v14, %v2379_v3  ;;  %v8818_v14 = vld [vmem:[#allocation64_spill] sm:$0xff]  ;;  %v3920_v11 = vld [vmem:[#allocation10 + $0x38] sm:$0xff]  ;;  %v3922_v3 = vld [vmem:[#allocation10 + $0x8] sm:$0xff] }
 0x781   :  { %v2387_v38 = vpop.permute.xlu1 %2386 }
 0x782   :  { %v2404_v63 = vmul.f32 %v2387_v38, %v2368_v50  ;;  %v2405_v5 = vmul.f32 %v2387_v38, %v2369_v0  ;;  %v2406_v4 = vmul.f32 %v2387_v38, %v2370_v59  ;;  %v2407_v18 = vmul.f32 %v2387_v38, %v2371_v47  ;;  %v8817_v50 = vld [vmem:[#allocation39_spill] sm:$0xff]  ;;  %v8819_v47 = vld [vmem:[#allocation56_spill] sm:$0xff] }
 0x783   :  { %v2428_v12 = vadd.f32 %v3909_v43, %v2412_v30  ;;  %v2429_v10 = vadd.f32 %v3910_v32, %v2413_v51  ;;  %v2430_v57 = vadd.f32 %v3915_v27, %v2414_v16  ;;  %v2431_v62 = vadd.f32 %v3916_v13, %v2415_v23  ;;  %v8821_v30 = vld [vmem:[#allocation54_spill] sm:$0xff]  ;;  %v8828_v43 = vld [vmem:[#allocation41_spill] sm:$0xff]  ;;  %v8829_v32 = vld [vmem:[#allocation16_spill] sm:$0xff] }
 0x784   :  { %v8822_v16 = vld [vmem:[#allocation34_spill] sm:$0xff] }
 0x785   :  { %v2445_v51 = vadd.f32 %v2429_v10, %v8821_v30  ;;  %v2446_v23 = vadd.f32 %v2430_v57, %v8822_v16 }
 0x78f   :  { %v2392_v29 = vpop.permute.xlu0 %2391 }
 0x790   :  { %v2408_v1 = vmul.f32 %v2392_v29, %v2372_v7  ;;  %v2409_v45 = vmul.f32 %v2392_v29, %v2373_v49  ;;  %v2410_v40 = vmul.f32 %v2392_v29, %v2374_v48  ;;  %v2411_v54 = vmul.f32 %v2392_v29, %v2375_v61  ;;  %v3919_v49 = vld [vmem:[#allocation10 + $0x30] sm:$0xff]  ;;  %v3921_v61 = vld [vmem:[#allocation10] sm:$0xff] }
 0x791   :  { %v2420_v25 = vadd.f32 %v3921_v61, %v2404_v63  ;;  %v2421_v29 = vadd.f32 %v3922_v3, %v2405_v5  ;;  %v8824_v63 = vld [vmem:[#allocation51_spill] sm:$0xff] }
 0x792   :  { %v2424_v8 = vadd.f32 %v3917_v44, %v2408_v1  ;;  %v2425_v24 = vadd.f32 %v3918_v31, %v2409_v45  ;;  %v2426_v17 = vadd.f32 %v3919_v49, %v2410_v40  ;;  %v2427_v48 = vadd.f32 %v3920_v11, %v2411_v54  ;;  %v8823_v1 = vld [vmem:[#allocation44_spill] sm:$0xff]  ;;  %v8827_v54 = vld [vmem:[#allocation30_spill] sm:$0xff] }
 0x793   :  { %v2447_v45 = vadd.f32 %v2431_v62, %v8823_v1  ;;  %v2437_v10 = vadd.f32 %v2421_v29, %v8829_v32  ;;  %v3929_v29 = vld [vmem:[#allocation5 + $0x208] sm:$0xff] }
 0x794   :  { %v2440_v5 = vadd.f32 %v2424_v8, %v8824_v63  ;;  %v3932_v63 = vld [vmem:[#allocation5 + $0x108] sm:$0xff] }
 0x799   :  { %v2402_v21 = vpop.permute.xlu1 %2401 }
 0x79a   :  { %v2416_v41 = vmul.f32 %v2402_v21, %v2380_v6  ;;  %v2417_v60 = vmul.f32 %v2402_v21, %v2381_v9  ;;  %v2418_v52 = vmul.f32 %v2402_v21, %v2382_v22  ;;  %v2419_v36 = vmul.f32 %v2402_v21, %v2383_v58  ;;  %v8820_v6 = vld [vmem:[#allocation32_spill] sm:$0xff]  ;;  %v3923_v22 = vld [vmem:[#allocation10 + $0x10] sm:$0xff]  ;;  %v3924_v21 = vld [vmem:[#allocation10 + $0x18] sm:$0xff] }
 0x79b   :  { %v2444_v9 = vadd.f32 %v2428_v12, %v8820_v6  ;;  %v2422_v58 = vadd.f32 %v3923_v22, %v2406_v4  ;;  %v2443_v4 = vadd.f32 %v2427_v48, %v8827_v54  ;;  %v2436_v12 = vadd.f32 %v2420_v25, %v8828_v43 }
 0x79c   :  { %v2432_v39 = vadd.f32 %v3911_v55, %v2416_v41  ;;  %v2433_v20 = vadd.f32 %v3912_v56, %v2417_v60  ;;  %v2434_v42 = vadd.f32 %v3913_v19, %v2418_v52  ;;  %v2435_v35 = vadd.f32 %v3914_v28, %v2419_v36  ;;  %v8825_v60 = vld [vmem:[#allocation72_spill] sm:$0xff]  ;;  %v8826_v36 = vld [vmem:[#allocation38_spill] sm:$0xff]  ;;  %v3926_v19 = vld [vmem:[%s8240_s2 + $0x8] sm:$0xff] }
 0x79d   :  { %v2423_v41 = vadd.f32 %v3924_v21, %v2407_v18  ;;  %v2441_v52 = vadd.f32 %v2425_v24, %v8825_v60  ;;  %v2442_v40 = vadd.f32 %v2426_v17, %v8826_v36  ;;  %v8830_v18 = vld [vmem:[#allocation18_spill] sm:$0xff]  ;;  %v3928_v28 = vld [vmem:[%s8240_s2 + $0x18] sm:$0xff] }
 0x79e   :  { %v2448_v38 = vadd.f32 %v2432_v39, %v8816_v37  ;;  %v2449_v0 = vadd.f32 %v2433_v20, %v8817_v50  ;;  %v2450_v59 = vadd.f32 %v2434_v42, %v8818_v14  ;;  %v2451_v7 = vadd.f32 %v2435_v35, %v8819_v47  ;;  %v8831_v39 = vld [vmem:[#allocation46_spill] sm:$0xff]  ;;  %v3925_v20 = vld [vmem:[%s8240_s2] sm:$0xff] }
 0x79f   :  { %v2438_v55 = vadd.f32 %v2422_v58, %v8830_v18  ;;  %v2439_v56 = vadd.f32 %v2423_v41, %v8831_v39  ;;  %v3927_v42 = vld [vmem:[%s8240_s2 + $0x10] sm:$0xff] }
 0x7a0   :  { %2464 = vmatpush.msrb.mxu0 %v2448_v38  ;;  %2493 = vmatpush.msrb.mxu1 %v2449_v0 }
 0x7a1   :  { %2522 = vmatpush.msrb.mxu2 %v2450_v59  ;;  %2551 = vmatpush.msrb.mxu3 %v2451_v7 }
 0x7a2   :  { %2465 = vmatpush.msrb.mxu0 %v2444_v9  ;;  %2494 = vmatpush.msrb.mxu1 %v2445_v51  ;;  %v3930_v9 = vld [vmem:[#allocation5 + $0x8] sm:$0xff] }
 0x7a3   :  { %2523 = vmatpush.msrb.mxu2 %v2446_v23  ;;  %2552 = vmatpush.msrb.mxu3 %v2447_v45  ;;  %v3931_v51 = vld [vmem:[#allocation5 + $0x88] sm:$0xff] }
 0x7a4   :  { %2466 = vmatpush.msrb.mxu0 %v2440_v5  ;;  %2495 = vmatpush.msrb.mxu1 %v2441_v52 }
 0x7a5   :  { %2524 = vmatpush.msrb.mxu2 %v2442_v40  ;;  %2553 = vmatpush.msrb.mxu3 %v2443_v4 }
 0x7a6   :  { %2467 = vmatpush.msrb.mxu0 %v2436_v12  ;;  %2496 = vmatpush.msrb.mxu1 %v2437_v10 }
 0x7a7   :  { %2525 = vmatpush.msrb.mxu2 %v2438_v55  ;;  %2554 = vmatpush.msrb.mxu3 %v2439_v56 }
 0x7a8   :  { %3647 = vmatmul.msk.f32.vlgmr.msrb.gmra.mxu0 %vm975_vm8, %v3925_v20  ;;  %3651 = vmatmul.msk.f32.vlgmr.msrb.gmra.mxu1 %vm975_vm8, %v3925_v20 }
 0x7a9   :  { %3659 = vmatmul.msk.f32.vlgmr.msrb.gmra.mxu3 %vm975_vm8, %v3925_v20  ;;  %3655 = vmatmul.msk.f32.vlgmr.msrb.gmra.mxu2 %vm975_vm8, %v3925_v20 }
 0x7b0   :  { %3652 = vmatmul.msk.f32.gmra.mxu1 %vm975_vm8, %v3926_v19  ;;  %3648 = vmatmul.msk.f32.gmra.mxu0 %vm975_vm8, %v3926_v19 }
 0x7b1   :  { %3660 = vmatmul.msk.f32.gmra.mxu3 %vm975_vm8, %v3926_v19  ;;  %3656 = vmatmul.msk.f32.gmra.mxu2 %vm975_vm8, %v3926_v19 }
 0x7b8   :  { %3653 = vmatmul.msk.f32.gmra.mxu1 %vm975_vm8, %v3927_v42  ;;  %3649 = vmatmul.msk.f32.gmra.mxu0 %vm975_vm8, %v3927_v42 }
 0x7b9   :  { %3661 = vmatmul.msk.f32.gmra.mxu3 %vm975_vm8, %v3927_v42  ;;  %3657 = vmatmul.msk.f32.gmra.mxu2 %vm975_vm8, %v3927_v42 }
 0x7c0   :  { %3650 = vmatmul.msk.f32.gmra.mxu0 %vm975_vm8, %v3928_v28  ;;  %3654 = vmatmul.msk.f32.gmra.mxu1 %vm975_vm8, %v3928_v28 }
 0x7c1   :  { %3658 = vmatmul.msk.f32.gmra.mxu2 %vm975_vm8, %v3928_v28  ;;  %3662 = vmatmul.msk.f32.gmra.mxu3 %vm975_vm8, %v3928_v28 }
 0x825   :  { %v7115_v35 = vpop.f32.mrf.mxu0  ;;  %v7117_v27 = vpop.f32.mrf.mxu1 }
 0x826   :  { %8832 = vst [vmem:[#allocation57_spill] sm:$0xff] %v7115_v35  ;;  %v7120_v57 = vmax.f32 %v7115_v35, 0.0  ;;  %v7123_v13 = vmax.f32 %v7117_v27, 0.0  ;;  %v3995_v35 = vld [vmem:[#allocation5 + $0x50] sm:$0xff] }
 0x827   :  { %8833 = vst [vmem:[#allocation36_spill] sm:$0xff] %v7117_v27 }
 0x828   :  { %2688 = vrot.lane.b32.xlu1 %v7123_v13, %s4269_s26  ;;  %2608 = vrot.lane.b32.xlu2 %v7123_v13, %s4268_s6  ;;  %v2585_v6 = vmul.f32 %v3929_v29, %v7123_v13 }
 0x829   :  { %2600 = vrot.lane.b32.xlu0 %v7120_v57, %s4268_s6 }
 0x82c   :  { %v7149_v62 = vpop.f32.mrf.mxu3  ;;  %v7160_v8 = vpop.f32.mrf.mxu2 }
 0x82d   :  { %8834 = vst [vmem:[#allocation81_spill] sm:$0xff] %v7149_v62  ;;  %v7152_v44 = vmax.f32 %v7149_v62, 0.0  ;;  %v7163_v31 = vmax.f32 %v7160_v8, 0.0  ;;  %v7177_v24 = vpop.f32.mrf.mxu1  ;;  %v7188_v38 = vpop.f32.mrf.mxu0  ;;  %v3994_v62 = vld [vmem:[#allocation5 + $0xc0] sm:$0xff] }
 0x82e   :  { %8835 = vst [vmem:[#allocation98_spill] sm:$0xff] %v7160_v8  ;;  %v7180_v37 = vmax.f32 %v7177_v24, 0.0  ;;  %v7191_v50 = vmax.f32 %v7188_v38, 0.0 }
 0x82f   :  { %8836 = vst [vmem:[#allocation84_spill] sm:$0xff] %v7177_v24  ;;  %v3993_v24 = vld [vmem:[#allocation5 + $0x40] sm:$0xff] }
 0x830   :  { %2760 = vrot.lane.b32.xlu1 %v7120_v57, %s4270_s27  ;;  %2680 = vrot.lane.b32.xlu2 %v7120_v57, %s4269_s26  ;;  %8837 = vst [vmem:[#allocation43_spill] sm:$0xff] %v7188_v38 }
 0x831   :  { %2768 = vrot.lane.b32.xlu0 %v7123_v13, %s4270_s27 }
 0x834   :  { %v7225_v14 = vpop.f32.mrf.mxu3  ;;  %v7244_v49 = vpop.f32.mrf.mxu2 }
 0x835   :  { %8838 = vst [vmem:[#allocation25_spill] sm:$0xff] %v7225_v14  ;;  %v7228_v47 = vmax.f32 %v7225_v14, 0.0  ;;  %v7257_v3 = vmax.f32 %v7244_v49, 0.0  ;;  %v7294_v4 = vpop.f32.mrf.mxu1  ;;  %v7322_v20 = vpop.f32.mrf.mxu0 }
 0x836   :  { %8839 = vst [vmem:[#allocation19_spill] sm:$0xff] %v7244_v49  ;;  %v7312_v39 = vmax.f32 %v7294_v4, 0.0 }
 0x837   :  { %8840 = vst [vmem:[#allocation67_spill] sm:$0xff] %v7294_v4 }
 0x838   :  { %2848 = vrot.lane.b32.xlu1 %v7123_v13, %s4271_s28  ;;  %2928 = vrot.lane.b32.xlu2 %v7123_v13, %s4272_s29  ;;  %8841 = vst [vmem:[#allocation23_spill] sm:$0xff] %v7322_v20 }
 0x839   :  { %2920 = vrot.lane.b32.xlu0 %v7120_v57, %s4272_s29 }
 0x840   :  { %2840 = vrot.lane.b32.xlu1 %v7120_v57, %s4271_s28  ;;  %3080 = vrot.lane.b32.xlu2 %v7120_v57, %s4274_s8 }
 0x841   :  { %3008 = vrot.lane.b32.xlu0 %v7123_v13, %s4273_s30 }
 0x848   :  { %3000 = vrot.lane.b32.xlu1 %v7120_v57, %s4273_s30  ;;  %2704 = vrot.lane.b32.xlu2 %v7152_v44, %s4269_s26 }
 0x849   :  { %2624 = vrot.lane.b32.xlu0 %v7152_v44, %s4268_s6 }
 0x850   :  { %2616 = vrot.lane.b32.xlu1 %v7163_v31, %s4268_s6  ;;  %2776 = vrot.lane.b32.xlu2 %v7163_v31, %s4270_s27 }
 0x851   :  { %2696 = vrot.lane.b32.xlu0 %v7163_v31, %s4269_s26 }
 0x858   :  { %3024 = vrot.lane.b32.xlu1 %v7152_v44, %s4273_s30  ;;  %2944 = vrot.lane.b32.xlu2 %v7152_v44, %s4272_s29 }
 0x859   :  { %2784 = vrot.lane.b32.xlu0 %v7152_v44, %s4270_s27 }
 0x860   :  { %2610 = vrot.lane.b32.xlu1 %v7180_v37, %s4268_s6  ;;  %3016 = vrot.lane.b32.xlu2 %v7163_v31, %s4273_s30 }
 0x861   :  { %2856 = vrot.lane.b32.xlu0 %v7163_v31, %s4271_s28 }
 0x868   :  { %3104 = vrot.lane.b32.xlu2 %v7152_v44, %s4274_s8  ;;  %2682 = vrot.lane.b32.xlu1 %v7191_v50, %s4269_s26 }
 0x869   :  { %2864 = vrot.lane.b32.xlu0 %v7152_v44, %s4271_s28 }
 0x870   :  { %2770 = vrot.lane.b32.xlu1 %v7180_v37, %s4270_s27  ;;  %2602 = vrot.lane.b32.xlu2 %v7191_v50, %s4268_s6 }
 0x871   :  { %2936 = vrot.lane.b32.xlu0 %v7163_v31, %s4272_s29 }
 0x878   :  { %2842 = vrot.lane.b32.xlu1 %v7191_v50, %s4271_s28  ;;  %2850 = vrot.lane.b32.xlu2 %v7180_v37, %s4271_s28 }
 0x879   :  { %3096 = vrot.lane.b32.xlu0 %v7163_v31, %s4274_s8 }
 0x880   :  { %3002 = vrot.lane.b32.xlu1 %v7191_v50, %s4273_s30  ;;  %2922 = vrot.lane.b32.xlu2 %v7191_v50, %s4272_s29 }
 0x881   :  { %2690 = vrot.lane.b32.xlu0 %v7180_v37, %s4269_s26 }
 0x882   :  { %v7217_v0 = vpop.permute.xlu2 %2608 }
 0x888   :  { %3090 = vrot.lane.b32.xlu1 %v7180_v37, %s4274_s8  ;;  %2930 = vrot.lane.b32.xlu2 %v7180_v37, %s4272_s29 }
 0x889   :  { %2762 = vrot.lane.b32.xlu0 %v7191_v50, %s4270_s27 }
 0x88a   :  { %v2681_v59 = vpop.permute.xlu2 %2680 }
 0x890   :  { %2706 = vrot.lane.b32.xlu1 %v7228_v47, %s4269_s26  ;;  %3082 = vrot.lane.b32.xlu2 %v7191_v50, %s4274_s8 }
 0x891   :  { %3010 = vrot.lane.b32.xlu0 %v7180_v37, %s4273_s30 }
 0x892   :  { %v7236_v7 = vpop.permute.xlu2 %2928 }
 0x898   :  { %2786 = vrot.lane.b32.xlu1 %v7228_v47, %s4270_s27  ;;  %2626 = vrot.lane.b32.xlu2 %v7228_v47, %s4268_s6 }
 0x899   :  { %3162 = vrot.lane.b32.xlu0 %v7191_v50, %s4275_s9 }
 0x89a   :  { %v7246_v17 = vpop.permute.xlu1 %2688  ;;  %v7248_v11 = vpop.permute.xlu2 %3080 }
 0x89b   :  { %v2720_v48 = vsel %vm301_vm1, %v2681_v59, %v7246_v17  ;;  %v2601_v61 = vpop.permute.xlu0 %2600 }
 0x89c   :  { %v2640_v25 = vsel %vm204_vm0, %v2601_v61, %v7217_v0  ;;  %v2729_v22 = vmul.f32 %v3931_v51, %v2720_v48  ;;  %v3935_v51 = vld [vmem:[#allocation5 + $0x80] sm:$0xff] }
 0x89d   :  { %v2649_v30 = vmul.f32 %v3930_v9, %v2640_v25  ;;  %v3933_v25 = vld [vmem:[#allocation5 + $0x200] sm:$0xff] }
 0x89e   :  { %v2584_v29 = vmul.f32 %v3933_v25, %v7120_v57  ;;  %v3939_v25 = vld [vmem:[#allocation5 + $0x18] sm:$0xff] }
 0x89f   :  { %v2665_v58 = vadd.f32 %v2649_v30, %v2585_v6  ;;  %v3934_v6 = vld [vmem:[#allocation5] sm:$0xff]  ;;  %v7336_v30 = vmax.f32 %v7322_v20, 0.0 }
 0x8a0   :  { %2858 = vrot.lane.b32.xlu1 %v7257_v3, %s4271_s28  ;;  %2698 = vrot.lane.b32.xlu2 %v7257_v3, %s4269_s26 }
 0x8a1   :  { %2618 = vrot.lane.b32.xlu0 %v7257_v3, %s4268_s6  ;;  %v2745_v16 = vadd.f32 %v2729_v22, %v2665_v58 }
 0x8a2   :  { %v7266_v23 = vpop.permute.xlu1 %2760  ;;  %v2705_v1 = vpop.permute.xlu2 %2704 }
 0x8a3   :  { %v2724_v45 = vsel %vm301_vm1, %v2705_v1, %v2681_v59  ;;  %v2769_v21 = vpop.permute.xlu0 %2768 }
 0x8a4   :  { %v2800_v41 = vsel %vm399_vm2, %v7266_v23, %v2769_v21  ;;  %v2728_v22 = vmul.f32 %v3935_v51, %v2724_v45 }
 0x8a5   :  { %v2809_v5 = vmul.f32 %v3932_v63, %v2800_v41  ;;  %v3936_v41 = vld [vmem:[#allocation5 + $0x218] sm:$0xff] }
 0x8a6   :  { %v2587_v63 = vmul.f32 %v3936_v41, %v7152_v44  ;;  %v3942_v41 = vld [vmem:[#allocation5 + $0x110] sm:$0xff] }
 0x8a7   :  { %v2825_v60 = vadd.f32 %v2809_v5, %v2745_v16 }
 0x8a8   :  { %2946 = vrot.lane.b32.xlu1 %v7228_v47, %s4272_s29  ;;  %2866 = vrot.lane.b32.xlu2 %v7228_v47, %s4271_s28 }
 0x8a9   :  { %2778 = vrot.lane.b32.xlu0 %v7257_v3, %s4270_s27 }
 0x8aa   :  { %v7279_v52 = vpop.permute.xlu1 %2848  ;;  %v7281_v36 = vpop.permute.xlu2 %2776 }
 0x8ab   :  { %v2796_v40 = vsel %vm399_vm2, %v2769_v21, %v7281_v36  ;;  %v7286_v54 = vpop.permute.xlu0 %2920 }
 0x8ac   :  { %v2810_v4 = vmul.f32 %v3942_v41, %v2796_v40 }
 0x8b0   :  { %3026 = vrot.lane.b32.xlu1 %v7228_v47, %s4273_s30  ;;  %2938 = vrot.lane.b32.xlu2 %v7257_v3, %s4272_s29 }
 0x8b1   :  { %3106 = vrot.lane.b32.xlu0 %v7228_v47, %s4274_s8 }
 0x8b2   :  { %v7296_v43 = vpop.permute.xlu1 %2840  ;;  %v7298_v12 = vpop.permute.xlu2 %2944 }
 0x8b3   :  { %v2880_v32 = vsel %vm497_vm3, %v7296_v43, %v7279_v52  ;;  %v7308_v10 = vsel %vm595_vm4, %v7298_v12, %v7286_v54  ;;  %v3009_v18 = vpop.permute.xlu0 %3008 }
 0x8b4   :  { %v2889_v55 = vmul.f32 %v6873_v46, %v2880_v32  ;;  %v3937_v32 = vld [vmem:[#allocation5 + $0x210] sm:$0xff] }
 0x8b6   :  { %v7314_v56 = vadd.f32 %v2889_v55, %v2825_v60  ;;  %v3938_v55 = vld [vmem:[#allocation5 + $0x10] sm:$0xff] }
 0x8b8   :  { %3098 = vrot.lane.b32.xlu1 %v7257_v3, %s4274_s8  ;;  %3018 = vrot.lane.b32.xlu2 %v7257_v3, %s4273_s30 }
 0x8b9   :  { %2612 = vrot.lane.b32.xlu0 %v7312_v39, %s4268_s6 }
 0x8ba   :  { %v3001_v19 = vpop.permute.xlu1 %3000  ;;  %v3017_v42 = vpop.permute.xlu2 %3016 }
 0x8bb   :  { %v7326_v46 = vsel %vm693_vm5, %v3001_v19, %v3009_v18  ;;  %v7330_v28 = vsel %vm693_vm5, %v3009_v18, %v3017_v42  ;;  %v2625_v59 = vpop.permute.xlu0 %2624  ;;  %v2586_v18 = vmul.f32 %v3937_v32, %v7163_v31 }
 0x8bc   :  { %v2644_v48 = vsel %vm204_vm0, %v2625_v59, %v2601_v61 }
 0x8bd   :  { %v2648_v9 = vmul.f32 %v3934_v6, %v2644_v48 }
 0x8bf   :  { %v2664_v58 = vadd.f32 %v2648_v9, %v2584_v29 }
 0x8c0   :  { %3186 = vrot.lane.b32.xlu1 %v7228_v47, %s4275_s9  ;;  %3178 = vrot.lane.b32.xlu2 %v7257_v3, %s4275_s9 }
 0x8c1   :  { %2684 = vrot.lane.b32.xlu0 %v7336_v30, %s4269_s26  ;;  %v2744_v61 = vadd.f32 %v2728_v22, %v2664_v58  ;;  %v3940_v22 = vld [vmem:[#allocation5 + $0x90] sm:$0xff] }
 0x8c2   :  { %v2617_v16 = vpop.permute.xlu1 %2616  ;;  %v7344_v21 = vpop.permute.xlu2 %3104 }
 0x8c3   :  { %v2632_v45 = vsel %vm204_vm0, %v2617_v16, %v2625_v59  ;;  %v2636_v5 = vsel %vm204_vm0, %v7217_v0, %v2617_v16  ;;  %v2697_v60 = vpop.permute.xlu0 %2696  ;;  %v3941_v0 = vld [vmem:[#allocation5 + $0x98] sm:$0xff] }
 0x8c4   :  { %v2650_v48 = vmul.f32 %v3938_v55, %v2636_v5  ;;  %v2651_v29 = vmul.f32 %v3939_v25, %v2632_v45  ;;  %v2712_v6 = vsel %vm301_vm1, %v2697_v60, %v2705_v1  ;;  %v2716_v9 = vsel %vm301_vm1, %v7246_v17, %v2697_v60  ;;  %v3943_v55 = vld [vmem:[#allocation5 + $0x100] sm:$0xff]  ;;  %v3944_v25 = vld [vmem:[#allocation5 + $0x118] sm:$0xff] }
 0x8c5   :  { %v2730_v58 = vmul.f32 %v3940_v22, %v2716_v9  ;;  %v2731_v16 = vmul.f32 %v3941_v0, %v2712_v6 }
 0x8c6   :  { %v2666_v59 = vadd.f32 %v2650_v48, %v2586_v18  ;;  %v2667_v51 = vadd.f32 %v2651_v29, %v2587_v63 }
 0x8c8   :  { %v2746_v32 = vadd.f32 %v2730_v58, %v2666_v59  ;;  %v2747_v20 = vadd.f32 %v2731_v16, %v2667_v51  ;;  %2692 = vrot.lane.b32.xlu2 %v7312_v39, %s4269_s26  ;;  %2604 = vrot.lane.b32.xlu1 %v7336_v30, %s4268_s6  ;;  %v7397_v59 = vpop.f32.mrf.mxu3 }
 0x8c9   :  { %2772 = vrot.lane.b32.xlu0 %v7312_v39, %s4270_s27  ;;  %8842 = vst [vmem:[#allocation63_spill] sm:$0xff] %v7397_v59 }
 0x8ca   :  { %v3025_v17 = vpop.permute.xlu1 %3024  ;;  %v7364_v1 = vpop.permute.xlu2 %2602  ;;  %v2826_v63 = vadd.f32 %v2810_v4, %v2746_v32  ;;  %v3946_v32 = vld [vmem:[#allocation5 + $0x198] sm:$0xff] }
 0x8cb   :  { %v7368_v45 = vsel %vm693_vm5, %v3017_v42, %v3025_v17  ;;  %v3044_v40 = vsel %vm693_vm5, %v3025_v17, %v3001_v19  ;;  %v2785_v5 = vpop.permute.xlu0 %2784 }
 0x8cc   :  { %v2792_v60 = vsel %vm399_vm2, %v7281_v36, %v2785_v5  ;;  %v2804_v18 = vsel %vm399_vm2, %v2785_v5, %v7266_v23 }
 0x8cd   :  { %v2808_v48 = vmul.f32 %v3943_v55, %v2804_v18  ;;  %v2811_v4 = vmul.f32 %v3944_v25, %v2792_v60  ;;  %v3947_v60 = vld [vmem:[#allocation5 + $0x298] sm:$0xff] }
 0x8ce   :  { %v2971_v18 = vmul.f32 %v3947_v60, %v7308_v10 }
 0x8cf   :  { %v2824_v29 = vadd.f32 %v2808_v48, %v2744_v61  ;;  %v2827_v6 = vadd.f32 %v2811_v4, %v2747_v20  ;;  %v3945_v61 = vld [vmem:[#allocation5 + $0x190] sm:$0xff]  ;;  %v3124_v48 = vsel %vm791_vm6, %v7344_v21, %v7248_v11  ;;  %v7430_v4 = vpop.f32.mrf.mxu2 }
 0x8d0   :  { %2764 = vrot.lane.b32.xlu2 %v7336_v30, %s4270_s27  ;;  %2852 = vrot.lane.b32.xlu1 %v7312_v39, %s4271_s28  ;;  %8843 = vst [vmem:[#allocation74_spill] sm:$0xff] %v7430_v4 }
 0x8d1   :  { %3012 = vrot.lane.b32.xlu0 %v7312_v39, %s4273_s30 }
 0x8d2   :  { %v7384_v36 = vpop.permute.xlu1 %2610  ;;  %v7386_v19 = vpop.permute.xlu2 %2850 }
 0x8d3   :  { %v2857_v23 = vpop.permute.xlu0 %2856 }
 0x8d4   :  { %v2876_v42 = vsel %vm497_vm3, %v7279_v52, %v2857_v23  ;;  %v2960_v52 = vsel %vm595_vm4, %v7286_v54, %v7236_v7 }
 0x8d5   :  { %v2890_v20 = vmul.f32 %v3945_v61, %v2876_v42  ;;  %v2968_v5 = vmul.f32 %v6880_v33, %v2960_v52  ;;  %v3948_v33 = vld [vmem:[#allocation5 + $0x318] sm:$0xff]  ;;  %v7451_v52 = vmax.f32 %v7430_v4, 0.0 }
 0x8d7   :  { %v2906_v9 = vadd.f32 %v2890_v20, %v2826_v63  ;;  %v7414_v63 = vmax.f32 %v7397_v59, 0.0  ;;  %v3964_v59 = vld [vmem:[#allocation5 + $0x2a0] sm:$0xff] }
 0x8d8   :  { %2844 = vrot.lane.b32.xlu2 %v7336_v30, %s4271_s28  ;;  %2924 = vrot.lane.b32.xlu1 %v7336_v30, %s4272_s29 }
 0x8d9   :  { %3084 = vrot.lane.b32.xlu0 %v7336_v30, %s4274_s8 }
 0x8da   :  { %v7399_v51 = vpop.permute.xlu1 %2682  ;;  %v7401_v22 = vpop.permute.xlu2 %2922 }
 0x8db   :  { %v2865_v58 = vpop.permute.xlu0 %2864 }
 0x8dc   :  { %v2872_v0 = vsel %vm497_vm3, %v2857_v23, %v2865_v58  ;;  %v2884_v16 = vsel %vm497_vm3, %v2865_v58, %v7296_v43  ;;  %v3051_v43 = vmul.f32 %v3948_v33, %v3044_v40  ;;  %v3949_v23 = vld [vmem:[#allocation5 + $0x398] sm:$0xff]  ;;  %v3953_v33 = vld [vmem:[#allocation5 + $0x28] sm:$0xff] }
 0x8dd   :  { %v2888_v41 = vmul.f32 %v6859_v2, %v2884_v16  ;;  %v2891_v17 = vmul.f32 %v3946_v32, %v2872_v0  ;;  %v3048_v2 = vmul.f32 %v6907_v34, %v7326_v46  ;;  %v3131_v42 = vmul.f32 %v3949_v23, %v3124_v48  ;;  %v3950_v16 = vld [vmem:[#allocation5 + $0x290] sm:$0xff] }
 0x8de   :  { %v2641_v48 = vsel %vm204_vm0, %v7364_v1, %v7384_v36 }
 0x8df   :  { %v2904_v54 = vadd.f32 %v2888_v41, %v2824_v29  ;;  %v2907_v55 = vadd.f32 %v2891_v17, %v2827_v6  ;;  %v3049_v17 = vmul.f32 %v6904_v26, %v7330_v28 }
 0x8e0   :  { %3172 = vrot.lane.b32.xlu2 %v7312_v39, %s4275_s9  ;;  %2932 = vrot.lane.b32.xlu1 %v7312_v39, %s4272_s29 }
 0x8e1   :  { %v2984_v25 = vadd.f32 %v2968_v5, %v2904_v54  ;;  %v2987_v10 = vadd.f32 %v2971_v18, %v2907_v55  ;;  %2708 = vrot.lane.b32.xlu0 %v7414_v63, %s4269_s26  ;;  %v3951_v5 = vld [vmem:[#allocation5 + $0x310] sm:$0xff] }
 0x8e2   :  { %v7432_v29 = vpop.permute.xlu1 %2770  ;;  %v7434_v6 = vpop.permute.xlu2 %2930  ;;  %v3050_v60 = vmul.f32 %v3951_v5, %v7368_v45 }
 0x8e3   :  { %v2937_v61 = vpop.permute.xlu0 %2936  ;;  %v7440_v34 = vsel %vm595_vm4, %v7401_v22, %v7434_v6  ;;  %v7442_v46 = vadd.f32 %v3048_v2, %v2984_v25  ;;  %v3067_v40 = vadd.f32 %v3051_v43, %v2987_v10  ;;  %v2653_v43 = vmul.f32 %v3953_v33, %v2641_v48  ;;  %v3954_v10 = vld [vmem:[#allocation5 + $0x228] sm:$0xff]  ;;  %v3958_v48 = vld [vmem:[#allocation5 + $0x20] sm:$0xff] }
 0x8e4   :  { %v2952_v20 = vsel %vm595_vm4, %v2937_v61, %v7298_v12  ;;  %v2956_v58 = vsel %vm595_vm4, %v7236_v7, %v2937_v61  ;;  %v2589_v23 = vmul.f32 %v3954_v10, %v7180_v37  ;;  %v2972_v4 = vmul.f32 %v3964_v59, %v7440_v34 }
 0x8e5   :  { %8844 = vst [vmem:[#allocation58_spill] sm:$0xff] %v7442_v46  ;;  %v2969_v0 = vmul.f32 %v6885_v53, %v2956_v58  ;;  %v2970_v41 = vmul.f32 %v3950_v16, %v2952_v20  ;;  %v7454_v32 = vadd.f32 %v3131_v42, %v3067_v40  ;;  %v3955_v58 = vld [vmem:[#allocation5 + $0xa8] sm:$0xff]  ;;  %v3998_v46 = vld [vmem:[#allocation5 + $0x250] sm:$0xff] }
 0x8e6   :  { %v2669_v20 = vadd.f32 %v2653_v43, %v2589_v23  ;;  %v7530_v43 = vpop.f32.mrf.mxu0  ;;  %v3959_v23 = vld [vmem:[#allocation5 + $0x220] sm:$0xff] }
 0x8e7   :  { %v2985_v12 = vadd.f32 %v2969_v0, %v7314_v56  ;;  %v2986_v18 = vadd.f32 %v2970_v41, %v2906_v9  ;;  %v3952_v9 = vld [vmem:[#allocation5 + $0x390] sm:$0xff]  ;;  %8847 = vst [vmem:[#allocation75_spill] sm:$0xff] %v7530_v43 }
 0x8e8   :  { %2620 = vrot.lane.b32.xlu2 %v7451_v52, %s4268_s6  ;;  %3004 = vrot.lane.b32.xlu1 %v7336_v30, %s4273_s30 }
 0x8e9   :  { %2860 = vrot.lane.b32.xlu0 %v7451_v52, %s4271_s28  ;;  %v3066_v53 = vadd.f32 %v3050_v60, %v2986_v18  ;;  %v7466_v7 = vadd.f32 %v3049_v17, %v2985_v12  ;;  %v3956_v18 = vld [vmem:[#allocation5 + $0x128] sm:$0xff] }
 0x8ea   :  { %v2843_v54 = vpop.permute.xlu1 %2842  ;;  %v7468_v26 = vpop.permute.xlu2 %3082 }
 0x8eb   :  { %8845 = vst [vmem:[#allocation90_spill] sm:$0xff] %v7466_v7  ;;  %v7470_v28 = vpop.permute.xlu0 %3096  ;;  %v2881_v56 = vsel %vm497_vm3, %v2843_v54, %v7386_v19  ;;  %v3997_v7 = vld [vmem:[#allocation5 + $0x58] sm:$0xff] }
 0x8ec   :  { %v3112_v45 = vsel %vm791_vm6, %v7470_v28, %v7344_v21 }
 0x8ed   :  { %v3130_v55 = vmul.f32 %v3952_v9, %v3112_v45  ;;  %v3957_v45 = vld [vmem:[#allocation5 + $0x1a8] sm:$0xff] }
 0x8ee   :  { %v2893_v9 = vmul.f32 %v3957_v45, %v2881_v56 }
 0x8ef   :  { %v7483_v2 = vadd.f32 %v3130_v55, %v3066_v53 }
 0x8f0   :  { %2780 = vrot.lane.b32.xlu2 %v7451_v52, %s4270_s27  ;;  %3092 = vrot.lane.b32.xlu1 %v7312_v39, %s4274_s8 }
 0x8f1   :  { %8846 = vst [vmem:[#allocation87_spill] sm:$0xff] %v7483_v2  ;;  %2868 = vrot.lane.b32.xlu0 %v7414_v63, %s4271_s28  ;;  %v2594_v2 = vmul.f32 %v3998_v46, %v7451_v52 }
 0x8f2   :  { %v7491_v21 = vpop.permute.xlu1 %3002  ;;  %v7493_v25 = vpop.permute.xlu2 %2626 }
 0x8f3   :  { %v2691_v42 = vpop.permute.xlu0 %2690  ;;  %v2645_v61 = vsel %vm204_vm0, %v7493_v25, %v7364_v1 }
 0x8f4   :  { %v2721_v40 = vsel %vm301_vm1, %v7399_v51, %v2691_v42  ;;  %v2652_v33 = vmul.f32 %v3958_v48, %v2645_v61 }
 0x8f5   :  { %v2733_v0 = vmul.f32 %v3955_v58, %v2721_v40 }
 0x8f7   :  { %v2749_v16 = vadd.f32 %v2733_v0, %v2669_v20 }
 0x8f8   :  { %2788 = vrot.lane.b32.xlu2 %v7414_v63, %s4270_s27  ;;  %3164 = vrot.lane.b32.xlu1 %v7336_v30, %s4275_s9 }
 0x8f9   :  { %2948 = vrot.lane.b32.xlu0 %v7414_v63, %s4272_s29 }
 0x8fa   :  { %v7509_v41 = vpop.permute.xlu1 %3090  ;;  %v2699_v1 = vpop.permute.xlu2 %2698 }
 0x8fb   :  { %v2763_v17 = vpop.permute.xlu0 %2762  ;;  %v7515_v5 = vsel %vm791_vm6, %v7468_v26, %v7509_v41  ;;  %v7519_v60 = vsel %vm301_vm1, %v2691_v42, %v2699_v1  ;;  %v2588_v42 = vmul.f32 %v3959_v23, %v7191_v50 }
 0x8fc   :  { %v2801_v12 = vsel %vm399_vm2, %v2763_v17, %v7432_v29 }
 0x8fd   :  { %v2813_v53 = vmul.f32 %v3956_v18, %v2801_v12  ;;  %v3960_v18 = vld [vmem:[#allocation5 + $0xa0] sm:$0xff] }
 0x8ff   :  { %v2829_v55 = vadd.f32 %v2813_v53, %v2749_v16  ;;  %v2668_v16 = vadd.f32 %v2652_v33, %v2588_v42  ;;  %v7544_v53 = vmax.f32 %v7530_v43, 0.0  ;;  %v3961_v33 = vld [vmem:[#allocation5 + $0x120] sm:$0xff]  ;;  %v3962_v42 = vld [vmem:[#allocation5 + $0x2a8] sm:$0xff] }
 0x900   :  { %3020 = vrot.lane.b32.xlu2 %v7451_v52, %s4273_s30  ;;  %2628 = vrot.lane.b32.xlu1 %v7414_v63, %s4268_s6 }
 0x901   :  { %3188 = vrot.lane.b32.xlu0 %v7414_v63, %s4275_s9  ;;  %v2909_v10 = vadd.f32 %v2893_v9, %v2829_v55 }
 0x902   :  { %v2707_v40 = vpop.permute.xlu1 %2706  ;;  %v2867_v56 = vpop.permute.xlu2 %2866 }
 0x903   :  { %v3011_v20 = vpop.permute.xlu0 %3010  ;;  %v2713_v61 = vsel %vm301_vm1, %v2699_v1, %v2707_v40  ;;  %v2725_v58 = vsel %vm301_vm1, %v2707_v40, %v7399_v51  ;;  %v2885_v0 = vsel %vm497_vm3, %v2867_v56, %v2843_v54  ;;  %v7552_v51 = vpop.f32.mrf.mxu1 }
 0x904   :  { %v3041_v12 = vsel %vm693_vm5, %v7491_v21, %v3011_v20  ;;  %v2732_v50 = vmul.f32 %v3960_v18, %v2725_v58  ;;  %8848 = vst [vmem:[#allocation82_spill] sm:$0xff] %v7552_v51  ;;  %v7565_v58 = vmax.f32 %v7552_v51, 0.0 }
 0x906   :  { %v2748_v45 = vadd.f32 %v2732_v50, %v2668_v16  ;;  %v3963_v16 = vld [vmem:[#allocation5 + $0x1a0] sm:$0xff] }
 0x907   :  { %v2892_v18 = vmul.f32 %v3963_v16, %v2885_v0  ;;  %v3970_v16 = vld [vmem:[#allocation5 + $0x38] sm:$0xff] }
 0x908   :  { %3100 = vrot.lane.b32.xlu2 %v7451_v52, %s4274_s8  ;;  %2700 = vrot.lane.b32.xlu1 %v7451_v52, %s4269_s26 }
 0x909   :  { %2606 = vrot.lane.b32.xlu0 %v7544_v53, %s4268_s6 }
 0x90a   :  { %v7554_v54 = vpop.permute.xlu1 %2786  ;;  %v2939_v1 = vpop.permute.xlu2 %2938 }
 0x90b   :  { %v7556_v9 = vpop.permute.xlu0 %3162  ;;  %v2805_v55 = vsel %vm399_vm2, %v7554_v54, %v2763_v17  ;;  %v2957_v48 = vsel %vm595_vm4, %v7434_v6, %v2939_v1  ;;  %v3965_v17 = vld [vmem:[#allocation5 + $0x238] sm:$0xff] }
 0x90c   :  { %v2812_v23 = vmul.f32 %v3961_v33, %v2805_v55  ;;  %v2973_v40 = vmul.f32 %v3962_v42, %v2957_v48  ;;  %v2591_v55 = vmul.f32 %v3965_v17, %v7228_v47 }
 0x90e   :  { %v2828_v50 = vadd.f32 %v2812_v23, %v2748_v45  ;;  %v2989_v43 = vadd.f32 %v2973_v40, %v2909_v10  ;;  %v3966_v10 = vld [vmem:[#allocation5 + $0x320] sm:$0xff]  ;;  %v3968_v23 = vld [vmem:[#allocation5 + $0x230] sm:$0xff] }
 0x90f   :  { %v3052_v48 = vmul.f32 %v3966_v10, %v3041_v12  ;;  %v2590_v42 = vmul.f32 %v3968_v23, %v7257_v3  ;;  %v3969_v40 = vld [vmem:[#allocation5 + $0x30] sm:$0xff]  ;;  %v3973_v10 = vld [vmem:[#allocation5 + $0xb8] sm:$0xff] }
 0x910   :  { %v2908_v14 = vadd.f32 %v2892_v18, %v2828_v50  ;;  %2614 = vrot.lane.b32.xlu2 %v7565_v58, %s4268_s6  ;;  %2940 = vrot.lane.b32.xlu1 %v7451_v52, %s4272_s29  ;;  %v3971_v50 = vld [vmem:[#allocation5 + $0x328] sm:$0xff]  ;;  %v2735_v3 = vmul.f32 %v3973_v10, %v2713_v61 }
 0x911   :  { %2854 = vrot.lane.b32.xlu0 %v7565_v58, %s4271_s28 }
 0x912   :  { %v2988_v6 = vadd.f32 %v2972_v4, %v2908_v14  ;;  %v2859_v0 = vpop.permute.xlu1 %2858  ;;  %v7575_v45 = vpop.permute.xlu2 %3018  ;;  %v3967_v4 = vld [vmem:[#allocation5 + $0x3a0] sm:$0xff] }
 0x913   :  { %v2619_v59 = vpop.permute.xlu0 %2618  ;;  %v2873_v34 = vsel %vm497_vm3, %v2859_v0, %v2867_v56  ;;  %v2877_v33 = vsel %vm497_vm3, %v7386_v19, %v2859_v0  ;;  %v3037_v14 = vsel %vm693_vm5, %v3011_v20, %v7575_v45  ;;  %v3132_v47 = vmul.f32 %v3967_v4, %v7515_v5  ;;  %v3972_v0 = vld [vmem:[#allocation5 + $0xb0] sm:$0xff] }
 0x914   :  { %v2633_v12 = vsel %vm204_vm0, %v2619_v59, %v7493_v25  ;;  %v2637_v56 = vsel %vm204_vm0, %v7384_v36, %v2619_v59  ;;  %v3053_v20 = vmul.f32 %v3971_v50, %v3037_v14  ;;  %v3068_v17 = vadd.f32 %v3052_v48, %v2988_v6 }
 0x915   :  { %v2654_v19 = vmul.f32 %v3969_v40, %v2637_v56  ;;  %v2655_v18 = vmul.f32 %v3970_v16, %v2633_v12  ;;  %v2734_v5 = vmul.f32 %v3972_v0, %v7519_v60  ;;  %v3975_v12 = vld [vmem:[#allocation5 + $0x138] sm:$0xff]  ;;  %v3976_v40 = vld [vmem:[#allocation5 + $0x1b0] sm:$0xff] }
 0x916   :  { %v3069_v51 = vadd.f32 %v3053_v20, %v2989_v43  ;;  %v7594_v25 = vadd.f32 %v3132_v47, %v3068_v17  ;;  %v3974_v47 = vld [vmem:[#allocation5 + $0x130] sm:$0xff]  ;;  %v3977_v16 = vld [vmem:[#allocation5 + $0x1b8] sm:$0xff] }
 0x917   :  { %v2670_v4 = vadd.f32 %v2654_v19, %v2590_v42  ;;  %v2671_v23 = vadd.f32 %v2655_v18, %v2591_v55  ;;  %v2894_v19 = vmul.f32 %v3976_v40, %v2877_v33  ;;  %v3978_v20 = vld [vmem:[#allocation5 + $0x2b0] sm:$0xff]  ;;  %v3979_v17 = vld [vmem:[#allocation5 + $0x2b8] sm:$0xff]  ;;  %v3983_v40 = vld [vmem:[#allocation5 + $0x3a8] sm:$0xff] }
 0x918   :  { %8849 = vst [vmem:[#allocation78_spill] sm:$0xff] %v7594_v25  ;;  %3028 = vrot.lane.b32.xlu1 %v7414_v63, %s4273_s30  ;;  %2686 = vrot.lane.b32.xlu2 %v7544_v53, %s4269_s26 }
 0x919   :  { %2846 = vrot.lane.b32.xlu0 %v7544_v53, %s4271_s28  ;;  %v2750_v36 = vadd.f32 %v2734_v5, %v2670_v4  ;;  %v2751_v6 = vadd.f32 %v2735_v3, %v2671_v23 }
 0x91a   :  { %v2947_v48 = vpop.permute.xlu1 %2946  ;;  %v7602_v60 = vpop.permute.xlu2 %3178 }
 0x91b   :  { %v2779_v61 = vpop.permute.xlu0 %2778  ;;  %v2953_v43 = vsel %vm595_vm4, %v2939_v1, %v2947_v48  ;;  %v2965_v55 = vsel %vm595_vm4, %v2947_v48, %v7401_v22  ;;  %v2895_v1 = vmul.f32 %v3977_v16, %v2873_v34  ;;  %v3984_v16 = vld [vmem:[#allocation5 + $0x3b0] sm:$0xff] }
 0x91c   :  { %v2793_v59 = vsel %vm399_vm2, %v2779_v61, %v7554_v54  ;;  %v2797_v14 = vsel %vm399_vm2, %v7432_v29, %v2779_v61  ;;  %v2974_v29 = vmul.f32 %v3978_v20, %v2953_v43  ;;  %v2975_v0 = vmul.f32 %v3979_v17, %v2965_v55  ;;  %v3981_v61 = vld [vmem:[#allocation5 + $0x338] sm:$0xff] }
 0x91d   :  { %v2814_v42 = vmul.f32 %v3974_v47, %v2797_v14  ;;  %v2815_v56 = vmul.f32 %v3975_v12, %v2793_v59  ;;  %v3982_v55 = vld [vmem:[#allocation5 + $0x3b8] sm:$0xff] }
 0x91f   :  { %v2830_v18 = vadd.f32 %v2814_v42, %v2750_v36  ;;  %v2831_v50 = vadd.f32 %v2815_v56, %v2751_v6  ;;  %v3980_v6 = vld [vmem:[#allocation5 + $0x330] sm:$0xff] }
 0x920   :  { %3108 = vrot.lane.b32.xlu1 %v7414_v63, %s4274_s8  ;;  %2774 = vrot.lane.b32.xlu2 %v7565_v58, %s4270_s27 }
 0x921   :  { %v2910_v22 = vadd.f32 %v2894_v19, %v2830_v18  ;;  %v2911_v54 = vadd.f32 %v2895_v1, %v2831_v50  ;;  %2934 = vrot.lane.b32.xlu0 %v7565_v58, %s4272_s29 }
 0x922   :  { %v3027_v33 = vpop.permute.xlu1 %3026  ;;  %v7621_v5 = vpop.permute.xlu2 %2692 }
 0x923   :  { %v2990_v34 = vadd.f32 %v2974_v29, %v2910_v22  ;;  %v2991_v10 = vadd.f32 %v2975_v0, %v2911_v54  ;;  %v3107_v3 = vpop.permute.xlu0 %3106  ;;  %v3033_v4 = vsel %vm693_vm5, %v7575_v45, %v3027_v33  ;;  %v3045_v23 = vsel %vm693_vm5, %v3027_v33, %v7491_v21  ;;  %v3985_v29 = vld [vmem:[#allocation5 + $0x430] sm:$0xff]  ;;  %v3986_v0 = vld [vmem:[#allocation5 + $0x438] sm:$0xff] }
 0x924   :  { %v3125_v36 = vsel %vm791_vm6, %v3107_v3, %v7468_v26  ;;  %v3054_v48 = vmul.f32 %v3980_v6, %v3033_v4  ;;  %v3055_v43 = vmul.f32 %v3981_v61, %v3045_v23  ;;  %v7673_v4 = vpop.f32.mrf.mxu3  ;;  %v3987_v61 = vld [vmem:[#allocation5 + $0x248] sm:$0xff] }
 0x925   :  { %v3135_v59 = vmul.f32 %v3982_v55, %v3125_v36  ;;  %8852 = vst [vmem:[#allocation77_spill] sm:$0xff] %v7673_v4 }
 0x926   :  { %v3070_v14 = vadd.f32 %v3054_v48, %v2990_v34  ;;  %v3071_v47 = vadd.f32 %v3055_v43, %v2991_v10  ;;  %v2593_v43 = vmul.f32 %v3987_v61, %v7312_v39  ;;  %v3990_v39 = vld [vmem:[#allocation5 + $0x148] sm:$0xff] }
 0x928   :  { %3180 = vrot.lane.b32.xlu1 %v7451_v52, %s4275_s9  ;;  %2926 = vrot.lane.b32.xlu2 %v7544_v53, %s4272_s29  ;;  %v3151_v45 = vadd.f32 %v3135_v59, %v3071_v47 }
 0x929   :  { %3006 = vrot.lane.b32.xlu0 %v7544_v53, %s4273_s30 }
 0x92a   :  { %v3099_v21 = vpop.permute.xlu1 %3098  ;;  %v7638_v26 = vpop.permute.xlu2 %2764 }
 0x92b   :  { %v2613_v42 = vpop.permute.xlu0 %2612  ;;  %v3113_v12 = vsel %vm791_vm6, %v3099_v21, %v3107_v3  ;;  %v3117_v56 = vsel %vm791_vm6, %v7509_v41, %v3099_v21  ;;  %v7671_v3 = vpop.f32.mrf.mxu2  ;;  %v7693_v21 = vmax.f32 %v7673_v4, 0.0 }
 0x92c   :  { %v3133_v19 = vmul.f32 %v3983_v40, %v3117_v56  ;;  %v3134_v1 = vmul.f32 %v3984_v16, %v3113_v12  ;;  %8851 = vst [vmem:[#allocation69_spill] sm:$0xff] %v7671_v3  ;;  %v3989_v12 = vld [vmem:[#allocation5 + $0xc8] sm:$0xff] }
 0x92e   :  { %v7645_v18 = vadd.f32 %v3133_v19, %v3069_v51  ;;  %v3150_v50 = vadd.f32 %v3134_v1, %v3070_v14  ;;  %v3988_v14 = vld [vmem:[#allocation5 + $0x48] sm:$0xff] }
 0x930   :  { %8850 = vst [vmem:[#allocation79_spill] sm:$0xff] %v7645_v18  ;;  %2694 = vrot.lane.b32.xlu1 %v7565_v58, %s4269_s26  ;;  %3094 = vrot.lane.b32.xlu2 %v7565_v58, %s4274_s8  ;;  %v3996_v18 = vld [vmem:[#allocation5 + $0x140] sm:$0xff] }
 0x931   :  { %3014 = vrot.lane.b32.xlu0 %v7565_v58, %s4273_s30 }
 0x932   :  { %v3187_v22 = vpop.permute.xlu1 %3186  ;;  %v7653_v54 = vpop.permute.xlu2 %2844 }
 0x933   :  { %v3193_v41 = vsel %vm889_vm7, %v7602_v60, %v3187_v22  ;;  %v3205_v51 = vsel %vm889_vm7, %v3187_v22, %v7556_v9  ;;  %v2685_v20 = vpop.permute.xlu0 %2684 }
 0x934   :  { %v3214_v17 = vmul.f32 %v3985_v29, %v3193_v41  ;;  %v3215_v33 = vmul.f32 %v3986_v0, %v3205_v51  ;;  %v2722_v6 = vsel %vm301_vm1, %v2685_v20, %v7621_v5 }
 0x935   :  { %v2737_v56 = vmul.f32 %v3989_v12, %v2722_v6 }
 0x936   :  { %v7661_v34 = vadd.f32 %v3215_v33, %v3151_v45  ;;  %v7663_v10 = vadd.f32 %v3214_v17, %v3150_v50  ;;  %v7690_v45 = vmax.f32 %v7671_v3, 0.0  ;;  %v3991_v17 = vld [vmem:[#allocation5 + $0x1c8] sm:$0xff]  ;;  %v3992_v3 = vld [vmem:[#allocation5 + $0x240] sm:$0xff] }
 0x937   :  { %v2592_v49 = vmul.f32 %v3992_v3, %v7336_v30 }
 0x938   :  { %2766 = vrot.lane.b32.xlu1 %v7544_v53, %s4270_s27  ;;  %3166 = vrot.lane.b32.xlu2 %v7544_v53, %s4275_s9 }
 0x939   :  { %3086 = vrot.lane.b32.xlu0 %v7544_v53, %s4274_s8 }
 0x93a   :  { %v7675_v23 = vpop.permute.xlu2 %3172  ;;  %v7677_v36 = vpop.permute.xlu1 %2604 }
 0x93b   :  { %v2773_v48 = vpop.permute.xlu0 %2772  ;;  %v2642_v55 = vsel %vm204_vm0, %v7677_v36, %v2613_v42 }
 0x93c   :  { %v2802_v59 = vsel %vm399_vm2, %v7638_v26, %v2773_v48  ;;  %v2657_v47 = vmul.f32 %v3988_v14, %v2642_v55 }
 0x93d   :  { %v2817_v19 = vmul.f32 %v3990_v39, %v2802_v59 }
 0x93e   :  { %v2673_v40 = vadd.f32 %v2657_v47, %v2593_v43 }
 0x940   :  { %v2753_v16 = vadd.f32 %v2737_v56, %v2673_v40  ;;  %2622 = vrot.lane.b32.xlu1 %v7690_v45, %s4268_s6  ;;  %2710 = vrot.lane.b32.xlu2 %v7693_v21, %s4269_s26 }
 0x941   :  { %3174 = vrot.lane.b32.xlu0 %v7565_v58, %s4275_s9 }
 0x942   :  { %v2621_v1 = vpop.permute.xlu2 %2620  ;;  %v2833_v50 = vadd.f32 %v2817_v19, %v2753_v16  ;;  %v2853_v22 = vpop.permute.xlu1 %2852 }
 0x943   :  { %v7703_v41 = vsel %vm204_vm0, %v2613_v42, %v2621_v1  ;;  %v3013_v51 = vpop.permute.xlu0 %3012  ;;  %v2882_v29 = vsel %vm497_vm3, %v7653_v54, %v2853_v22 }
 0x944   :  { %v2897_v0 = vmul.f32 %v3991_v17, %v2882_v29 }
 0x946   :  { %v7708_v33 = vadd.f32 %v2897_v0, %v2833_v50 }
 0x948   :  { %2782 = vrot.lane.b32.xlu1 %v7690_v45, %s4270_s27  ;;  %2862 = vrot.lane.b32.xlu2 %v7690_v45, %s4271_s28 }
 0x949   :  { %2630 = vrot.lane.b32.xlu0 %v7693_v21, %s4268_s6 }
 0x94a   :  { %v2781_v42 = vpop.permute.xlu2 %2780  ;;  %v2925_v6 = vpop.permute.xlu1 %2924 }
 0x94b   :  { %v7718_v61 = vsel %vm399_vm2, %v2773_v48, %v2781_v42  ;;  %v7720_v43 = vpop.permute.xlu0 %3084 }
 0x950   :  { %2790 = vrot.lane.b32.xlu1 %v7693_v21, %s4270_s27  ;;  %2870 = vrot.lane.b32.xlu2 %v7693_v21, %s4271_s28 }
 0x951   :  { %2702 = vrot.lane.b32.xlu0 %v7690_v45, %s4269_s26 }
 0x952   :  { %v2789_v55 = vpop.permute.xlu2 %2788  ;;  %v7728_v59 = vpop.permute.xlu1 %2932 }
 0x953   :  { %v7732_v14 = vsel %vm399_vm2, %v2781_v42, %v2789_v55  ;;  %v2806_v48 = vsel %vm399_vm2, %v2789_v55, %v7638_v26  ;;  %v7737_v47 = vpop.permute.xlu0 %2708  ;;  %v7742_v12 = vsel %vm595_vm4, %v2925_v6, %v7728_v59 }
 0x954   :  { %v2726_v56 = vsel %vm301_vm1, %v7737_v47, %v2685_v20  ;;  %v2816_v25 = vmul.f32 %v3996_v18, %v2806_v48 }
 0x955   :  { %v2736_v8 = vmul.f32 %v3994_v62, %v2726_v56 }
 0x958   :  { %2942 = vrot.lane.b32.xlu1 %v7690_v45, %s4272_s29  ;;  %3022 = vrot.lane.b32.xlu2 %v7690_v45, %s4273_s30 }
 0x959   :  { %2950 = vrot.lane.b32.xlu0 %v7693_v21, %s4272_s29 }
 0x95a   :  { %v7753_v26 = vpop.permute.xlu2 %3020  ;;  %v7755_v40 = vpop.permute.xlu1 %3004 }
 0x95b   :  { %v7760_v39 = vsel %vm693_vm5, %v3013_v51, %v7753_v26  ;;  %v2861_v19 = vpop.permute.xlu0 %2860  ;;  %v7765_v20 = vsel %vm693_vm5, %v7755_v40, %v3013_v51 }
 0x95c   :  { %v7769_v16 = vsel %vm497_vm3, %v2853_v22, %v2861_v19 }
 0x960   :  { %3030 = vrot.lane.b32.xlu1 %v7693_v21, %s4273_s30  ;;  %3110 = vrot.lane.b32.xlu2 %v7693_v21, %s4274_s8 }
 0x961   :  { %3184 = vrot.lane.b32.xlu0 %v7152_v44, %s4275_s9 }
 0x962   :  { %v7777_v50 = vpop.permute.xlu2 %3100  ;;  %v3093_v29 = vpop.permute.xlu1 %3092 }
 0x963   :  { %v2869_v17 = vpop.permute.xlu0 %2868  ;;  %v7782_v51 = vsel %vm791_vm6, %v3093_v29, %v7777_v50  ;;  %v7787_v22 = vsel %vm791_vm6, %v7720_v43, %v3093_v29 }
 0x964   :  { %v7791_v0 = vsel %vm497_vm3, %v2861_v19, %v2869_v17  ;;  %v2886_v44 = vsel %vm497_vm3, %v2869_v17, %v7653_v54 }
 0x968   :  { %3176 = vrot.lane.b32.xlu1 %v7163_v31, %s4275_s9  ;;  %3190 = vrot.lane.b32.xlu2 %v7693_v21, %s4275_s9 }
 0x969   :  { %3102 = vrot.lane.b32.xlu0 %v7690_v45, %s4274_s8 }
 0x96a   :  { %v7802_v42 = vpop.permute.xlu2 %2614  ;;  %v3165_v55 = vpop.permute.xlu1 %3164 }
 0x96b   :  { %v7804_v29 = vpop.permute.xlu0 %2948 }
 0x96c   :  { %v7809_v19 = vsel %vm595_vm4, %v7804_v29, %v2925_v6 }
 0x970   :  { %3160 = vrot.lane.b32.xlu1 %v7120_v57, %s4275_s9  ;;  %3088 = vrot.lane.b32.xlu2 %v7123_v13, %s4274_s8 }
 0x971   :  { %3182 = vrot.lane.b32.xlu0 %v7690_v45, %s4275_s9 }
 0x972   :  { %v2629_v31 = vpop.permute.xlu1 %2628  ;;  %v7817_v54 = vpop.permute.xlu2 %2686 }
 0x973   :  { %v7819_v17 = vpop.permute.xlu0 %3188  ;;  %v2634_v4 = vsel %vm204_vm0, %v2621_v1, %v2629_v31  ;;  %v2646_v6 = vsel %vm204_vm0, %v2629_v31, %v7677_v36  ;;  %v2658_v1 = vmul.f32 %v3995_v35, %v7703_v41 }
 0x974   :  { %v7829_v57 = vsel %vm889_vm7, %v7819_v17, %v3165_v55  ;;  %v2656_v38 = vmul.f32 %v3993_v24, %v2646_v6  ;;  %v2659_v36 = vmul.f32 %v3997_v7, %v2634_v4  ;;  %v3999_v24 = vld [vmem:[#allocation5 + $0x1c0] sm:$0xff]  ;;  %v4003_v4 = vld [vmem:[#allocation5 + $0xd8] sm:$0xff] }
 0x975   :  { %v2896_v62 = vmul.f32 %v3999_v24, %v2886_v44  ;;  %v2674_v7 = vadd.f32 %v2658_v1, %v2594_v2  ;;  %v4004_v2 = vld [vmem:[#allocation5 + $0x150] sm:$0xff]  ;;  %v4006_v44 = vld [vmem:[#allocation5 + $0x340] sm:$0xff] }
 0x976   :  { %v2672_v27 = vadd.f32 %v2656_v38, %v2592_v49  ;;  %v4000_v38 = vld [vmem:[#allocation5 + $0x258] sm:$0xff]  ;;  %v2818_v48 = vmul.f32 %v4004_v2, %v7718_v61 }
 0x977   :  { %v2595_v49 = vmul.f32 %v4000_v38, %v7414_v63  ;;  %v4009_v61 = vld [vmem:[#allocation5 + $0x1d8] sm:$0xff] }
 0x978   :  { %v2752_v31 = vadd.f32 %v2736_v8, %v2672_v27  ;;  %3168 = vrot.lane.b32.xlu2 %v7123_v13, %s4275_s9  ;;  %v4001_v27 = vld [vmem:[#allocation5 + $0x2c0] sm:$0xff] }
 0x979   :  { %3170 = vrot.lane.b32.xlu0 %v7180_v37, %s4275_s9  ;;  %v2976_v8 = vmul.f32 %v4001_v27, %v7742_v12  ;;  %v2675_v52 = vadd.f32 %v2659_v36, %v2595_v49  ;;  %v4005_v12 = vld [vmem:[#allocation5 + $0x158] sm:$0xff]  ;;  %v2899_v49 = vmul.f32 %v4009_v61, %v7791_v0 }
 0x97a   :  { %v2832_v35 = vadd.f32 %v2816_v25, %v2752_v31  ;;  %v2701_v30 = vpop.permute.xlu1 %2700  ;;  %v7839_v18 = vpop.permute.xlu2 %2774  ;;  %v4002_v25 = vld [vmem:[#allocation5 + $0xd0] sm:$0xff]  ;;  %v2819_v56 = vmul.f32 %v4005_v12, %v7732_v14 }
 0x97b   :  { %v2714_v13 = vsel %vm301_vm1, %v2701_v30, %v7737_v47  ;;  %v2718_v37 = vsel %vm301_vm1, %v7621_v5, %v2701_v30  ;;  %v7848_v46 = vpop.permute.xlu0 %2606  ;;  %v3056_v47 = vmul.f32 %v4006_v44, %v7765_v20  ;;  %v3202_v5 = vsel %vm889_vm7, %v3165_v55, %v7675_v23  ;;  %v4007_v31 = vld [vmem:[#allocation5 + $0x1d0] sm:$0xff]  ;;  %v4010_v20 = vld [vmem:[#allocation5 + $0x440] sm:$0xff] }
 0x97c   :  { %v2912_v63 = vadd.f32 %v2896_v62, %v2832_v35  ;;  %v2738_v3 = vmul.f32 %v4002_v25, %v2718_v37  ;;  %v2739_v41 = vmul.f32 %v4003_v4, %v2714_v13  ;;  %v2898_v24 = vmul.f32 %v4007_v31, %v7769_v16  ;;  %v4008_v62 = vld [vmem:[#allocation5 + $0x3c0] sm:$0xff]  ;;  %v4011_v13 = vld [vmem:[#allocation5 + $0x2d8] sm:$0xff]  ;;  %v4012_v25 = vld [vmem:[#allocation5 + $0x2c8] sm:$0xff] }
 0x97d   :  { %v3136_v38 = vmul.f32 %v4008_v62, %v7787_v22  ;;  %v3216_v27 = vmul.f32 %v4010_v20, %v3202_v5  ;;  %v2979_v55 = vmul.f32 %v4011_v13, %v7809_v19  ;;  %v4013_v4 = vld [vmem:[#allocation5 + $0x2d0] sm:$0xff] }
 0x97e   :  { %v2754_v6 = vadd.f32 %v2738_v3, %v2674_v7  ;;  %v2755_v1 = vadd.f32 %v2739_v41, %v2675_v52  ;;  %v2992_v36 = vadd.f32 %v2976_v8, %v2912_v63 }
 0x980   :  { %v2834_v14 = vadd.f32 %v2818_v48, %v2754_v6  ;;  %v2835_v35 = vadd.f32 %v2819_v56, %v2755_v1  ;;  %v3072_v30 = vadd.f32 %v3056_v47, %v2992_v36  ;;  %v4014_v48 = vld [vmem:[#allocation5 + $0x348] sm:$0xff] }
 0x981   :  { %v3057_v12 = vmul.f32 %v4014_v48, %v7760_v39  ;;  %v4016_v39 = vld [vmem:[#allocation5 + $0x350] sm:$0xff] }
 0x982   :  { %v2914_v7 = vadd.f32 %v2898_v24, %v2834_v14  ;;  %v2941_v37 = vpop.permute.xlu1 %2940  ;;  %v7860_v8 = vpop.permute.xlu2 %2926  ;;  %v2915_v52 = vadd.f32 %v2899_v49, %v2835_v35  ;;  %v3152_v16 = vadd.f32 %v3136_v38, %v3072_v30  ;;  %v4018_v30 = vld [vmem:[#allocation5 + $0x3d0] sm:$0xff] }
 0x983   :  { %v2954_v22 = vsel %vm595_vm4, %v2941_v37, %v7804_v29  ;;  %v2958_v0 = vsel %vm595_vm4, %v7728_v59, %v2941_v37  ;;  %v7868_v63 = vpop.permute.xlu0 %2854  ;;  %v4015_v29 = vld [vmem:[#allocation5 + $0x3c8] sm:$0xff] }
 0x984   :  { %v2977_v3 = vmul.f32 %v4012_v25, %v2958_v0  ;;  %v2978_v19 = vmul.f32 %v4013_v4, %v2954_v22  ;;  %v2995_v41 = vadd.f32 %v2979_v55, %v2915_v52  ;;  %v7870_v2 = vadd.f32 %v3216_v27, %v3152_v16  ;;  %v4019_v27 = vld [vmem:[#allocation5 + $0x3d8] sm:$0xff] }
 0x985   :  { %v3137_v47 = vmul.f32 %v4015_v29, %v7782_v51  ;;  %v4020_v55 = vld [vmem:[#allocation5 + $0x458] sm:$0xff]  ;;  %v4024_v29 = vld [vmem:[#allocation5 + $0x268] sm:$0xff] }
 0x986   :  { %v2993_v56 = vadd.f32 %v2977_v3, %v7708_v33  ;;  %v2994_v44 = vadd.f32 %v2978_v19, %v2914_v7  ;;  %v4017_v33 = vld [vmem:[#allocation5 + $0x358] sm:$0xff]  ;;  %v3219_v7 = vmul.f32 %v4020_v55, %v7829_v57  ;;  %v4021_v3 = vld [vmem:[#allocation5 + $0x448] sm:$0xff]  ;;  %v4022_v57 = vld [vmem:[#allocation5 + $0x450] sm:$0xff] }
 0x988   :  { %v3073_v5 = vadd.f32 %v3057_v12, %v2993_v56 }
 0x98a   :  { %v3029_v59 = vpop.permute.xlu1 %3028  ;;  %v3153_v6 = vadd.f32 %v3137_v47, %v3073_v5  ;;  %v7883_v38 = vpop.permute.xlu2 %3094 }
 0x98b   :  { %v3034_v1 = vsel %vm693_vm5, %v7753_v26, %v3029_v59  ;;  %v3046_v36 = vsel %vm693_vm5, %v3029_v59, %v7755_v40  ;;  %v7881_v31 = vpop.permute.xlu0 %2846 }
 0x98c   :  { %v3058_v24 = vmul.f32 %v4016_v39, %v3034_v1  ;;  %v3059_v62 = vmul.f32 %v4017_v33, %v3046_v36  ;;  %v2883_v51 = vsel %vm497_vm3, %v7881_v31, %v7868_v63  ;;  %v4025_v36 = vld [vmem:[#allocation5 + $0xe8] sm:$0xff] }
 0x98e   :  { %v3074_v61 = vadd.f32 %v3058_v24, %v2994_v44  ;;  %v3075_v49 = vadd.f32 %v3059_v62, %v2995_v41  ;;  %v2643_v41 = vsel %vm204_vm0, %v7848_v46, %v7802_v42 }
 0x992   :  { %v3109_v26 = vpop.permute.xlu1 %3108  ;;  %v7898_v16 = vpop.permute.xlu2 %3166 }
 0x993   :  { %v3114_v40 = vsel %vm791_vm6, %v7777_v50, %v3109_v26  ;;  %v3126_v14 = vsel %vm791_vm6, %v3109_v26, %v7720_v43  ;;  %v7895_v35 = vpop.permute.xlu0 %2934  ;;  %v4027_v26 = vld [vmem:[#allocation5 + $0x1e8] sm:$0xff] }
 0x994   :  { %v3138_v20 = vmul.f32 %v4018_v30, %v3114_v40  ;;  %v3139_v13 = vmul.f32 %v4019_v27, %v3126_v14  ;;  %v2901_v40 = vmul.f32 %v4027_v26, %v2883_v51 }
 0x996   :  { %v3154_v37 = vadd.f32 %v3138_v20, %v3074_v61  ;;  %v3155_v52 = vadd.f32 %v3139_v13, %v3075_v49 }
 0x998   :  { %v7900_v22 = vadd.f32 %v3219_v7, %v3155_v52  ;;  %v4028_v52 = vld [vmem:[#allocation5 + $0x60] sm:$0xff] }
 0x99a   :  { %v3181_v50 = vpop.permute.xlu1 %3180  ;;  %v2711_v44 = vpop.permute.xlu2 %2710 }
 0x99b   :  { %v3194_v43 = vsel %vm889_vm7, %v3181_v50, %v7819_v17  ;;  %v3198_v0 = vsel %vm889_vm7, %v7675_v23, %v3181_v50  ;;  %v7908_v25 = vpop.permute.xlu0 %3006  ;;  %v4023_v17 = vld [vmem:[#allocation5 + $0x68] sm:$0xff]  ;;  %v2597_v23 = vmul.f32 %v4024_v29, %v7565_v58 }
 0x99c   :  { %v3217_v4 = vmul.f32 %v4021_v3, %v3198_v0  ;;  %v3218_v19 = vmul.f32 %v4022_v57, %v3194_v43  ;;  %v2661_v56 = vmul.f32 %v4023_v17, %v2643_v41  ;;  %v4026_v58 = vld [vmem:[#allocation5 + $0x168] sm:$0xff]  ;;  %v4029_v0 = vld [vmem:[#allocation5 + $0x260] sm:$0xff]  ;;  %v2727_v3 = vsel %vm301_vm1, %v2711_v44, %v7817_v54 }
 0x99d   :  { %v2596_v51 = vmul.f32 %v4029_v0, %v7544_v53  ;;  %v4031_v53 = vld [vmem:[#allocation5 + $0x70] sm:$0xff]  ;;  %v4039_v0 = vld [vmem:[#allocation5 + $0x2e0] sm:$0xff] }
 0x99e   :  { %v7914_v48 = vadd.f32 %v3217_v4, %v3153_v6  ;;  %v7916_v12 = vadd.f32 %v3218_v19, %v3154_v37  ;;  %v2677_v1 = vadd.f32 %v2661_v56, %v2597_v23 }
 0x9a2   :  { %v2695_v47 = vpop.permute.xlu1 %2694  ;;  %v7924_v24 = vpop.permute.xlu2 %2862 }
 0x9a3   :  { %v2723_v5 = vsel %vm301_vm1, %v7817_v54, %v2695_v47  ;;  %v7922_v59 = vpop.permute.xlu0 %3014  ;;  %v2963_v54 = vsel %vm595_vm4, %v7860_v8, %v7895_v35 }
 0x9a4   :  { %v2741_v39 = vmul.f32 %v4025_v36, %v2723_v5  ;;  %v4033_v5 = vld [vmem:[#allocation5 + $0x278] sm:$0xff] }
 0x9a6   :  { %v2757_v6 = vadd.f32 %v2741_v39, %v2677_v1  ;;  %v2599_v1 = vmul.f32 %v4033_v5, %v7693_v21  ;;  %v4042_v5 = vld [vmem:[#allocation5 + $0x1f0] sm:$0xff] }
 0x9aa   :  { %v2767_v33 = vpop.permute.xlu1 %2766  ;;  %v7935_v13 = vpop.permute.xlu2 %2870 }
 0x9ab   :  { %v2803_v62 = vsel %vm399_vm2, %v2767_v33, %v7839_v18  ;;  %v7929_v61 = vpop.permute.xlu0 %3086  ;;  %v2887_v17 = vsel %vm497_vm3, %v7935_v13, %v7881_v31 }
 0x9ac   :  { %v2821_v49 = vmul.f32 %v4026_v58, %v2803_v62  ;;  %v4035_v58 = vld [vmem:[#allocation5 + $0x160] sm:$0xff] }
 0x9ae   :  { %v2837_v14 = vadd.f32 %v2821_v49, %v2757_v6  ;;  %v4034_v6 = vld [vmem:[#allocation5 + $0x78] sm:$0xff] }
 0x9b0   :  { %v7931_v30 = vadd.f32 %v2901_v40, %v2837_v14  ;;  %v4036_v40 = vld [vmem:[#allocation5 + $0x1e0] sm:$0xff] }
 0x9b1   :  { %v2900_v14 = vmul.f32 %v4036_v40, %v2887_v17 }
 0x9b2   :  { %v2623_v20 = vpop.permute.xlu1 %2622  ;;  %v7940_v43 = vpop.permute.xlu2 %3022 }
 0x9b3   :  { %v7933_v27 = vpop.permute.xlu0 %3174  ;;  %v2639_v4 = vsel %vm204_vm0, %v7802_v42, %v2623_v20  ;;  %v4032_v42 = vld [vmem:[#allocation5 + $0x270] sm:$0xff] }
 0x9b4   :  { %v2662_v56 = vmul.f32 %v4031_v53, %v2639_v4  ;;  %v2598_v23 = vmul.f32 %v4032_v42, %v7690_v45  ;;  %v3043_v45 = vsel %vm693_vm5, %v7908_v25, %v7922_v59  ;;  %v4040_v4 = vld [vmem:[#allocation5 + $0x170] sm:$0xff] }
 0x9ba   :  { %v2783_v55 = vpop.permute.xlu1 %2782 }
 0x9bb   :  { %v2631_v7 = vpop.permute.xlu0 %2630  ;;  %v2799_v21 = vsel %vm399_vm2, %v7839_v18, %v2783_v55 }
 0x9bc   :  { %v2647_v37 = vsel %vm204_vm0, %v2631_v7, %v7848_v46  ;;  %v2635_v19 = vsel %vm204_vm0, %v2623_v20, %v2631_v7  ;;  %v4030_v46 = vld [vmem:[#allocation5 + $0xe0] sm:$0xff]  ;;  %v2678_v20 = vadd.f32 %v2662_v56, %v2598_v23  ;;  %v3123_v56 = vsel %vm791_vm6, %v7929_v61, %v7883_v38 }
 0x9bd   :  { %v2660_v50 = vmul.f32 %v4028_v52, %v2647_v37  ;;  %v2740_v41 = vmul.f32 %v4030_v46, %v2727_v3  ;;  %v2663_v31 = vmul.f32 %v4034_v6, %v2635_v19  ;;  %v4037_v37 = vld [vmem:[#allocation5 + $0xf0] sm:$0xff]  ;;  %v2879_v3 = vsel %vm497_vm3, %v7868_v63, %v7924_v24  ;;  %v7978_v19 = vpop.permute.xlu2 %3110 }
 0x9bf   :  { %v2676_v57 = vadd.f32 %v2660_v50, %v2596_v51  ;;  %v4038_v50 = vld [vmem:[#allocation5 + $0xf8] sm:$0xff]  ;;  %v2980_v51 = vmul.f32 %v4039_v0, %v2963_v54  ;;  %v2679_v18 = vadd.f32 %v2663_v31, %v2599_v1 }
 0x9c1   :  { %v2756_v62 = vadd.f32 %v2740_v41, %v2676_v57  ;;  %v2822_v57 = vmul.f32 %v4040_v4, %v2799_v21  ;;  %v4041_v41 = vld [vmem:[#allocation5 + $0x360] sm:$0xff] }
 0x9c2   :  { %v2791_v29 = vpop.permute.xlu1 %2790  ;;  %v3060_v17 = vmul.f32 %v4041_v41, %v3043_v45 }
 0x9c3   :  { %v2807_v36 = vsel %vm399_vm2, %v2791_v29, %v2767_v33  ;;  %v2703_v39 = vpop.permute.xlu0 %2702  ;;  %v2795_v53 = vsel %vm399_vm2, %v2783_v55, %v2791_v29  ;;  %v3203_v55 = vsel %vm889_vm7, %v7898_v16, %v7933_v27  ;;  %v4043_v29 = vld [vmem:[#allocation5 + $0x178] sm:$0xff] }
 0x9c4   :  { %v2820_v49 = vmul.f32 %v4035_v58, %v2807_v36  ;;  %v2715_v26 = vsel %vm301_vm1, %v2703_v39, %v2711_v44  ;;  %v2719_v33 = vsel %vm301_vm1, %v2695_v47, %v2703_v39  ;;  %v2902_v36 = vmul.f32 %v4042_v5, %v2879_v3  ;;  %v4052_v5 = vld [vmem:[#allocation5 + $0x368] sm:$0xff] }
 0x9c5   :  { %v2742_v52 = vmul.f32 %v4037_v37, %v2719_v33  ;;  %v2743_v44 = vmul.f32 %v4038_v50, %v2715_v26  ;;  %v2823_v6 = vmul.f32 %v4043_v29, %v2795_v53  ;;  %v4045_v26 = vld [vmem:[#allocation5 + $0x3e0] sm:$0xff]  ;;  %v4047_v37 = vld [vmem:[#allocation5 + $0x1f8] sm:$0xff]  ;;  %v3127_v3 = vsel %vm791_vm6, %v7978_v19, %v7929_v61 }
 0x9c6   :  { %v2836_v7 = vadd.f32 %v2820_v49, %v2756_v62  ;;  %v4044_v62 = vld [vmem:[#allocation5 + $0x2e8] sm:$0xff]  ;;  %v2875_v49 = vsel %vm497_vm3, %v7924_v24, %v7935_v13  ;;  %v3140_v45 = vmul.f32 %v4045_v26, %v3123_v56  ;;  %v4046_v33 = vld [vmem:[#allocation5 + $0x460] sm:$0xff]  ;;  %v4048_v50 = vld [vmem:[#allocation5 + $0x2f8] sm:$0xff]  ;;  %v3039_v61 = vsel %vm693_vm5, %v7922_v59, %v7940_v43 }
 0x9c7   :  { %v2758_v47 = vadd.f32 %v2742_v52, %v2678_v20  ;;  %v2759_v42 = vadd.f32 %v2743_v44, %v2679_v18  ;;  %v3220_v20 = vmul.f32 %v4046_v33, %v3203_v55  ;;  %v2903_v52 = vmul.f32 %v4047_v37, %v2875_v49  ;;  %v4053_v59 = vld [vmem:[#allocation5 + $0x2f0] sm:$0xff]  ;;  %v4057_v33 = vld [vmem:[#allocation5 + $0x418] sm:$0xff] }
 0x9c8   :  { %v2916_v46 = vadd.f32 %v2900_v14, %v2836_v7  ;;  %v4059_v37 = vld [vmem:[#allocation5 + $0x470] sm:$0xff] }
 0x9c9   :  { %v2838_v63 = vadd.f32 %v2822_v57, %v2758_v47  ;;  %v2839_v14 = vadd.f32 %v2823_v6, %v2759_v42  ;;  %v4049_v57 = vld [vmem:[#allocation5 + $0x378] sm:$0xff]  ;;  %v4054_v6 = vld [vmem:[#allocation5 + $0x3e8] sm:$0xff] }
 0x9ca   :  { %v2996_v54 = vadd.f32 %v2980_v51, %v2916_v46  ;;  %v2943_v23 = vpop.permute.xlu1 %2942  ;;  %v3191_v51 = vpop.permute.xlu2 %3190  ;;  %v4050_v47 = vld [vmem:[#allocation5 + $0x3f8] sm:$0xff] }
 0x9cb   :  { %v2959_v1 = vsel %vm595_vm4, %v7895_v35, %v2943_v23  ;;  %v2951_v39 = vpop.permute.xlu0 %2950  ;;  %v2918_v40 = vadd.f32 %v2902_v36, %v2838_v63  ;;  %v2919_v24 = vadd.f32 %v2903_v52, %v2839_v14  ;;  %v3207_v46 = vsel %vm889_vm7, %v3191_v51, %v7898_v16 }
 0x9cc   :  { %v3076_v31 = vadd.f32 %v3060_v17, %v2996_v54  ;;  %v2981_v58 = vmul.f32 %v4044_v62, %v2959_v1  ;;  %v2967_v35 = vsel %vm595_vm4, %v2951_v39, %v7860_v8  ;;  %v3143_v41 = vmul.f32 %v4050_v47, %v3127_v3  ;;  %v4055_v62 = vld [vmem:[#allocation5 + $0x370] sm:$0xff]  ;;  %v4064_v47 = vld [vmem:[#allocation5 + $0x408] sm:$0xff] }
 0x9cd   :  { %v2983_v44 = vmul.f32 %v4048_v50, %v2967_v35  ;;  %v2955_v54 = vsel %vm595_vm4, %v2943_v23, %v2951_v39  ;;  %v3061_v16 = vmul.f32 %v4052_v5, %v3039_v61  ;;  %v8854_v5 = vld [vmem:[#allocation58_spill] sm:$0xff] }
 0x9ce   :  { %v2997_v21 = vadd.f32 %v2981_v58, %v7931_v30  ;;  %v3156_v7 = vadd.f32 %v3140_v45, %v3076_v31  ;;  %v2982_v55 = vmul.f32 %v4053_v59, %v2955_v54  ;;  %v8857_v59 = vld [vmem:[#allocation79_spill] sm:$0xff] }
 0x9cf   :  { %v2999_v4 = vadd.f32 %v2983_v44, %v2919_v24 }
 0x9d0   :  { %v3236_v0 = vadd.f32 %v3220_v20, %v3156_v7  ;;  %v3077_v29 = vadd.f32 %v3061_v16, %v2997_v21  ;;  %v2998_v49 = vadd.f32 %v2982_v55, %v2918_v40 }
 0x9d2   :  { %v3031_v13 = vpop.permute.xlu1 %3030  ;;  %3252 = vmatpush.msra.mxu0 %v3236_v0  ;;  %v3089_v23 = vpop.permute.xlu2 %3088 }
 0x9d3   :  { %v3047_v8 = vsel %vm693_vm5, %v3031_v13, %v7908_v25  ;;  %v3185_v30 = vpop.permute.xlu0 %3184  ;;  %v4051_v25 = vld [vmem:[#allocation5 + $0x478] sm:$0xff] }
 0x9d4   :  { %v3063_v18 = vmul.f32 %v4049_v57, %v3047_v8  ;;  %3253 = vmatpush.msra.mxu0 %v7870_v2  ;;  %v3223_v53 = vmul.f32 %v4051_v25, %v3207_v46  ;;  %v3035_v2 = vsel %vm693_vm5, %v7940_v43, %v3031_v13  ;;  %v4060_v8 = vld [vmem:[#allocation5 + $0x410] sm:$0xff]  ;;  %v4065_v25 = vld [vmem:[#allocation5 + $0x400] sm:$0xff] }
 0x9d5   :  { %v3062_v58 = vmul.f32 %v4055_v62, %v3035_v2  ;;  %v4071_v62 = vld [vmem:[#allocation8] sm:$0xff] }
 0x9d6   :  { %v3079_v17 = vadd.f32 %v3063_v18, %v2999_v4  ;;  %v4063_v18 = vld [vmem:[#allocation5 + $0x388] sm:$0xff] }
 0x9d7   :  { %v3078_v35 = vadd.f32 %v3062_v58, %v2998_v49 }
 0x9d8   :  { %v3159_v56 = vadd.f32 %v3143_v41, %v3079_v17 }
 0x9da   :  { %v3177_v42 = vpop.permute.xlu1 %3176  ;;  %v3239_v63 = vadd.f32 %v3223_v53, %v3159_v56  ;;  %v3169_v13 = vpop.permute.xlu2 %3168  ;;  %v4066_v56 = vld [vmem:[#allocation5 + $0x420] sm:$0xff] }
 0x9db   :  { %v3103_v36 = vpop.permute.xlu0 %3102  ;;  %v3192_v50 = vsel %vm889_vm7, %v3177_v42, %v3185_v30  ;;  %v3196_v3 = vsel %vm889_vm7, %v3169_v13, %v3177_v42  ;;  %v4067_v42 = vld [vmem:[#allocation5 + $0x428] sm:$0xff] }
 0x9dc   :  { %v3119_v1 = vsel %vm791_vm6, %v7883_v38, %v3103_v36  ;;  %3339 = vmatpush.msra.mxu3 %v3239_v63  ;;  %v3115_v39 = vsel %vm791_vm6, %v3103_v36, %v7978_v19  ;;  %v4056_v38 = vld [vmem:[#allocation5 + $0x3f0] sm:$0xff]  ;;  %v3210_v4 = vmul.f32 %v4060_v8, %v3192_v50  ;;  %v3209_v41 = vmul.f32 %v4064_v47, %v3196_v3  ;;  %v4075_v50 = vld [vmem:[#allocation8 + $0x20] sm:$0xff] }
 0x9dd   :  { %v3141_v31 = vmul.f32 %v4054_v6, %v3119_v1  ;;  %v3142_v26 = vmul.f32 %v4056_v38, %v3115_v39  ;;  %v8855_v36 = vld [vmem:[#allocation90_spill] sm:$0xff]  ;;  %v4070_v6 = vld [vmem:[#allocation7 + $0x18] sm:$0xff] }
 0x9de   :  { %3340 = vmatpush.msra.mxu3 %v7900_v22 }
 0x9df   :  { %v3157_v43 = vadd.f32 %v3141_v31, %v3077_v29  ;;  %v3158_v7 = vadd.f32 %v3142_v26, %v3078_v35  ;;  %v4068_v29 = vld [vmem:[#allocation7 + $0x8] sm:$0xff]  ;;  %v4073_v26 = vld [vmem:[#allocation8 + $0x18] sm:$0xff] }
 0x9e0   :  { %3341 = vmatpush.msra.mxu3 %v7661_v34  ;;  %v4058_v34 = vld [vmem:[#allocation5 + $0x468] sm:$0xff] }
 0x9e2   :  { %v3161_v45 = vpop.permute.xlu1 %3160 }
 0x9e3   :  { %v3204_v14 = vsel %vm889_vm7, %v3185_v30, %v3161_v45  ;;  %v3183_v21 = vpop.permute.xlu0 %3182  ;;  %v4061_v30 = vld [vmem:[#allocation7] sm:$0xff] }
 0x9e4   :  { %v3211_v20 = vmul.f32 %v4057_v33, %v3204_v14  ;;  %v3195_v19 = vsel %vm889_vm7, %v3183_v21, %v3191_v51  ;;  %v3199_v22 = vsel %vm889_vm7, %v7933_v27, %v3183_v21  ;;  %v3116_v51 = vsel %vm791_vm6, %v3089_v23, %v7470_v28  ;;  %v4062_v28 = vld [vmem:[#allocation5 + $0x380] sm:$0xff]  ;;  %v4074_v33 = vld [vmem:[#allocation8 + $0x10] sm:$0xff] }
 0x9e5   :  { %v3221_v40 = vmul.f32 %v4058_v34, %v3199_v22  ;;  %v3222_v52 = vmul.f32 %v4059_v37, %v3195_v19  ;;  %v3120_v27 = vsel %vm791_vm6, %v7248_v11, %v3089_v23  ;;  %v3129_v46 = vmul.f32 %v4063_v18, %v3116_v51 }
 0x9e6   :  { %v3227_v44 = vadd.f32 %v3211_v20, %v7454_v32  ;;  %v3200_v32 = vsel %vm889_vm7, %v3161_v45, %v3169_v13  ;;  %v3128_v57 = vmul.f32 %v4062_v28, %v3120_v27  ;;  %v4077_v13 = vld [vmem:[#allocation8 + $0x38] sm:$0xff]  ;;  %v4078_v28 = vld [vmem:[#allocation8 + $0x30] sm:$0xff] }
 0x9e7   :  { %v3237_v0 = vadd.f32 %v3221_v40, %v3157_v43  ;;  %v3238_v24 = vadd.f32 %v3222_v52, %v3158_v7  ;;  %v3208_v53 = vmul.f32 %v4065_v25, %v3200_v32  ;;  %v3145_v2 = vadd.f32 %v3129_v46, %v8855_v36  ;;  %v4072_v43 = vld [vmem:[#allocation8 + $0x8] sm:$0xff] }
 0x9e8   :  { %3342 = vmatpush.msra.mxu3 %v3227_v44  ;;  %v3144_v16 = vadd.f32 %v3128_v57, %v8854_v5 }
 0x9e9   :  { %3281 = vmatpush.msra.mxu1 %v3237_v0  ;;  %3310 = vmatpush.msra.mxu2 %v3238_v24  ;;  %v3225_v55 = vadd.f32 %v3209_v41, %v3145_v2  ;;  %v4076_v0 = vld [vmem:[#allocation8 + $0x28] sm:$0xff] }
 0x9ea   :  { %3675 = vmatmul.msk.f32.vlgmr.msra.gmra.mxu3 %vm975_vm8, %v4061_v30 }
 0x9eb   :  { %3282 = vmatpush.msra.mxu1 %v7914_v48  ;;  %3311 = vmatpush.msra.mxu2 %v7916_v12  ;;  %v3171_v11 = vpop.permute.xlu0 %3170  ;;  %v8853_v48 = vld [vmem:[#allocation87_spill] sm:$0xff] }
 0x9ec   :  { %v3197_v17 = vsel %vm889_vm7, %v3171_v11, %v7602_v60  ;;  %v3201_v61 = vsel %vm889_vm7, %v7556_v9, %v3171_v11  ;;  %v3226_v12 = vadd.f32 %v3210_v4, %v8853_v48  ;;  %v8856_v60 = vld [vmem:[#allocation78_spill] sm:$0xff]  ;;  %v3224_v9 = vadd.f32 %v3208_v53, %v3144_v16  ;;  %v4079_v53 = vld [vmem:[#allocation8 + $0x40] sm:$0xff] }
 0x9ed   :  { %v3212_v54 = vmul.f32 %v4066_v56, %v3201_v61  ;;  %v3213_v63 = vmul.f32 %v4067_v42, %v3197_v17  ;;  %3312 = vmatpush.msra.mxu2 %v7663_v10  ;;  %v4069_v10 = vld [vmem:[#allocation7 + $0x10] sm:$0xff] }
 0x9ef   :  { %3313 = vmatpush.msra.mxu2 %v3226_v12  ;;  %v3228_v1 = vadd.f32 %v3212_v54, %v8856_v60  ;;  %v3229_v15 = vadd.f32 %v3213_v63, %v8857_v59  ;;  %v4080_v54 = vld [vmem:[#allocation8 + $0x48] sm:$0xff]  ;;  %v4081_v63 = vld [vmem:[#allocation8 + $0x58] sm:$0xff] }
 0x9f0   :  { %3671 = vmatmul.msk.f32.vlgmr.msra.gmra.mxu2 %vm975_vm8, %v4061_v30 }
 0x9f1   :  { %3254 = vmatpush.msra.mxu0 %v3228_v1  ;;  %3283 = vmatpush.msra.mxu1 %v3229_v15  ;;  %v4082_v1 = vld [vmem:[#allocation8 + $0x50] sm:$0xff] }
 0x9f2   :  { %3676 = vmatmul.msk.f32.gmra.mxu3 %vm975_vm8, %v4068_v29 }
 0x9f3   :  { %3255 = vmatpush.msra.mxu0 %v3224_v9  ;;  %3284 = vmatpush.msra.mxu1 %v3225_v55 }
 0x9f4   :  { %3663 = vmatmul.msk.f32.vlgmr.msra.gmra.mxu0 %vm975_vm8, %v4061_v30  ;;  %3667 = vmatmul.msk.f32.vlgmr.msra.gmra.mxu1 %vm975_vm8, %v4061_v30 }
 0x9f8   :  { %3672 = vmatmul.msk.f32.gmra.mxu2 %vm975_vm8, %v4068_v29 }
 0x9fa   :  { %3677 = vmatmul.msk.f32.gmra.mxu3 %vm975_vm8, %v4069_v10 }
 0x9fc   :  { %3664 = vmatmul.msk.f32.gmra.mxu0 %vm975_vm8, %v4068_v29  ;;  %3668 = vmatmul.msk.f32.gmra.mxu1 %vm975_vm8, %v4068_v29 }
 0xa00   :  { %3673 = vmatmul.msk.f32.gmra.mxu2 %vm975_vm8, %v4069_v10 }
 0xa02   :  { %3678 = vmatmul.msk.f32.gmra.mxu3 %vm975_vm8, %v4070_v6 }
 0xa04   :  { %3665 = vmatmul.msk.f32.gmra.mxu0 %vm975_vm8, %v4069_v10  ;;  %3669 = vmatmul.msk.f32.gmra.mxu1 %vm975_vm8, %v4069_v10 }
 0xa08   :  { %3674 = vmatmul.msk.f32.gmra.mxu2 %vm975_vm8, %v4070_v6 }
 0xa0c   :  { %3666 = vmatmul.msk.f32.gmra.mxu0 %vm975_vm8, %v4070_v6  ;;  %3670 = vmatmul.msk.f32.gmra.mxu1 %vm975_vm8, %v4070_v6 }
 0xa6d   :  { %v3344_v31 = vpop.f32.mrf.mxu3 }
 0xa6e   :  { %v8083_v45 = vadd.f32 %v4073_v26, %v3344_v31  ;;  %v4084_v26 = vld [vmem:[#allocation8 + $0x60] sm:$0xff] }
 0xa70   :  { %v3383_v51 = vmul.f32 %v8083_v45, %v8083_v45 }
 0xa71   :  { %v3257_v23 = vpop.f32.mrf.mxu0  ;;  %v3286_v39 = vpop.f32.mrf.mxu1 }
 0xa72   :  { %v8079_v58 = vadd.f32 %v4071_v62, %v3257_v23  ;;  %v8081_v49 = vadd.f32 %v4072_v43, %v3286_v39  ;;  %v4083_v43 = vld [vmem:[#allocation8 + $0x78] sm:$0xff] }
 0xa73   :  { %v3315_v38 = vpop.f32.mrf.mxu2 }
 0xa74   :  { %v3380_v35 = vmul.f32 %v8079_v58, %v8079_v58  ;;  %v3356_v14 = vadd.f32 %v8081_v49, %v8079_v58  ;;  %v3381_v21 = vmul.f32 %v8081_v49, %v8081_v49  ;;  %v8091_v20 = vadd.f32 %v4074_v33, %v3315_v38 }
 0xa75   :  { %v3347_v19 = vpop.f32.mrf.mxu3 }
 0xa76   :  { %v3357_v22 = vadd.f32 %v3356_v14, %v8091_v20  ;;  %v3396_v7 = vadd.f32 %v3381_v21, %v3380_v35  ;;  %v3382_v34 = vmul.f32 %v8091_v20, %v8091_v20  ;;  %v8103_v3 = vadd.f32 %v4077_v13, %v3347_v19  ;;  %v4085_v14 = vld [vmem:[#allocation8 + $0x68] sm:$0xff] }
 0xa78   :  { %v3358_v40 = vadd.f32 %v3357_v22, %v8083_v45  ;;  %v3397_v8 = vadd.f32 %v3396_v7, %v3382_v34  ;;  %v3387_v12 = vmul.f32 %v8103_v3, %v8103_v3 }
 0xa79   :  { %v3260_v37 = vpop.f32.mrf.mxu0  ;;  %v3289_v52 = vpop.f32.mrf.mxu1 }
 0xa7a   :  { %v8097_v44 = vadd.f32 %v4075_v50, %v3260_v37  ;;  %v8099_v24 = vadd.f32 %v4076_v0, %v3289_v52  ;;  %3359 = vadd.xlane.f32.xlu1 %v3358_v40  ;;  %v3398_v17 = vadd.f32 %v3397_v8, %v3383_v51  ;;  %v4086_v40 = vld [vmem:[#allocation8 + $0x70] sm:$0xff] }
 0xa7b   :  { %v3318_v27 = vpop.f32.mrf.mxu2 }
 0xa7c   :  { %v3384_v4 = vmul.f32 %v8097_v44, %v8097_v44  ;;  %v3361_v32 = vadd.f32 %v8099_v24, %v8097_v44  ;;  %v3385_v30 = vmul.f32 %v8099_v24, %v8099_v24  ;;  %v8111_v57 = vadd.f32 %v4078_v28, %v3318_v27 }
 0xa7d   :  { %v3350_v18 = vpop.f32.mrf.mxu3 }
 0xa7e   :  { %v3362_v46 = vadd.f32 %v3361_v32, %v8111_v57  ;;  %v3401_v11 = vadd.f32 %v3385_v30, %v3384_v4  ;;  %v3386_v47 = vmul.f32 %v8111_v57, %v8111_v57  ;;  %v8121_v48 = vadd.f32 %v4081_v63, %v3350_v18 }
 0xa80   :  { %v3363_v41 = vadd.f32 %v3362_v46, %v8103_v3  ;;  %v3402_v16 = vadd.f32 %v3401_v11, %v3386_v47  ;;  %v3391_v29 = vmul.f32 %v8121_v48, %v8121_v48 }
 0xa81   :  { %v3263_v61 = vpop.f32.mrf.mxu0  ;;  %v3292_v25 = vpop.f32.mrf.mxu1 }
 0xa82   :  { %v8117_v56 = vadd.f32 %v4079_v53, %v3263_v61  ;;  %v8119_v42 = vadd.f32 %v4080_v54, %v3292_v25  ;;  %3364 = vadd.xlane.f32.xlu0 %v3363_v41  ;;  %3399 = vadd.xlane.f32.xlu1 %v3398_v17  ;;  %v3403_v31 = vadd.f32 %v3402_v16, %v3387_v12 }
 0xa83   :  { %v3321_v5 = vpop.f32.mrf.mxu2 }
 0xa84   :  { %v3388_v36 = vmul.f32 %v8117_v56, %v8117_v56  ;;  %v3366_v2 = vadd.f32 %v8119_v42, %v8117_v56  ;;  %v3389_v60 = vmul.f32 %v8119_v42, %v8119_v42  ;;  %v8131_v59 = vadd.f32 %v4082_v1, %v3321_v5 }
 0xa85   :  { %v3353_v10 = vpop.f32.mrf.mxu3 }
 0xa86   :  { %v3406_v15 = vadd.f32 %v3389_v60, %v3388_v36  ;;  %v3367_v9 = vadd.f32 %v3366_v2, %v8131_v59  ;;  %v3390_v55 = vmul.f32 %v8131_v59, %v8131_v59  ;;  %v8139_v38 = vadd.f32 %v4083_v43, %v3353_v10 }
 0xa88   :  { %v3368_v6 = vadd.f32 %v3367_v9, %v8121_v48  ;;  %v3407_v23 = vadd.f32 %v3406_v15, %v3390_v55  ;;  %v3395_v51 = vmul.f32 %v8139_v38, %v8139_v38 }
 0xa89   :  { %v3266_v39 = vpop.f32.mrf.mxu0  ;;  %v3295_v62 = vpop.f32.mrf.mxu1 }
 0xa8a   :  { %v8141_v35 = vadd.f32 %v4084_v26, %v3266_v39  ;;  %v8143_v21 = vadd.f32 %v4085_v14, %v3295_v62  ;;  %3369 = vadd.xlane.f32.xlu2 %v3368_v6  ;;  %3404 = vadd.xlane.f32.xlu0 %v3403_v31  ;;  %v3408_v33 = vadd.f32 %v3407_v23, %v3391_v29 }
 0xa8b   :  { %v3324_v19 = vpop.f32.mrf.mxu2 }
 0xa8c   :  { %v3392_v22 = vmul.f32 %v8141_v35, %v8141_v35  ;;  %v3371_v7 = vadd.f32 %v8143_v21, %v8141_v35  ;;  %v3393_v34 = vmul.f32 %v8143_v21, %v8143_v21  ;;  %v8151_v37 = vadd.f32 %v4086_v40, %v3324_v19  ;;  %3409 = vadd.xlane.f32.xlu1 %v3408_v33  ;;  %v4087_v40 = vld [vmem:[%s8243_s5] sm:$0xff] }
 0xa8e   :  { %v3411_v52 = vadd.f32 %v3393_v34, %v3392_v22  ;;  %v3372_v50 = vadd.f32 %v3371_v7, %v8151_v37  ;;  %v3394_v0 = vmul.f32 %v8151_v37, %v8151_v37 }
 0xa90   :  { %v3373_v27 = vadd.f32 %v3372_v50, %v8139_v38  ;;  %v3412_v13 = vadd.f32 %v3411_v52, %v3394_v0 }
 0xa92   :  { %3374 = vadd.xlane.f32.xlu2 %v3373_v27  ;;  %v3413_v8 = vadd.f32 %v3412_v13, %v3395_v51 }
 0xa94   :  { %3414 = vadd.xlane.f32.xlu0 %v3413_v8 }
 0xaed   :  { %v3360_v4 = vpop.xlane.xlu1 %3359 }
 0xaee   :  { %v8159_v32 = vmul.f32 0.001953125, %v3360_v4 }
 0xaf0   :  { %v3420_v18 = vmul.f32 %v8159_v32, %v8159_v32 }
 0xaf5   :  { %v3365_v30 = vpop.xlane.xlu0 %3364  ;;  %v3400_v28 = vpop.xlane.xlu1 %3399 }
 0xaf6   :  { %v3416_v46 = vmul.f32 0.001953125, %v3400_v28  ;;  %v8163_v47 = vmul.f32 0.001953125, %v3365_v30 }
 0xaf8   :  { %v3424_v11 = vsub.f32 %v3416_v46, %v3420_v18  ;;  %v3421_v53 = vmul.f32 %v8163_v47, %v8163_v47  ;;  %v4088_v46 = vld [vmem:[%s8243_s5 + $0x8] sm:$0xff] }
 0xafa   :  { %v3428_v41 = vadd.f32 1e-05, %v3424_v11 }
 0xafc   :  { %3717 = vrsqrt.f32 %v3428_v41  ;;  %vm3438_vm1 = vweird.f32 %v3428_v41 }
 0xafd   :  { %v3370_v17 = vpop.xlane.xlu2 %3369  ;;  %v3405_v61 = vpop.xlane.xlu0 %3404 }
 0xafe   :  { %v8165_v25 = vmul.f32 0.001953125, %v3370_v17  ;;  %v3417_v54 = vmul.f32 0.001953125, %v3405_v61  ;;  %v4089_v61 = vld [vmem:[%s8243_s5 + $0x10] sm:$0xff] }
 0xaff   :  { %v3410_v63 = vpop.xlane.xlu1 %3409 }
 0xb00   :  { %v3425_v12 = vsub.f32 %v3417_v54, %v3421_v53  ;;  %v3422_v5 = vmul.f32 %v8165_v25, %v8165_v25  ;;  %v3418_v16 = vmul.f32 0.001953125, %v3410_v63 }
 0xb02   :  { %v3718_v36 = vpop.eup %3717  ;;  %v3429_v2 = vadd.f32 1e-05, %v3425_v12  ;;  %v3426_v60 = vsub.f32 %v3418_v16, %v3422_v5  ;;  %v4090_v16 = vld [vmem:[%s8243_s5 + $0x18] sm:$0xff]  ;;  %s4277_s5 = smov [#allocation11]  }
 0xb03   :  { %v3433_v1 = vmul.f32 %v3718_v36, %v3428_v41  ;;  %vm3439_vm0 = vweird.f32 %v3718_v36  ;;  %s3585_s9 = sshll.u32 %s4277_s5, 4  ;;  %s3586_s9 = int_to_ptr.vmem [resolvable:$true] %s3585_s9 }
 0xb04   :  { %3719 = vrsqrt.f32 %v3429_v2  ;;  %v3430_v15 = vadd.f32 1e-05, %v3426_v60  ;;  %vm3440_vm2 = vmor %vm3438_vm1, %vm3439_vm0  ;;  %vm3448_vm4 = vweird.f32 %v3429_v2  ;;  %v3476_v60 = vsub.f32 %v8079_v58, %v8159_v32 }
 0xb05   :  { %v3434_v9 = vmul.f32 %v3718_v36, %v3433_v1  ;;  %v3375_v55 = vpop.xlane.xlu2 %3374  ;;  %v3477_v1 = vsub.f32 %v8081_v49, %v8159_v32 }
 0xb06   :  { %3721 = vrsqrt.f32 %v3430_v15  ;;  %v8171_v29 = vmul.f32 0.001953125, %v3375_v55  ;;  %vm3458_vm7 = vweird.f32 %v3430_v15 }
 0xb07   :  { %v3435_v10 = vmul.f32 0.5, %v3434_v9  ;;  %v3415_v6 = vpop.xlane.xlu0 %3414  ;;  %v3479_v9 = vsub.f32 %v8083_v45, %v8159_v32  ;;  %v4092_v45 = vld [vmem:[#allocation10 + $0x8] sm:$0xff] }
 0xb08   :  { %v3423_v31 = vmul.f32 %v8171_v29, %v8171_v29  ;;  %v3419_v23 = vmul.f32 0.001953125, %v3415_v6  ;;  %v3490_v58 = vsub.f32 %v8151_v37, %v8171_v29  ;;  %v3491_v49 = vsub.f32 %v8139_v38, %v8171_v29 }
 0xb09   :  { %v3436_v39 = vsub.f32 1.5, %v3435_v10  ;;  %v3482_v37 = vsub.f32 %v8111_v57, %v8163_v47  ;;  %v3483_v38 = vsub.f32 %v8103_v3, %v8163_v47  ;;  %v8858_v57 = vld [vmem:[#allocation57_spill] sm:$0xff] }
 0xb0a   :  { %v3720_v62 = vpop.eup %3719  ;;  %v3427_v43 = vsub.f32 %v3419_v23, %v3423_v31  ;;  %v3488_v23 = vsub.f32 %v8141_v35, %v8171_v29  ;;  %v3480_v35 = vsub.f32 %v8097_v44, %v8163_v47  ;;  %v3486_v44 = vsub.f32 %v8131_v59, %v8165_v25 }
 0xb0b   :  { %v3437_v26 = vmul.f32 %v3718_v36, %v3436_v39  ;;  %v3443_v14 = vmul.f32 %v3720_v62, %v3429_v2  ;;  %vm3449_vm3 = vweird.f32 %v3720_v62  ;;  %v3489_v39 = vsub.f32 %v8143_v21, %v8171_v29 }
 0xb0c   :  { %v3722_v33 = vpop.eup %3721  ;;  %v3431_v19 = vadd.f32 1e-05, %v3427_v43  ;;  %vm3450_vm6 = vmor %vm3448_vm4, %vm3449_vm3  ;;  %v3481_v21 = vsub.f32 %v8099_v24, %v8163_v47  ;;  %v3487_v24 = vsub.f32 %v8121_v48, %v8165_v25  ;;  %v8860_v47 = vld [vmem:[#allocation98_spill] sm:$0xff]  ;;  %v4098_v48 = vld [vmem:[#allocation10 + $0x78] sm:$0xff] }
 0xb0d   :  { %v3444_v22 = vmul.f32 %v3720_v62, %v3443_v14  ;;  %v3453_v7 = vmul.f32 %v3722_v33, %v3430_v15  ;;  %v3441_v34 = vsel %vm3440_vm2, %v3718_v36, %v3437_v26  ;;  %vm3459_vm5 = vweird.f32 %v3722_v33  ;;  %v4093_v26 = vld [vmem:[#allocation10 + $0x10] sm:$0xff] }
 0xb0e   :  { %3723 = vrsqrt.f32 %v3431_v19  ;;  %v3472_v52 = vmul.f32 %v4087_v40, %v3441_v34  ;;  %vm3460_vm8 = vmor %vm3458_vm7, %vm3459_vm5  ;;  %vm3468_vm12 = vweird.f32 %v3431_v19  ;;  %v3478_v15 = vsub.f32 %v8091_v20, %v8159_v32 }
 0xb0f   :  { %v3445_v50 = vmul.f32 0.5, %v3444_v22  ;;  %v3454_v0 = vmul.f32 %v3722_v33, %v3453_v7  ;;  %v3484_v40 = vsub.f32 %v8117_v56, %v8165_v25 }
 0xb10   :  { %3494 = vperm.xlu2 %3699, %v3472_v52   ;;  %v3485_v52 = vsub.f32 %v8119_v42, %v8165_v25  ;;  %v4095_v42 = vld [vmem:[#allocation10 + $0x60] sm:$0xff] }
 0xb11   :  { %v3446_v51 = vsub.f32 1.5, %v3445_v50  ;;  %v3455_v27 = vmul.f32 0.5, %v3454_v0  ;;  %v8859_v0 = vld [vmem:[#allocation36_spill] sm:$0xff] }
 0xb13   :  { %v3447_v13 = vmul.f32 %v3720_v62, %v3446_v51  ;;  %v3456_v8 = vsub.f32 1.5, %v3455_v27  ;;  %v8861_v27 = vld [vmem:[#allocation81_spill] sm:$0xff] }
 0xb14   :  { %v3724_v4 = vpop.eup %3723 }
 0xb15   :  { %v3457_v30 = vmul.f32 %v3722_v33, %v3456_v8  ;;  %v3463_v28 = vmul.f32 %v3724_v4, %v3431_v19  ;;  %v3451_v18 = vsel %vm3450_vm6, %v3720_v62, %v3447_v13  ;;  %vm3469_vm13 = vweird.f32 %v3724_v4  ;;  %v4091_v62 = vld [vmem:[#allocation10] sm:$0xff] }
 0xb16   :  { %v3473_v11 = vmul.f32 %v4088_v46, %v3451_v18  ;;  %vm3470_vm14 = vmor %vm3468_vm12, %vm3469_vm13  ;;  %v4096_v46 = vld [vmem:[#allocation10 + $0x68] sm:$0xff] }
 0xb17   :  { %v3464_v41 = vmul.f32 %v3724_v4, %v3463_v28  ;;  %v3461_v17 = vsel %vm3460_vm8, %v3722_v33, %v3457_v30  ;;  %v4094_v33 = vld [vmem:[#allocation10 + $0x18] sm:$0xff] }
 0xb18   :  { %3499 = vperm.xlu1 %3698, %v3473_v11   ;;  %v3474_v53 = vmul.f32 %v4089_v61, %v3461_v17  ;;  %v4097_v11 = vld [vmem:[#allocation10 + $0x70] sm:$0xff]  ;;  %v4099_v61 = vld [vmem:[#allocation10 + $0x20] sm:$0xff] }
 0xb19   :  { %v3465_v54 = vmul.f32 0.5, %v3464_v41 }
 0xb1a   :  { %3504 = vperm.xlu0 %3700, %v3474_v53  }
 0xb1b   :  { %v3466_v63 = vsub.f32 1.5, %v3465_v54  ;;  %v4100_v54 = vld [vmem:[#allocation10 + $0x28] sm:$0xff] }
 0xb1d   :  { %v3467_v12 = vmul.f32 %v3724_v4, %v3466_v63 }
 0xb1f   :  { %v3471_v5 = vsel %vm3470_vm14, %v3724_v4, %v3467_v12  ;;  %v4101_v12 = vld [vmem:[#allocation10 + $0x30] sm:$0xff] }
 0xb20   :  { %v3475_v36 = vmul.f32 %v4090_v16, %v3471_v5  ;;  %v4102_v16 = vld [vmem:[#allocation10 + $0x38] sm:$0xff] }
 0xb22   :  { %3509 = vperm.xlu2 %3699, %v3475_v36  }
 0xb6a   :  { %v3495_v2 = vpop.permute.xlu2 %3494 }
 0xb6b   :  { %v3512_v55 = vmul.f32 %v3495_v2, %v3476_v60  ;;  %v3513_v10 = vmul.f32 %v3495_v2, %v3477_v1  ;;  %v3514_v6 = vmul.f32 %v3495_v2, %v3478_v15  ;;  %v3515_v31 = vmul.f32 %v3495_v2, %v3479_v9  ;;  %v8862_v9 = vld [vmem:[#allocation43_spill] sm:$0xff] }
 0xb6d   :  { %v3528_v43 = vadd.f32 %v4091_v62, %v3512_v55  ;;  %v3529_v32 = vadd.f32 %v4092_v45, %v3513_v10  ;;  %v3530_v14 = vadd.f32 %v4093_v26, %v3514_v6  ;;  %v3531_v19 = vadd.f32 %v4094_v33, %v3515_v31  ;;  %v8863_v10 = vld [vmem:[#allocation84_spill] sm:$0xff]  ;;  %v8864_v31 = vld [vmem:[#allocation19_spill] sm:$0xff]  ;;  %v4104_v62 = vld [vmem:[#allocation10 + $0x48] sm:$0xff] }
 0xb6e   :  { %v4105_v45 = vld [vmem:[#allocation10 + $0x50] sm:$0xff]  ;;  %v4106_v26 = vld [vmem:[#allocation10 + $0x58] sm:$0xff] }
 0xb6f   :  { %v3544_v50 = vadd.f32 %v3528_v43, %v8858_v57  ;;  %v3545_v3 = vadd.f32 %v3529_v32, %v8859_v0  ;;  %v3546_v51 = vadd.f32 %v3530_v14, %v8860_v47  ;;  %v3547_v13 = vadd.f32 %v3531_v19, %v8861_v27  ;;  %v8871_v57 = vld [vmem:[#allocation82_spill] sm:$0xff]  ;;  %v8872_v47 = vld [vmem:[#allocation69_spill] sm:$0xff] }
 0xb7c   :  { %v3510_v20 = vpop.permute.xlu2 %3509 }
 0xb7d   :  { %v3524_v29 = vmul.f32 %v3510_v20, %v3488_v23  ;;  %v3525_v22 = vmul.f32 %v3510_v20, %v3489_v39  ;;  %v3526_v7 = vmul.f32 %v3510_v20, %v3490_v58  ;;  %v3527_v34 = vmul.f32 %v3510_v20, %v3491_v49  ;;  %v8865_v39 = vld [vmem:[#allocation25_spill] sm:$0xff]  ;;  %v4103_v49 = vld [vmem:[#allocation10 + $0x40] sm:$0xff] }
 0xb7f   :  { %v3540_v18 = vadd.f32 %v4095_v42, %v3524_v29  ;;  %v3541_v59 = vadd.f32 %v4096_v46, %v3525_v22  ;;  %v3542_v41 = vadd.f32 %v4097_v11, %v3526_v7  ;;  %v3543_v25 = vadd.f32 %v4098_v48, %v3527_v34  ;;  %v8867_v29 = vld [vmem:[#allocation67_spill] sm:$0xff]  ;;  %v8868_v7 = vld [vmem:[#allocation74_spill] sm:$0xff] }
 0xb81   :  { %v3557_v0 = vadd.f32 %v3541_v59, %v8871_v57  ;;  %v3558_v27 = vadd.f32 %v3542_v41, %v8872_v47 }
 0xb8a   :  { %v3500_v8 = vpop.permute.xlu1 %3499 }
 0xb8b   :  { %v3516_v4 = vmul.f32 %v3500_v8, %v3480_v35  ;;  %v3517_v56 = vmul.f32 %v3500_v8, %v3481_v21  ;;  %v3518_v30 = vmul.f32 %v3500_v8, %v3482_v37  ;;  %v3519_v28 = vmul.f32 %v3500_v8, %v3483_v38  ;;  %v8866_v37 = vld [vmem:[#allocation23_spill] sm:$0xff]  ;;  %v8873_v8 = vld [vmem:[#allocation77_spill] sm:$0xff] }
 0xb8c   :  { %v3505_v17 = vpop.permute.xlu0 %3504 }
 0xb8d   :  { %v3532_v53 = vadd.f32 %v4099_v61, %v3516_v4  ;;  %v3533_v63 = vadd.f32 %v4100_v54, %v3517_v56  ;;  %v3534_v5 = vadd.f32 %v4101_v12, %v3518_v30  ;;  %v3535_v36 = vadd.f32 %v4102_v16, %v3519_v28 }
 0xb8e   :  { %v3520_v2 = vmul.f32 %v3505_v17, %v3484_v40  ;;  %v3521_v60 = vmul.f32 %v3505_v17, %v3485_v52  ;;  %v3522_v1 = vmul.f32 %v3505_v17, %v3486_v44  ;;  %v3523_v15 = vmul.f32 %v3505_v17, %v3487_v24  ;;  %v8869_v40 = vld [vmem:[#allocation63_spill] sm:$0xff] }
 0xb8f   :  { %v3548_v55 = vadd.f32 %v3532_v53, %v8862_v9  ;;  %v3549_v6 = vadd.f32 %v3533_v63, %v8863_v10  ;;  %v3550_v23 = vadd.f32 %v3534_v5, %v8864_v31  ;;  %v3551_v58 = vadd.f32 %v3535_v36, %v8865_v39  ;;  %v8870_v44 = vld [vmem:[#allocation75_spill] sm:$0xff] }
 0xb90   :  { %v3536_v20 = vadd.f32 %v4103_v49, %v3520_v2  ;;  %v3537_v43 = vadd.f32 %v4104_v62, %v3521_v60  ;;  %v3538_v32 = vadd.f32 %v4105_v45, %v3522_v1  ;;  %v3539_v14 = vadd.f32 %v4106_v26, %v3523_v15 }
 0xb91   :  { %v3560_v33 = vadd.f32 %v3548_v55, %v3544_v50  ;;  %v3561_v19 = vadd.f32 %v3549_v6, %v3545_v3  ;;  %v3562_v35 = vadd.f32 %v3550_v23, %v3546_v51  ;;  %v3563_v21 = vadd.f32 %v3551_v58, %v3547_v13 }
 0xb92   :  { %v3552_v38 = vadd.f32 %v3536_v20, %v8866_v37  ;;  %v3553_v22 = vadd.f32 %v3537_v43, %v8867_v29  ;;  %v3554_v34 = vadd.f32 %v3538_v32, %v8868_v7  ;;  %v3555_v52 = vadd.f32 %v3539_v14, %v8869_v40 }
 0xb93   :  { %v3556_v24 = vadd.f32 %v3540_v18, %v8870_v44  ;;  %v3559_v4 = vadd.f32 %v3543_v25, %v8873_v8 }
 0xb94   :  { %v3564_v50 = vadd.f32 %v3560_v33, %v3552_v38  ;;  %v3565_v3 = vadd.f32 %v3561_v19, %v3553_v22  ;;  %v3566_v51 = vadd.f32 %v3562_v35, %v3554_v34  ;;  %v3567_v13 = vadd.f32 %v3563_v21, %v3555_v52 }
 0xb96   :  { %v3568_v56 = vadd.f32 %v3564_v50, %v3556_v24  ;;  %v3569_v30 = vadd.f32 %v3565_v3, %v3557_v0  ;;  %v3570_v28 = vadd.f32 %v3566_v51, %v3558_v27  ;;  %v3571_v42 = vadd.f32 %v3567_v13, %v3559_v4 }
 0xb98   :  { %v3572_v46 = vmul.f32 0.25, %v3568_v56  ;;  %v3573_v11 = vmul.f32 0.25, %v3569_v30  ;;  %v3574_v48 = vmul.f32 0.25, %v3570_v28  ;;  %v3575_v18 = vmul.f32 0.25, %v3571_v42 }
 0xb9a   :  { %3576 = vst [vmem:[#allocation11] sm:$0xff] %v3572_v46 }
 0xb9b   :  { %3577 = vst [vmem:[#allocation11 + $0x8] sm:$0xff] %v3573_v11 }
 0xb9c   :  { %3578 = vst [vmem:[#allocation11 + $0x10] sm:$0xff] %v3574_v48 }
 0xb9d   :  { %3579 = vst [vmem:[#allocation11 + $0x18] sm:$0xff] %v3575_v18 }
 0xb9e   :  { %3590 = dma.vmem_to_hbm [thread:$0]  %s3586_s9, 512, %s3588_s21, [#allocation4]  }
 0xb9f   :  { %4257 = dma.done.wait [#allocation4], 512  }
 0xba0   :  { %4258 = vsyncadd [#allocation4], 4294966784 }
 0xba1   :  { %3595 = vsyncpa [#allocation3], 1 }
 0xba2   :  { %3596 = vsyncpa [#allocation6], 1 }
 0xba3   :  { %3597 = vsyncpa [#allocation9], 1 }
 0xba4   :  { %3598 = vsyncpa [#allocation4], 1 }

</bundles_post_ra>
